<compile_context>
chip_gen: v6e
topology: v6e:2x2x1
jax: 0.10.0
libtpu: 0.0.40
codegen_flags: <defaults>
</compile_context>

<pallas_src>
import jax
import jax.numpy as jnp
from jax.experimental import pallas as pl
from jax.experimental.pallas import tpu as pltpu


def _round_up(v, m):
    return (v + m - 1) // m * m


# -----------------------------------------------------------------------------
# Fused Pallas kernel:
#   y  = dot_bf16(x, w) + bias + sum(residuals)              (f32 accumulate)
#   y  = relu(y)                         (optional, or dual pre/post outputs)
#   y  = y + sum(post_residuals)         (post-ReLU skip, e.g. UNet skip add)
#   y  = relu(dot_bf16(y, chain_w) + sum(chain_residuals))   (optional chain)
# -----------------------------------------------------------------------------
def fused_matmul(x, w, bias=None, residuals=(), relu=False, post_residuals=(),
                 dual_output=False, chain_w=None, chain_residuals=(),
                 chain_relu=False, out_dtype=jnp.bfloat16):
    M, K = x.shape
    N = w.shape[1]
    has_chain = chain_w is not None
    N_out = chain_w.shape[1] if has_chain else N

    residuals = list(residuals)
    post_residuals = list(post_residuals)
    chain_residuals = list(chain_residuals)
    has_bias = bias is not None
    n_res, n_post, n_cres = len(residuals), len(post_residuals), len(chain_residuals)

    # Adaptive tiling: pad M only to a multiple of 16; single grid step when the
    # whole problem fits one block (the common case for this tiny UNet).
    M16 = _round_up(M, 16)
    if M16 <= 1024:
        tile_m, M_pad = M16, M16
    else:
        tile_m = 512
        M_pad = _round_up(M, tile_m)
    pad = M_pad - M

    def _pad_rows(a):
        return jnp.pad(a, ((0, pad), (0, 0))) if pad else a

    x = _pad_rows(x).astype(jnp.bfloat16)
    residuals = [_pad_rows(r) for r in residuals]
    post_residuals = [_pad_rows(r) for r in post_residuals]
    chain_residuals = [_pad_rows(r) for r in chain_residuals]

    inputs = [x, w.astype(jnp.bfloat16)]
    in_specs = [pl.BlockSpec((tile_m, K), lambda i: (i, 0)),
                pl.BlockSpec((K, N), lambda i: (0, 0))]
    if has_bias:
        inputs.append(bias.reshape(1, N).astype(jnp.float32))
        in_specs.append(pl.BlockSpec((1, N), lambda i: (0, 0)))
    for r in residuals + post_residuals:
        inputs.append(r)
        in_specs.append(pl.BlockSpec((tile_m, N), lambda i: (i, 0)))
    if has_chain:
        inputs.append(chain_w.astype(jnp.bfloat16))
        in_specs.append(pl.BlockSpec((N, N_out), lambda i: (0, 0)))
        for r in chain_residuals:
            inputs.append(r)
            in_specs.append(pl.BlockSpec((tile_m, N_out), lambda i: (i, 0)))

    def kernel(*refs):
        it = iter(refs)
        x_ref = next(it)
        w_ref = next(it)
        b_ref = next(it) if has_bias else None
        res_refs = [next(it) for _ in range(n_res)]
        post_refs = [next(it) for _ in range(n_post)]
        cw_ref = next(it) if has_chain else None
        cres_refs = [next(it) for _ in range(n_cres)]
        out_refs = list(it)

        acc = jnp.dot(x_ref[...], w_ref[...], preferred_element_type=jnp.float32)
        if has_bias:
            acc = acc + b_ref[...]
        for r in res_refs:
            acc = acc + r[...].astype(jnp.float32)

        if dual_output:
            out_refs[0][...] = acc.astype(out_refs[0].dtype)
            out_refs[1][...] = jnp.maximum(acc, 0.0).astype(out_refs[1].dtype)
            return

        y = jnp.maximum(acc, 0.0) if relu else acc
        for r in post_refs:
            y = y + r[...].astype(jnp.float32)
        if has_chain:
            y = jnp.dot(y.astype(jnp.bfloat16), cw_ref[...],
                        preferred_element_type=jnp.float32)
            for r in cres_refs:
                y = y + r[...].astype(jnp.float32)
            if chain_relu:
                y = jnp.maximum(y, 0.0)
        out_refs[0][...] = y.astype(out_refs[0].dtype)

    if dual_output:
        out_shape = (jax.ShapeDtypeStruct((M_pad, N), out_dtype),
                     jax.ShapeDtypeStruct((M_pad, N), out_dtype))
        out_specs = (pl.BlockSpec((tile_m, N), lambda i: (i, 0)),
                     pl.BlockSpec((tile_m, N), lambda i: (i, 0)))
    else:
        out_shape = jax.ShapeDtypeStruct((M_pad, N_out), out_dtype)
        out_specs = pl.BlockSpec((tile_m, N_out), lambda i: (i, 0))

    out = pl.pallas_call(
        kernel,
        out_shape=out_shape,
        grid=(M_pad // tile_m,),
        in_specs=in_specs,
        out_specs=out_specs,
        compiler_params=pltpu.CompilerParams(dimension_semantics=("parallel",)),
    )(*inputs)

    if dual_output:
        return out[0][:M], out[1][:M]
    return out[:M]


# -----------------------------------------------------------------------------
# Conv3d (NDHWC) via im2col + fused Pallas matmul
# -----------------------------------------------------------------------------
def conv3d(x, w, bias=None, stride=(1, 1, 1), padding=(0, 0, 0),
           dilation=(1, 1, 1), residuals=(), relu=False, dual_output=False,
           chain_w=None, chain_residuals=(), chain_relu=False):
    """x: [B,D,H,W,Cin]; w: [kD,kH,kW,Cin,Cout]; chain_w: [1,1,1,Cout,N2] or None."""
    B, D, H, W, Cin = x.shape
    kD, kH, kW, _, Cout = w.shape
    pd, ph, pw = padding
    sd, sh, sw = stride
    dd, dh, dw = dilation
    Do = (D + 2 * pd - dd * (kD - 1) - 1) // sd + 1
    Ho = (H + 2 * ph - dh * (kH - 1) - 1) // sh + 1
    Wo = (W + 2 * pw - dw * (kW - 1) - 1) // sw + 1

    xp = jnp.pad(x, ((0, 0), (pd, pd), (ph, ph), (pw, pw), (0, 0)))
    cols = []
    for kd in range(kD):
        for kh in range(kH):
            for kw_ in range(kW):
                cols.append(xp[:,
                               kd * dd: kd * dd + sd * Do: sd,
                               kh * dh: kh * dh + sh * Ho: sh,
                               kw_ * dw: kw_ * dw + sw * Wo: sw, :])
    Xc = cols[0] if len(cols) == 1 else jnp.concatenate(cols, axis=-1)
    M = B * Do * Ho * Wo
    Xm = Xc.reshape(M, kD * kH * kW * Cin)
    Wm = w.reshape(kD * kH * kW * Cin, Cout)        # same (tap, cin) row order

    res_flat = [r.reshape(M, Cout) for r in residuals]
    if chain_w is not None:
        N2 = chain_w.shape[-1]
        cw = chain_w.reshape(chain_w.shape[-2], N2)
        cres_flat = [r.reshape(M, N2) for r in chain_residuals]
    else:
        N2, cw, cres_flat = Cout, None, []

    out = fused_matmul(Xm, Wm, bias=bias, residuals=res_flat, relu=relu,
                       dual_output=dual_output, chain_w=cw,
                       chain_residuals=cres_flat, chain_relu=chain_relu)
    if dual_output:
        return (out[0].reshape(B, Do, Ho, Wo, Cout),
                out[1].reshape(B, Do, Ho, Wo, Cout))
    return out.reshape(B, Do, Ho, Wo, N2)


def pool_conv1x1(x, w1, pool):
    """Conv1x1(AvgPool3d(pool)) folded into one stride-`pool` conv (one matmul)."""
    kd, kh, kw = pool
    Cin, Cout = w1.shape[-2], w1.shape[-1]
    wt = jnp.tile(w1.reshape(1, 1, 1, Cin, Cout), (kd, kh, kw, 1, 1)) / (kd * kh * kw)
    return conv3d(x, wt, stride=pool)


# -----------------------------------------------------------------------------
# Sub-pixel ConvTranspose3d (k=3, s=2, p=1, op=1) + ReLU (+ post-ReLU skip)
# -----------------------------------------------------------------------------
_PARITY_TAP = ((1, -1), (0, 2))   # [output parity][input offset 0/1] -> kernel tap (-1: zero)


def _subpixel_weight(w):
    """w: [3,3,3,Cin,Cout] equivalent stride-1 conv weight (ConvTranspose weight
    with spatial flip + in/out swap already applied).  Returns [8*Cin, 8*Cout]:
    rows ordered (u,v,s,cin) over the 2x2x2 input neighbourhood, columns ordered
    (a,b,c,cout) over the 8 output parities."""
    Cin, Cout = w.shape[3], w.shape[4]
    zero = jnp.zeros((Cin, Cout), w.dtype)
    rows = []
    for u in range(2):
        for v in range(2):
            for s in range(2):
                cols = []
                for a in range(2):
                    for b in range(2):
                        for c in range(2):
                            td, th, tw = _PARITY_TAP[a][u], _PARITY_TAP[b][v], _PARITY_TAP[c][s]
                            cols.append(zero if min(td, th, tw) < 0 else w[td, th, tw])
                rows.append(jnp.concatenate(cols, axis=1))   # [Cin, 8*Cout]
    return jnp.concatenate(rows, axis=0)                      # [8*Cin, 8*Cout]


def upsample_won(x, p, skip=None):
    """UpsamplewoN: ConvTranspose3d(3, s=2, p=1, op=1) + ReLU, optional post-ReLU
    skip add.  Computed as ONE fused matmul (K=8*Cin, N=8*Cout), then a cheap
    parity interleave -- no zero-stuffed buffer, no 27-tap im2col."""
    w, bias = p["w"], p["b"]
    B, D, H, W, Cin = x.shape
    Cout = w.shape[-1]

    xp = jnp.pad(x, ((0, 0), (0, 1), (0, 1), (0, 1), (0, 0)))
    cols = [xp[:, u:u + D, v:v + H, s:s + W, :]
            for u in range(2) for v in range(2) for s in range(2)]
    Xm = jnp.concatenate(cols, axis=-1).reshape(B * D * H * W, 8 * Cin)
    W8 = _subpixel_weight(w)                  # [8*Cin, 8*Cout]
    b8 = jnp.tile(bias, 8)                    # [8*Cout]

    post = []
    if skip is not None:   # de-interleave the skip so the add fuses in-kernel
        post = [skip.reshape(B, D, 2, H, 2, W, 2, Cout)
                    .transpose(0, 1, 3, 5, 2, 4, 6, 7)
                    .reshape(B * D * H * W, 8 * Cout)]

    y = fused_matmul(Xm, W8, bias=b8, relu=True, post_residuals=post)
    y = (y.reshape(B, D, H, W, 2, 2, 2, Cout)
          .transpose(0, 1, 4, 2, 5, 3, 6, 7)
          .reshape(B, 2 * D, 2 * H, 2 * W, Cout))
    return y


# -----------------------------------------------------------------------------
# MonoScene blocks without norm ("woN")
# -----------------------------------------------------------------------------
def bottleneck_s1(x, p, dilation=1):
    """Bottleneck3D, stride=1, expansion=4, no norm."""
    d = dilation
    out1 = conv3d(x, p["w1"], relu=True)                                      # 1x1x1
    out2, out2_relu = conv3d(out1, p["w2"], padding=(0, 0, d),
                             dilation=(1, 1, d), dual_output=True)            # (1,1,3)
    out3, out3_relu = conv3d(out2_relu, p["w3"], padding=(0, d, 0),
                             dilation=(1, d, 1), residuals=(out2,),
                             dual_output=True)                                # (1,3,1)+out2
    # (3,1,1)+out2+out3, ReLU, then the 1x1x1 conv5 + skip + ReLU chained in-kernel
    out = conv3d(out3_relu, p["w4"], padding=(d, 0, 0), dilation=(d, 1, 1),
                 residuals=(out2, out3), relu=True,
                 chain_w=p["w5"], chain_residuals=(x,), chain_relu=True)
    return out


def bottleneck_down(x, p):
    """Bottleneck3D, stride=2, expansion=8, downsample = AvgPool(2)+Conv1x1, no norm."""
    residual = pool_conv1x1(x, p["w_ds"], (2, 2, 2))
    out1 = conv3d(x, p["w1"], relu=True)
    out2, out2_relu = conv3d(out1, p["w2"], padding=(0, 0, 1),
                             stride=(1, 1, 2), dual_output=True)              # W/2
    out2_ds = pool_conv1x1(out2, p["w_d2"], (1, 2, 1))                        # downsample2
    out3, out3_relu = conv3d(out2_relu, p["w3"], padding=(0, 1, 0),
                             stride=(1, 2, 1), residuals=(out2_ds,),
                             dual_output=True)                                # H/2
    out2_ds2 = pool_conv1x1(out2_ds, p["w_d3"], (2, 1, 1))                    # downsample3
    out3_ds = pool_conv1x1(out3, p["w_d4"], (2, 1, 1))                        # downsample4
    # D/2 conv + residuals + ReLU, then 1x1x1 conv5 + residual + ReLU chained in-kernel
    out = conv3d(out3_relu, p["w4"], padding=(1, 0, 0), stride=(2, 1, 1),
                 residuals=(out2_ds2, out3_ds), relu=True,
                 chain_w=p["w5"], chain_residuals=(residual,), chain_relu=True)
    return out


# -----------------------------------------------------------------------------
# UNet3D forward
# -----------------------------------------------------------------------------
def unet3d_forward_ndhwc(params, x3d_l1):
    x = bottleneck_s1(x3d_l1, params["proc_l1"], dilation=1)     # ProcesswoN(f)
    x3d_l2 = bottleneck_down(x, params["down_l1"])               # DownsamplewoN(f)
    x = bottleneck_s1(x3d_l2, params["proc_l2"], dilation=1)     # ProcesswoN(2f)
    x3d_l3 = bottleneck_down(x, params["down_l2"])               # DownsamplewoN(2f)

    x3d_up_l2 = upsample_won(x3d_l3, params["up_13_l2"], skip=x3d_l2)
    x3d_up_l1 = upsample_won(x3d_up_l2, params["up_12_l1"], skip=x3d_l1)
    x3d_up_lfull = upsample_won(x3d_up_l1, params["up_l1_lfull"])
    return x3d_up_lfull


@jax.jit
def unet3d_forward(params, x3d_ncdhw):
    # layout: NCDHW (PyTorch) in -> NDHWC / bf16 internally -> NCDHW f32 out
    x = jnp.transpose(x3d_ncdhw, (0, 2, 3, 4, 1)).astype(jnp.bfloat16)
    y = unet3d_forward_ndhwc(params, x)
    return jnp.transpose(y, (0, 4, 1, 2, 3)).astype(jnp.float32)


# -----------------------------------------------------------------------------
# Deterministic synthetic parameter init
# -----------------------------------------------------------------------------
class _KeyGen:
    def __init__(self, seed=0):
        self.key = jax.random.PRNGKey(seed)

    def __call__(self):
        self.key, sub = jax.random.split(self.key)
        return sub


def init_params(feature, seed=0):
    kg = _KeyGen(seed)

    def W(shape):
        return 0.1 * jax.random.normal(kg(), shape, dtype=jnp.float32)

    def bneck_s1(cin):
        p = cin // 4
        return dict(w1=W((1, 1, 1, cin, p)), w2=W((1, 1, 3, p, p)),
                    w3=W((1, 3, 1, p, p)), w4=W((3, 1, 1, p, p)),
                    w5=W((1, 1, 1, p, p * 4)))

    def bneck_down(cin):
        p = cin // 4
        return dict(w1=W((1, 1, 1, cin, p)), w2=W((1, 1, 3, p, p)),
                    w3=W((1, 3, 1, p, p)), w4=W((3, 1, 1, p, p)),
                    w5=W((1, 1, 1, p, p * 8)),
                    w_ds=W((1, 1, 1, cin, cin * 2)),
                    w_d2=W((1, 1, 1, p, p)), w_d3=W((1, 1, 1, p, p)),
                    w_d4=W((1, 1, 1, p, p)))

    def up(cin, cout):
        return dict(w=W((3, 3, 3, cin, cout)),
                    b=0.1 * jax.random.normal(kg(), (cout,), dtype=jnp.float32))

    f = feature
    return dict(
        proc_l1=bneck_s1(f), down_l1=bneck_down(f),
        proc_l2=bneck_s1(2 * f), down_l2=bneck_down(2 * f),
        up_13_l2=up(4 * f, 2 * f), up_12_l1=up(2 * f, f),
        up_l1_lfull=up(f, f // 2),
    )


# -----------------------------------------------------------------------------
if __name__ == "__main__":
    feature = 16
    full_scene_size = (16, 16, 16)
    project_scale = 2
    B = 1
    D = full_scene_size[0] // project_scale   # level-1 spatial size = 8

    params = init_params(feature, seed=0)

    key = jax.random.PRNGKey(0)
    x3d = jax.random.normal(key, (B, feature, D, D, D), dtype=jnp.float32)  # NCDHW

    out = unet3d_forward(params, x3d)
    out = jax.block_until_ready(out)

    expected = (B, feature // 2, 2 * D, 2 * D, 2 * D)
    assert out.shape == expected, (out.shape, expected)
    assert jnp.all(jnp.isfinite(out))
    print("KERNEL_OK")
</pallas_src>

<mosaic_0001>
module attributes {stable_mosaic.version = 11 : i64} {
  func.func @kernel(%arg0: i32, %arg1: memref<512x16xbf16, #tpu.memory_space<vmem>>, %arg2: memref<16x4xbf16, #tpu.memory_space<vmem>>, %arg3: memref<512x4xbf16, #tpu.memory_space<vmem>>) attributes {dimension_semantics = [#tpu.dimension_semantics<parallel>], iteration_bounds = array<i64: 1>, scalar_prefetch = 0 : i64, scratch_operands = 0 : i64, tpu.core_type = #tpu.core_type<tc>, window_params = [{transform_indices = @transform_0, window_bounds = array<i64: 512, 16>}, {pipeline_mode = #tpu.pipeline_mode<synchronous>, transform_indices = @transform_1, window_bounds = array<i64: 16, 4>}, {transform_indices = @transform_2, window_bounds = array<i64: 512, 4>}]} {
    %c0 = arith.constant 0 : index
    %c0_0 = arith.constant 0 : index
    %0 = vector.load %arg1[%c0, %c0_0] : memref<512x16xbf16, #tpu.memory_space<vmem>>, vector<512x16xbf16>
    %c0_1 = arith.constant 0 : index
    %c0_2 = arith.constant 0 : index
    %1 = vector.load %arg2[%c0_1, %c0_2] : memref<16x4xbf16, #tpu.memory_space<vmem>>, vector<16x4xbf16>
    %cst = arith.constant dense<0.000000e+00> : vector<512x4xf32>
    %2 = tpu.matmul %0, %1, %cst {dimension_numbers = #tpu.dot_dimension_numbers<[1], [0], [0], [1], [0, 0, 1, 1], [], []>} : vector<512x16xbf16>, vector<16x4xbf16>, vector<512x4xf32> -> vector<512x4xf32>
    %cst_3 = arith.constant 0.000000e+00 : f32
    %3 = vector.broadcast %cst_3 : f32 to vector<512x4xf32>
    %4 = arith.maximumf %2, %3 : vector<512x4xf32>
    %5 = arith.truncf %4 : vector<512x4xf32> to vector<512x4xbf16>
    %c0_4 = arith.constant 0 : index
    %c0_5 = arith.constant 0 : index
    %6 = vector.load %arg3[%c0_4, %c0_5] : memref<512x4xbf16, #tpu.memory_space<vmem>>, vector<512x4xbf16>
    tpu.vector_store %arg3[%c0_4, %c0_5], %5 {strides = array<i32>} : memref<512x4xbf16, #tpu.memory_space<vmem>>, vector<512x4xbf16>,
    return
  }
  func.func @transform_0(%arg0: i32) -> (i32, i32) {
    %c0_i32 = arith.constant 0 : i32
    %c0_i32_0 = arith.constant 0 : i32
    return %arg0, %c0_i32 : i32, i32
  }
  func.func @transform_1(%arg0: i32) -> (i32, i32) {
    %c0_i32 = arith.constant 0 : i32
    %c0_i32_0 = arith.constant 0 : i32
    %c0_i32_1 = arith.constant 0 : i32
    return %c0_i32, %c0_i32_0 : i32, i32
  }
  func.func @transform_2(%arg0: i32) -> (i32, i32) {
    %c0_i32 = arith.constant 0 : i32
    %c0_i32_0 = arith.constant 0 : i32
    return %arg0, %c0_i32 : i32, i32
  }
}

module attributes {stable_mosaic.version = 11 : i64} {
  func.func @kernel(%arg0: i32, %arg1: memref<512x12xbf16, #tpu.memory_space<vmem>>, %arg2: memref<12x4xbf16, #tpu.memory_space<vmem>>, %arg3: memref<512x4xbf16, #tpu.memory_space<vmem>>, %arg4: memref<512x4xbf16, #tpu.memory_space<vmem>>) attributes {dimension_semantics = [#tpu.dimension_semantics<parallel>], iteration_bounds = array<i64: 1>, scalar_prefetch = 0 : i64, scratch_operands = 0 : i64, tpu.core_type = #tpu.core_type<tc>, window_params = [{transform_indices = @transform_0, window_bounds = array<i64: 512, 12>}, {pipeline_mode = #tpu.pipeline_mode<synchronous>, transform_indices = @transform_1, window_bounds = array<i64: 12, 4>}, {transform_indices = @transform_2, window_bounds = array<i64: 512, 4>}, {transform_indices = @transform_3, window_bounds = array<i64: 512, 4>}]} {
    %c0 = arith.constant 0 : index
    %c0_0 = arith.constant 0 : index
    %0 = vector.load %arg1[%c0, %c0_0] : memref<512x12xbf16, #tpu.memory_space<vmem>>, vector<512x12xbf16>
    %c0_1 = arith.constant 0 : index
    %c0_2 = arith.constant 0 : index
    %1 = vector.load %arg2[%c0_1, %c0_2] : memref<12x4xbf16, #tpu.memory_space<vmem>>, vector<12x4xbf16>
    %cst = arith.constant dense<0.000000e+00> : vector<512x4xf32>
    %2 = tpu.matmul %0, %1, %cst {dimension_numbers = #tpu.dot_dimension_numbers<[1], [0], [0], [1], [0, 0, 1, 1], [], []>} : vector<512x12xbf16>, vector<12x4xbf16>, vector<512x4xf32> -> vector<512x4xf32>
    %3 = arith.truncf %2 : vector<512x4xf32> to vector<512x4xbf16>
    %c0_3 = arith.constant 0 : index
    %c0_4 = arith.constant 0 : index
    %4 = vector.load %arg3[%c0_3, %c0_4] : memref<512x4xbf16, #tpu.memory_space<vmem>>, vector<512x4xbf16>
    tpu.vector_store %arg3[%c0_3, %c0_4], %3 {strides = array<i32>} : memref<512x4xbf16, #tpu.memory_space<vmem>>, vector<512x4xbf16>,
    %cst_5 = arith.constant 0.000000e+00 : f32
    %5 = vector.broadcast %cst_5 : f32 to vector<512x4xf32>
    %6 = arith.maximumf %2, %5 : vector<512x4xf32>
    %7 = arith.truncf %6 : vector<512x4xf32> to vector<512x4xbf16>
    %c0_6 = arith.constant 0 : index
    %c0_7 = arith.constant 0 : index
    %8 = vector.load %arg4[%c0_6, %c0_7] : memref<512x4xbf16, #tpu.memory_space<vmem>>, vector<512x4xbf16>
    tpu.vector_store %arg4[%c0_6, %c0_7], %7 {strides = array<i32>} : memref<512x4xbf16, #tpu.memory_space<vmem>>, vector<512x4xbf16>,
    return
  }
  func.func @transform_0(%arg0: i32) -> (i32, i32) {
    %c0_i32 = arith.constant 0 : i32
    %c0_i32_0 = arith.constant 0 : i32
    return %arg0, %c0_i32 : i32, i32
  }
  func.func @transform_1(%arg0: i32) -> (i32, i32) {
    %c0_i32 = arith.constant 0 : i32
    %c0_i32_0 = arith.constant 0 : i32
    %c0_i32_1 = arith.constant 0 : i32
    return %c0_i32, %c0_i32_0 : i32, i32
  }
  func.func @transform_2(%arg0: i32) -> (i32, i32) {
    %c0_i32 = arith.constant 0 : i32
    %c0_i32_0 = arith.constant 0 : i32
    return %arg0, %c0_i32 : i32, i32
  }
  func.func @transform_3(%arg0: i32) -> (i32, i32) {
    %c0_i32 = arith.constant 0 : i32
    %c0_i32_0 = arith.constant 0 : i32
    return %arg0, %c0_i32 : i32, i32
  }
}

module attributes {stable_mosaic.version = 11 : i64} {
  func.func @kernel(%arg0: i32, %arg1: memref<512x12xbf16, #tpu.memory_space<vmem>>, %arg2: memref<12x4xbf16, #tpu.memory_space<vmem>>, %arg3: memref<512x4xbf16, #tpu.memory_space<vmem>>, %arg4: memref<512x4xbf16, #tpu.memory_space<vmem>>, %arg5: memref<512x4xbf16, #tpu.memory_space<vmem>>) attributes {dimension_semantics = [#tpu.dimension_semantics<parallel>], iteration_bounds = array<i64: 1>, scalar_prefetch = 0 : i64, scratch_operands = 0 : i64, tpu.core_type = #tpu.core_type<tc>, window_params = [{transform_indices = @transform_0, window_bounds = array<i64: 512, 12>}, {pipeline_mode = #tpu.pipeline_mode<synchronous>, transform_indices = @transform_1, window_bounds = array<i64: 12, 4>}, {transform_indices = @transform_2, window_bounds = array<i64: 512, 4>}, {transform_indices = @transform_3, window_bounds = array<i64: 512, 4>}, {transform_indices = @transform_4, window_bounds = array<i64: 512, 4>}]} {
    %c0 = arith.constant 0 : index
    %c0_0 = arith.constant 0 : index
    %0 = vector.load %arg1[%c0, %c0_0] : memref<512x12xbf16, #tpu.memory_space<vmem>>, vector<512x12xbf16>
    %c0_1 = arith.constant 0 : index
    %c0_2 = arith.constant 0 : index
    %1 = vector.load %arg2[%c0_1, %c0_2] : memref<12x4xbf16, #tpu.memory_space<vmem>>, vector<12x4xbf16>
    %cst = arith.constant dense<0.000000e+00> : vector<512x4xf32>
    %2 = tpu.matmul %0, %1, %cst {dimension_numbers = #tpu.dot_dimension_numbers<[1], [0], [0], [1], [0, 0, 1, 1], [], []>} : vector<512x12xbf16>, vector<12x4xbf16>, vector<512x4xf32> -> vector<512x4xf32>
    %c0_3 = arith.constant 0 : index
    %c0_4 = arith.constant 0 : index
    %3 = vector.load %arg3[%c0_3, %c0_4] : memref<512x4xbf16, #tpu.memory_space<vmem>>, vector<512x4xbf16>
    %4 = arith.extf %3 : vector<512x4xbf16> to vector<512x4xf32>
    %5 = arith.addf %2, %4 : vector<512x4xf32>
    %6 = arith.truncf %5 : vector<512x4xf32> to vector<512x4xbf16>
    %c0_5 = arith.constant 0 : index
    %c0_6 = arith.constant 0 : index
    %7 = vector.load %arg4[%c0_5, %c0_6] : memref<512x4xbf16, #tpu.memory_space<vmem>>, vector<512x4xbf16>
    tpu.vector_store %arg4[%c0_5, %c0_6], %6 {strides = array<i32>} : memref<512x4xbf16, #tpu.memory_space<vmem>>, vector<512x4xbf16>,
    %cst_7 = arith.constant 0.000000e+00 : f32
    %8 = vector.broadcast %cst_7 : f32 to vector<512x4xf32>
    %9 = arith.maximumf %5, %8 : vector<512x4xf32>
    %10 = arith.truncf %9 : vector<512x4xf32> to vector<512x4xbf16>
    %c0_8 = arith.constant 0 : index
    %c0_9 = arith.constant 0 : index
    %11 = vector.load %arg5[%c0_8, %c0_9] : memref<512x4xbf16, #tpu.memory_space<vmem>>, vector<512x4xbf16>
    tpu.vector_store %arg5[%c0_8, %c0_9], %10 {strides = array<i32>} : memref<512x4xbf16, #tpu.memory_space<vmem>>, vector<512x4xbf16>,
    return
  }
  func.func @transform_0(%arg0: i32) -> (i32, i32) {
    %c0_i32 = arith.constant 0 : i32
    %c0_i32_0 = arith.constant 0 : i32
    return %arg0, %c0_i32 : i32, i32
  }
  func.func @transform_1(%arg0: i32) -> (i32, i32) {
    %c0_i32 = arith.constant 0 : i32
    %c0_i32_0 = arith.constant 0 : i32
    %c0_i32_1 = arith.constant 0 : i32
    return %c0_i32, %c0_i32_0 : i32, i32
  }
  func.func @transform_2(%arg0: i32) -> (i32, i32) {
    %c0_i32 = arith.constant 0 : i32
    %c0_i32_0 = arith.constant 0 : i32
    return %arg0, %c0_i32 : i32, i32
  }
  func.func @transform_3(%arg0: i32) -> (i32, i32) {
    %c0_i32 = arith.constant 0 : i32
    %c0_i32_0 = arith.constant 0 : i32
    return %arg0, %c0_i32 : i32, i32
  }
  func.func @transform_4(%arg0: i32) -> (i32, i32) {
    %c0_i32 = arith.constant 0 : i32
    %c0_i32_0 = arith.constant 0 : i32
    return %arg0, %c0_i32 : i32, i32
  }
}

module attributes {stable_mosaic.version = 11 : i64} {
  func.func @kernel(%arg0: i32, %arg1: memref<512x12xbf16, #tpu.memory_space<vmem>>, %arg2: memref<12x4xbf16, #tpu.memory_space<vmem>>, %arg3: memref<512x4xbf16, #tpu.memory_space<vmem>>, %arg4: memref<512x4xbf16, #tpu.memory_space<vmem>>, %arg5: memref<4x16xbf16, #tpu.memory_space<vmem>>, %arg6: memref<512x16xbf16, #tpu.memory_space<vmem>>, %arg7: memref<512x16xbf16, #tpu.memory_space<vmem>>) attributes {dimension_semantics = [#tpu.dimension_semantics<parallel>], iteration_bounds = array<i64: 1>, scalar_prefetch = 0 : i64, scratch_operands = 0 : i64, tpu.core_type = #tpu.core_type<tc>, window_params = [{transform_indices = @transform_0, window_bounds = array<i64: 512, 12>}, {pipeline_mode = #tpu.pipeline_mode<synchronous>, transform_indices = @transform_1, window_bounds = array<i64: 12, 4>}, {transform_indices = @transform_2, window_bounds = array<i64: 512, 4>}, {transform_indices = @transform_3, window_bounds = array<i64: 512, 4>}, {pipeline_mode = #tpu.pipeline_mode<synchronous>, transform_indices = @transform_4, window_bounds = array<i64: 4, 16>}, {transform_indices = @transform_5, window_bounds = array<i64: 512, 16>}, {transform_indices = @transform_6, window_bounds = array<i64: 512, 16>}]} {
    %c0 = arith.constant 0 : index
    %c0_0 = arith.constant 0 : index
    %0 = vector.load %arg1[%c0, %c0_0] : memref<512x12xbf16, #tpu.memory_space<vmem>>, vector<512x12xbf16>
    %c0_1 = arith.constant 0 : index
    %c0_2 = arith.constant 0 : index
    %1 = vector.load %arg2[%c0_1, %c0_2] : memref<12x4xbf16, #tpu.memory_space<vmem>>, vector<12x4xbf16>
    %cst = arith.constant dense<0.000000e+00> : vector<512x4xf32>
    %2 = tpu.matmul %0, %1, %cst {dimension_numbers = #tpu.dot_dimension_numbers<[1], [0], [0], [1], [0, 0, 1, 1], [], []>} : vector<512x12xbf16>, vector<12x4xbf16>, vector<512x4xf32> -> vector<512x4xf32>
    %c0_3 = arith.constant 0 : index
    %c0_4 = arith.constant 0 : index
    %3 = vector.load %arg3[%c0_3, %c0_4] : memref<512x4xbf16, #tpu.memory_space<vmem>>, vector<512x4xbf16>
    %4 = arith.extf %3 : vector<512x4xbf16> to vector<512x4xf32>
    %5 = arith.addf %2, %4 : vector<512x4xf32>
    %c0_5 = arith.constant 0 : index
    %c0_6 = arith.constant 0 : index
    %6 = vector.load %arg4[%c0_5, %c0_6] : memref<512x4xbf16, #tpu.memory_space<vmem>>, vector<512x4xbf16>
    %7 = arith.extf %6 : vector<512x4xbf16> to vector<512x4xf32>
    %8 = arith.addf %5, %7 : vector<512x4xf32>
    %cst_7 = arith.constant 0.000000e+00 : f32
    %9 = vector.broadcast %cst_7 : f32 to vector<512x4xf32>
    %10 = arith.maximumf %8, %9 : vector<512x4xf32>
    %11 = arith.truncf %10 : vector<512x4xf32> to vector<512x4xbf16>
    %c0_8 = arith.constant 0 : index
    %c0_9 = arith.constant 0 : index
    %12 = vector.load %arg5[%c0_8, %c0_9] : memref<4x16xbf16, #tpu.memory_space<vmem>>, vector<4x16xbf16>
    %cst_10 = arith.constant dense<0.000000e+00> : vector<512x16xf32>
    %13 = tpu.matmul %11, %12, %cst_10 {dimension_numbers = #tpu.dot_dimension_numbers<[1], [0], [0], [1], [0, 0, 1, 1], [], []>} : vector<512x4xbf16>, vector<4x16xbf16>, vector<512x16xf32> -> vector<512x16xf32>
    %c0_11 = arith.constant 0 : index
    %c0_12 = arith.constant 0 : index
    %14 = vector.load %arg6[%c0_11, %c0_12] : memref<512x16xbf16, #tpu.memory_space<vmem>>, vector<512x16xbf16>
    %15 = arith.extf %14 : vector<512x16xbf16> to vector<512x16xf32>
    %16 = arith.addf %13, %15 : vector<512x16xf32>
    %cst_13 = arith.constant 0.000000e+00 : f32
    %17 = vector.broadcast %cst_13 : f32 to vector<512x16xf32>
    %18 = arith.maximumf %16, %17 : vector<512x16xf32>
    %19 = arith.truncf %18 : vector<512x16xf32> to vector<512x16xbf16>
    %c0_14 = arith.constant 0 : index
    %c0_15 = arith.constant 0 : index
    %20 = vector.load %arg7[%c0_14, %c0_15] : memref<512x16xbf16, #tpu.memory_space<vmem>>, vector<512x16xbf16>
    tpu.vector_store %arg7[%c0_14, %c0_15], %19 {strides = array<i32>} : memref<512x16xbf16, #tpu.memory_space<vmem>>, vector<512x16xbf16>,
    return
  }
  func.func @transform_0(%arg0: i32) -> (i32, i32) {
    %c0_i32 = arith.constant 0 : i32
    %c0_i32_0 = arith.constant 0 : i32
    return %arg0, %c0_i32 : i32, i32
  }
  func.func @transform_1(%arg0: i32) -> (i32, i32) {
    %c0_i32 = arith.constant 0 : i32
    %c0_i32_0 = arith.constant 0 : i32
    %c0_i32_1 = arith.constant 0 : i32
    return %c0_i32, %c0_i32_0 : i32, i32
  }
  func.func @transform_2(%arg0: i32) -> (i32, i32) {
    %c0_i32 = arith.constant 0 : i32
    %c0_i32_0 = arith.constant 0 : i32
    return %arg0, %c0_i32 : i32, i32
  }
  func.func @transform_3(%arg0: i32) -> (i32, i32) {
    %c0_i32 = arith.constant 0 : i32
    %c0_i32_0 = arith.constant 0 : i32
    return %arg0, %c0_i32 : i32, i32
  }
  func.func @transform_4(%arg0: i32) -> (i32, i32) {
    %c0_i32 = arith.constant 0 : i32
    %c0_i32_0 = arith.constant 0 : i32
    %c0_i32_1 = arith.constant 0 : i32
    return %c0_i32, %c0_i32_0 : i32, i32
  }
  func.func @transform_5(%arg0: i32) -> (i32, i32) {
    %c0_i32 = arith.constant 0 : i32
    %c0_i32_0 = arith.constant 0 : i32
    return %arg0, %c0_i32 : i32, i32
  }
  func.func @transform_6(%arg0: i32) -> (i32, i32) {
    %c0_i32 = arith.constant 0 : i32
    %c0_i32_0 = arith.constant 0 : i32
    return %arg0, %c0_i32 : i32, i32
  }
}

module attributes {stable_mosaic.version = 11 : i64} {
  func.func @kernel(%arg0: i32, %arg1: memref<64x128xbf16, #tpu.memory_space<vmem>>, %arg2: memref<128x32xbf16, #tpu.memory_space<vmem>>, %arg3: memref<64x32xbf16, #tpu.memory_space<vmem>>) attributes {dimension_semantics = [#tpu.dimension_semantics<parallel>], iteration_bounds = array<i64: 1>, scalar_prefetch = 0 : i64, scratch_operands = 0 : i64, tpu.core_type = #tpu.core_type<tc>, window_params = [{transform_indices = @transform_0, window_bounds = array<i64: 64, 128>}, {pipeline_mode = #tpu.pipeline_mode<synchronous>, transform_indices = @transform_1, window_bounds = array<i64: 128, 32>}, {transform_indices = @transform_2, window_bounds = array<i64: 64, 32>}]} {
    %c0 = arith.constant 0 : index
    %c0_0 = arith.constant 0 : index
    %0 = vector.load %arg1[%c0, %c0_0] : memref<64x128xbf16, #tpu.memory_space<vmem>>, vector<64x128xbf16>
    %c0_1 = arith.constant 0 : index
    %c0_2 = arith.constant 0 : index
    %1 = vector.load %arg2[%c0_1, %c0_2] : memref<128x32xbf16, #tpu.memory_space<vmem>>, vector<128x32xbf16>
    %cst = arith.constant dense<0.000000e+00> : vector<64x32xf32>
    %2 = tpu.matmul %0, %1, %cst {dimension_numbers = #tpu.dot_dimension_numbers<[1], [0], [0], [1], [0, 0, 1, 1], [], []>} : vector<64x128xbf16>, vector<128x32xbf16>, vector<64x32xf32> -> vector<64x32xf32>
    %3 = arith.truncf %2 : vector<64x32xf32> to vector<64x32xbf16>
    %c0_3 = arith.constant 0 : index
    %c0_4 = arith.constant 0 : index
    %4 = vector.load %arg3[%c0_3, %c0_4] : memref<64x32xbf16, #tpu.memory_space<vmem>>, vector<64x32xbf16>
    tpu.vector_store %arg3[%c0_3, %c0_4], %3 {strides = array<i32>} : memref<64x32xbf16, #tpu.memory_space<vmem>>, vector<64x32xbf16>,
    return
  }
  func.func @transform_0(%arg0: i32) -> (i32, i32) {
    %c0_i32 = arith.constant 0 : i32
    %c0_i32_0 = arith.constant 0 : i32
    return %arg0, %c0_i32 : i32, i32
  }
  func.func @transform_1(%arg0: i32) -> (i32, i32) {
    %c0_i32 = arith.constant 0 : i32
    %c0_i32_0 = arith.constant 0 : i32
    %c0_i32_1 = arith.constant 0 : i32
    return %c0_i32, %c0_i32_0 : i32, i32
  }
  func.func @transform_2(%arg0: i32) -> (i32, i32) {
    %c0_i32 = arith.constant 0 : i32
    %c0_i32_0 = arith.constant 0 : i32
    return %arg0, %c0_i32 : i32, i32
  }
}

module attributes {stable_mosaic.version = 11 : i64} {
  func.func @kernel(%arg0: i32, %arg1: memref<256x12xbf16, #tpu.memory_space<vmem>>, %arg2: memref<12x4xbf16, #tpu.memory_space<vmem>>, %arg3: memref<256x4xbf16, #tpu.memory_space<vmem>>, %arg4: memref<256x4xbf16, #tpu.memory_space<vmem>>) attributes {dimension_semantics = [#tpu.dimension_semantics<parallel>], iteration_bounds = array<i64: 1>, scalar_prefetch = 0 : i64, scratch_operands = 0 : i64, tpu.core_type = #tpu.core_type<tc>, window_params = [{transform_indices = @transform_0, window_bounds = array<i64: 256, 12>}, {pipeline_mode = #tpu.pipeline_mode<synchronous>, transform_indices = @transform_1, window_bounds = array<i64: 12, 4>}, {transform_indices = @transform_2, window_bounds = array<i64: 256, 4>}, {transform_indices = @transform_3, window_bounds = array<i64: 256, 4>}]} {
    %c0 = arith.constant 0 : index
    %c0_0 = arith.constant 0 : index
    %0 = vector.load %arg1[%c0, %c0_0] : memref<256x12xbf16, #tpu.memory_space<vmem>>, vector<256x12xbf16>
    %c0_1 = arith.constant 0 : index
    %c0_2 = arith.constant 0 : index
    %1 = vector.load %arg2[%c0_1, %c0_2] : memref<12x4xbf16, #tpu.memory_space<vmem>>, vector<12x4xbf16>
    %cst = arith.constant dense<0.000000e+00> : vector<256x4xf32>
    %2 = tpu.matmul %0, %1, %cst {dimension_numbers = #tpu.dot_dimension_numbers<[1], [0], [0], [1], [0, 0, 1, 1], [], []>} : vector<256x12xbf16>, vector<12x4xbf16>, vector<256x4xf32> -> vector<256x4xf32>
    %3 = arith.truncf %2 : vector<256x4xf32> to vector<256x4xbf16>
    %c0_3 = arith.constant 0 : index
    %c0_4 = arith.constant 0 : index
    %4 = vector.load %arg3[%c0_3, %c0_4] : memref<256x4xbf16, #tpu.memory_space<vmem>>, vector<256x4xbf16>
    tpu.vector_store %arg3[%c0_3, %c0_4], %3 {strides = array<i32>} : memref<256x4xbf16, #tpu.memory_space<vmem>>, vector<256x4xbf16>,
    %cst_5 = arith.constant 0.000000e+00 : f32
    %5 = vector.broadcast %cst_5 : f32 to vector<256x4xf32>
    %6 = arith.maximumf %2, %5 : vector<256x4xf32>
    %7 = arith.truncf %6 : vector<256x4xf32> to vector<256x4xbf16>
    %c0_6 = arith.constant 0 : index
    %c0_7 = arith.constant 0 : index
    %8 = vector.load %arg4[%c0_6, %c0_7] : memref<256x4xbf16, #tpu.memory_space<vmem>>, vector<256x4xbf16>
    tpu.vector_store %arg4[%c0_6, %c0_7], %7 {strides = array<i32>} : memref<256x4xbf16, #tpu.memory_space<vmem>>, vector<256x4xbf16>,
    return
  }
  func.func @transform_0(%arg0: i32) -> (i32, i32) {
    %c0_i32 = arith.constant 0 : i32
    %c0_i32_0 = arith.constant 0 : i32
    return %arg0, %c0_i32 : i32, i32
  }
  func.func @transform_1(%arg0: i32) -> (i32, i32) {
    %c0_i32 = arith.constant 0 : i32
    %c0_i32_0 = arith.constant 0 : i32
    %c0_i32_1 = arith.constant 0 : i32
    return %c0_i32, %c0_i32_0 : i32, i32
  }
  func.func @transform_2(%arg0: i32) -> (i32, i32) {
    %c0_i32 = arith.constant 0 : i32
    %c0_i32_0 = arith.constant 0 : i32
    return %arg0, %c0_i32 : i32, i32
  }
  func.func @transform_3(%arg0: i32) -> (i32, i32) {
    %c0_i32 = arith.constant 0 : i32
    %c0_i32_0 = arith.constant 0 : i32
    return %arg0, %c0_i32 : i32, i32
  }
}

module attributes {stable_mosaic.version = 11 : i64} {
  func.func @kernel(%arg0: i32, %arg1: memref<128x8xbf16, #tpu.memory_space<vmem>>, %arg2: memref<8x4xbf16, #tpu.memory_space<vmem>>, %arg3: memref<128x4xbf16, #tpu.memory_space<vmem>>) attributes {dimension_semantics = [#tpu.dimension_semantics<parallel>], iteration_bounds = array<i64: 1>, scalar_prefetch = 0 : i64, scratch_operands = 0 : i64, tpu.core_type = #tpu.core_type<tc>, window_params = [{transform_indices = @transform_0, window_bounds = array<i64: 128, 8>}, {pipeline_mode = #tpu.pipeline_mode<synchronous>, transform_indices = @transform_1, window_bounds = array<i64: 8, 4>}, {transform_indices = @transform_2, window_bounds = array<i64: 128, 4>}]} {
    %c0 = arith.constant 0 : index
    %c0_0 = arith.constant 0 : index
    %0 = vector.load %arg1[%c0, %c0_0] : memref<128x8xbf16, #tpu.memory_space<vmem>>, vector<128x8xbf16>
    %c0_1 = arith.constant 0 : index
    %c0_2 = arith.constant 0 : index
    %1 = vector.load %arg2[%c0_1, %c0_2] : memref<8x4xbf16, #tpu.memory_space<vmem>>, vector<8x4xbf16>
    %cst = arith.constant dense<0.000000e+00> : vector<128x4xf32>
    %2 = tpu.matmul %0, %1, %cst {dimension_numbers = #tpu.dot_dimension_numbers<[1], [0], [0], [1], [0, 0, 1, 1], [], []>} : vector<128x8xbf16>, vector<8x4xbf16>, vector<128x4xf32> -> vector<128x4xf32>
    %3 = arith.truncf %2 : vector<128x4xf32> to vector<128x4xbf16>
    %c0_3 = arith.constant 0 : index
    %c0_4 = arith.constant 0 : index
    %4 = vector.load %arg3[%c0_3, %c0_4] : memref<128x4xbf16, #tpu.memory_space<vmem>>, vector<128x4xbf16>
    tpu.vector_store %arg3[%c0_3, %c0_4], %3 {strides = array<i32>} : memref<128x4xbf16, #tpu.memory_space<vmem>>, vector<128x4xbf16>,
    return
  }
  func.func @transform_0(%arg0: i32) -> (i32, i32) {
    %c0_i32 = arith.constant 0 : i32
    %c0_i32_0 = arith.constant 0 : i32
    return %arg0, %c0_i32 : i32, i32
  }
  func.func @transform_1(%arg0: i32) -> (i32, i32) {
    %c0_i32 = arith.constant 0 : i32
    %c0_i32_0 = arith.constant 0 : i32
    %c0_i32_1 = arith.constant 0 : i32
    return %c0_i32, %c0_i32_0 : i32, i32
  }
  func.func @transform_2(%arg0: i32) -> (i32, i32) {
    %c0_i32 = arith.constant 0 : i32
    %c0_i32_0 = arith.constant 0 : i32
    return %arg0, %c0_i32 : i32, i32
  }
}

module attributes {stable_mosaic.version = 11 : i64} {
  func.func @kernel(%arg0: i32, %arg1: memref<128x12xbf16, #tpu.memory_space<vmem>>, %arg2: memref<12x4xbf16, #tpu.memory_space<vmem>>, %arg3: memref<128x4xbf16, #tpu.memory_space<vmem>>, %arg4: memref<128x4xbf16, #tpu.memory_space<vmem>>, %arg5: memref<128x4xbf16, #tpu.memory_space<vmem>>) attributes {dimension_semantics = [#tpu.dimension_semantics<parallel>], iteration_bounds = array<i64: 1>, scalar_prefetch = 0 : i64, scratch_operands = 0 : i64, tpu.core_type = #tpu.core_type<tc>, window_params = [{transform_indices = @transform_0, window_bounds = array<i64: 128, 12>}, {pipeline_mode = #tpu.pipeline_mode<synchronous>, transform_indices = @transform_1, window_bounds = array<i64: 12, 4>}, {transform_indices = @transform_2, window_bounds = array<i64: 128, 4>}, {transform_indices = @transform_3, window_bounds = array<i64: 128, 4>}, {transform_indices = @transform_4, window_bounds = array<i64: 128, 4>}]} {
    %c0 = arith.constant 0 : index
    %c0_0 = arith.constant 0 : index
    %0 = vector.load %arg1[%c0, %c0_0] : memref<128x12xbf16, #tpu.memory_space<vmem>>, vector<128x12xbf16>
    %c0_1 = arith.constant 0 : index
    %c0_2 = arith.constant 0 : index
    %1 = vector.load %arg2[%c0_1, %c0_2] : memref<12x4xbf16, #tpu.memory_space<vmem>>, vector<12x4xbf16>
    %cst = arith.constant dense<0.000000e+00> : vector<128x4xf32>
    %2 = tpu.matmul %0, %1, %cst {dimension_numbers = #tpu.dot_dimension_numbers<[1], [0], [0], [1], [0, 0, 1, 1], [], []>} : vector<128x12xbf16>, vector<12x4xbf16>, vector<128x4xf32> -> vector<128x4xf32>
    %c0_3 = arith.constant 0 : index
    %c0_4 = arith.constant 0 : index
    %3 = vector.load %arg3[%c0_3, %c0_4] : memref<128x4xbf16, #tpu.memory_space<vmem>>, vector<128x4xbf16>
    %4 = arith.extf %3 : vector<128x4xbf16> to vector<128x4xf32>
    %5 = arith.addf %2, %4 : vector<128x4xf32>
    %6 = arith.truncf %5 : vector<128x4xf32> to vector<128x4xbf16>
    %c0_5 = arith.constant 0 : index
    %c0_6 = arith.constant 0 : index
    %7 = vector.load %arg4[%c0_5, %c0_6] : memref<128x4xbf16, #tpu.memory_space<vmem>>, vector<128x4xbf16>
    tpu.vector_store %arg4[%c0_5, %c0_6], %6 {strides = array<i32>} : memref<128x4xbf16, #tpu.memory_space<vmem>>, vector<128x4xbf16>,
    %cst_7 = arith.constant 0.000000e+00 : f32
    %8 = vector.broadcast %cst_7 : f32 to vector<128x4xf32>
    %9 = arith.maximumf %5, %8 : vector<128x4xf32>
    %10 = arith.truncf %9 : vector<128x4xf32> to vector<128x4xbf16>
    %c0_8 = arith.constant 0 : index
    %c0_9 = arith.constant 0 : index
    %11 = vector.load %arg5[%c0_8, %c0_9] : memref<128x4xbf16, #tpu.memory_space<vmem>>, vector<128x4xbf16>
    tpu.vector_store %arg5[%c0_8, %c0_9], %10 {strides = array<i32>} : memref<128x4xbf16, #tpu.memory_space<vmem>>, vector<128x4xbf16>,
    return
  }
  func.func @transform_0(%arg0: i32) -> (i32, i32) {
    %c0_i32 = arith.constant 0 : i32
    %c0_i32_0 = arith.constant 0 : i32
    return %arg0, %c0_i32 : i32, i32
  }
  func.func @transform_1(%arg0: i32) -> (i32, i32) {
    %c0_i32 = arith.constant 0 : i32
    %c0_i32_0 = arith.constant 0 : i32
    %c0_i32_1 = arith.constant 0 : i32
    return %c0_i32, %c0_i32_0 : i32, i32
  }
  func.func @transform_2(%arg0: i32) -> (i32, i32) {
    %c0_i32 = arith.constant 0 : i32
    %c0_i32_0 = arith.constant 0 : i32
    return %arg0, %c0_i32 : i32, i32
  }
  func.func @transform_3(%arg0: i32) -> (i32, i32) {
    %c0_i32 = arith.constant 0 : i32
    %c0_i32_0 = arith.constant 0 : i32
    return %arg0, %c0_i32 : i32, i32
  }
  func.func @transform_4(%arg0: i32) -> (i32, i32) {
    %c0_i32 = arith.constant 0 : i32
    %c0_i32_0 = arith.constant 0 : i32
    return %arg0, %c0_i32 : i32, i32
  }
}

module attributes {stable_mosaic.version = 11 : i64} {
  func.func @kernel(%arg0: i32, %arg1: memref<64x8xbf16, #tpu.memory_space<vmem>>, %arg2: memref<8x4xbf16, #tpu.memory_space<vmem>>, %arg3: memref<64x4xbf16, #tpu.memory_space<vmem>>) attributes {dimension_semantics = [#tpu.dimension_semantics<parallel>], iteration_bounds = array<i64: 1>, scalar_prefetch = 0 : i64, scratch_operands = 0 : i64, tpu.core_type = #tpu.core_type<tc>, window_params = [{transform_indices = @transform_0, window_bounds = array<i64: 64, 8>}, {pipeline_mode = #tpu.pipeline_mode<synchronous>, transform_indices = @transform_1, window_bounds = array<i64: 8, 4>}, {transform_indices = @transform_2, window_bounds = array<i64: 64, 4>}]} {
    %c0 = arith.constant 0 : index
    %c0_0 = arith.constant 0 : index
    %0 = vector.load %arg1[%c0, %c0_0] : memref<64x8xbf16, #tpu.memory_space<vmem>>, vector<64x8xbf16>
    %c0_1 = arith.constant 0 : index
    %c0_2 = arith.constant 0 : index
    %1 = vector.load %arg2[%c0_1, %c0_2] : memref<8x4xbf16, #tpu.memory_space<vmem>>, vector<8x4xbf16>
    %cst = arith.constant dense<0.000000e+00> : vector<64x4xf32>
    %2 = tpu.matmul %0, %1, %cst {dimension_numbers = #tpu.dot_dimension_numbers<[1], [0], [0], [1], [0, 0, 1, 1], [], []>} : vector<64x8xbf16>, vector<8x4xbf16>, vector<64x4xf32> -> vector<64x4xf32>
    %3 = arith.truncf %2 : vector<64x4xf32> to vector<64x4xbf16>
    %c0_3 = arith.constant 0 : index
    %c0_4 = arith.constant 0 : index
    %4 = vector.load %arg3[%c0_3, %c0_4] : memref<64x4xbf16, #tpu.memory_space<vmem>>, vector<64x4xbf16>
    tpu.vector_store %arg3[%c0_3, %c0_4], %3 {strides = array<i32>} : memref<64x4xbf16, #tpu.memory_space<vmem>>, vector<64x4xbf16>,
    return
  }
  func.func @transform_0(%arg0: i32) -> (i32, i32) {
    %c0_i32 = arith.constant 0 : i32
    %c0_i32_0 = arith.constant 0 : i32
    return %arg0, %c0_i32 : i32, i32
  }
  func.func @transform_1(%arg0: i32) -> (i32, i32) {
    %c0_i32 = arith.constant 0 : i32
    %c0_i32_0 = arith.constant 0 : i32
    %c0_i32_1 = arith.constant 0 : i32
    return %c0_i32, %c0_i32_0 : i32, i32
  }
  func.func @transform_2(%arg0: i32) -> (i32, i32) {
    %c0_i32 = arith.constant 0 : i32
    %c0_i32_0 = arith.constant 0 : i32
    return %arg0, %c0_i32 : i32, i32
  }
}

module attributes {stable_mosaic.version = 11 : i64} {
  func.func @kernel(%arg0: i32, %arg1: memref<64x12xbf16, #tpu.memory_space<vmem>>, %arg2: memref<12x4xbf16, #tpu.memory_space<vmem>>, %arg3: memref<64x4xbf16, #tpu.memory_space<vmem>>, %arg4: memref<64x4xbf16, #tpu.memory_space<vmem>>, %arg5: memref<4x32xbf16, #tpu.memory_space<vmem>>, %arg6: memref<64x32xbf16, #tpu.memory_space<vmem>>, %arg7: memref<64x32xbf16, #tpu.memory_space<vmem>>) attributes {dimension_semantics = [#tpu.dimension_semantics<parallel>], iteration_bounds = array<i64: 1>, scalar_prefetch = 0 : i64, scratch_operands = 0 : i64, tpu.core_type = #tpu.core_type<tc>, window_params = [{transform_indices = @transform_0, window_bounds = array<i64: 64, 12>}, {pipeline_mode = #tpu.pipeline_mode<synchronous>, transform_indices = @transform_1, window_bounds = array<i64: 12, 4>}, {transform_indices = @transform_2, window_bounds = array<i64: 64, 4>}, {transform_indices = @transform_3, window_bounds = array<i64: 64, 4>}, {pipeline_mode = #tpu.pipeline_mode<synchronous>, transform_indices = @transform_4, window_bounds = array<i64: 4, 32>}, {transform_indices = @transform_5, window_bounds = array<i64: 64, 32>}, {transform_indices = @transform_6, window_bounds = array<i64: 64, 32>}]} {
    %c0 = arith.constant 0 : index
    %c0_0 = arith.constant 0 : index
    %0 = vector.load %arg1[%c0, %c0_0] : memref<64x12xbf16, #tpu.memory_space<vmem>>, vector<64x12xbf16>
    %c0_1 = arith.constant 0 : index
    %c0_2 = arith.constant 0 : index
    %1 = vector.load %arg2[%c0_1, %c0_2] : memref<12x4xbf16, #tpu.memory_space<vmem>>, vector<12x4xbf16>
    %cst = arith.constant dense<0.000000e+00> : vector<64x4xf32>
    %2 = tpu.matmul %0, %1, %cst {dimension_numbers = #tpu.dot_dimension_numbers<[1], [0], [0], [1], [0, 0, 1, 1], [], []>} : vector<64x12xbf16>, vector<12x4xbf16>, vector<64x4xf32> -> vector<64x4xf32>
    %c0_3 = arith.constant 0 : index
    %c0_4 = arith.constant 0 : index
    %3 = vector.load %arg3[%c0_3, %c0_4] : memref<64x4xbf16, #tpu.memory_space<vmem>>, vector<64x4xbf16>
    %4 = arith.extf %3 : vector<64x4xbf16> to vector<64x4xf32>
    %5 = arith.addf %2, %4 : vector<64x4xf32>
    %c0_5 = arith.constant 0 : index
    %c0_6 = arith.constant 0 : index
    %6 = vector.load %arg4[%c0_5, %c0_6] : memref<64x4xbf16, #tpu.memory_space<vmem>>, vector<64x4xbf16>
    %7 = arith.extf %6 : vector<64x4xbf16> to vector<64x4xf32>
    %8 = arith.addf %5, %7 : vector<64x4xf32>
    %cst_7 = arith.constant 0.000000e+00 : f32
    %9 = vector.broadcast %cst_7 : f32 to vector<64x4xf32>
    %10 = arith.maximumf %8, %9 : vector<64x4xf32>
    %11 = arith.truncf %10 : vector<64x4xf32> to vector<64x4xbf16>
    %c0_8 = arith.constant 0 : index
    %c0_9 = arith.constant 0 : index
    %12 = vector.load %arg5[%c0_8, %c0_9] : memref<4x32xbf16, #tpu.memory_space<vmem>>, vector<4x32xbf16>
    %cst_10 = arith.constant dense<0.000000e+00> : vector<64x32xf32>
    %13 = tpu.matmul %11, %12, %cst_10 {dimension_numbers = #tpu.dot_dimension_numbers<[1], [0], [0], [1], [0, 0, 1, 1], [], []>} : vector<64x4xbf16>, vector<4x32xbf16>, vector<64x32xf32> -> vector<64x32xf32>
    %c0_11 = arith.constant 0 : index
    %c0_12 = arith.constant 0 : index
    %14 = vector.load %arg6[%c0_11, %c0_12] : memref<64x32xbf16, #tpu.memory_space<vmem>>, vector<64x32xbf16>
    %15 = arith.extf %14 : vector<64x32xbf16> to vector<64x32xf32>
    %16 = arith.addf %13, %15 : vector<64x32xf32>
    %cst_13 = arith.constant 0.000000e+00 : f32
    %17 = vector.broadcast %cst_13 : f32 to vector<64x32xf32>
    %18 = arith.maximumf %16, %17 : vector<64x32xf32>
    %19 = arith.truncf %18 : vector<64x32xf32> to vector<64x32xbf16>
    %c0_14 = arith.constant 0 : index
    %c0_15 = arith.constant 0 : index
    %20 = vector.load %arg7[%c0_14, %c0_15] : memref<64x32xbf16, #tpu.memory_space<vmem>>, vector<64x32xbf16>
    tpu.vector_store %arg7[%c0_14, %c0_15], %19 {strides = array<i32>} : memref<64x32xbf16, #tpu.memory_space<vmem>>, vector<64x32xbf16>,
    return
  }
  func.func @transform_0(%arg0: i32) -> (i32, i32) {
    %c0_i32 = arith.constant 0 : i32
    %c0_i32_0 = arith.constant 0 : i32
    return %arg0, %c0_i32 : i32, i32
  }
  func.func @transform_1(%arg0: i32) -> (i32, i32) {
    %c0_i32 = arith.constant 0 : i32
    %c0_i32_0 = arith.constant 0 : i32
    %c0_i32_1 = arith.constant 0 : i32
    return %c0_i32, %c0_i32_0 : i32, i32
  }
  func.func @transform_2(%arg0: i32) -> (i32, i32) {
    %c0_i32 = arith.constant 0 : i32
    %c0_i32_0 = arith.constant 0 : i32
    return %arg0, %c0_i32 : i32, i32
  }
  func.func @transform_3(%arg0: i32) -> (i32, i32) {
    %c0_i32 = arith.constant 0 : i32
    %c0_i32_0 = arith.constant 0 : i32
    return %arg0, %c0_i32 : i32, i32
  }
  func.func @transform_4(%arg0: i32) -> (i32, i32) {
    %c0_i32 = arith.constant 0 : i32
    %c0_i32_0 = arith.constant 0 : i32
    %c0_i32_1 = arith.constant 0 : i32
    return %c0_i32, %c0_i32_0 : i32, i32
  }
  func.func @transform_5(%arg0: i32) -> (i32, i32) {
    %c0_i32 = arith.constant 0 : i32
    %c0_i32_0 = arith.constant 0 : i32
    return %arg0, %c0_i32 : i32, i32
  }
  func.func @transform_6(%arg0: i32) -> (i32, i32) {
    %c0_i32 = arith.constant 0 : i32
    %c0_i32_0 = arith.constant 0 : i32
    return %arg0, %c0_i32 : i32, i32
  }
}

module attributes {stable_mosaic.version = 11 : i64} {
  func.func @kernel(%arg0: i32, %arg1: memref<64x32xbf16, #tpu.memory_space<vmem>>, %arg2: memref<32x8xbf16, #tpu.memory_space<vmem>>, %arg3: memref<64x8xbf16, #tpu.memory_space<vmem>>) attributes {dimension_semantics = [#tpu.dimension_semantics<parallel>], iteration_bounds = array<i64: 1>, scalar_prefetch = 0 : i64, scratch_operands = 0 : i64, tpu.core_type = #tpu.core_type<tc>, window_params = [{transform_indices = @transform_0, window_bounds = array<i64: 64, 32>}, {pipeline_mode = #tpu.pipeline_mode<synchronous>, transform_indices = @transform_1, window_bounds = array<i64: 32, 8>}, {transform_indices = @transform_2, window_bounds = array<i64: 64, 8>}]} {
    %c0 = arith.constant 0 : index
    %c0_0 = arith.constant 0 : index
    %0 = vector.load %arg1[%c0, %c0_0] : memref<64x32xbf16, #tpu.memory_space<vmem>>, vector<64x32xbf16>
    %c0_1 = arith.constant 0 : index
    %c0_2 = arith.constant 0 : index
    %1 = vector.load %arg2[%c0_1, %c0_2] : memref<32x8xbf16, #tpu.memory_space<vmem>>, vector<32x8xbf16>
    %cst = arith.constant dense<0.000000e+00> : vector<64x8xf32>
    %2 = tpu.matmul %0, %1, %cst {dimension_numbers = #tpu.dot_dimension_numbers<[1], [0], [0], [1], [0, 0, 1, 1], [], []>} : vector<64x32xbf16>, vector<32x8xbf16>, vector<64x8xf32> -> vector<64x8xf32>
    %cst_3 = arith.constant 0.000000e+00 : f32
    %3 = vector.broadcast %cst_3 : f32 to vector<64x8xf32>
    %4 = arith.maximumf %2, %3 : vector<64x8xf32>
    %5 = arith.truncf %4 : vector<64x8xf32> to vector<64x8xbf16>
    %c0_4 = arith.constant 0 : index
    %c0_5 = arith.constant 0 : index
    %6 = vector.load %arg3[%c0_4, %c0_5] : memref<64x8xbf16, #tpu.memory_space<vmem>>, vector<64x8xbf16>
    tpu.vector_store %arg3[%c0_4, %c0_5], %5 {strides = array<i32>} : memref<64x8xbf16, #tpu.memory_space<vmem>>, vector<64x8xbf16>,
    return
  }
  func.func @transform_0(%arg0: i32) -> (i32, i32) {
    %c0_i32 = arith.constant 0 : i32
    %c0_i32_0 = arith.constant 0 : i32
    return %arg0, %c0_i32 : i32, i32
  }
  func.func @transform_1(%arg0: i32) -> (i32, i32) {
    %c0_i32 = arith.constant 0 : i32
    %c0_i32_0 = arith.constant 0 : i32
    %c0_i32_1 = arith.constant 0 : i32
    return %c0_i32, %c0_i32_0 : i32, i32
  }
  func.func @transform_2(%arg0: i32) -> (i32, i32) {
    %c0_i32 = arith.constant 0 : i32
    %c0_i32_0 = arith.constant 0 : i32
    return %arg0, %c0_i32 : i32, i32
  }
}

module attributes {stable_mosaic.version = 11 : i64} {
  func.func @kernel(%arg0: i32, %arg1: memref<64x24xbf16, #tpu.memory_space<vmem>>, %arg2: memref<24x8xbf16, #tpu.memory_space<vmem>>, %arg3: memref<64x8xbf16, #tpu.memory_space<vmem>>, %arg4: memref<64x8xbf16, #tpu.memory_space<vmem>>, %arg5: memref<64x8xbf16, #tpu.memory_space<vmem>>) attributes {dimension_semantics = [#tpu.dimension_semantics<parallel>], iteration_bounds = array<i64: 1>, scalar_prefetch = 0 : i64, scratch_operands = 0 : i64, tpu.core_type = #tpu.core_type<tc>, window_params = [{transform_indices = @transform_0, window_bounds = array<i64: 64, 24>}, {pipeline_mode = #tpu.pipeline_mode<synchronous>, transform_indices = @transform_1, window_bounds = array<i64: 24, 8>}, {transform_indices = @transform_2, window_bounds = array<i64: 64, 8>}, {transform_indices = @transform_3, window_bounds = array<i64: 64, 8>}, {transform_indices = @transform_4, window_bounds = array<i64: 64, 8>}]} {
    %c0 = arith.constant 0 : index
    %c0_0 = arith.constant 0 : index
    %0 = vector.load %arg1[%c0, %c0_0] : memref<64x24xbf16, #tpu.memory_space<vmem>>, vector<64x24xbf16>
    %c0_1 = arith.constant 0 : index
    %c0_2 = arith.constant 0 : index
    %1 = vector.load %arg2[%c0_1, %c0_2] : memref<24x8xbf16, #tpu.memory_space<vmem>>, vector<24x8xbf16>
    %cst = arith.constant dense<0.000000e+00> : vector<64x8xf32>
    %2 = tpu.matmul %0, %1, %cst {dimension_numbers = #tpu.dot_dimension_numbers<[1], [0], [0], [1], [0, 0, 1, 1], [], []>} : vector<64x24xbf16>, vector<24x8xbf16>, vector<64x8xf32> -> vector<64x8xf32>
    %c0_3 = arith.constant 0 : index
    %c0_4 = arith.constant 0 : index
    %3 = vector.load %arg3[%c0_3, %c0_4] : memref<64x8xbf16, #tpu.memory_space<vmem>>, vector<64x8xbf16>
    %4 = arith.extf %3 : vector<64x8xbf16> to vector<64x8xf32>
    %5 = arith.addf %2, %4 : vector<64x8xf32>
    %6 = arith.truncf %5 : vector<64x8xf32> to vector<64x8xbf16>
    %c0_5 = arith.constant 0 : index
    %c0_6 = arith.constant 0 : index
    %7 = vector.load %arg4[%c0_5, %c0_6] : memref<64x8xbf16, #tpu.memory_space<vmem>>, vector<64x8xbf16>
    tpu.vector_store %arg4[%c0_5, %c0_6], %6 {strides = array<i32>} : memref<64x8xbf16, #tpu.memory_space<vmem>>, vector<64x8xbf16>,
    %cst_7 = arith.constant 0.000000e+00 : f32
    %8 = vector.broadcast %cst_7 : f32 to vector<64x8xf32>
    %9 = arith.maximumf %5, %8 : vector<64x8xf32>
    %10 = arith.truncf %9 : vector<64x8xf32> to vector<64x8xbf16>
    %c0_8 = arith.constant 0 : index
    %c0_9 = arith.constant 0 : index
    %11 = vector.load %arg5[%c0_8, %c0_9] : memref<64x8xbf16, #tpu.memory_space<vmem>>, vector<64x8xbf16>
    tpu.vector_store %arg5[%c0_8, %c0_9], %10 {strides = array<i32>} : memref<64x8xbf16, #tpu.memory_space<vmem>>, vector<64x8xbf16>,
    return
  }
  func.func @transform_0(%arg0: i32) -> (i32, i32) {
    %c0_i32 = arith.constant 0 : i32
    %c0_i32_0 = arith.constant 0 : i32
    return %arg0, %c0_i32 : i32, i32
  }
  func.func @transform_1(%arg0: i32) -> (i32, i32) {
    %c0_i32 = arith.constant 0 : i32
    %c0_i32_0 = arith.constant 0 : i32
    %c0_i32_1 = arith.constant 0 : i32
    return %c0_i32, %c0_i32_0 : i32, i32
  }
  func.func @transform_2(%arg0: i32) -> (i32, i32) {
    %c0_i32 = arith.constant 0 : i32
    %c0_i32_0 = arith.constant 0 : i32
    return %arg0, %c0_i32 : i32, i32
  }
  func.func @transform_3(%arg0: i32) -> (i32, i32) {
    %c0_i32 = arith.constant 0 : i32
    %c0_i32_0 = arith.constant 0 : i32
    return %arg0, %c0_i32 : i32, i32
  }
  func.func @transform_4(%arg0: i32) -> (i32, i32) {
    %c0_i32 = arith.constant 0 : i32
    %c0_i32_0 = arith.constant 0 : i32
    return %arg0, %c0_i32 : i32, i32
  }
}

module attributes {stable_mosaic.version = 11 : i64} {
  func.func @kernel(%arg0: i32, %arg1: memref<64x24xbf16, #tpu.memory_space<vmem>>, %arg2: memref<24x8xbf16, #tpu.memory_space<vmem>>, %arg3: memref<64x8xbf16, #tpu.memory_space<vmem>>, %arg4: memref<64x8xbf16, #tpu.memory_space<vmem>>) attributes {dimension_semantics = [#tpu.dimension_semantics<parallel>], iteration_bounds = array<i64: 1>, scalar_prefetch = 0 : i64, scratch_operands = 0 : i64, tpu.core_type = #tpu.core_type<tc>, window_params = [{transform_indices = @transform_0, window_bounds = array<i64: 64, 24>}, {pipeline_mode = #tpu.pipeline_mode<synchronous>, transform_indices = @transform_1, window_bounds = array<i64: 24, 8>}, {transform_indices = @transform_2, window_bounds = array<i64: 64, 8>}, {transform_indices = @transform_3, window_bounds = array<i64: 64, 8>}]} {
    %c0 = arith.constant 0 : index
    %c0_0 = arith.constant 0 : index
    %0 = vector.load %arg1[%c0, %c0_0] : memref<64x24xbf16, #tpu.memory_space<vmem>>, vector<64x24xbf16>
    %c0_1 = arith.constant 0 : index
    %c0_2 = arith.constant 0 : index
    %1 = vector.load %arg2[%c0_1, %c0_2] : memref<24x8xbf16, #tpu.memory_space<vmem>>, vector<24x8xbf16>
    %cst = arith.constant dense<0.000000e+00> : vector<64x8xf32>
    %2 = tpu.matmul %0, %1, %cst {dimension_numbers = #tpu.dot_dimension_numbers<[1], [0], [0], [1], [0, 0, 1, 1], [], []>} : vector<64x24xbf16>, vector<24x8xbf16>, vector<64x8xf32> -> vector<64x8xf32>
    %3 = arith.truncf %2 : vector<64x8xf32> to vector<64x8xbf16>
    %c0_3 = arith.constant 0 : index
    %c0_4 = arith.constant 0 : index
    %4 = vector.load %arg3[%c0_3, %c0_4] : memref<64x8xbf16, #tpu.memory_space<vmem>>, vector<64x8xbf16>
    tpu.vector_store %arg3[%c0_3, %c0_4], %3 {strides = array<i32>} : memref<64x8xbf16, #tpu.memory_space<vmem>>, vector<64x8xbf16>,
    %cst_5 = arith.constant 0.000000e+00 : f32
    %5 = vector.broadcast %cst_5 : f32 to vector<64x8xf32>
    %6 = arith.maximumf %2, %5 : vector<64x8xf32>
    %7 = arith.truncf %6 : vector<64x8xf32> to vector<64x8xbf16>
    %c0_6 = arith.constant 0 : index
    %c0_7 = arith.constant 0 : index
    %8 = vector.load %arg4[%c0_6, %c0_7] : memref<64x8xbf16, #tpu.memory_space<vmem>>, vector<64x8xbf16>
    tpu.vector_store %arg4[%c0_6, %c0_7], %7 {strides = array<i32>} : memref<64x8xbf16, #tpu.memory_space<vmem>>, vector<64x8xbf16>,
    return
  }
  func.func @transform_0(%arg0: i32) -> (i32, i32) {
    %c0_i32 = arith.constant 0 : i32
    %c0_i32_0 = arith.constant 0 : i32
    return %arg0, %c0_i32 : i32, i32
  }
  func.func @transform_1(%arg0: i32) -> (i32, i32) {
    %c0_i32 = arith.constant 0 : i32
    %c0_i32_0 = arith.constant 0 : i32
    %c0_i32_1 = arith.constant 0 : i32
    return %c0_i32, %c0_i32_0 : i32, i32
  }
  func.func @transform_2(%arg0: i32) -> (i32, i32) {
    %c0_i32 = arith.constant 0 : i32
    %c0_i32_0 = arith.constant 0 : i32
    return %arg0, %c0_i32 : i32, i32
  }
  func.func @transform_3(%arg0: i32) -> (i32, i32) {
    %c0_i32 = arith.constant 0 : i32
    %c0_i32_0 = arith.constant 0 : i32
    return %arg0, %c0_i32 : i32, i32
  }
}

module attributes {stable_mosaic.version = 11 : i64} {
  func.func @kernel(%arg0: i32, %arg1: memref<64x24xbf16, #tpu.memory_space<vmem>>, %arg2: memref<24x8xbf16, #tpu.memory_space<vmem>>, %arg3: memref<64x8xbf16, #tpu.memory_space<vmem>>, %arg4: memref<64x8xbf16, #tpu.memory_space<vmem>>, %arg5: memref<8x32xbf16, #tpu.memory_space<vmem>>, %arg6: memref<64x32xbf16, #tpu.memory_space<vmem>>, %arg7: memref<64x32xbf16, #tpu.memory_space<vmem>>) attributes {dimension_semantics = [#tpu.dimension_semantics<parallel>], iteration_bounds = array<i64: 1>, scalar_prefetch = 0 : i64, scratch_operands = 0 : i64, tpu.core_type = #tpu.core_type<tc>, window_params = [{transform_indices = @transform_0, window_bounds = array<i64: 64, 24>}, {pipeline_mode = #tpu.pipeline_mode<synchronous>, transform_indices = @transform_1, window_bounds = array<i64: 24, 8>}, {transform_indices = @transform_2, window_bounds = array<i64: 64, 8>}, {transform_indices = @transform_3, window_bounds = array<i64: 64, 8>}, {pipeline_mode = #tpu.pipeline_mode<synchronous>, transform_indices = @transform_4, window_bounds = array<i64: 8, 32>}, {transform_indices = @transform_5, window_bounds = array<i64: 64, 32>}, {transform_indices = @transform_6, window_bounds = array<i64: 64, 32>}]} {
    %c0 = arith.constant 0 : index
    %c0_0 = arith.constant 0 : index
    %0 = vector.load %arg1[%c0, %c0_0] : memref<64x24xbf16, #tpu.memory_space<vmem>>, vector<64x24xbf16>
    %c0_1 = arith.constant 0 : index
    %c0_2 = arith.constant 0 : index
    %1 = vector.load %arg2[%c0_1, %c0_2] : memref<24x8xbf16, #tpu.memory_space<vmem>>, vector<24x8xbf16>
    %cst = arith.constant dense<0.000000e+00> : vector<64x8xf32>
    %2 = tpu.matmul %0, %1, %cst {dimension_numbers = #tpu.dot_dimension_numbers<[1], [0], [0], [1], [0, 0, 1, 1], [], []>} : vector<64x24xbf16>, vector<24x8xbf16>, vector<64x8xf32> -> vector<64x8xf32>
    %c0_3 = arith.constant 0 : index
    %c0_4 = arith.constant 0 : index
    %3 = vector.load %arg3[%c0_3, %c0_4] : memref<64x8xbf16, #tpu.memory_space<vmem>>, vector<64x8xbf16>
    %4 = arith.extf %3 : vector<64x8xbf16> to vector<64x8xf32>
    %5 = arith.addf %2, %4 : vector<64x8xf32>
    %c0_5 = arith.constant 0 : index
    %c0_6 = arith.constant 0 : index
    %6 = vector.load %arg4[%c0_5, %c0_6] : memref<64x8xbf16, #tpu.memory_space<vmem>>, vector<64x8xbf16>
    %7 = arith.extf %6 : vector<64x8xbf16> to vector<64x8xf32>
    %8 = arith.addf %5, %7 : vector<64x8xf32>
    %cst_7 = arith.constant 0.000000e+00 : f32
    %9 = vector.broadcast %cst_7 : f32 to vector<64x8xf32>
    %10 = arith.maximumf %8, %9 : vector<64x8xf32>
    %11 = arith.truncf %10 : vector<64x8xf32> to vector<64x8xbf16>
    %c0_8 = arith.constant 0 : index
    %c0_9 = arith.constant 0 : index
    %12 = vector.load %arg5[%c0_8, %c0_9] : memref<8x32xbf16, #tpu.memory_space<vmem>>, vector<8x32xbf16>
    %cst_10 = arith.constant dense<0.000000e+00> : vector<64x32xf32>
    %13 = tpu.matmul %11, %12, %cst_10 {dimension_numbers = #tpu.dot_dimension_numbers<[1], [0], [0], [1], [0, 0, 1, 1], [], []>} : vector<64x8xbf16>, vector<8x32xbf16>, vector<64x32xf32> -> vector<64x32xf32>
    %c0_11 = arith.constant 0 : index
    %c0_12 = arith.constant 0 : index
    %14 = vector.load %arg6[%c0_11, %c0_12] : memref<64x32xbf16, #tpu.memory_space<vmem>>, vector<64x32xbf16>
    %15 = arith.extf %14 : vector<64x32xbf16> to vector<64x32xf32>
    %16 = arith.addf %13, %15 : vector<64x32xf32>
    %cst_13 = arith.constant 0.000000e+00 : f32
    %17 = vector.broadcast %cst_13 : f32 to vector<64x32xf32>
    %18 = arith.maximumf %16, %17 : vector<64x32xf32>
    %19 = arith.truncf %18 : vector<64x32xf32> to vector<64x32xbf16>
    %c0_14 = arith.constant 0 : index
    %c0_15 = arith.constant 0 : index
    %20 = vector.load %arg7[%c0_14, %c0_15] : memref<64x32xbf16, #tpu.memory_space<vmem>>, vector<64x32xbf16>
    tpu.vector_store %arg7[%c0_14, %c0_15], %19 {strides = array<i32>} : memref<64x32xbf16, #tpu.memory_space<vmem>>, vector<64x32xbf16>,
    return
  }
  func.func @transform_0(%arg0: i32) -> (i32, i32) {
    %c0_i32 = arith.constant 0 : i32
    %c0_i32_0 = arith.constant 0 : i32
    return %arg0, %c0_i32 : i32, i32
  }
  func.func @transform_1(%arg0: i32) -> (i32, i32) {
    %c0_i32 = arith.constant 0 : i32
    %c0_i32_0 = arith.constant 0 : i32
    %c0_i32_1 = arith.constant 0 : i32
    return %c0_i32, %c0_i32_0 : i32, i32
  }
  func.func @transform_2(%arg0: i32) -> (i32, i32) {
    %c0_i32 = arith.constant 0 : i32
    %c0_i32_0 = arith.constant 0 : i32
    return %arg0, %c0_i32 : i32, i32
  }
  func.func @transform_3(%arg0: i32) -> (i32, i32) {
    %c0_i32 = arith.constant 0 : i32
    %c0_i32_0 = arith.constant 0 : i32
    return %arg0, %c0_i32 : i32, i32
  }
  func.func @transform_4(%arg0: i32) -> (i32, i32) {
    %c0_i32 = arith.constant 0 : i32
    %c0_i32_0 = arith.constant 0 : i32
    %c0_i32_1 = arith.constant 0 : i32
    return %c0_i32, %c0_i32_0 : i32, i32
  }
  func.func @transform_5(%arg0: i32) -> (i32, i32) {
    %c0_i32 = arith.constant 0 : i32
    %c0_i32_0 = arith.constant 0 : i32
    return %arg0, %c0_i32 : i32, i32
  }
  func.func @transform_6(%arg0: i32) -> (i32, i32) {
    %c0_i32 = arith.constant 0 : i32
    %c0_i32_0 = arith.constant 0 : i32
    return %arg0, %c0_i32 : i32, i32
  }
}

module attributes {stable_mosaic.version = 11 : i64} {
  func.func @kernel(%arg0: i32, %arg1: memref<16x256xbf16, #tpu.memory_space<vmem>>, %arg2: memref<256x64xbf16, #tpu.memory_space<vmem>>, %arg3: memref<16x64xbf16, #tpu.memory_space<vmem>>) attributes {dimension_semantics = [#tpu.dimension_semantics<parallel>], iteration_bounds = array<i64: 1>, scalar_prefetch = 0 : i64, scratch_operands = 0 : i64, tpu.core_type = #tpu.core_type<tc>, window_params = [{transform_indices = @transform_0, window_bounds = array<i64: 16, 256>}, {pipeline_mode = #tpu.pipeline_mode<synchronous>, transform_indices = @transform_1, window_bounds = array<i64: 256, 64>}, {transform_indices = @transform_2, window_bounds = array<i64: 16, 64>}]} {
    %c0 = arith.constant 0 : index
    %c0_0 = arith.constant 0 : index
    %0 = vector.load %arg1[%c0, %c0_0] : memref<16x256xbf16, #tpu.memory_space<vmem>>, vector<16x256xbf16>
    %c0_1 = arith.constant 0 : index
    %c0_2 = arith.constant 0 : index
    %1 = vector.load %arg2[%c0_1, %c0_2] : memref<256x64xbf16, #tpu.memory_space<vmem>>, vector<256x64xbf16>
    %cst = arith.constant dense<0.000000e+00> : vector<16x64xf32>
    %2 = tpu.matmul %0, %1, %cst {dimension_numbers = #tpu.dot_dimension_numbers<[1], [0], [0], [1], [0, 0, 1, 1], [], []>} : vector<16x256xbf16>, vector<256x64xbf16>, vector<16x64xf32> -> vector<16x64xf32>
    %3 = arith.truncf %2 : vector<16x64xf32> to vector<16x64xbf16>
    %c0_3 = arith.constant 0 : index
    %c0_4 = arith.constant 0 : index
    %4 = vector.load %arg3[%c0_3, %c0_4] : memref<16x64xbf16, #tpu.memory_space<vmem>>, vector<16x64xbf16>
    tpu.vector_store %arg3[%c0_3, %c0_4], %3 {strides = array<i32>} : memref<16x64xbf16, #tpu.memory_space<vmem>>, vector<16x64xbf16>,
    return
  }
  func.func @transform_0(%arg0: i32) -> (i32, i32) {
    %c0_i32 = arith.constant 0 : i32
    %c0_i32_0 = arith.constant 0 : i32
    return %arg0, %c0_i32 : i32, i32
  }
  func.func @transform_1(%arg0: i32) -> (i32, i32) {
    %c0_i32 = arith.constant 0 : i32
    %c0_i32_0 = arith.constant 0 : i32
    %c0_i32_1 = arith.constant 0 : i32
    return %c0_i32, %c0_i32_0 : i32, i32
  }
  func.func @transform_2(%arg0: i32) -> (i32, i32) {
    %c0_i32 = arith.constant 0 : i32
    %c0_i32_0 = arith.constant 0 : i32
    return %arg0, %c0_i32 : i32, i32
  }
}

module attributes {stable_mosaic.version = 11 : i64} {
  func.func @kernel(%arg0: i32, %arg1: memref<32x24xbf16, #tpu.memory_space<vmem>>, %arg2: memref<24x8xbf16, #tpu.memory_space<vmem>>, %arg3: memref<32x8xbf16, #tpu.memory_space<vmem>>, %arg4: memref<32x8xbf16, #tpu.memory_space<vmem>>) attributes {dimension_semantics = [#tpu.dimension_semantics<parallel>], iteration_bounds = array<i64: 1>, scalar_prefetch = 0 : i64, scratch_operands = 0 : i64, tpu.core_type = #tpu.core_type<tc>, window_params = [{transform_indices = @transform_0, window_bounds = array<i64: 32, 24>}, {pipeline_mode = #tpu.pipeline_mode<synchronous>, transform_indices = @transform_1, window_bounds = array<i64: 24, 8>}, {transform_indices = @transform_2, window_bounds = array<i64: 32, 8>}, {transform_indices = @transform_3, window_bounds = array<i64: 32, 8>}]} {
    %c0 = arith.constant 0 : index
    %c0_0 = arith.constant 0 : index
    %0 = vector.load %arg1[%c0, %c0_0] : memref<32x24xbf16, #tpu.memory_space<vmem>>, vector<32x24xbf16>
    %c0_1 = arith.constant 0 : index
    %c0_2 = arith.constant 0 : index
    %1 = vector.load %arg2[%c0_1, %c0_2] : memref<24x8xbf16, #tpu.memory_space<vmem>>, vector<24x8xbf16>
    %cst = arith.constant dense<0.000000e+00> : vector<32x8xf32>
    %2 = tpu.matmul %0, %1, %cst {dimension_numbers = #tpu.dot_dimension_numbers<[1], [0], [0], [1], [0, 0, 1, 1], [], []>} : vector<32x24xbf16>, vector<24x8xbf16>, vector<32x8xf32> -> vector<32x8xf32>
    %3 = arith.truncf %2 : vector<32x8xf32> to vector<32x8xbf16>
    %c0_3 = arith.constant 0 : index
    %c0_4 = arith.constant 0 : index
    %4 = vector.load %arg3[%c0_3, %c0_4] : memref<32x8xbf16, #tpu.memory_space<vmem>>, vector<32x8xbf16>
    tpu.vector_store %arg3[%c0_3, %c0_4], %3 {strides = array<i32>} : memref<32x8xbf16, #tpu.memory_space<vmem>>, vector<32x8xbf16>,
    %cst_5 = arith.constant 0.000000e+00 : f32
    %5 = vector.broadcast %cst_5 : f32 to vector<32x8xf32>
    %6 = arith.maximumf %2, %5 : vector<32x8xf32>
    %7 = arith.truncf %6 : vector<32x8xf32> to vector<32x8xbf16>
    %c0_6 = arith.constant 0 : index
    %c0_7 = arith.constant 0 : index
    %8 = vector.load %arg4[%c0_6, %c0_7] : memref<32x8xbf16, #tpu.memory_space<vmem>>, vector<32x8xbf16>
    tpu.vector_store %arg4[%c0_6, %c0_7], %7 {strides = array<i32>} : memref<32x8xbf16, #tpu.memory_space<vmem>>, vector<32x8xbf16>,
    return
  }
  func.func @transform_0(%arg0: i32) -> (i32, i32) {
    %c0_i32 = arith.constant 0 : i32
    %c0_i32_0 = arith.constant 0 : i32
    return %arg0, %c0_i32 : i32, i32
  }
  func.func @transform_1(%arg0: i32) -> (i32, i32) {
    %c0_i32 = arith.constant 0 : i32
    %c0_i32_0 = arith.constant 0 : i32
    %c0_i32_1 = arith.constant 0 : i32
    return %c0_i32, %c0_i32_0 : i32, i32
  }
  func.func @transform_2(%arg0: i32) -> (i32, i32) {
    %c0_i32 = arith.constant 0 : i32
    %c0_i32_0 = arith.constant 0 : i32
    return %arg0, %c0_i32 : i32, i32
  }
  func.func @transform_3(%arg0: i32) -> (i32, i32) {
    %c0_i32 = arith.constant 0 : i32
    %c0_i32_0 = arith.constant 0 : i32
    return %arg0, %c0_i32 : i32, i32
  }
}

module attributes {stable_mosaic.version = 11 : i64} {
  func.func @kernel(%arg0: i32, %arg1: memref<16x16xbf16, #tpu.memory_space<vmem>>, %arg2: memref<16x8xbf16, #tpu.memory_space<vmem>>, %arg3: memref<16x8xbf16, #tpu.memory_space<vmem>>) attributes {dimension_semantics = [#tpu.dimension_semantics<parallel>], iteration_bounds = array<i64: 1>, scalar_prefetch = 0 : i64, scratch_operands = 0 : i64, tpu.core_type = #tpu.core_type<tc>, window_params = [{transform_indices = @transform_0, window_bounds = array<i64: 16, 16>}, {pipeline_mode = #tpu.pipeline_mode<synchronous>, transform_indices = @transform_1, window_bounds = array<i64: 16, 8>}, {transform_indices = @transform_2, window_bounds = array<i64: 16, 8>}]} {
    %c0 = arith.constant 0 : index
    %c0_0 = arith.constant 0 : index
    %0 = vector.load %arg1[%c0, %c0_0] : memref<16x16xbf16, #tpu.memory_space<vmem>>, vector<16x16xbf16>
    %c0_1 = arith.constant 0 : index
    %c0_2 = arith.constant 0 : index
    %1 = vector.load %arg2[%c0_1, %c0_2] : memref<16x8xbf16, #tpu.memory_space<vmem>>, vector<16x8xbf16>
    %cst = arith.constant dense<0.000000e+00> : vector<16x8xf32>
    %2 = tpu.matmul %0, %1, %cst {dimension_numbers = #tpu.dot_dimension_numbers<[1], [0], [0], [1], [0, 0, 1, 1], [], []>} : vector<16x16xbf16>, vector<16x8xbf16>, vector<16x8xf32> -> vector<16x8xf32>
    %3 = arith.truncf %2 : vector<16x8xf32> to vector<16x8xbf16>
    %c0_3 = arith.constant 0 : index
    %c0_4 = arith.constant 0 : index
    %4 = vector.load %arg3[%c0_3, %c0_4] : memref<16x8xbf16, #tpu.memory_space<vmem>>, vector<16x8xbf16>
    tpu.vector_store %arg3[%c0_3, %c0_4], %3 {strides = array<i32>} : memref<16x8xbf16, #tpu.memory_space<vmem>>, vector<16x8xbf16>,
    return
  }
  func.func @transform_0(%arg0: i32) -> (i32, i32) {
    %c0_i32 = arith.constant 0 : i32
    %c0_i32_0 = arith.constant 0 : i32
    return %arg0, %c0_i32 : i32, i32
  }
  func.func @transform_1(%arg0: i32) -> (i32, i32) {
    %c0_i32 = arith.constant 0 : i32
    %c0_i32_0 = arith.constant 0 : i32
    %c0_i32_1 = arith.constant 0 : i32
    return %c0_i32, %c0_i32_0 : i32, i32
  }
  func.func @transform_2(%arg0: i32) -> (i32, i32) {
    %c0_i32 = arith.constant 0 : i32
    %c0_i32_0 = arith.constant 0 : i32
    return %arg0, %c0_i32 : i32, i32
  }
}

module attributes {stable_mosaic.version = 11 : i64} {
  func.func @kernel(%arg0: i32, %arg1: memref<16x24xbf16, #tpu.memory_space<vmem>>, %arg2: memref<24x8xbf16, #tpu.memory_space<vmem>>, %arg3: memref<16x8xbf16, #tpu.memory_space<vmem>>, %arg4: memref<16x8xbf16, #tpu.memory_space<vmem>>, %arg5: memref<16x8xbf16, #tpu.memory_space<vmem>>) attributes {dimension_semantics = [#tpu.dimension_semantics<parallel>], iteration_bounds = array<i64: 1>, scalar_prefetch = 0 : i64, scratch_operands = 0 : i64, tpu.core_type = #tpu.core_type<tc>, window_params = [{transform_indices = @transform_0, window_bounds = array<i64: 16, 24>}, {pipeline_mode = #tpu.pipeline_mode<synchronous>, transform_indices = @transform_1, window_bounds = array<i64: 24, 8>}, {transform_indices = @transform_2, window_bounds = array<i64: 16, 8>}, {transform_indices = @transform_3, window_bounds = array<i64: 16, 8>}, {transform_indices = @transform_4, window_bounds = array<i64: 16, 8>}]} {
    %c0 = arith.constant 0 : index
    %c0_0 = arith.constant 0 : index
    %0 = vector.load %arg1[%c0, %c0_0] : memref<16x24xbf16, #tpu.memory_space<vmem>>, vector<16x24xbf16>
    %c0_1 = arith.constant 0 : index
    %c0_2 = arith.constant 0 : index
    %1 = vector.load %arg2[%c0_1, %c0_2] : memref<24x8xbf16, #tpu.memory_space<vmem>>, vector<24x8xbf16>
    %cst = arith.constant dense<0.000000e+00> : vector<16x8xf32>
    %2 = tpu.matmul %0, %1, %cst {dimension_numbers = #tpu.dot_dimension_numbers<[1], [0], [0], [1], [0, 0, 1, 1], [], []>} : vector<16x24xbf16>, vector<24x8xbf16>, vector<16x8xf32> -> vector<16x8xf32>
    %c0_3 = arith.constant 0 : index
    %c0_4 = arith.constant 0 : index
    %3 = vector.load %arg3[%c0_3, %c0_4] : memref<16x8xbf16, #tpu.memory_space<vmem>>, vector<16x8xbf16>
    %4 = arith.extf %3 : vector<16x8xbf16> to vector<16x8xf32>
    %5 = arith.addf %2, %4 : vector<16x8xf32>
    %6 = arith.truncf %5 : vector<16x8xf32> to vector<16x8xbf16>
    %c0_5 = arith.constant 0 : index
    %c0_6 = arith.constant 0 : index
    %7 = vector.load %arg4[%c0_5, %c0_6] : memref<16x8xbf16, #tpu.memory_space<vmem>>, vector<16x8xbf16>
    tpu.vector_store %arg4[%c0_5, %c0_6], %6 {strides = array<i32>} : memref<16x8xbf16, #tpu.memory_space<vmem>>, vector<16x8xbf16>,
    %cst_7 = arith.constant 0.000000e+00 : f32
    %8 = vector.broadcast %cst_7 : f32 to vector<16x8xf32>
    %9 = arith.maximumf %5, %8 : vector<16x8xf32>
    %10 = arith.truncf %9 : vector<16x8xf32> to vector<16x8xbf16>
    %c0_8 = arith.constant 0 : index
    %c0_9 = arith.constant 0 : index
    %11 = vector.load %arg5[%c0_8, %c0_9] : memref<16x8xbf16, #tpu.memory_space<vmem>>, vector<16x8xbf16>
    tpu.vector_store %arg5[%c0_8, %c0_9], %10 {strides = array<i32>} : memref<16x8xbf16, #tpu.memory_space<vmem>>, vector<16x8xbf16>,
    return
  }
  func.func @transform_0(%arg0: i32) -> (i32, i32) {
    %c0_i32 = arith.constant 0 : i32
    %c0_i32_0 = arith.constant 0 : i32
    return %arg0, %c0_i32 : i32, i32
  }
  func.func @transform_1(%arg0: i32) -> (i32, i32) {
    %c0_i32 = arith.constant 0 : i32
    %c0_i32_0 = arith.constant 0 : i32
    %c0_i32_1 = arith.constant 0 : i32
    return %c0_i32, %c0_i32_0 : i32, i32
  }
  func.func @transform_2(%arg0: i32) -> (i32, i32) {
    %c0_i32 = arith.constant 0 : i32
    %c0_i32_0 = arith.constant 0 : i32
    return %arg0, %c0_i32 : i32, i32
  }
  func.func @transform_3(%arg0: i32) -> (i32, i32) {
    %c0_i32 = arith.constant 0 : i32
    %c0_i32_0 = arith.constant 0 : i32
    return %arg0, %c0_i32 : i32, i32
  }
  func.func @transform_4(%arg0: i32) -> (i32, i32) {
    %c0_i32 = arith.constant 0 : i32
    %c0_i32_0 = arith.constant 0 : i32
    return %arg0, %c0_i32 : i32, i32
  }
}

module attributes {stable_mosaic.version = 11 : i64} {
  func.func @kernel(%arg0: i32, %arg1: memref<16x24xbf16, #tpu.memory_space<vmem>>, %arg2: memref<24x8xbf16, #tpu.memory_space<vmem>>, %arg3: memref<16x8xbf16, #tpu.memory_space<vmem>>, %arg4: memref<16x8xbf16, #tpu.memory_space<vmem>>, %arg5: memref<8x64xbf16, #tpu.memory_space<vmem>>, %arg6: memref<16x64xbf16, #tpu.memory_space<vmem>>, %arg7: memref<16x64xbf16, #tpu.memory_space<vmem>>) attributes {dimension_semantics = [#tpu.dimension_semantics<parallel>], iteration_bounds = array<i64: 1>, scalar_prefetch = 0 : i64, scratch_operands = 0 : i64, tpu.core_type = #tpu.core_type<tc>, window_params = [{transform_indices = @transform_0, window_bounds = array<i64: 16, 24>}, {pipeline_mode = #tpu.pipeline_mode<synchronous>, transform_indices = @transform_1, window_bounds = array<i64: 24, 8>}, {transform_indices = @transform_2, window_bounds = array<i64: 16, 8>}, {transform_indices = @transform_3, window_bounds = array<i64: 16, 8>}, {pipeline_mode = #tpu.pipeline_mode<synchronous>, transform_indices = @transform_4, window_bounds = array<i64: 8, 64>}, {transform_indices = @transform_5, window_bounds = array<i64: 16, 64>}, {transform_indices = @transform_6, window_bounds = array<i64: 16, 64>}]} {
    %c0 = arith.constant 0 : index
    %c0_0 = arith.constant 0 : index
    %0 = vector.load %arg1[%c0, %c0_0] : memref<16x24xbf16, #tpu.memory_space<vmem>>, vector<16x24xbf16>
    %c0_1 = arith.constant 0 : index
    %c0_2 = arith.constant 0 : index
    %1 = vector.load %arg2[%c0_1, %c0_2] : memref<24x8xbf16, #tpu.memory_space<vmem>>, vector<24x8xbf16>
    %cst = arith.constant dense<0.000000e+00> : vector<16x8xf32>
    %2 = tpu.matmul %0, %1, %cst {dimension_numbers = #tpu.dot_dimension_numbers<[1], [0], [0], [1], [0, 0, 1, 1], [], []>} : vector<16x24xbf16>, vector<24x8xbf16>, vector<16x8xf32> -> vector<16x8xf32>
    %c0_3 = arith.constant 0 : index
    %c0_4 = arith.constant 0 : index
    %3 = vector.load %arg3[%c0_3, %c0_4] : memref<16x8xbf16, #tpu.memory_space<vmem>>, vector<16x8xbf16>
    %4 = arith.extf %3 : vector<16x8xbf16> to vector<16x8xf32>
    %5 = arith.addf %2, %4 : vector<16x8xf32>
    %c0_5 = arith.constant 0 : index
    %c0_6 = arith.constant 0 : index
    %6 = vector.load %arg4[%c0_5, %c0_6] : memref<16x8xbf16, #tpu.memory_space<vmem>>, vector<16x8xbf16>
    %7 = arith.extf %6 : vector<16x8xbf16> to vector<16x8xf32>
    %8 = arith.addf %5, %7 : vector<16x8xf32>
    %cst_7 = arith.constant 0.000000e+00 : f32
    %9 = vector.broadcast %cst_7 : f32 to vector<16x8xf32>
    %10 = arith.maximumf %8, %9 : vector<16x8xf32>
    %11 = arith.truncf %10 : vector<16x8xf32> to vector<16x8xbf16>
    %c0_8 = arith.constant 0 : index
    %c0_9 = arith.constant 0 : index
    %12 = vector.load %arg5[%c0_8, %c0_9] : memref<8x64xbf16, #tpu.memory_space<vmem>>, vector<8x64xbf16>
    %cst_10 = arith.constant dense<0.000000e+00> : vector<16x64xf32>
    %13 = tpu.matmul %11, %12, %cst_10 {dimension_numbers = #tpu.dot_dimension_numbers<[1], [0], [0], [1], [0, 0, 1, 1], [], []>} : vector<16x8xbf16>, vector<8x64xbf16>, vector<16x64xf32> -> vector<16x64xf32>
    %c0_11 = arith.constant 0 : index
    %c0_12 = arith.constant 0 : index
    %14 = vector.load %arg6[%c0_11, %c0_12] : memref<16x64xbf16, #tpu.memory_space<vmem>>, vector<16x64xbf16>
    %15 = arith.extf %14 : vector<16x64xbf16> to vector<16x64xf32>
    %16 = arith.addf %13, %15 : vector<16x64xf32>
    %cst_13 = arith.constant 0.000000e+00 : f32
    %17 = vector.broadcast %cst_13 : f32 to vector<16x64xf32>
    %18 = arith.maximumf %16, %17 : vector<16x64xf32>
    %19 = arith.truncf %18 : vector<16x64xf32> to vector<16x64xbf16>
    %c0_14 = arith.constant 0 : index
    %c0_15 = arith.constant 0 : index
    %20 = vector.load %arg7[%c0_14, %c0_15] : memref<16x64xbf16, #tpu.memory_space<vmem>>, vector<16x64xbf16>
    tpu.vector_store %arg7[%c0_14, %c0_15], %19 {strides = array<i32>} : memref<16x64xbf16, #tpu.memory_space<vmem>>, vector<16x64xbf16>,
    return
  }
  func.func @transform_0(%arg0: i32) -> (i32, i32) {
    %c0_i32 = arith.constant 0 : i32
    %c0_i32_0 = arith.constant 0 : i32
    return %arg0, %c0_i32 : i32, i32
  }
  func.func @transform_1(%arg0: i32) -> (i32, i32) {
    %c0_i32 = arith.constant 0 : i32
    %c0_i32_0 = arith.constant 0 : i32
    %c0_i32_1 = arith.constant 0 : i32
    return %c0_i32, %c0_i32_0 : i32, i32
  }
  func.func @transform_2(%arg0: i32) -> (i32, i32) {
    %c0_i32 = arith.constant 0 : i32
    %c0_i32_0 = arith.constant 0 : i32
    return %arg0, %c0_i32 : i32, i32
  }
  func.func @transform_3(%arg0: i32) -> (i32, i32) {
    %c0_i32 = arith.constant 0 : i32
    %c0_i32_0 = arith.constant 0 : i32
    return %arg0, %c0_i32 : i32, i32
  }
  func.func @transform_4(%arg0: i32) -> (i32, i32) {
    %c0_i32 = arith.constant 0 : i32
    %c0_i32_0 = arith.constant 0 : i32
    %c0_i32_1 = arith.constant 0 : i32
    return %c0_i32, %c0_i32_0 : i32, i32
  }
  func.func @transform_5(%arg0: i32) -> (i32, i32) {
    %c0_i32 = arith.constant 0 : i32
    %c0_i32_0 = arith.constant 0 : i32
    return %arg0, %c0_i32 : i32, i32
  }
  func.func @transform_6(%arg0: i32) -> (i32, i32) {
    %c0_i32 = arith.constant 0 : i32
    %c0_i32_0 = arith.constant 0 : i32
    return %arg0, %c0_i32 : i32, i32
  }
}

module attributes {stable_mosaic.version = 11 : i64} {
  func.func @kernel(%arg0: i32, %arg1: memref<16x512xbf16, #tpu.memory_space<vmem>>, %arg2: memref<512x256xbf16, #tpu.memory_space<vmem>>, %arg3: memref<1x256xf32, #tpu.memory_space<vmem>>, %arg4: memref<16x256xbf16, #tpu.memory_space<vmem>>, %arg5: memref<16x256xbf16, #tpu.memory_space<vmem>>) attributes {dimension_semantics = [#tpu.dimension_semantics<parallel>], iteration_bounds = array<i64: 1>, scalar_prefetch = 0 : i64, scratch_operands = 0 : i64, tpu.core_type = #tpu.core_type<tc>, window_params = [{transform_indices = @transform_0, window_bounds = array<i64: 16, 512>}, {pipeline_mode = #tpu.pipeline_mode<synchronous>, transform_indices = @transform_1, window_bounds = array<i64: 512, 256>}, {pipeline_mode = #tpu.pipeline_mode<synchronous>, transform_indices = @transform_2, window_bounds = array<i64: 1, 256>}, {transform_indices = @transform_3, window_bounds = array<i64: 16, 256>}, {transform_indices = @transform_4, window_bounds = array<i64: 16, 256>}]} {
    %c0 = arith.constant 0 : index
    %c0_0 = arith.constant 0 : index
    %0 = vector.load %arg1[%c0, %c0_0] : memref<16x512xbf16, #tpu.memory_space<vmem>>, vector<16x512xbf16>
    %c0_1 = arith.constant 0 : index
    %c0_2 = arith.constant 0 : index
    %1 = vector.load %arg2[%c0_1, %c0_2] : memref<512x256xbf16, #tpu.memory_space<vmem>>, vector<512x256xbf16>
    %cst = arith.constant dense<0.000000e+00> : vector<16x256xf32>
    %2 = tpu.matmul %0, %1, %cst {dimension_numbers = #tpu.dot_dimension_numbers<[1], [0], [0], [1], [0, 0, 1, 1], [], []>} : vector<16x512xbf16>, vector<512x256xbf16>, vector<16x256xf32> -> vector<16x256xf32>
    %c0_3 = arith.constant 0 : index
    %c0_4 = arith.constant 0 : index
    %3 = vector.load %arg3[%c0_3, %c0_4] : memref<1x256xf32, #tpu.memory_space<vmem>>, vector<1x256xf32>
    %4 = vector.broadcast %3 : vector<1x256xf32> to vector<16x256xf32>
    %5 = arith.addf %2, %4 : vector<16x256xf32>
    %cst_5 = arith.constant 0.000000e+00 : f32
    %6 = vector.broadcast %cst_5 : f32 to vector<16x256xf32>
    %7 = arith.maximumf %5, %6 : vector<16x256xf32>
    %c0_6 = arith.constant 0 : index
    %c0_7 = arith.constant 0 : index
    %8 = vector.load %arg4[%c0_6, %c0_7] : memref<16x256xbf16, #tpu.memory_space<vmem>>, vector<16x256xbf16>
    %9 = arith.extf %8 : vector<16x256xbf16> to vector<16x256xf32>
    %10 = arith.addf %7, %9 : vector<16x256xf32>
    %11 = arith.truncf %10 : vector<16x256xf32> to vector<16x256xbf16>
    %c0_8 = arith.constant 0 : index
    %c0_9 = arith.constant 0 : index
    %12 = vector.load %arg5[%c0_8, %c0_9] : memref<16x256xbf16, #tpu.memory_space<vmem>>, vector<16x256xbf16>
    tpu.vector_store %arg5[%c0_8, %c0_9], %11 {strides = array<i32>} : memref<16x256xbf16, #tpu.memory_space<vmem>>, vector<16x256xbf16>,
    return
  }
  func.func @transform_0(%arg0: i32) -> (i32, i32) {
    %c0_i32 = arith.constant 0 : i32
    %c0_i32_0 = arith.constant 0 : i32
    return %arg0, %c0_i32 : i32, i32
  }
  func.func @transform_1(%arg0: i32) -> (i32, i32) {
    %c0_i32 = arith.constant 0 : i32
    %c0_i32_0 = arith.constant 0 : i32
    %c0_i32_1 = arith.constant 0 : i32
    return %c0_i32, %c0_i32_0 : i32, i32
  }
  func.func @transform_2(%arg0: i32) -> (i32, i32) {
    %c0_i32 = arith.constant 0 : i32
    %c0_i32_0 = arith.constant 0 : i32
    %c0_i32_1 = arith.constant 0 : i32
    return %c0_i32, %c0_i32_0 : i32, i32
  }
  func.func @transform_3(%arg0: i32) -> (i32, i32) {
    %c0_i32 = arith.constant 0 : i32
    %c0_i32_0 = arith.constant 0 : i32
    return %arg0, %c0_i32 : i32, i32
  }
  func.func @transform_4(%arg0: i32) -> (i32, i32) {
    %c0_i32 = arith.constant 0 : i32
    %c0_i32_0 = arith.constant 0 : i32
    return %arg0, %c0_i32 : i32, i32
  }
}

module attributes {stable_mosaic.version = 11 : i64} {
  func.func @kernel(%arg0: i32, %arg1: memref<64x256xbf16, #tpu.memory_space<vmem>>, %arg2: memref<256x128xbf16, #tpu.memory_space<vmem>>, %arg3: memref<1x128xf32, #tpu.memory_space<vmem>>, %arg4: memref<64x128xbf16, #tpu.memory_space<vmem>>, %arg5: memref<64x128xbf16, #tpu.memory_space<vmem>>) attributes {dimension_semantics = [#tpu.dimension_semantics<parallel>], iteration_bounds = array<i64: 1>, scalar_prefetch = 0 : i64, scratch_operands = 0 : i64, tpu.core_type = #tpu.core_type<tc>, window_params = [{transform_indices = @transform_0, window_bounds = array<i64: 64, 256>}, {pipeline_mode = #tpu.pipeline_mode<synchronous>, transform_indices = @transform_1, window_bounds = array<i64: 256, 128>}, {pipeline_mode = #tpu.pipeline_mode<synchronous>, transform_indices = @transform_2, window_bounds = array<i64: 1, 128>}, {transform_indices = @transform_3, window_bounds = array<i64: 64, 128>}, {transform_indices = @transform_4, window_bounds = array<i64: 64, 128>}]} {
    %c0 = arith.constant 0 : index
    %c0_0 = arith.constant 0 : index
    %0 = vector.load %arg1[%c0, %c0_0] : memref<64x256xbf16, #tpu.memory_space<vmem>>, vector<64x256xbf16>
    %c0_1 = arith.constant 0 : index
    %c0_2 = arith.constant 0 : index
    %1 = vector.load %arg2[%c0_1, %c0_2] : memref<256x128xbf16, #tpu.memory_space<vmem>>, vector<256x128xbf16>
    %cst = arith.constant dense<0.000000e+00> : vector<64x128xf32>
    %2 = tpu.matmul %0, %1, %cst {dimension_numbers = #tpu.dot_dimension_numbers<[1], [0], [0], [1], [0, 0, 1, 1], [], []>} : vector<64x256xbf16>, vector<256x128xbf16>, vector<64x128xf32> -> vector<64x128xf32>
    %c0_3 = arith.constant 0 : index
    %c0_4 = arith.constant 0 : index
    %3 = vector.load %arg3[%c0_3, %c0_4] : memref<1x128xf32, #tpu.memory_space<vmem>>, vector<1x128xf32>
    %4 = vector.broadcast %3 : vector<1x128xf32> to vector<64x128xf32>
    %5 = arith.addf %2, %4 : vector<64x128xf32>
    %cst_5 = arith.constant 0.000000e+00 : f32
    %6 = vector.broadcast %cst_5 : f32 to vector<64x128xf32>
    %7 = arith.maximumf %5, %6 : vector<64x128xf32>
    %c0_6 = arith.constant 0 : index
    %c0_7 = arith.constant 0 : index
    %8 = vector.load %arg4[%c0_6, %c0_7] : memref<64x128xbf16, #tpu.memory_space<vmem>>, vector<64x128xbf16>
    %9 = arith.extf %8 : vector<64x128xbf16> to vector<64x128xf32>
    %10 = arith.addf %7, %9 : vector<64x128xf32>
    %11 = arith.truncf %10 : vector<64x128xf32> to vector<64x128xbf16>
    %c0_8 = arith.constant 0 : index
    %c0_9 = arith.constant 0 : index
    %12 = vector.load %arg5[%c0_8, %c0_9] : memref<64x128xbf16, #tpu.memory_space<vmem>>, vector<64x128xbf16>
    tpu.vector_store %arg5[%c0_8, %c0_9], %11 {strides = array<i32>} : memref<64x128xbf16, #tpu.memory_space<vmem>>, vector<64x128xbf16>,
    return
  }
  func.func @transform_0(%arg0: i32) -> (i32, i32) {
    %c0_i32 = arith.constant 0 : i32
    %c0_i32_0 = arith.constant 0 : i32
    return %arg0, %c0_i32 : i32, i32
  }
  func.func @transform_1(%arg0: i32) -> (i32, i32) {
    %c0_i32 = arith.constant 0 : i32
    %c0_i32_0 = arith.constant 0 : i32
    %c0_i32_1 = arith.constant 0 : i32
    return %c0_i32, %c0_i32_0 : i32, i32
  }
  func.func @transform_2(%arg0: i32) -> (i32, i32) {
    %c0_i32 = arith.constant 0 : i32
    %c0_i32_0 = arith.constant 0 : i32
    %c0_i32_1 = arith.constant 0 : i32
    return %c0_i32, %c0_i32_0 : i32, i32
  }
  func.func @transform_3(%arg0: i32) -> (i32, i32) {
    %c0_i32 = arith.constant 0 : i32
    %c0_i32_0 = arith.constant 0 : i32
    return %arg0, %c0_i32 : i32, i32
  }
  func.func @transform_4(%arg0: i32) -> (i32, i32) {
    %c0_i32 = arith.constant 0 : i32
    %c0_i32_0 = arith.constant 0 : i32
    return %arg0, %c0_i32 : i32, i32
  }
}

module attributes {stable_mosaic.version = 11 : i64} {
  func.func @kernel(%arg0: i32, %arg1: memref<512x128xbf16, #tpu.memory_space<vmem>>, %arg2: memref<128x64xbf16, #tpu.memory_space<vmem>>, %arg3: memref<1x64xf32, #tpu.memory_space<vmem>>, %arg4: memref<512x64xbf16, #tpu.memory_space<vmem>>) attributes {dimension_semantics = [#tpu.dimension_semantics<parallel>], iteration_bounds = array<i64: 1>, scalar_prefetch = 0 : i64, scratch_operands = 0 : i64, tpu.core_type = #tpu.core_type<tc>, window_params = [{transform_indices = @transform_0, window_bounds = array<i64: 512, 128>}, {pipeline_mode = #tpu.pipeline_mode<synchronous>, transform_indices = @transform_1, window_bounds = array<i64: 128, 64>}, {pipeline_mode = #tpu.pipeline_mode<synchronous>, transform_indices = @transform_2, window_bounds = array<i64: 1, 64>}, {transform_indices = @transform_3, window_bounds = array<i64: 512, 64>}]} {
    %c0 = arith.constant 0 : index
    %c0_0 = arith.constant 0 : index
    %0 = vector.load %arg1[%c0, %c0_0] : memref<512x128xbf16, #tpu.memory_space<vmem>>, vector<512x128xbf16>
    %c0_1 = arith.constant 0 : index
    %c0_2 = arith.constant 0 : index
    %1 = vector.load %arg2[%c0_1, %c0_2] : memref<128x64xbf16, #tpu.memory_space<vmem>>, vector<128x64xbf16>
    %cst = arith.constant dense<0.000000e+00> : vector<512x64xf32>
    %2 = tpu.matmul %0, %1, %cst {dimension_numbers = #tpu.dot_dimension_numbers<[1], [0], [0], [1], [0, 0, 1, 1], [], []>} : vector<512x128xbf16>, vector<128x64xbf16>, vector<512x64xf32> -> vector<512x64xf32>
    %c0_3 = arith.constant 0 : index
    %c0_4 = arith.constant 0 : index
    %3 = vector.load %arg3[%c0_3, %c0_4] : memref<1x64xf32, #tpu.memory_space<vmem>>, vector<1x64xf32>
    %4 = vector.broadcast %3 : vector<1x64xf32> to vector<512x64xf32>
    %5 = arith.addf %2, %4 : vector<512x64xf32>
    %cst_5 = arith.constant 0.000000e+00 : f32
    %6 = vector.broadcast %cst_5 : f32 to vector<512x64xf32>
    %7 = arith.maximumf %5, %6 : vector<512x64xf32>
    %8 = arith.truncf %7 : vector<512x64xf32> to vector<512x64xbf16>
    %c0_6 = arith.constant 0 : index
    %c0_7 = arith.constant 0 : index
    %9 = vector.load %arg4[%c0_6, %c0_7] : memref<512x64xbf16, #tpu.memory_space<vmem>>, vector<512x64xbf16>
    tpu.vector_store %arg4[%c0_6, %c0_7], %8 {strides = array<i32>} : memref<512x64xbf16, #tpu.memory_space<vmem>>, vector<512x64xbf16>,
    return
  }
  func.func @transform_0(%arg0: i32) -> (i32, i32) {
    %c0_i32 = arith.constant 0 : i32
    %c0_i32_0 = arith.constant 0 : i32
    return %arg0, %c0_i32 : i32, i32
  }
  func.func @transform_1(%arg0: i32) -> (i32, i32) {
    %c0_i32 = arith.constant 0 : i32
    %c0_i32_0 = arith.constant 0 : i32
    %c0_i32_1 = arith.constant 0 : i32
    return %c0_i32, %c0_i32_0 : i32, i32
  }
  func.func @transform_2(%arg0: i32) -> (i32, i32) {
    %c0_i32 = arith.constant 0 : i32
    %c0_i32_0 = arith.constant 0 : i32
    %c0_i32_1 = arith.constant 0 : i32
    return %c0_i32, %c0_i32_0 : i32, i32
  }
  func.func @transform_3(%arg0: i32) -> (i32, i32) {
    %c0_i32 = arith.constant 0 : i32
    %c0_i32_0 = arith.constant 0 : i32
    return %arg0, %c0_i32 : i32, i32
  }
}

</mosaic_0001>

<bundles_post_ra>
// kernel: tile.104
= control target key start
LH: loop header
LB: loop body
LE: loop exit
PB: predicated region body
PF: predicated region fallthrough
CT: control target
= control target key end

     0   :  { %s69_s10 = smov 112   ;;  %s70_s11 = smov 80   ;;  %vm3_vm0 = vcmask 130048   ;;  %vm9_vm1 = vcmask 1048448   ;;  %vm15_vm2 = vcmask 917248   ;;  %vm21_vm3 = vcmask 786048   ;;  %s113_s0 = inlined_call_operand.vmem [shape: f32[8,16], index: 0, kind: input, shape index: {}]   ;;  %s114_s1 = inlined_call_operand.vmem [shape: f32[1,128], index: 1, kind: output, shape index: {}]  }
   0x1   :  { %v55_v0 = vld [vmem:[%s113_s0 + $0x7] sm:$0x1]   ;;  %v57_v1 = vld [vmem:[%s113_s0 + $0x5] sm:$0x1]   ;;  %v56_v2 = vld [vmem:[%s113_s0 + $0x6] sm:$0x1]  }
   0x2   :  { %7 = vrot.lane.b32.xlu0 %v55_v0, %s69_s10  ;;  %19 = vrot.lane.b32.xlu1 %v57_v1, %s70_s11  ;;  %v58_v3 = vld [vmem:[%s113_s0 + $0x4] sm:$0x1]   ;;  %v2_v4 = vld [vmem:[%s113_s0] sm:$0x1]   ;;  %s71_s18 = smov 96   ;;  %s72_s19 = smov 64  }
   0x3   :  { %4 = vst.msk [vmem:[#allocation0] sm:$0x1] %vm3_vm0, %v2_v4   ;;  %v59_v5 = vld [vmem:[%s113_s0 + $0x3] sm:$0x1]   ;;  %v60_v6 = vld [vmem:[%s113_s0 + $0x2] sm:$0x1]  }
   0x4   :  { %s73_s24 = smov 48   ;;  %s74_s25 = smov 32   ;;  %v61_v7 = vld [vmem:[%s113_s0 + $0x1] sm:$0x1]   ;;  %vm27_vm4 = vcmask 654848   ;;  %vm33_vm5 = vcmask 523648  }
   0x5   :  { %s75_s0 = smov 16   ;;  %vm39_vm6 = vcmask 392448   ;;  %vm45_vm7 = vcmask 261248  }
   0x6   :  { %13 = vrot.lane.b32.xlu0 %v56_v2, %s71_s18  ;;  %25 = vrot.lane.b32.xlu1 %v58_v3, %s72_s19 }
   0xa   :  { %31 = vrot.lane.b32.xlu0 %v59_v5, %s73_s24  ;;  %37 = vrot.lane.b32.xlu1 %v60_v6, %s74_s25 }
   0xe   :  { %43 = vrot.lane.b32.xlu0 %v61_v7, %s75_s0 }
  0x74   :  { %v8_v8 = vpop.permute.xlu0 %7   ;;  %v20_v9 = vpop.permute.xlu1 %19  }
  0x75   :  { %10 = vst.msk [vmem:[#allocation0] sm:$0x1] %vm9_vm1, %v8_v8  }
  0x78   :  { %v14_v10 = vpop.permute.xlu0 %13   ;;  %v26_v11 = vpop.permute.xlu1 %25  }
  0x79   :  { %16 = vst.msk [vmem:[#allocation0] sm:$0x1] %vm15_vm2, %v14_v10  }
  0x7a   :  { %22 = vst.msk [vmem:[#allocation0] sm:$0x1] %vm21_vm3, %v20_v9  }
  0x7b   :  { %28 = vst.msk [vmem:[#allocation0] sm:$0x1] %vm27_vm4, %v26_v11  }
  0x7c   :  { %v32_v12 = vpop.permute.xlu0 %31   ;;  %v38_v13 = vpop.permute.xlu1 %37  }
  0x7d   :  { %34 = vst.msk [vmem:[#allocation0] sm:$0x1] %vm33_vm5, %v32_v12  }
  0x7e   :  { %40 = vst.msk [vmem:[#allocation0] sm:$0x1] %vm39_vm6, %v38_v13  }
  0x80   :  { %v44_v14 = vpop.permute.xlu0 %43  }
  0x81   :  { %46 = vst.msk [vmem:[#allocation0] sm:$0x1] %vm45_vm7, %v44_v14  }
  0x88   :  { %v51_v15 = vld [vmem:[#allocation0] sm:$0x1] }
  0x89   :  { %54 = vst [vmem:[%s114_s1] sm:$0x1] %v51_v15 }

// kernel: tile.103
= control target key start
LH: loop header
LB: loop body
LE: loop exit
PB: predicated region body
PF: predicated region fallthrough
CT: control target
= control target key end

     0   :  { %2 = vsyncpa [#allocation1], 0  ;;  %s42_s6 = smov [#allocation0]   ;;  %s59_s0 = inlined_call_operand.hbm [shape: f32[16], index: 0, kind: input, shape index: {}]   ;;  %s60_s1 = inlined_call_operand.vmem [shape: f32[8,16], index: 1, kind: output, shape index: {}]  }
   0x1   :  { %s9_s7 = sshll.u32 %s42_s6, 4  ;;  %s10_s7 = int_to_ptr.vmem [resolvable:$true] %s9_s7 }
   0x2   :  { %s28_s8 = scalar_lea.vmem %s10_s7, 16  ;;  %s32_s9 = scalar_lea.vmem %s10_s7, 32 }
   0x3   :  { %p29_p0 = scmp.ne.s32.totalorder %s10_s7, %s28_s8  ;;  %p33_p1 = scmp.lt.s32.totalorder %s10_s7, %s10_s7 }
   0x4   :  { %p34_p2 = scmp.lt.s32.totalorder %s32_s9, %s28_s8 }
   0x6   :  { %p35_p3 = por %p34_p2, %p33_p1 }
   0x8   :  { %p36_p4 = pnand %p35_p3, %p29_p0 }
   0xa   :  { %39 = shalt.err (!%p36_p4)
}
   0xb   :  { %12 = dma.hbm_to_vmem [thread:$0]  %s59_s0, 16, %s10_s7, [#allocation1]  }
   0xc   :  { %40 = dma.done.wait [#allocation1], 16  }
   0xd   :  { %41 = vsyncadd [#allocation1], 4294967280  ;;  %v16_v0 = vld [vmem:[#allocation0] ss:$0 sm:$0xff] }
   0xe   :  { %17 = vst [vmem:[%s60_s1] sm:$0xff] %v16_v0 }
   0xf   :  { %18 = vsyncpa [#allocation1], 1 }

// kernel: tile.98
= control target key start
LH: loop header
LB: loop body
LE: loop exit
PB: predicated region body
PF: predicated region fallthrough
CT: control target
= control target key end

     0   :  { %2 = vsyncpa [#allocation1], 0  ;;  %s42_s6 = smov [#allocation0]   ;;  %s59_s0 = inlined_call_operand.hbm [shape: f32[32], index: 0, kind: input, shape index: {}]   ;;  %s60_s1 = inlined_call_operand.vmem [shape: f32[8,32], index: 1, kind: output, shape index: {}]  }
   0x1   :  { %s9_s7 = sshll.u32 %s42_s6, 4  ;;  %s10_s7 = int_to_ptr.vmem [resolvable:$true] %s9_s7 }
   0x2   :  { %s28_s8 = scalar_lea.vmem %s10_s7, 16  ;;  %s32_s9 = scalar_lea.vmem %s10_s7, 32 }
   0x3   :  { %p29_p0 = scmp.ne.s32.totalorder %s10_s7, %s28_s8  ;;  %p33_p1 = scmp.lt.s32.totalorder %s10_s7, %s10_s7 }
   0x4   :  { %p34_p2 = scmp.lt.s32.totalorder %s32_s9, %s28_s8 }
   0x6   :  { %p35_p3 = por %p34_p2, %p33_p1 }
   0x8   :  { %p36_p4 = pnand %p35_p3, %p29_p0 }
   0xa   :  { %39 = shalt.err (!%p36_p4)
}
   0xb   :  { %12 = dma.hbm_to_vmem [thread:$0]  %s59_s0, 16, %s10_s7, [#allocation1]  }
   0xc   :  { %40 = dma.done.wait [#allocation1], 16  }
   0xd   :  { %41 = vsyncadd [#allocation1], 4294967280  ;;  %v16_v0 = vld [vmem:[#allocation0] ss:$0 sm:$0xff] }
   0xe   :  { %17 = vst [vmem:[%s60_s1] sm:$0xff] %v16_v0 }
   0xf   :  { %18 = vsyncpa [#allocation1], 1 }

// kernel: tile.99
= control target key start
LH: loop header
LB: loop body
LE: loop exit
PB: predicated region body
PF: predicated region fallthrough
CT: control target
= control target key end

     0   :  { %s7_s6 = smov 3  ;;  %s14_s9 = smov 3  ;;  %vm4_vm0 = vcmask 261120   ;;  %vm11_vm1 = vcmask 1048320   ;;  %vm18_vm2 = vcmask 785920   ;;  %vm25_vm3 = vcmask 523520   ;;  %s79_s0 = inlined_call_operand.vmem [shape: f32[8,32], index: 0, kind: input, shape index: {}]   ;;  %s80_s1 = inlined_call_operand.vmem [shape: f32[1,256], index: 1, kind: output, shape index: {}]  }
   0x1   :  { %v41_v0 = vld [vmem:[%s79_s0 + $0x3] ss:$4 sm:%s7_s6]   ;;  %s48_s10 = smov 96   ;;  %s21_s11 = smov 3  ;;  %v42_v1 = vld [vmem:[%s79_s0 + $0x2] ss:$4 sm:%s14_s9]  }
   0x2   :  { %9 = vrot.lane.b32.xlu0 %v41_v0, %s48_s10  ;;  %v43_v2 = vld [vmem:[%s79_s0 + $0x1] ss:$4 sm:%s21_s11]   ;;  %s2_s16 = smov 3  ;;  %s49_s17 = smov 32  }
   0x3   :  { %23 = vrot.lane.b32.xlu1 %v43_v2, %s49_s17  ;;  %v3_v3 = vld [vmem:[%s79_s0] ss:$4 sm:%s2_s16]   ;;  %s50_s0 = smov 64  }
   0x4   :  { %5 = vst.msk [vmem:[#allocation0] ss:$8 sm:$0x3] %vm4_vm0, %v3_v3  }
   0x6   :  { %16 = vrot.lane.b32.xlu0 %v42_v1, %s50_s0 }
  0x74   :  { %v10_v4 = vpop.permute.xlu0 %9  }
  0x75   :  { %12 = vst.msk [vmem:[#allocation0] ss:$8 sm:$0x3] %vm11_vm1, %v10_v4   ;;  %v24_v5 = vpop.permute.xlu1 %23  }
  0x78   :  { %v17_v6 = vpop.permute.xlu0 %16  }
  0x79   :  { %19 = vst.msk [vmem:[#allocation0] ss:$8 sm:$0x3] %vm18_vm2, %v17_v6  }
  0x7a   :  { %26 = vst.msk [vmem:[#allocation0] ss:$8 sm:$0x3] %vm25_vm3, %v24_v5  }
  0x81   :  { %v31_v7 = vld [vmem:[#allocation0] sm:$0x1]  ;;  %v36_v8 = vld [vmem:[#allocation0 + $0x8] sm:$0x1] }
  0x82   :  { %34 = vst [vmem:[%s80_s1] sm:$0x1] %v31_v7  ;;  %44 = vst [vmem:[%s80_s1 + $0x1] sm:$0x1] %v36_v8 }

// kernel: tile.108
= control target key start
LH: loop header
LB: loop body
LE: loop exit
PB: predicated region body
PF: predicated region fallthrough
CT: control target
= control target key end

     0   :  { %2 = vsyncpa [#allocation1], 0  ;;  %s42_s6 = smov [#allocation0]   ;;  %s59_s0 = inlined_call_operand.hbm [shape: f32[8], index: 0, kind: input, shape index: {}]   ;;  %s60_s1 = inlined_call_operand.vmem [shape: f32[8,8], index: 1, kind: output, shape index: {}]  }
   0x1   :  { %s9_s7 = sshll.u32 %s42_s6, 4  ;;  %s10_s7 = int_to_ptr.vmem [resolvable:$true] %s9_s7 }
   0x2   :  { %s28_s8 = scalar_lea.vmem %s10_s7, 16  ;;  %s32_s9 = scalar_lea.vmem %s10_s7, 32 }
   0x3   :  { %p29_p0 = scmp.ne.s32.totalorder %s10_s7, %s28_s8  ;;  %p33_p1 = scmp.lt.s32.totalorder %s10_s7, %s10_s7 }
   0x4   :  { %p34_p2 = scmp.lt.s32.totalorder %s32_s9, %s28_s8 }
   0x6   :  { %p35_p3 = por %p34_p2, %p33_p1 }
   0x8   :  { %p36_p4 = pnand %p35_p3, %p29_p0 }
   0xa   :  { %39 = shalt.err (!%p36_p4)
}
   0xb   :  { %12 = dma.hbm_to_vmem [thread:$0]  %s59_s0, 16, %s10_s7, [#allocation1]  }
   0xc   :  { %40 = dma.done.wait [#allocation1], 16  }
   0xd   :  { %41 = vsyncadd [#allocation1], 4294967280  ;;  %v16_v0 = vld [vmem:[#allocation0] ss:$0 sm:$0xff] }
   0xe   :  { %17 = vst [vmem:[%s60_s1] sm:$0xff] %v16_v0 }
   0xf   :  { %18 = vsyncpa [#allocation1], 1 }

// kernel: tile.109
= control target key start
LH: loop header
LB: loop body
LE: loop exit
PB: predicated region body
PF: predicated region fallthrough
CT: control target
= control target key end

     0   :  { %s69_s10 = smov 56   ;;  %s70_s11 = smov 40   ;;  %vm3_vm0 = vcmask 64512   ;;  %vm9_vm1 = vcmask 523712   ;;  %vm15_vm2 = vcmask 458112   ;;  %vm21_vm3 = vcmask 392512   ;;  %s113_s0 = inlined_call_operand.vmem [shape: f32[8,8], index: 0, kind: input, shape index: {}]   ;;  %s114_s1 = inlined_call_operand.vmem [shape: f32[1,64], index: 1, kind: output, shape index: {}]  }
   0x1   :  { %v55_v0 = vld [vmem:[%s113_s0 + $0x7] sm:$0x1]   ;;  %v57_v1 = vld [vmem:[%s113_s0 + $0x5] sm:$0x1]   ;;  %v56_v2 = vld [vmem:[%s113_s0 + $0x6] sm:$0x1]  }
   0x2   :  { %7 = vrot.lane.b32.xlu0 %v55_v0, %s69_s10  ;;  %19 = vrot.lane.b32.xlu1 %v57_v1, %s70_s11  ;;  %v58_v3 = vld [vmem:[%s113_s0 + $0x4] sm:$0x1]   ;;  %v2_v4 = vld [vmem:[%s113_s0] sm:$0x1]   ;;  %s71_s18 = smov 48   ;;  %s72_s19 = smov 32  }
   0x3   :  { %4 = vst.msk [vmem:[#allocation0] sm:$0x1] %vm3_vm0, %v2_v4   ;;  %v59_v5 = vld [vmem:[%s113_s0 + $0x3] sm:$0x1]   ;;  %v60_v6 = vld [vmem:[%s113_s0 + $0x2] sm:$0x1]  }
   0x4   :  { %s73_s24 = smov 24   ;;  %s74_s25 = smov 16   ;;  %v61_v7 = vld [vmem:[%s113_s0 + $0x1] sm:$0x1]   ;;  %vm27_vm4 = vcmask 326912   ;;  %vm33_vm5 = vcmask 261312  }
   0x5   :  { %s75_s0 = smov 8   ;;  %vm39_vm6 = vcmask 195712   ;;  %vm45_vm7 = vcmask 130112  }
   0x6   :  { %13 = vrot.lane.b32.xlu0 %v56_v2, %s71_s18  ;;  %25 = vrot.lane.b32.xlu1 %v58_v3, %s72_s19 }
   0xa   :  { %31 = vrot.lane.b32.xlu0 %v59_v5, %s73_s24  ;;  %37 = vrot.lane.b32.xlu1 %v60_v6, %s74_s25 }
   0xe   :  { %43 = vrot.lane.b32.xlu0 %v61_v7, %s75_s0 }
  0x74   :  { %v8_v8 = vpop.permute.xlu0 %7   ;;  %v20_v9 = vpop.permute.xlu1 %19  }
  0x75   :  { %10 = vst.msk [vmem:[#allocation0] sm:$0x1] %vm9_vm1, %v8_v8  }
  0x78   :  { %v14_v10 = vpop.permute.xlu0 %13   ;;  %v26_v11 = vpop.permute.xlu1 %25  }
  0x79   :  { %16 = vst.msk [vmem:[#allocation0] sm:$0x1] %vm15_vm2, %v14_v10  }
  0x7a   :  { %22 = vst.msk [vmem:[#allocation0] sm:$0x1] %vm21_vm3, %v20_v9  }
  0x7b   :  { %28 = vst.msk [vmem:[#allocation0] sm:$0x1] %vm27_vm4, %v26_v11  }
  0x7c   :  { %v32_v12 = vpop.permute.xlu0 %31   ;;  %v38_v13 = vpop.permute.xlu1 %37  }
  0x7d   :  { %34 = vst.msk [vmem:[#allocation0] sm:$0x1] %vm33_vm5, %v32_v12  }
  0x7e   :  { %40 = vst.msk [vmem:[#allocation0] sm:$0x1] %vm39_vm6, %v38_v13  }
  0x80   :  { %v44_v14 = vpop.permute.xlu0 %43  }
  0x81   :  { %46 = vst.msk [vmem:[#allocation0] sm:$0x1] %vm45_vm7, %v44_v14  }
  0x88   :  { %v51_v15 = vld [vmem:[#allocation0] sm:$0x1] }
  0x89   :  { %54 = vst [vmem:[%s114_s1] sm:$0x1] %v51_v15 }

// kernel: unet3d_forward.27
= control target key start
LH: loop header
LB: loop body
LE: loop exit
PB: predicated region body
PF: predicated region fallthrough
CT: control target
= control target key end

     0   :  { %vm244_vm0 = vcmask 130048   ;;  %vm950_vm1 = vcmask 27648   ;;  %s1748_s1 = inlined_call_operand.vmem [shape: bf16[16,4], index: 1, kind: input, shape index: {}]   ;;  %s1749_s0 = inlined_call_operand.vmem [shape: bf16[512,16], index: 0, kind: input, shape index: {}]   ;;  %s1750_s2 = inlined_call_operand.vmem [shape: bf16[512,4], index: 2, kind: output, shape index: {}]  }
   0x1   :  { %v1313_v0 = vld [vmem:[%s1748_s1] sm:$0xff]   ;;  %v1316_v3 = vld [vmem:[%s1749_s0 + $0x8] sm:$0xff]   ;;  %v1318_v5 = vld [vmem:[%s1749_s0 + $0x10] sm:$0xff]  }
   0x2   :  { %v1314_v1 = vld [vmem:[%s1749_s0] sm:$0xff]   ;;  %1245 = vmatprep.subr.bf16.mxu0 %v1313_v0  ;;  %1311 = vmatprep.subr.bf16.mxu1 %v1313_v0  ;;  %v1317_v4 = vld [vmem:[%s1749_s0 + $0x88] sm:$0xff]   ;;  %v1319_v6 = vld [vmem:[%s1749_s0 + $0x90] sm:$0xff]  }
   0x3   :  { %v1315_v2 = vld [vmem:[%s1749_s0 + $0x80] sm:$0xff]   ;;  %1246 = vmatpush3.bf16.msra.mxu0 %v1313_v0  ;;  %1312 = vmatpush3.bf16.msra.mxu1 %v1313_v0  ;;  %v1320_v7 = vld [vmem:[%s1749_s0 + $0x18] sm:$0xff]   ;;  %v1324_v11 = vld [vmem:[%s1749_s0 + $0x28] sm:$0xff]  }
   0x4   :  { %1247 = vmatprep.mubr.msk.bf16.mxu0 %vm244_vm0, %v1314_v1  ;;  %1279 = vmatprep.mubr.msk.bf16.mxu1 %vm244_vm0, %v1315_v2  ;;  %v1321_v8 = vld [vmem:[%s1749_s0 + $0x98] sm:$0xff]   ;;  %v1322_v9 = vld [vmem:[%s1749_s0 + $0x20] sm:$0xff]   ;;  %v1325_v12 = vld [vmem:[%s1749_s0 + $0xa8] sm:$0xff]  }
   0x5   :  { %v1323_v10 = vld [vmem:[%s1749_s0 + $0xa0] sm:$0xff]   ;;  %v1326_v13 = vld [vmem:[%s1749_s0 + $0x30] sm:$0xff]   ;;  %v1328_v15 = vld [vmem:[%s1749_s0 + $0x38] sm:$0xff]  }
   0x6   :  { %1248 = vmatmul.mubr.msk.bf16.vlgmr.msra.gmra.mxu0 %vm244_vm0, %v1316_v3  ;;  %1280 = vmatmul.mubr.msk.bf16.vlgmr.msra.gmra.mxu1 %vm244_vm0, %v1317_v4  ;;  %v1327_v14 = vld [vmem:[%s1749_s0 + $0xb0] sm:$0xff]   ;;  %v1329_v16 = vld [vmem:[%s1749_s0 + $0xb8] sm:$0xff]   ;;  %v1330_v17 = vld [vmem:[%s1749_s0 + $0x40] sm:$0xff]  }
   0x7   :  { %1251 = vmatprep.mubr.msk.bf16.mxu0 %vm244_vm0, %v1318_v5  ;;  %1283 = vmatprep.mubr.msk.bf16.mxu1 %vm244_vm0, %v1319_v6  ;;  %v1331_v18 = vld [vmem:[%s1749_s0 + $0xc0] sm:$0xff]   ;;  %v1332_v19 = vld [vmem:[%s1749_s0 + $0x48] sm:$0xff]   ;;  %v1334_v21 = vld [vmem:[%s1749_s0 + $0x50] sm:$0xff]  }
   0x8   :  { %v1333_v20 = vld [vmem:[%s1749_s0 + $0xc8] sm:$0xff]   ;;  %v1335_v22 = vld [vmem:[%s1749_s0 + $0xd0] sm:$0xff]   ;;  %v1336_v23 = vld [vmem:[%s1749_s0 + $0x58] sm:$0xff]  }
   0x9   :  { %v1337_v24 = vld [vmem:[%s1749_s0 + $0xd8] sm:$0xff]   ;;  %v1338_v25 = vld [vmem:[%s1749_s0 + $0x60] sm:$0xff]   ;;  %v1340_v27 = vld [vmem:[%s1749_s0 + $0x68] sm:$0xff]  }
   0xa   :  { %v1339_v26 = vld [vmem:[%s1749_s0 + $0xe0] sm:$0xff]   ;;  %v1341_v28 = vld [vmem:[%s1749_s0 + $0xe8] sm:$0xff]   ;;  %v1342_v29 = vld [vmem:[%s1749_s0 + $0x70] sm:$0xff]  }
   0xb   :  { %v1343_v30 = vld [vmem:[%s1749_s0 + $0xf0] sm:$0xff]   ;;  %v1344_v31 = vld [vmem:[%s1749_s0 + $0x78] sm:$0xff]  }
   0xc   :  { %v1345_v32 = vld [vmem:[%s1749_s0 + $0xf8] sm:$0xff]  }
   0xe   :  { %1252 = vmatmul.mubr.msk.bf16.gmra.mxu0 %vm244_vm0, %v1320_v7  ;;  %1284 = vmatmul.mubr.msk.bf16.gmra.mxu1 %vm244_vm0, %v1321_v8 }
   0xf   :  { %1255 = vmatprep.mubr.msk.bf16.mxu0 %vm244_vm0, %v1322_v9  ;;  %1287 = vmatprep.mubr.msk.bf16.mxu1 %vm244_vm0, %v1323_v10 }
  0x16   :  { %1256 = vmatmul.mubr.msk.bf16.gmra.mxu0 %vm244_vm0, %v1324_v11  ;;  %1288 = vmatmul.mubr.msk.bf16.gmra.mxu1 %vm244_vm0, %v1325_v12 }
  0x17   :  { %1259 = vmatprep.mubr.msk.bf16.mxu0 %vm244_vm0, %v1326_v13  ;;  %1291 = vmatprep.mubr.msk.bf16.mxu1 %vm244_vm0, %v1327_v14 }
  0x1e   :  { %1260 = vmatmul.mubr.msk.bf16.gmra.mxu0 %vm244_vm0, %v1328_v15  ;;  %1292 = vmatmul.mubr.msk.bf16.gmra.mxu1 %vm244_vm0, %v1329_v16 }
  0x1f   :  { %1263 = vmatprep.mubr.msk.bf16.mxu0 %vm244_vm0, %v1330_v17  ;;  %1295 = vmatprep.mubr.msk.bf16.mxu1 %vm244_vm0, %v1331_v18 }
  0x26   :  { %1264 = vmatmul.mubr.msk.bf16.gmra.mxu0 %vm244_vm0, %v1332_v19  ;;  %1296 = vmatmul.mubr.msk.bf16.gmra.mxu1 %vm244_vm0, %v1333_v20 }
  0x27   :  { %1267 = vmatprep.mubr.msk.bf16.mxu0 %vm244_vm0, %v1334_v21  ;;  %1299 = vmatprep.mubr.msk.bf16.mxu1 %vm244_vm0, %v1335_v22 }
  0x2e   :  { %1268 = vmatmul.mubr.msk.bf16.gmra.mxu0 %vm244_vm0, %v1336_v23  ;;  %1300 = vmatmul.mubr.msk.bf16.gmra.mxu1 %vm244_vm0, %v1337_v24 }
  0x2f   :  { %1271 = vmatprep.mubr.msk.bf16.mxu0 %vm244_vm0, %v1338_v25  ;;  %1303 = vmatprep.mubr.msk.bf16.mxu1 %vm244_vm0, %v1339_v26 }
  0x36   :  { %1272 = vmatmul.mubr.msk.bf16.gmra.mxu0 %vm244_vm0, %v1340_v27  ;;  %1304 = vmatmul.mubr.msk.bf16.gmra.mxu1 %vm244_vm0, %v1341_v28 }
  0x37   :  { %1275 = vmatprep.mubr.msk.bf16.mxu0 %vm244_vm0, %v1342_v29  ;;  %1307 = vmatprep.mubr.msk.bf16.mxu1 %vm244_vm0, %v1343_v30 }
  0x3e   :  { %1276 = vmatmul.mubr.msk.bf16.gmra.mxu0 %vm244_vm0, %v1344_v31  ;;  %1308 = vmatmul.mubr.msk.bf16.gmra.mxu1 %vm244_vm0, %v1345_v32 }
  0xc6   :  { %v1249_v33 = vpop.f32.mrf.mxu0  ;;  %v1281_v34 = vpop.f32.mrf.mxu1 }
  0xc7   :  { %v632_v35 = vmax.f32 %v1249_v33, 0.0  ;;  %v664_v36 = vmax.f32 %v1281_v34, 0.0 }
  0xc8   :  { %v375_v37 = vpop.f32.mrf.mxu0  ;;  %v503_v38 = vpop.f32.mrf.mxu1 }
  0xc9   :  { %v1150_v39 = vpack.c.bf16 %v632_v35, %v632_v35  ;;  %v1182_v40 = vpack.c.bf16 %v664_v36, %v664_v36  ;;  %v630_v41 = vmax.f32 %v375_v37, 0.0  ;;  %v662_v42 = vmax.f32 %v503_v38, 0.0 }
  0xca   :  { %v1250_v43 = vpop.f32.mrf.mxu0  ;;  %v1282_v44 = vpop.f32.mrf.mxu1 }
  0xcb   :  { %953 = vst.msk [vmem:[%s1750_s2 + $0x8] sm:$0xf] %vm950_vm1, %v1150_v39  ;;  %985 = vst.msk [vmem:[%s1750_s2 + $0x88] sm:$0xf] %vm950_vm1, %v1182_v40  ;;  %v1148_v45 = vpack.c.bf16 %v630_v41, %v630_v41  ;;  %v1180_v46 = vpack.c.bf16 %v662_v42, %v662_v42  ;;  %v633_v47 = vmax.f32 %v1250_v43, 0.0  ;;  %v665_v48 = vmax.f32 %v1282_v44, 0.0 }
  0xcc   :  { %v378_v49 = vpop.f32.mrf.mxu0  ;;  %v506_v50 = vpop.f32.mrf.mxu1 }
  0xcd   :  { %951 = vst.msk [vmem:[%s1750_s2] sm:$0xf] %vm950_vm1, %v1148_v45  ;;  %983 = vst.msk [vmem:[%s1750_s2 + $0x80] sm:$0xf] %vm950_vm1, %v1180_v46  ;;  %v1151_v51 = vpack.c.bf16 %v633_v47, %v633_v47  ;;  %v1183_v52 = vpack.c.bf16 %v665_v48, %v665_v48  ;;  %v631_v53 = vmax.f32 %v378_v49, 0.0  ;;  %v663_v54 = vmax.f32 %v506_v50, 0.0 }
  0xce   :  { %v1253_v55 = vpop.f32.mrf.mxu0  ;;  %v1285_v56 = vpop.f32.mrf.mxu1 }
  0xcf   :  { %954 = vst.msk [vmem:[%s1750_s2 + $0xc] sm:$0xf] %vm950_vm1, %v1151_v51  ;;  %986 = vst.msk [vmem:[%s1750_s2 + $0x8c] sm:$0xf] %vm950_vm1, %v1183_v52  ;;  %v1149_v57 = vpack.c.bf16 %v631_v53, %v631_v53  ;;  %v1181_v58 = vpack.c.bf16 %v663_v54, %v663_v54  ;;  %v636_v59 = vmax.f32 %v1253_v55, 0.0  ;;  %v668_v60 = vmax.f32 %v1285_v56, 0.0 }
  0xd0   :  { %v391_v61 = vpop.f32.mrf.mxu0  ;;  %v519_v62 = vpop.f32.mrf.mxu1 }
  0xd1   :  { %952 = vst.msk [vmem:[%s1750_s2 + $0x4] sm:$0xf] %vm950_vm1, %v1149_v57  ;;  %984 = vst.msk [vmem:[%s1750_s2 + $0x84] sm:$0xf] %vm950_vm1, %v1181_v58  ;;  %v1154_v63 = vpack.c.bf16 %v636_v59, %v636_v59  ;;  %v1186_v0 = vpack.c.bf16 %v668_v60, %v668_v60  ;;  %v634_v1 = vmax.f32 %v391_v61, 0.0  ;;  %v666_v2 = vmax.f32 %v519_v62, 0.0 }
  0xd2   :  { %v1254_v3 = vpop.f32.mrf.mxu0  ;;  %v1286_v4 = vpop.f32.mrf.mxu1 }
  0xd3   :  { %957 = vst.msk [vmem:[%s1750_s2 + $0x18] sm:$0xf] %vm950_vm1, %v1154_v63  ;;  %989 = vst.msk [vmem:[%s1750_s2 + $0x98] sm:$0xf] %vm950_vm1, %v1186_v0  ;;  %v1152_v5 = vpack.c.bf16 %v634_v1, %v634_v1  ;;  %v1184_v6 = vpack.c.bf16 %v666_v2, %v666_v2  ;;  %v637_v7 = vmax.f32 %v1254_v3, 0.0  ;;  %v669_v8 = vmax.f32 %v1286_v4, 0.0 }
  0xd4   :  { %v394_v9 = vpop.f32.mrf.mxu0  ;;  %v522_v10 = vpop.f32.mrf.mxu1 }
  0xd5   :  { %955 = vst.msk [vmem:[%s1750_s2 + $0x10] sm:$0xf] %vm950_vm1, %v1152_v5  ;;  %987 = vst.msk [vmem:[%s1750_s2 + $0x90] sm:$0xf] %vm950_vm1, %v1184_v6  ;;  %v1155_v11 = vpack.c.bf16 %v637_v7, %v637_v7  ;;  %v1187_v12 = vpack.c.bf16 %v669_v8, %v669_v8  ;;  %v635_v13 = vmax.f32 %v394_v9, 0.0  ;;  %v667_v14 = vmax.f32 %v522_v10, 0.0 }
  0xd6   :  { %v1257_v15 = vpop.f32.mrf.mxu0  ;;  %v1289_v16 = vpop.f32.mrf.mxu1 }
  0xd7   :  { %958 = vst.msk [vmem:[%s1750_s2 + $0x1c] sm:$0xf] %vm950_vm1, %v1155_v11  ;;  %990 = vst.msk [vmem:[%s1750_s2 + $0x9c] sm:$0xf] %vm950_vm1, %v1187_v12  ;;  %v1153_v17 = vpack.c.bf16 %v635_v13, %v635_v13  ;;  %v1185_v18 = vpack.c.bf16 %v667_v14, %v667_v14  ;;  %v640_v19 = vmax.f32 %v1257_v15, 0.0  ;;  %v672_v20 = vmax.f32 %v1289_v16, 0.0 }
  0xd8   :  { %v407_v21 = vpop.f32.mrf.mxu0  ;;  %v535_v22 = vpop.f32.mrf.mxu1 }
  0xd9   :  { %956 = vst.msk [vmem:[%s1750_s2 + $0x14] sm:$0xf] %vm950_vm1, %v1153_v17  ;;  %988 = vst.msk [vmem:[%s1750_s2 + $0x94] sm:$0xf] %vm950_vm1, %v1185_v18  ;;  %v1158_v23 = vpack.c.bf16 %v640_v19, %v640_v19  ;;  %v1190_v24 = vpack.c.bf16 %v672_v20, %v672_v20  ;;  %v638_v25 = vmax.f32 %v407_v21, 0.0  ;;  %v670_v26 = vmax.f32 %v535_v22, 0.0 }
  0xda   :  { %v1258_v27 = vpop.f32.mrf.mxu0  ;;  %v1290_v28 = vpop.f32.mrf.mxu1 }
  0xdb   :  { %961 = vst.msk [vmem:[%s1750_s2 + $0x28] sm:$0xf] %vm950_vm1, %v1158_v23  ;;  %993 = vst.msk [vmem:[%s1750_s2 + $0xa8] sm:$0xf] %vm950_vm1, %v1190_v24  ;;  %v1156_v29 = vpack.c.bf16 %v638_v25, %v638_v25  ;;  %v1188_v30 = vpack.c.bf16 %v670_v26, %v670_v26  ;;  %v641_v31 = vmax.f32 %v1258_v27, 0.0  ;;  %v673_v32 = vmax.f32 %v1290_v28, 0.0 }
  0xdc   :  { %v410_v33 = vpop.f32.mrf.mxu0  ;;  %v538_v34 = vpop.f32.mrf.mxu1 }
  0xdd   :  { %959 = vst.msk [vmem:[%s1750_s2 + $0x20] sm:$0xf] %vm950_vm1, %v1156_v29  ;;  %991 = vst.msk [vmem:[%s1750_s2 + $0xa0] sm:$0xf] %vm950_vm1, %v1188_v30  ;;  %v1159_v35 = vpack.c.bf16 %v641_v31, %v641_v31  ;;  %v1191_v36 = vpack.c.bf16 %v673_v32, %v673_v32  ;;  %v639_v37 = vmax.f32 %v410_v33, 0.0  ;;  %v671_v38 = vmax.f32 %v538_v34, 0.0 }
  0xde   :  { %v1261_v39 = vpop.f32.mrf.mxu0  ;;  %v1293_v40 = vpop.f32.mrf.mxu1 }
  0xdf   :  { %962 = vst.msk [vmem:[%s1750_s2 + $0x2c] sm:$0xf] %vm950_vm1, %v1159_v35  ;;  %994 = vst.msk [vmem:[%s1750_s2 + $0xac] sm:$0xf] %vm950_vm1, %v1191_v36  ;;  %v1157_v41 = vpack.c.bf16 %v639_v37, %v639_v37  ;;  %v1189_v42 = vpack.c.bf16 %v671_v38, %v671_v38  ;;  %v644_v43 = vmax.f32 %v1261_v39, 0.0  ;;  %v676_v44 = vmax.f32 %v1293_v40, 0.0 }
  0xe0   :  { %v423_v45 = vpop.f32.mrf.mxu0  ;;  %v551_v46 = vpop.f32.mrf.mxu1 }
  0xe1   :  { %960 = vst.msk [vmem:[%s1750_s2 + $0x24] sm:$0xf] %vm950_vm1, %v1157_v41  ;;  %992 = vst.msk [vmem:[%s1750_s2 + $0xa4] sm:$0xf] %vm950_vm1, %v1189_v42  ;;  %v1162_v47 = vpack.c.bf16 %v644_v43, %v644_v43  ;;  %v1194_v48 = vpack.c.bf16 %v676_v44, %v676_v44  ;;  %v642_v49 = vmax.f32 %v423_v45, 0.0  ;;  %v674_v50 = vmax.f32 %v551_v46, 0.0 }
  0xe2   :  { %v1262_v51 = vpop.f32.mrf.mxu0  ;;  %v1294_v52 = vpop.f32.mrf.mxu1 }
  0xe3   :  { %965 = vst.msk [vmem:[%s1750_s2 + $0x38] sm:$0xf] %vm950_vm1, %v1162_v47  ;;  %997 = vst.msk [vmem:[%s1750_s2 + $0xb8] sm:$0xf] %vm950_vm1, %v1194_v48  ;;  %v1160_v53 = vpack.c.bf16 %v642_v49, %v642_v49  ;;  %v1192_v54 = vpack.c.bf16 %v674_v50, %v674_v50  ;;  %v645_v55 = vmax.f32 %v1262_v51, 0.0  ;;  %v677_v56 = vmax.f32 %v1294_v52, 0.0 }
  0xe4   :  { %v426_v57 = vpop.f32.mrf.mxu0  ;;  %v554_v58 = vpop.f32.mrf.mxu1 }
  0xe5   :  { %963 = vst.msk [vmem:[%s1750_s2 + $0x30] sm:$0xf] %vm950_vm1, %v1160_v53  ;;  %995 = vst.msk [vmem:[%s1750_s2 + $0xb0] sm:$0xf] %vm950_vm1, %v1192_v54  ;;  %v1163_v59 = vpack.c.bf16 %v645_v55, %v645_v55  ;;  %v1195_v60 = vpack.c.bf16 %v677_v56, %v677_v56  ;;  %v643_v61 = vmax.f32 %v426_v57, 0.0  ;;  %v675_v62 = vmax.f32 %v554_v58, 0.0 }
  0xe6   :  { %v1265_v63 = vpop.f32.mrf.mxu0  ;;  %v1297_v0 = vpop.f32.mrf.mxu1 }
  0xe7   :  { %966 = vst.msk [vmem:[%s1750_s2 + $0x3c] sm:$0xf] %vm950_vm1, %v1163_v59  ;;  %998 = vst.msk [vmem:[%s1750_s2 + $0xbc] sm:$0xf] %vm950_vm1, %v1195_v60  ;;  %v1161_v1 = vpack.c.bf16 %v643_v61, %v643_v61  ;;  %v1193_v2 = vpack.c.bf16 %v675_v62, %v675_v62  ;;  %v648_v3 = vmax.f32 %v1265_v63, 0.0  ;;  %v680_v4 = vmax.f32 %v1297_v0, 0.0 }
  0xe8   :  { %v439_v5 = vpop.f32.mrf.mxu0  ;;  %v567_v6 = vpop.f32.mrf.mxu1 }
  0xe9   :  { %964 = vst.msk [vmem:[%s1750_s2 + $0x34] sm:$0xf] %vm950_vm1, %v1161_v1  ;;  %996 = vst.msk [vmem:[%s1750_s2 + $0xb4] sm:$0xf] %vm950_vm1, %v1193_v2  ;;  %v1166_v7 = vpack.c.bf16 %v648_v3, %v648_v3  ;;  %v1198_v8 = vpack.c.bf16 %v680_v4, %v680_v4  ;;  %v646_v9 = vmax.f32 %v439_v5, 0.0  ;;  %v678_v10 = vmax.f32 %v567_v6, 0.0 }
  0xea   :  { %v1266_v11 = vpop.f32.mrf.mxu0  ;;  %v1298_v12 = vpop.f32.mrf.mxu1 }
  0xeb   :  { %969 = vst.msk [vmem:[%s1750_s2 + $0x48] sm:$0xf] %vm950_vm1, %v1166_v7  ;;  %1001 = vst.msk [vmem:[%s1750_s2 + $0xc8] sm:$0xf] %vm950_vm1, %v1198_v8  ;;  %v1164_v13 = vpack.c.bf16 %v646_v9, %v646_v9  ;;  %v1196_v14 = vpack.c.bf16 %v678_v10, %v678_v10  ;;  %v649_v15 = vmax.f32 %v1266_v11, 0.0  ;;  %v681_v16 = vmax.f32 %v1298_v12, 0.0 }
  0xec   :  { %v442_v17 = vpop.f32.mrf.mxu0  ;;  %v570_v18 = vpop.f32.mrf.mxu1 }
  0xed   :  { %967 = vst.msk [vmem:[%s1750_s2 + $0x40] sm:$0xf] %vm950_vm1, %v1164_v13  ;;  %999 = vst.msk [vmem:[%s1750_s2 + $0xc0] sm:$0xf] %vm950_vm1, %v1196_v14  ;;  %v1167_v19 = vpack.c.bf16 %v649_v15, %v649_v15  ;;  %v1199_v20 = vpack.c.bf16 %v681_v16, %v681_v16  ;;  %v647_v21 = vmax.f32 %v442_v17, 0.0  ;;  %v679_v22 = vmax.f32 %v570_v18, 0.0 }
  0xee   :  { %v1269_v23 = vpop.f32.mrf.mxu0  ;;  %v1301_v24 = vpop.f32.mrf.mxu1 }
  0xef   :  { %970 = vst.msk [vmem:[%s1750_s2 + $0x4c] sm:$0xf] %vm950_vm1, %v1167_v19  ;;  %1002 = vst.msk [vmem:[%s1750_s2 + $0xcc] sm:$0xf] %vm950_vm1, %v1199_v20  ;;  %v1165_v25 = vpack.c.bf16 %v647_v21, %v647_v21  ;;  %v1197_v26 = vpack.c.bf16 %v679_v22, %v679_v22  ;;  %v652_v27 = vmax.f32 %v1269_v23, 0.0  ;;  %v684_v28 = vmax.f32 %v1301_v24, 0.0 }
  0xf0   :  { %v455_v29 = vpop.f32.mrf.mxu0  ;;  %v583_v30 = vpop.f32.mrf.mxu1 }
  0xf1   :  { %968 = vst.msk [vmem:[%s1750_s2 + $0x44] sm:$0xf] %vm950_vm1, %v1165_v25  ;;  %1000 = vst.msk [vmem:[%s1750_s2 + $0xc4] sm:$0xf] %vm950_vm1, %v1197_v26  ;;  %v1170_v31 = vpack.c.bf16 %v652_v27, %v652_v27  ;;  %v1202_v32 = vpack.c.bf16 %v684_v28, %v684_v28  ;;  %v650_v33 = vmax.f32 %v455_v29, 0.0  ;;  %v682_v34 = vmax.f32 %v583_v30, 0.0 }
  0xf2   :  { %v1270_v35 = vpop.f32.mrf.mxu0  ;;  %v1302_v36 = vpop.f32.mrf.mxu1 }
  0xf3   :  { %973 = vst.msk [vmem:[%s1750_s2 + $0x58] sm:$0xf] %vm950_vm1, %v1170_v31  ;;  %1005 = vst.msk [vmem:[%s1750_s2 + $0xd8] sm:$0xf] %vm950_vm1, %v1202_v32  ;;  %v1168_v37 = vpack.c.bf16 %v650_v33, %v650_v33  ;;  %v1200_v38 = vpack.c.bf16 %v682_v34, %v682_v34  ;;  %v653_v39 = vmax.f32 %v1270_v35, 0.0  ;;  %v685_v40 = vmax.f32 %v1302_v36, 0.0 }
  0xf4   :  { %v458_v41 = vpop.f32.mrf.mxu0  ;;  %v586_v42 = vpop.f32.mrf.mxu1 }
  0xf5   :  { %971 = vst.msk [vmem:[%s1750_s2 + $0x50] sm:$0xf] %vm950_vm1, %v1168_v37  ;;  %1003 = vst.msk [vmem:[%s1750_s2 + $0xd0] sm:$0xf] %vm950_vm1, %v1200_v38  ;;  %v1171_v43 = vpack.c.bf16 %v653_v39, %v653_v39  ;;  %v1203_v44 = vpack.c.bf16 %v685_v40, %v685_v40  ;;  %v651_v45 = vmax.f32 %v458_v41, 0.0  ;;  %v683_v46 = vmax.f32 %v586_v42, 0.0 }
  0xf6   :  { %v1273_v47 = vpop.f32.mrf.mxu0  ;;  %v1305_v48 = vpop.f32.mrf.mxu1 }
  0xf7   :  { %974 = vst.msk [vmem:[%s1750_s2 + $0x5c] sm:$0xf] %vm950_vm1, %v1171_v43  ;;  %1006 = vst.msk [vmem:[%s1750_s2 + $0xdc] sm:$0xf] %vm950_vm1, %v1203_v44  ;;  %v1169_v49 = vpack.c.bf16 %v651_v45, %v651_v45  ;;  %v1201_v50 = vpack.c.bf16 %v683_v46, %v683_v46  ;;  %v656_v51 = vmax.f32 %v1273_v47, 0.0  ;;  %v688_v52 = vmax.f32 %v1305_v48, 0.0 }
  0xf8   :  { %v471_v53 = vpop.f32.mrf.mxu0  ;;  %v599_v54 = vpop.f32.mrf.mxu1 }
  0xf9   :  { %972 = vst.msk [vmem:[%s1750_s2 + $0x54] sm:$0xf] %vm950_vm1, %v1169_v49  ;;  %1004 = vst.msk [vmem:[%s1750_s2 + $0xd4] sm:$0xf] %vm950_vm1, %v1201_v50  ;;  %v1174_v55 = vpack.c.bf16 %v656_v51, %v656_v51  ;;  %v1206_v56 = vpack.c.bf16 %v688_v52, %v688_v52  ;;  %v654_v57 = vmax.f32 %v471_v53, 0.0  ;;  %v686_v58 = vmax.f32 %v599_v54, 0.0 }
  0xfa   :  { %v1274_v59 = vpop.f32.mrf.mxu0  ;;  %v1306_v60 = vpop.f32.mrf.mxu1 }
  0xfb   :  { %977 = vst.msk [vmem:[%s1750_s2 + $0x68] sm:$0xf] %vm950_vm1, %v1174_v55  ;;  %1009 = vst.msk [vmem:[%s1750_s2 + $0xe8] sm:$0xf] %vm950_vm1, %v1206_v56  ;;  %v1172_v61 = vpack.c.bf16 %v654_v57, %v654_v57  ;;  %v1204_v62 = vpack.c.bf16 %v686_v58, %v686_v58  ;;  %v657_v63 = vmax.f32 %v1274_v59, 0.0  ;;  %v689_v0 = vmax.f32 %v1306_v60, 0.0 }
  0xfc   :  { %v474_v1 = vpop.f32.mrf.mxu0  ;;  %v602_v2 = vpop.f32.mrf.mxu1 }
  0xfd   :  { %975 = vst.msk [vmem:[%s1750_s2 + $0x60] sm:$0xf] %vm950_vm1, %v1172_v61  ;;  %1007 = vst.msk [vmem:[%s1750_s2 + $0xe0] sm:$0xf] %vm950_vm1, %v1204_v62  ;;  %v1175_v3 = vpack.c.bf16 %v657_v63, %v657_v63  ;;  %v1207_v4 = vpack.c.bf16 %v689_v0, %v689_v0  ;;  %v655_v5 = vmax.f32 %v474_v1, 0.0  ;;  %v687_v6 = vmax.f32 %v602_v2, 0.0 }
  0xfe   :  { %v1277_v7 = vpop.f32.mrf.mxu0  ;;  %v1309_v8 = vpop.f32.mrf.mxu1 }
  0xff   :  { %978 = vst.msk [vmem:[%s1750_s2 + $0x6c] sm:$0xf] %vm950_vm1, %v1175_v3  ;;  %1010 = vst.msk [vmem:[%s1750_s2 + $0xec] sm:$0xf] %vm950_vm1, %v1207_v4  ;;  %v1173_v9 = vpack.c.bf16 %v655_v5, %v655_v5  ;;  %v1205_v10 = vpack.c.bf16 %v687_v6, %v687_v6  ;;  %v660_v11 = vmax.f32 %v1277_v7, 0.0  ;;  %v692_v12 = vmax.f32 %v1309_v8, 0.0 }
 0x100   :  { %v487_v13 = vpop.f32.mrf.mxu0  ;;  %v615_v14 = vpop.f32.mrf.mxu1 }
 0x101   :  { %976 = vst.msk [vmem:[%s1750_s2 + $0x64] sm:$0xf] %vm950_vm1, %v1173_v9  ;;  %1008 = vst.msk [vmem:[%s1750_s2 + $0xe4] sm:$0xf] %vm950_vm1, %v1205_v10  ;;  %v1178_v15 = vpack.c.bf16 %v660_v11, %v660_v11  ;;  %v1210_v16 = vpack.c.bf16 %v692_v12, %v692_v12  ;;  %v658_v17 = vmax.f32 %v487_v13, 0.0  ;;  %v690_v18 = vmax.f32 %v615_v14, 0.0 }
 0x102   :  { %v1278_v19 = vpop.f32.mrf.mxu0  ;;  %v1310_v20 = vpop.f32.mrf.mxu1 }
 0x103   :  { %981 = vst.msk [vmem:[%s1750_s2 + $0x78] sm:$0xf] %vm950_vm1, %v1178_v15  ;;  %1013 = vst.msk [vmem:[%s1750_s2 + $0xf8] sm:$0xf] %vm950_vm1, %v1210_v16  ;;  %v1176_v21 = vpack.c.bf16 %v658_v17, %v658_v17  ;;  %v1208_v22 = vpack.c.bf16 %v690_v18, %v690_v18  ;;  %v661_v23 = vmax.f32 %v1278_v19, 0.0  ;;  %v693_v24 = vmax.f32 %v1310_v20, 0.0 }
 0x104   :  { %v490_v25 = vpop.f32.mrf.mxu0  ;;  %v618_v26 = vpop.f32.mrf.mxu1 }
 0x105   :  { %979 = vst.msk [vmem:[%s1750_s2 + $0x70] sm:$0xf] %vm950_vm1, %v1176_v21  ;;  %1011 = vst.msk [vmem:[%s1750_s2 + $0xf0] sm:$0xf] %vm950_vm1, %v1208_v22  ;;  %v1179_v27 = vpack.c.bf16 %v661_v23, %v661_v23  ;;  %v1211_v28 = vpack.c.bf16 %v693_v24, %v693_v24  ;;  %v659_v29 = vmax.f32 %v490_v25, 0.0  ;;  %v691_v30 = vmax.f32 %v618_v26, 0.0 }
 0x107   :  { %982 = vst.msk [vmem:[%s1750_s2 + $0x7c] sm:$0xf] %vm950_vm1, %v1179_v27  ;;  %1014 = vst.msk [vmem:[%s1750_s2 + $0xfc] sm:$0xf] %vm950_vm1, %v1211_v28  ;;  %v1177_v31 = vpack.c.bf16 %v659_v29, %v659_v29  ;;  %v1209_v32 = vpack.c.bf16 %v691_v30, %v691_v30 }
 0x109   :  { %980 = vst.msk [vmem:[%s1750_s2 + $0x74] sm:$0xf] %vm950_vm1, %v1177_v31  ;;  %1012 = vst.msk [vmem:[%s1750_s2 + $0xf4] sm:$0xf] %vm950_vm1, %v1209_v32 }

// kernel: unet3d_forward.28
= control target key start
LH: loop header
LB: loop body
LE: loop exit
PB: predicated region body
PF: predicated region fallthrough
CT: control target
= control target key end

     0   :  { %vm342_vm0 = vcmask 1045504   ;;  %vm245_vm1 = vcmask 97280   ;;  %vm891_vm2 = vcmask 27648   ;;  %s2468_s1 = inlined_call_operand.vmem [shape: bf16[12,4], index: 1, kind: input, shape index: {}]   ;;  %s2469_s0 = inlined_call_operand.vmem [shape: bf16[512,12], index: 0, kind: input, shape index: {}]   ;;  %s2470_s2 = inlined_call_operand.vmem [shape: bf16[512,4], index: 2, kind: output, shape index: {0}]   ;;  %s2471_s3 = inlined_call_operand.vmem [shape: bf16[512,4], index: 3, kind: output, shape index: {1}]  }
   0x1   :  { %v1772_v0 = vld [vmem:[%s2468_s1] sm:$0x3f]   ;;  %v1775_v4 = vld [vmem:[%s2469_s0 + $0x8] sm:$0xff]   ;;  %v1777_v6 = vld [vmem:[%s2469_s0 + $0x10] sm:$0xff]  }
   0x2   :  { %v1773_v1 = vld [vmem:[%s2469_s0] sm:$0xff]   ;;  %1770 = vmatprep.subr.msk.bf16.mxu0 %vm342_vm0, %v1772_v0  ;;  %1771 = vmatprep.subr.msk.bf16.mxu1 %vm342_vm0, %v1772_v0  ;;  %v344_v2 = vsel %vm342_vm0, %v1772_v0, 0  ;;  %v1776_v5 = vld [vmem:[%s2469_s0 + $0x88] sm:$0xff]   ;;  %v1778_v7 = vld [vmem:[%s2469_s0 + $0x90] sm:$0xff]  }
   0x3   :  { %v1774_v3 = vld [vmem:[%s2469_s0 + $0x80] sm:$0xff]   ;;  %1703 = vmatpush3.bf16.msra.mxu0 %v344_v2  ;;  %1769 = vmatpush3.bf16.msra.mxu1 %v344_v2  ;;  %v1779_v8 = vld [vmem:[%s2469_s0 + $0x18] sm:$0xff]   ;;  %v1783_v12 = vld [vmem:[%s2469_s0 + $0x28] sm:$0xff]  }
   0x4   :  { %1704 = vmatprep.mubr.msk.bf16.mxu0 %vm245_vm1, %v1773_v1  ;;  %1736 = vmatprep.mubr.msk.bf16.mxu1 %vm245_vm1, %v1774_v3  ;;  %v1780_v9 = vld [vmem:[%s2469_s0 + $0x98] sm:$0xff]   ;;  %v1781_v10 = vld [vmem:[%s2469_s0 + $0x20] sm:$0xff]   ;;  %v1784_v13 = vld [vmem:[%s2469_s0 + $0xa8] sm:$0xff]  }
   0x5   :  { %v1782_v11 = vld [vmem:[%s2469_s0 + $0xa0] sm:$0xff]   ;;  %v1785_v14 = vld [vmem:[%s2469_s0 + $0x30] sm:$0xff]   ;;  %v1787_v16 = vld [vmem:[%s2469_s0 + $0x38] sm:$0xff]  }
   0x6   :  { %1705 = vmatmul.mubr.msk.bf16.vlgmr.msra.gmra.mxu0 %vm245_vm1, %v1775_v4  ;;  %1737 = vmatmul.mubr.msk.bf16.vlgmr.msra.gmra.mxu1 %vm245_vm1, %v1776_v5  ;;  %v1786_v15 = vld [vmem:[%s2469_s0 + $0xb0] sm:$0xff]   ;;  %v1788_v17 = vld [vmem:[%s2469_s0 + $0xb8] sm:$0xff]   ;;  %v1789_v18 = vld [vmem:[%s2469_s0 + $0x40] sm:$0xff]  }
   0x7   :  { %1708 = vmatprep.mubr.msk.bf16.mxu0 %vm245_vm1, %v1777_v6  ;;  %1740 = vmatprep.mubr.msk.bf16.mxu1 %vm245_vm1, %v1778_v7  ;;  %v1790_v19 = vld [vmem:[%s2469_s0 + $0xc0] sm:$0xff]   ;;  %v1791_v20 = vld [vmem:[%s2469_s0 + $0x48] sm:$0xff]   ;;  %v1793_v22 = vld [vmem:[%s2469_s0 + $0x50] sm:$0xff]  }
   0x8   :  { %v1792_v21 = vld [vmem:[%s2469_s0 + $0xc8] sm:$0xff]   ;;  %v1794_v23 = vld [vmem:[%s2469_s0 + $0xd0] sm:$0xff]   ;;  %v1795_v24 = vld [vmem:[%s2469_s0 + $0x58] sm:$0xff]  }
   0x9   :  { %v1796_v25 = vld [vmem:[%s2469_s0 + $0xd8] sm:$0xff]   ;;  %v1797_v26 = vld [vmem:[%s2469_s0 + $0x60] sm:$0xff]   ;;  %v1799_v28 = vld [vmem:[%s2469_s0 + $0x68] sm:$0xff]  }
   0xa   :  { %v1798_v27 = vld [vmem:[%s2469_s0 + $0xe0] sm:$0xff]   ;;  %v1800_v29 = vld [vmem:[%s2469_s0 + $0xe8] sm:$0xff]   ;;  %v1801_v30 = vld [vmem:[%s2469_s0 + $0x70] sm:$0xff]  }
   0xb   :  { %v1802_v31 = vld [vmem:[%s2469_s0 + $0xf0] sm:$0xff]   ;;  %v1803_v32 = vld [vmem:[%s2469_s0 + $0x78] sm:$0xff]  }
   0xc   :  { %v1804_v33 = vld [vmem:[%s2469_s0 + $0xf8] sm:$0xff]  }
   0xe   :  { %1709 = vmatmul.mubr.msk.bf16.gmra.mxu0 %vm245_vm1, %v1779_v8  ;;  %1741 = vmatmul.mubr.msk.bf16.gmra.mxu1 %vm245_vm1, %v1780_v9 }
   0xf   :  { %1712 = vmatprep.mubr.msk.bf16.mxu0 %vm245_vm1, %v1781_v10  ;;  %1744 = vmatprep.mubr.msk.bf16.mxu1 %vm245_vm1, %v1782_v11 }
  0x16   :  { %1713 = vmatmul.mubr.msk.bf16.gmra.mxu0 %vm245_vm1, %v1783_v12  ;;  %1745 = vmatmul.mubr.msk.bf16.gmra.mxu1 %vm245_vm1, %v1784_v13 }
  0x17   :  { %1716 = vmatprep.mubr.msk.bf16.mxu0 %vm245_vm1, %v1785_v14  ;;  %1748 = vmatprep.mubr.msk.bf16.mxu1 %vm245_vm1, %v1786_v15 }
  0x1e   :  { %1717 = vmatmul.mubr.msk.bf16.gmra.mxu0 %vm245_vm1, %v1787_v16  ;;  %1749 = vmatmul.mubr.msk.bf16.gmra.mxu1 %vm245_vm1, %v1788_v17 }
  0x1f   :  { %1720 = vmatprep.mubr.msk.bf16.mxu0 %vm245_vm1, %v1789_v18  ;;  %1752 = vmatprep.mubr.msk.bf16.mxu1 %vm245_vm1, %v1790_v19 }
  0x26   :  { %1721 = vmatmul.mubr.msk.bf16.gmra.mxu0 %vm245_vm1, %v1791_v20  ;;  %1753 = vmatmul.mubr.msk.bf16.gmra.mxu1 %vm245_vm1, %v1792_v21 }
  0x27   :  { %1724 = vmatprep.mubr.msk.bf16.mxu0 %vm245_vm1, %v1793_v22  ;;  %1756 = vmatprep.mubr.msk.bf16.mxu1 %vm245_vm1, %v1794_v23 }
  0x2e   :  { %1725 = vmatmul.mubr.msk.bf16.gmra.mxu0 %vm245_vm1, %v1795_v24  ;;  %1757 = vmatmul.mubr.msk.bf16.gmra.mxu1 %vm245_vm1, %v1796_v25 }
  0x2f   :  { %1728 = vmatprep.mubr.msk.bf16.mxu0 %vm245_vm1, %v1797_v26  ;;  %1760 = vmatprep.mubr.msk.bf16.mxu1 %vm245_vm1, %v1798_v27 }
  0x36   :  { %1729 = vmatmul.mubr.msk.bf16.gmra.mxu0 %vm245_vm1, %v1799_v28  ;;  %1761 = vmatmul.mubr.msk.bf16.gmra.mxu1 %vm245_vm1, %v1800_v29 }
  0x37   :  { %1732 = vmatprep.mubr.msk.bf16.mxu0 %vm245_vm1, %v1801_v30  ;;  %1764 = vmatprep.mubr.msk.bf16.mxu1 %vm245_vm1, %v1802_v31 }
  0x3e   :  { %1733 = vmatmul.mubr.msk.bf16.gmra.mxu0 %vm245_vm1, %v1803_v32  ;;  %1765 = vmatmul.mubr.msk.bf16.gmra.mxu1 %vm245_vm1, %v1804_v33 }
  0xc6   :  { %v1706_v34 = vpop.f32.mrf.mxu0  ;;  %v1738_v35 = vpop.f32.mrf.mxu1 }
  0xc7   :  { %v1543_v36 = vpack.c.bf16 %v1706_v34, %v1706_v34  ;;  %v958_v37 = vmax.f32 %v1706_v34, 0.0  ;;  %v1575_v38 = vpack.c.bf16 %v1738_v35, %v1738_v35  ;;  %v990_v39 = vmax.f32 %v1738_v35, 0.0 }
  0xc8   :  { %v380_v40 = vpop.f32.mrf.mxu0  ;;  %v508_v41 = vpop.f32.mrf.mxu1 }
  0xc9   :  { %894 = vst.msk [vmem:[%s2470_s2 + $0x8] sm:$0xf] %vm891_vm2, %v1543_v36  ;;  %v1607_v42 = vpack.c.bf16 %v958_v37, %v958_v37  ;;  %926 = vst.msk [vmem:[%s2470_s2 + $0x88] sm:$0xf] %vm891_vm2, %v1575_v38  ;;  %v1639_v43 = vpack.c.bf16 %v990_v39, %v990_v39  ;;  %v1541_v44 = vpack.c.bf16 %v380_v40, %v380_v40  ;;  %v956_v45 = vmax.f32 %v380_v40, 0.0 }
  0xca   :  { %v1573_v46 = vpack.c.bf16 %v508_v41, %v508_v41  ;;  %v988_v47 = vmax.f32 %v508_v41, 0.0  ;;  %v1707_v48 = vpop.f32.mrf.mxu0  ;;  %v1739_v49 = vpop.f32.mrf.mxu1 }
  0xcb   :  { %1278 = vst.msk [vmem:[%s2471_s3 + $0x8] sm:$0xf] %vm891_vm2, %v1607_v42  ;;  %1310 = vst.msk [vmem:[%s2471_s3 + $0x88] sm:$0xf] %vm891_vm2, %v1639_v43  ;;  %v1605_v50 = vpack.c.bf16 %v956_v45, %v956_v45  ;;  %v1544_v51 = vpack.c.bf16 %v1707_v48, %v1707_v48  ;;  %v959_v52 = vmax.f32 %v1707_v48, 0.0  ;;  %v1576_v53 = vpack.c.bf16 %v1739_v49, %v1739_v49 }
  0xcc   :  { %892 = vst.msk [vmem:[%s2470_s2] sm:$0xf] %vm891_vm2, %v1541_v44  ;;  %924 = vst.msk [vmem:[%s2470_s2 + $0x80] sm:$0xf] %vm891_vm2, %v1573_v46  ;;  %v1637_v54 = vpack.c.bf16 %v988_v47, %v988_v47  ;;  %v991_v55 = vmax.f32 %v1739_v49, 0.0  ;;  %v383_v56 = vpop.f32.mrf.mxu0  ;;  %v511_v57 = vpop.f32.mrf.mxu1 }
  0xcd   :  { %1276 = vst.msk [vmem:[%s2471_s3] sm:$0xf] %vm891_vm2, %v1605_v50  ;;  %895 = vst.msk [vmem:[%s2470_s2 + $0xc] sm:$0xf] %vm891_vm2, %v1544_v51  ;;  %v1608_v58 = vpack.c.bf16 %v959_v52, %v959_v52  ;;  %v1542_v59 = vpack.c.bf16 %v383_v56, %v383_v56  ;;  %v957_v60 = vmax.f32 %v383_v56, 0.0  ;;  %v1574_v61 = vpack.c.bf16 %v511_v57, %v511_v57 }
  0xce   :  { %927 = vst.msk [vmem:[%s2470_s2 + $0x8c] sm:$0xf] %vm891_vm2, %v1576_v53  ;;  %1308 = vst.msk [vmem:[%s2471_s3 + $0x80] sm:$0xf] %vm891_vm2, %v1637_v54  ;;  %v1640_v62 = vpack.c.bf16 %v991_v55, %v991_v55  ;;  %v989_v63 = vmax.f32 %v511_v57, 0.0  ;;  %v1710_v0 = vpop.f32.mrf.mxu0  ;;  %v1742_v1 = vpop.f32.mrf.mxu1 }
  0xcf   :  { %1279 = vst.msk [vmem:[%s2471_s3 + $0xc] sm:$0xf] %vm891_vm2, %v1608_v58  ;;  %893 = vst.msk [vmem:[%s2470_s2 + $0x4] sm:$0xf] %vm891_vm2, %v1542_v59  ;;  %v1606_v2 = vpack.c.bf16 %v957_v60, %v957_v60  ;;  %v1547_v3 = vpack.c.bf16 %v1710_v0, %v1710_v0  ;;  %v962_v4 = vmax.f32 %v1710_v0, 0.0  ;;  %v1579_v5 = vpack.c.bf16 %v1742_v1, %v1742_v1 }
  0xd0   :  { %925 = vst.msk [vmem:[%s2470_s2 + $0x84] sm:$0xf] %vm891_vm2, %v1574_v61  ;;  %1311 = vst.msk [vmem:[%s2471_s3 + $0x8c] sm:$0xf] %vm891_vm2, %v1640_v62  ;;  %v1638_v6 = vpack.c.bf16 %v989_v63, %v989_v63  ;;  %v994_v7 = vmax.f32 %v1742_v1, 0.0  ;;  %v396_v8 = vpop.f32.mrf.mxu0  ;;  %v524_v9 = vpop.f32.mrf.mxu1 }
  0xd1   :  { %1277 = vst.msk [vmem:[%s2471_s3 + $0x4] sm:$0xf] %vm891_vm2, %v1606_v2  ;;  %898 = vst.msk [vmem:[%s2470_s2 + $0x18] sm:$0xf] %vm891_vm2, %v1547_v3  ;;  %v1611_v10 = vpack.c.bf16 %v962_v4, %v962_v4  ;;  %v1545_v11 = vpack.c.bf16 %v396_v8, %v396_v8  ;;  %v960_v12 = vmax.f32 %v396_v8, 0.0  ;;  %v1577_v13 = vpack.c.bf16 %v524_v9, %v524_v9 }
  0xd2   :  { %930 = vst.msk [vmem:[%s2470_s2 + $0x98] sm:$0xf] %vm891_vm2, %v1579_v5  ;;  %1309 = vst.msk [vmem:[%s2471_s3 + $0x84] sm:$0xf] %vm891_vm2, %v1638_v6  ;;  %v1643_v14 = vpack.c.bf16 %v994_v7, %v994_v7  ;;  %v992_v15 = vmax.f32 %v524_v9, 0.0  ;;  %v1711_v16 = vpop.f32.mrf.mxu0  ;;  %v1743_v17 = vpop.f32.mrf.mxu1 }
  0xd3   :  { %1282 = vst.msk [vmem:[%s2471_s3 + $0x18] sm:$0xf] %vm891_vm2, %v1611_v10  ;;  %896 = vst.msk [vmem:[%s2470_s2 + $0x10] sm:$0xf] %vm891_vm2, %v1545_v11  ;;  %v1609_v18 = vpack.c.bf16 %v960_v12, %v960_v12  ;;  %v1548_v19 = vpack.c.bf16 %v1711_v16, %v1711_v16  ;;  %v963_v20 = vmax.f32 %v1711_v16, 0.0  ;;  %v1580_v21 = vpack.c.bf16 %v1743_v17, %v1743_v17 }
  0xd4   :  { %928 = vst.msk [vmem:[%s2470_s2 + $0x90] sm:$0xf] %vm891_vm2, %v1577_v13  ;;  %1314 = vst.msk [vmem:[%s2471_s3 + $0x98] sm:$0xf] %vm891_vm2, %v1643_v14  ;;  %v1641_v22 = vpack.c.bf16 %v992_v15, %v992_v15  ;;  %v995_v23 = vmax.f32 %v1743_v17, 0.0  ;;  %v399_v24 = vpop.f32.mrf.mxu0  ;;  %v527_v25 = vpop.f32.mrf.mxu1 }
  0xd5   :  { %1280 = vst.msk [vmem:[%s2471_s3 + $0x10] sm:$0xf] %vm891_vm2, %v1609_v18  ;;  %899 = vst.msk [vmem:[%s2470_s2 + $0x1c] sm:$0xf] %vm891_vm2, %v1548_v19  ;;  %v1612_v26 = vpack.c.bf16 %v963_v20, %v963_v20  ;;  %v1546_v27 = vpack.c.bf16 %v399_v24, %v399_v24  ;;  %v961_v28 = vmax.f32 %v399_v24, 0.0  ;;  %v1578_v29 = vpack.c.bf16 %v527_v25, %v527_v25 }
  0xd6   :  { %931 = vst.msk [vmem:[%s2470_s2 + $0x9c] sm:$0xf] %vm891_vm2, %v1580_v21  ;;  %1312 = vst.msk [vmem:[%s2471_s3 + $0x90] sm:$0xf] %vm891_vm2, %v1641_v22  ;;  %v1644_v30 = vpack.c.bf16 %v995_v23, %v995_v23  ;;  %v993_v31 = vmax.f32 %v527_v25, 0.0  ;;  %v1714_v32 = vpop.f32.mrf.mxu0  ;;  %v1746_v33 = vpop.f32.mrf.mxu1 }
  0xd7   :  { %1283 = vst.msk [vmem:[%s2471_s3 + $0x1c] sm:$0xf] %vm891_vm2, %v1612_v26  ;;  %897 = vst.msk [vmem:[%s2470_s2 + $0x14] sm:$0xf] %vm891_vm2, %v1546_v27  ;;  %v1610_v34 = vpack.c.bf16 %v961_v28, %v961_v28  ;;  %v1551_v35 = vpack.c.bf16 %v1714_v32, %v1714_v32  ;;  %v966_v36 = vmax.f32 %v1714_v32, 0.0  ;;  %v1583_v37 = vpack.c.bf16 %v1746_v33, %v1746_v33 }
  0xd8   :  { %929 = vst.msk [vmem:[%s2470_s2 + $0x94] sm:$0xf] %vm891_vm2, %v1578_v29  ;;  %1315 = vst.msk [vmem:[%s2471_s3 + $0x9c] sm:$0xf] %vm891_vm2, %v1644_v30  ;;  %v1642_v38 = vpack.c.bf16 %v993_v31, %v993_v31  ;;  %v998_v39 = vmax.f32 %v1746_v33, 0.0  ;;  %v412_v40 = vpop.f32.mrf.mxu0  ;;  %v540_v41 = vpop.f32.mrf.mxu1 }
  0xd9   :  { %1281 = vst.msk [vmem:[%s2471_s3 + $0x14] sm:$0xf] %vm891_vm2, %v1610_v34  ;;  %902 = vst.msk [vmem:[%s2470_s2 + $0x28] sm:$0xf] %vm891_vm2, %v1551_v35  ;;  %v1615_v42 = vpack.c.bf16 %v966_v36, %v966_v36  ;;  %v1549_v43 = vpack.c.bf16 %v412_v40, %v412_v40  ;;  %v964_v44 = vmax.f32 %v412_v40, 0.0  ;;  %v1581_v45 = vpack.c.bf16 %v540_v41, %v540_v41 }
  0xda   :  { %934 = vst.msk [vmem:[%s2470_s2 + $0xa8] sm:$0xf] %vm891_vm2, %v1583_v37  ;;  %1313 = vst.msk [vmem:[%s2471_s3 + $0x94] sm:$0xf] %vm891_vm2, %v1642_v38  ;;  %v1647_v46 = vpack.c.bf16 %v998_v39, %v998_v39  ;;  %v996_v47 = vmax.f32 %v540_v41, 0.0  ;;  %v1715_v48 = vpop.f32.mrf.mxu0  ;;  %v1747_v49 = vpop.f32.mrf.mxu1 }
  0xdb   :  { %1286 = vst.msk [vmem:[%s2471_s3 + $0x28] sm:$0xf] %vm891_vm2, %v1615_v42  ;;  %900 = vst.msk [vmem:[%s2470_s2 + $0x20] sm:$0xf] %vm891_vm2, %v1549_v43  ;;  %v1613_v50 = vpack.c.bf16 %v964_v44, %v964_v44  ;;  %v1552_v51 = vpack.c.bf16 %v1715_v48, %v1715_v48  ;;  %v967_v52 = vmax.f32 %v1715_v48, 0.0  ;;  %v1584_v53 = vpack.c.bf16 %v1747_v49, %v1747_v49 }
  0xdc   :  { %932 = vst.msk [vmem:[%s2470_s2 + $0xa0] sm:$0xf] %vm891_vm2, %v1581_v45  ;;  %1318 = vst.msk [vmem:[%s2471_s3 + $0xa8] sm:$0xf] %vm891_vm2, %v1647_v46  ;;  %v1645_v54 = vpack.c.bf16 %v996_v47, %v996_v47  ;;  %v999_v55 = vmax.f32 %v1747_v49, 0.0  ;;  %v415_v56 = vpop.f32.mrf.mxu0  ;;  %v543_v57 = vpop.f32.mrf.mxu1 }
  0xdd   :  { %1284 = vst.msk [vmem:[%s2471_s3 + $0x20] sm:$0xf] %vm891_vm2, %v1613_v50  ;;  %903 = vst.msk [vmem:[%s2470_s2 + $0x2c] sm:$0xf] %vm891_vm2, %v1552_v51  ;;  %v1616_v58 = vpack.c.bf16 %v967_v52, %v967_v52  ;;  %v1550_v59 = vpack.c.bf16 %v415_v56, %v415_v56  ;;  %v965_v60 = vmax.f32 %v415_v56, 0.0  ;;  %v1582_v61 = vpack.c.bf16 %v543_v57, %v543_v57 }
  0xde   :  { %935 = vst.msk [vmem:[%s2470_s2 + $0xac] sm:$0xf] %vm891_vm2, %v1584_v53  ;;  %1316 = vst.msk [vmem:[%s2471_s3 + $0xa0] sm:$0xf] %vm891_vm2, %v1645_v54  ;;  %v1648_v62 = vpack.c.bf16 %v999_v55, %v999_v55  ;;  %v997_v63 = vmax.f32 %v543_v57, 0.0  ;;  %v1718_v0 = vpop.f32.mrf.mxu0  ;;  %v1750_v1 = vpop.f32.mrf.mxu1 }
  0xdf   :  { %1287 = vst.msk [vmem:[%s2471_s3 + $0x2c] sm:$0xf] %vm891_vm2, %v1616_v58  ;;  %901 = vst.msk [vmem:[%s2470_s2 + $0x24] sm:$0xf] %vm891_vm2, %v1550_v59  ;;  %v1614_v2 = vpack.c.bf16 %v965_v60, %v965_v60  ;;  %v1555_v3 = vpack.c.bf16 %v1718_v0, %v1718_v0  ;;  %v970_v4 = vmax.f32 %v1718_v0, 0.0  ;;  %v1587_v5 = vpack.c.bf16 %v1750_v1, %v1750_v1 }
  0xe0   :  { %933 = vst.msk [vmem:[%s2470_s2 + $0xa4] sm:$0xf] %vm891_vm2, %v1582_v61  ;;  %1319 = vst.msk [vmem:[%s2471_s3 + $0xac] sm:$0xf] %vm891_vm2, %v1648_v62  ;;  %v1646_v6 = vpack.c.bf16 %v997_v63, %v997_v63  ;;  %v1002_v7 = vmax.f32 %v1750_v1, 0.0  ;;  %v428_v8 = vpop.f32.mrf.mxu0  ;;  %v556_v9 = vpop.f32.mrf.mxu1 }
  0xe1   :  { %1285 = vst.msk [vmem:[%s2471_s3 + $0x24] sm:$0xf] %vm891_vm2, %v1614_v2  ;;  %906 = vst.msk [vmem:[%s2470_s2 + $0x38] sm:$0xf] %vm891_vm2, %v1555_v3  ;;  %v1619_v10 = vpack.c.bf16 %v970_v4, %v970_v4  ;;  %v1553_v11 = vpack.c.bf16 %v428_v8, %v428_v8  ;;  %v968_v12 = vmax.f32 %v428_v8, 0.0  ;;  %v1585_v13 = vpack.c.bf16 %v556_v9, %v556_v9 }
  0xe2   :  { %938 = vst.msk [vmem:[%s2470_s2 + $0xb8] sm:$0xf] %vm891_vm2, %v1587_v5  ;;  %1317 = vst.msk [vmem:[%s2471_s3 + $0xa4] sm:$0xf] %vm891_vm2, %v1646_v6  ;;  %v1651_v14 = vpack.c.bf16 %v1002_v7, %v1002_v7  ;;  %v1000_v15 = vmax.f32 %v556_v9, 0.0  ;;  %v1719_v16 = vpop.f32.mrf.mxu0  ;;  %v1751_v17 = vpop.f32.mrf.mxu1 }
  0xe3   :  { %1290 = vst.msk [vmem:[%s2471_s3 + $0x38] sm:$0xf] %vm891_vm2, %v1619_v10  ;;  %904 = vst.msk [vmem:[%s2470_s2 + $0x30] sm:$0xf] %vm891_vm2, %v1553_v11  ;;  %v1617_v18 = vpack.c.bf16 %v968_v12, %v968_v12  ;;  %v1556_v19 = vpack.c.bf16 %v1719_v16, %v1719_v16  ;;  %v971_v20 = vmax.f32 %v1719_v16, 0.0  ;;  %v1588_v21 = vpack.c.bf16 %v1751_v17, %v1751_v17 }
  0xe4   :  { %936 = vst.msk [vmem:[%s2470_s2 + $0xb0] sm:$0xf] %vm891_vm2, %v1585_v13  ;;  %1322 = vst.msk [vmem:[%s2471_s3 + $0xb8] sm:$0xf] %vm891_vm2, %v1651_v14  ;;  %v1649_v22 = vpack.c.bf16 %v1000_v15, %v1000_v15  ;;  %v1003_v23 = vmax.f32 %v1751_v17, 0.0  ;;  %v431_v24 = vpop.f32.mrf.mxu0  ;;  %v559_v25 = vpop.f32.mrf.mxu1 }
  0xe5   :  { %1288 = vst.msk [vmem:[%s2471_s3 + $0x30] sm:$0xf] %vm891_vm2, %v1617_v18  ;;  %907 = vst.msk [vmem:[%s2470_s2 + $0x3c] sm:$0xf] %vm891_vm2, %v1556_v19  ;;  %v1620_v26 = vpack.c.bf16 %v971_v20, %v971_v20  ;;  %v1554_v27 = vpack.c.bf16 %v431_v24, %v431_v24  ;;  %v969_v28 = vmax.f32 %v431_v24, 0.0  ;;  %v1586_v29 = vpack.c.bf16 %v559_v25, %v559_v25 }
  0xe6   :  { %939 = vst.msk [vmem:[%s2470_s2 + $0xbc] sm:$0xf] %vm891_vm2, %v1588_v21  ;;  %1320 = vst.msk [vmem:[%s2471_s3 + $0xb0] sm:$0xf] %vm891_vm2, %v1649_v22  ;;  %v1652_v30 = vpack.c.bf16 %v1003_v23, %v1003_v23  ;;  %v1001_v31 = vmax.f32 %v559_v25, 0.0  ;;  %v1722_v32 = vpop.f32.mrf.mxu0  ;;  %v1754_v33 = vpop.f32.mrf.mxu1 }
  0xe7   :  { %1291 = vst.msk [vmem:[%s2471_s3 + $0x3c] sm:$0xf] %vm891_vm2, %v1620_v26  ;;  %905 = vst.msk [vmem:[%s2470_s2 + $0x34] sm:$0xf] %vm891_vm2, %v1554_v27  ;;  %v1618_v34 = vpack.c.bf16 %v969_v28, %v969_v28  ;;  %v1559_v35 = vpack.c.bf16 %v1722_v32, %v1722_v32  ;;  %v974_v36 = vmax.f32 %v1722_v32, 0.0  ;;  %v1591_v37 = vpack.c.bf16 %v1754_v33, %v1754_v33 }
  0xe8   :  { %937 = vst.msk [vmem:[%s2470_s2 + $0xb4] sm:$0xf] %vm891_vm2, %v1586_v29  ;;  %1323 = vst.msk [vmem:[%s2471_s3 + $0xbc] sm:$0xf] %vm891_vm2, %v1652_v30  ;;  %v1650_v38 = vpack.c.bf16 %v1001_v31, %v1001_v31  ;;  %v1006_v39 = vmax.f32 %v1754_v33, 0.0  ;;  %v444_v40 = vpop.f32.mrf.mxu0  ;;  %v572_v41 = vpop.f32.mrf.mxu1 }
  0xe9   :  { %1289 = vst.msk [vmem:[%s2471_s3 + $0x34] sm:$0xf] %vm891_vm2, %v1618_v34  ;;  %910 = vst.msk [vmem:[%s2470_s2 + $0x48] sm:$0xf] %vm891_vm2, %v1559_v35  ;;  %v1623_v42 = vpack.c.bf16 %v974_v36, %v974_v36  ;;  %v1557_v43 = vpack.c.bf16 %v444_v40, %v444_v40  ;;  %v972_v44 = vmax.f32 %v444_v40, 0.0  ;;  %v1589_v45 = vpack.c.bf16 %v572_v41, %v572_v41 }
  0xea   :  { %942 = vst.msk [vmem:[%s2470_s2 + $0xc8] sm:$0xf] %vm891_vm2, %v1591_v37  ;;  %1321 = vst.msk [vmem:[%s2471_s3 + $0xb4] sm:$0xf] %vm891_vm2, %v1650_v38  ;;  %v1655_v46 = vpack.c.bf16 %v1006_v39, %v1006_v39  ;;  %v1004_v47 = vmax.f32 %v572_v41, 0.0  ;;  %v1723_v48 = vpop.f32.mrf.mxu0  ;;  %v1755_v49 = vpop.f32.mrf.mxu1 }
  0xeb   :  { %1294 = vst.msk [vmem:[%s2471_s3 + $0x48] sm:$0xf] %vm891_vm2, %v1623_v42  ;;  %908 = vst.msk [vmem:[%s2470_s2 + $0x40] sm:$0xf] %vm891_vm2, %v1557_v43  ;;  %v1621_v50 = vpack.c.bf16 %v972_v44, %v972_v44  ;;  %v1560_v51 = vpack.c.bf16 %v1723_v48, %v1723_v48  ;;  %v975_v52 = vmax.f32 %v1723_v48, 0.0  ;;  %v1592_v53 = vpack.c.bf16 %v1755_v49, %v1755_v49 }
  0xec   :  { %940 = vst.msk [vmem:[%s2470_s2 + $0xc0] sm:$0xf] %vm891_vm2, %v1589_v45  ;;  %1326 = vst.msk [vmem:[%s2471_s3 + $0xc8] sm:$0xf] %vm891_vm2, %v1655_v46  ;;  %v1653_v54 = vpack.c.bf16 %v1004_v47, %v1004_v47  ;;  %v1007_v55 = vmax.f32 %v1755_v49, 0.0  ;;  %v447_v56 = vpop.f32.mrf.mxu0  ;;  %v575_v57 = vpop.f32.mrf.mxu1 }
  0xed   :  { %1292 = vst.msk [vmem:[%s2471_s3 + $0x40] sm:$0xf] %vm891_vm2, %v1621_v50  ;;  %911 = vst.msk [vmem:[%s2470_s2 + $0x4c] sm:$0xf] %vm891_vm2, %v1560_v51  ;;  %v1624_v58 = vpack.c.bf16 %v975_v52, %v975_v52  ;;  %v1558_v59 = vpack.c.bf16 %v447_v56, %v447_v56  ;;  %v973_v60 = vmax.f32 %v447_v56, 0.0  ;;  %v1590_v61 = vpack.c.bf16 %v575_v57, %v575_v57 }
  0xee   :  { %943 = vst.msk [vmem:[%s2470_s2 + $0xcc] sm:$0xf] %vm891_vm2, %v1592_v53  ;;  %1324 = vst.msk [vmem:[%s2471_s3 + $0xc0] sm:$0xf] %vm891_vm2, %v1653_v54  ;;  %v1656_v62 = vpack.c.bf16 %v1007_v55, %v1007_v55  ;;  %v1005_v63 = vmax.f32 %v575_v57, 0.0  ;;  %v1726_v0 = vpop.f32.mrf.mxu0  ;;  %v1758_v1 = vpop.f32.mrf.mxu1 }
  0xef   :  { %1295 = vst.msk [vmem:[%s2471_s3 + $0x4c] sm:$0xf] %vm891_vm2, %v1624_v58  ;;  %909 = vst.msk [vmem:[%s2470_s2 + $0x44] sm:$0xf] %vm891_vm2, %v1558_v59  ;;  %v1622_v2 = vpack.c.bf16 %v973_v60, %v973_v60  ;;  %v1563_v3 = vpack.c.bf16 %v1726_v0, %v1726_v0  ;;  %v978_v4 = vmax.f32 %v1726_v0, 0.0  ;;  %v1595_v5 = vpack.c.bf16 %v1758_v1, %v1758_v1 }
  0xf0   :  { %941 = vst.msk [vmem:[%s2470_s2 + $0xc4] sm:$0xf] %vm891_vm2, %v1590_v61  ;;  %1327 = vst.msk [vmem:[%s2471_s3 + $0xcc] sm:$0xf] %vm891_vm2, %v1656_v62  ;;  %v1654_v6 = vpack.c.bf16 %v1005_v63, %v1005_v63  ;;  %v1010_v7 = vmax.f32 %v1758_v1, 0.0  ;;  %v460_v8 = vpop.f32.mrf.mxu0  ;;  %v588_v9 = vpop.f32.mrf.mxu1 }
  0xf1   :  { %1293 = vst.msk [vmem:[%s2471_s3 + $0x44] sm:$0xf] %vm891_vm2, %v1622_v2  ;;  %914 = vst.msk [vmem:[%s2470_s2 + $0x58] sm:$0xf] %vm891_vm2, %v1563_v3  ;;  %v1627_v10 = vpack.c.bf16 %v978_v4, %v978_v4  ;;  %v1561_v11 = vpack.c.bf16 %v460_v8, %v460_v8  ;;  %v976_v12 = vmax.f32 %v460_v8, 0.0  ;;  %v1593_v13 = vpack.c.bf16 %v588_v9, %v588_v9 }
  0xf2   :  { %946 = vst.msk [vmem:[%s2470_s2 + $0xd8] sm:$0xf] %vm891_vm2, %v1595_v5  ;;  %1325 = vst.msk [vmem:[%s2471_s3 + $0xc4] sm:$0xf] %vm891_vm2, %v1654_v6  ;;  %v1659_v14 = vpack.c.bf16 %v1010_v7, %v1010_v7  ;;  %v1008_v15 = vmax.f32 %v588_v9, 0.0  ;;  %v1727_v16 = vpop.f32.mrf.mxu0  ;;  %v1759_v17 = vpop.f32.mrf.mxu1 }
  0xf3   :  { %1298 = vst.msk [vmem:[%s2471_s3 + $0x58] sm:$0xf] %vm891_vm2, %v1627_v10  ;;  %912 = vst.msk [vmem:[%s2470_s2 + $0x50] sm:$0xf] %vm891_vm2, %v1561_v11  ;;  %v1625_v18 = vpack.c.bf16 %v976_v12, %v976_v12  ;;  %v1564_v19 = vpack.c.bf16 %v1727_v16, %v1727_v16  ;;  %v979_v20 = vmax.f32 %v1727_v16, 0.0  ;;  %v1596_v21 = vpack.c.bf16 %v1759_v17, %v1759_v17 }
  0xf4   :  { %944 = vst.msk [vmem:[%s2470_s2 + $0xd0] sm:$0xf] %vm891_vm2, %v1593_v13  ;;  %1330 = vst.msk [vmem:[%s2471_s3 + $0xd8] sm:$0xf] %vm891_vm2, %v1659_v14  ;;  %v1657_v22 = vpack.c.bf16 %v1008_v15, %v1008_v15  ;;  %v1011_v23 = vmax.f32 %v1759_v17, 0.0  ;;  %v463_v24 = vpop.f32.mrf.mxu0  ;;  %v591_v25 = vpop.f32.mrf.mxu1 }
  0xf5   :  { %1296 = vst.msk [vmem:[%s2471_s3 + $0x50] sm:$0xf] %vm891_vm2, %v1625_v18  ;;  %915 = vst.msk [vmem:[%s2470_s2 + $0x5c] sm:$0xf] %vm891_vm2, %v1564_v19  ;;  %v1628_v26 = vpack.c.bf16 %v979_v20, %v979_v20  ;;  %v1562_v27 = vpack.c.bf16 %v463_v24, %v463_v24  ;;  %v977_v28 = vmax.f32 %v463_v24, 0.0  ;;  %v1594_v29 = vpack.c.bf16 %v591_v25, %v591_v25 }
  0xf6   :  { %947 = vst.msk [vmem:[%s2470_s2 + $0xdc] sm:$0xf] %vm891_vm2, %v1596_v21  ;;  %1328 = vst.msk [vmem:[%s2471_s3 + $0xd0] sm:$0xf] %vm891_vm2, %v1657_v22  ;;  %v1660_v30 = vpack.c.bf16 %v1011_v23, %v1011_v23  ;;  %v1009_v31 = vmax.f32 %v591_v25, 0.0  ;;  %v1730_v32 = vpop.f32.mrf.mxu0  ;;  %v1762_v33 = vpop.f32.mrf.mxu1 }
  0xf7   :  { %1299 = vst.msk [vmem:[%s2471_s3 + $0x5c] sm:$0xf] %vm891_vm2, %v1628_v26  ;;  %913 = vst.msk [vmem:[%s2470_s2 + $0x54] sm:$0xf] %vm891_vm2, %v1562_v27  ;;  %v1626_v34 = vpack.c.bf16 %v977_v28, %v977_v28  ;;  %v1567_v35 = vpack.c.bf16 %v1730_v32, %v1730_v32  ;;  %v982_v36 = vmax.f32 %v1730_v32, 0.0  ;;  %v1599_v37 = vpack.c.bf16 %v1762_v33, %v1762_v33 }
  0xf8   :  { %945 = vst.msk [vmem:[%s2470_s2 + $0xd4] sm:$0xf] %vm891_vm2, %v1594_v29  ;;  %1331 = vst.msk [vmem:[%s2471_s3 + $0xdc] sm:$0xf] %vm891_vm2, %v1660_v30  ;;  %v1658_v38 = vpack.c.bf16 %v1009_v31, %v1009_v31  ;;  %v1014_v39 = vmax.f32 %v1762_v33, 0.0  ;;  %v476_v40 = vpop.f32.mrf.mxu0  ;;  %v604_v41 = vpop.f32.mrf.mxu1 }
  0xf9   :  { %1297 = vst.msk [vmem:[%s2471_s3 + $0x54] sm:$0xf] %vm891_vm2, %v1626_v34  ;;  %918 = vst.msk [vmem:[%s2470_s2 + $0x68] sm:$0xf] %vm891_vm2, %v1567_v35  ;;  %v1631_v42 = vpack.c.bf16 %v982_v36, %v982_v36  ;;  %v1565_v43 = vpack.c.bf16 %v476_v40, %v476_v40  ;;  %v980_v44 = vmax.f32 %v476_v40, 0.0  ;;  %v1597_v45 = vpack.c.bf16 %v604_v41, %v604_v41 }
  0xfa   :  { %950 = vst.msk [vmem:[%s2470_s2 + $0xe8] sm:$0xf] %vm891_vm2, %v1599_v37  ;;  %1329 = vst.msk [vmem:[%s2471_s3 + $0xd4] sm:$0xf] %vm891_vm2, %v1658_v38  ;;  %v1663_v46 = vpack.c.bf16 %v1014_v39, %v1014_v39  ;;  %v1012_v47 = vmax.f32 %v604_v41, 0.0  ;;  %v1731_v48 = vpop.f32.mrf.mxu0  ;;  %v1763_v49 = vpop.f32.mrf.mxu1 }
  0xfb   :  { %1302 = vst.msk [vmem:[%s2471_s3 + $0x68] sm:$0xf] %vm891_vm2, %v1631_v42  ;;  %916 = vst.msk [vmem:[%s2470_s2 + $0x60] sm:$0xf] %vm891_vm2, %v1565_v43  ;;  %v1629_v50 = vpack.c.bf16 %v980_v44, %v980_v44  ;;  %v1568_v51 = vpack.c.bf16 %v1731_v48, %v1731_v48  ;;  %v983_v52 = vmax.f32 %v1731_v48, 0.0  ;;  %v1600_v53 = vpack.c.bf16 %v1763_v49, %v1763_v49 }
  0xfc   :  { %948 = vst.msk [vmem:[%s2470_s2 + $0xe0] sm:$0xf] %vm891_vm2, %v1597_v45  ;;  %1334 = vst.msk [vmem:[%s2471_s3 + $0xe8] sm:$0xf] %vm891_vm2, %v1663_v46  ;;  %v1661_v54 = vpack.c.bf16 %v1012_v47, %v1012_v47  ;;  %v1015_v55 = vmax.f32 %v1763_v49, 0.0  ;;  %v479_v56 = vpop.f32.mrf.mxu0  ;;  %v607_v57 = vpop.f32.mrf.mxu1 }
  0xfd   :  { %1300 = vst.msk [vmem:[%s2471_s3 + $0x60] sm:$0xf] %vm891_vm2, %v1629_v50  ;;  %919 = vst.msk [vmem:[%s2470_s2 + $0x6c] sm:$0xf] %vm891_vm2, %v1568_v51  ;;  %v1632_v58 = vpack.c.bf16 %v983_v52, %v983_v52  ;;  %v1566_v59 = vpack.c.bf16 %v479_v56, %v479_v56  ;;  %v981_v60 = vmax.f32 %v479_v56, 0.0  ;;  %v1598_v61 = vpack.c.bf16 %v607_v57, %v607_v57 }
  0xfe   :  { %951 = vst.msk [vmem:[%s2470_s2 + $0xec] sm:$0xf] %vm891_vm2, %v1600_v53  ;;  %1332 = vst.msk [vmem:[%s2471_s3 + $0xe0] sm:$0xf] %vm891_vm2, %v1661_v54  ;;  %v1664_v62 = vpack.c.bf16 %v1015_v55, %v1015_v55  ;;  %v1013_v63 = vmax.f32 %v607_v57, 0.0  ;;  %v1734_v0 = vpop.f32.mrf.mxu0  ;;  %v1766_v1 = vpop.f32.mrf.mxu1 }
  0xff   :  { %1303 = vst.msk [vmem:[%s2471_s3 + $0x6c] sm:$0xf] %vm891_vm2, %v1632_v58  ;;  %917 = vst.msk [vmem:[%s2470_s2 + $0x64] sm:$0xf] %vm891_vm2, %v1566_v59  ;;  %v1630_v2 = vpack.c.bf16 %v981_v60, %v981_v60  ;;  %v1571_v3 = vpack.c.bf16 %v1734_v0, %v1734_v0  ;;  %v986_v4 = vmax.f32 %v1734_v0, 0.0  ;;  %v1603_v5 = vpack.c.bf16 %v1766_v1, %v1766_v1 }
 0x100   :  { %949 = vst.msk [vmem:[%s2470_s2 + $0xe4] sm:$0xf] %vm891_vm2, %v1598_v61  ;;  %1335 = vst.msk [vmem:[%s2471_s3 + $0xec] sm:$0xf] %vm891_vm2, %v1664_v62  ;;  %v1662_v6 = vpack.c.bf16 %v1013_v63, %v1013_v63  ;;  %v1018_v7 = vmax.f32 %v1766_v1, 0.0  ;;  %v492_v8 = vpop.f32.mrf.mxu0  ;;  %v620_v9 = vpop.f32.mrf.mxu1 }
 0x101   :  { %1301 = vst.msk [vmem:[%s2471_s3 + $0x64] sm:$0xf] %vm891_vm2, %v1630_v2  ;;  %922 = vst.msk [vmem:[%s2470_s2 + $0x78] sm:$0xf] %vm891_vm2, %v1571_v3  ;;  %v1635_v10 = vpack.c.bf16 %v986_v4, %v986_v4  ;;  %v1569_v11 = vpack.c.bf16 %v492_v8, %v492_v8  ;;  %v984_v12 = vmax.f32 %v492_v8, 0.0  ;;  %v1601_v13 = vpack.c.bf16 %v620_v9, %v620_v9 }
 0x102   :  { %954 = vst.msk [vmem:[%s2470_s2 + $0xf8] sm:$0xf] %vm891_vm2, %v1603_v5  ;;  %1333 = vst.msk [vmem:[%s2471_s3 + $0xe4] sm:$0xf] %vm891_vm2, %v1662_v6  ;;  %v1667_v14 = vpack.c.bf16 %v1018_v7, %v1018_v7  ;;  %v1016_v15 = vmax.f32 %v620_v9, 0.0  ;;  %v1735_v16 = vpop.f32.mrf.mxu0  ;;  %v1767_v17 = vpop.f32.mrf.mxu1 }
 0x103   :  { %1306 = vst.msk [vmem:[%s2471_s3 + $0x78] sm:$0xf] %vm891_vm2, %v1635_v10  ;;  %920 = vst.msk [vmem:[%s2470_s2 + $0x70] sm:$0xf] %vm891_vm2, %v1569_v11  ;;  %v1633_v18 = vpack.c.bf16 %v984_v12, %v984_v12  ;;  %v1572_v19 = vpack.c.bf16 %v1735_v16, %v1735_v16  ;;  %v987_v20 = vmax.f32 %v1735_v16, 0.0  ;;  %v1604_v21 = vpack.c.bf16 %v1767_v17, %v1767_v17 }
 0x104   :  { %952 = vst.msk [vmem:[%s2470_s2 + $0xf0] sm:$0xf] %vm891_vm2, %v1601_v13  ;;  %1338 = vst.msk [vmem:[%s2471_s3 + $0xf8] sm:$0xf] %vm891_vm2, %v1667_v14  ;;  %v1665_v22 = vpack.c.bf16 %v1016_v15, %v1016_v15  ;;  %v1019_v23 = vmax.f32 %v1767_v17, 0.0  ;;  %v495_v24 = vpop.f32.mrf.mxu0  ;;  %v623_v25 = vpop.f32.mrf.mxu1 }
 0x105   :  { %1304 = vst.msk [vmem:[%s2471_s3 + $0x70] sm:$0xf] %vm891_vm2, %v1633_v18  ;;  %923 = vst.msk [vmem:[%s2470_s2 + $0x7c] sm:$0xf] %vm891_vm2, %v1572_v19  ;;  %v1636_v26 = vpack.c.bf16 %v987_v20, %v987_v20  ;;  %v1570_v27 = vpack.c.bf16 %v495_v24, %v495_v24  ;;  %v985_v28 = vmax.f32 %v495_v24, 0.0  ;;  %v1602_v29 = vpack.c.bf16 %v623_v25, %v623_v25 }
 0x106   :  { %955 = vst.msk [vmem:[%s2470_s2 + $0xfc] sm:$0xf] %vm891_vm2, %v1604_v21  ;;  %1336 = vst.msk [vmem:[%s2471_s3 + $0xf0] sm:$0xf] %vm891_vm2, %v1665_v22  ;;  %v1668_v30 = vpack.c.bf16 %v1019_v23, %v1019_v23  ;;  %v1017_v31 = vmax.f32 %v623_v25, 0.0 }
 0x107   :  { %1307 = vst.msk [vmem:[%s2471_s3 + $0x7c] sm:$0xf] %vm891_vm2, %v1636_v26  ;;  %921 = vst.msk [vmem:[%s2470_s2 + $0x74] sm:$0xf] %vm891_vm2, %v1570_v27  ;;  %v1634_v32 = vpack.c.bf16 %v985_v28, %v985_v28 }
 0x108   :  { %953 = vst.msk [vmem:[%s2470_s2 + $0xf4] sm:$0xf] %vm891_vm2, %v1602_v29  ;;  %1339 = vst.msk [vmem:[%s2471_s3 + $0xfc] sm:$0xf] %vm891_vm2, %v1668_v30  ;;  %v1666_v33 = vpack.c.bf16 %v1017_v31, %v1017_v31 }
 0x109   :  { %1305 = vst.msk [vmem:[%s2471_s3 + $0x74] sm:$0xf] %vm891_vm2, %v1634_v32 }
 0x10a   :  { %1337 = vst.msk [vmem:[%s2471_s3 + $0xf4] sm:$0xf] %vm891_vm2, %v1666_v33 }

// kernel: unet3d_forward.29
= control target key start
LH: loop header
LB: loop body
LE: loop exit
PB: predicated region body
PF: predicated region fallthrough
CT: control target
= control target key end

     0   :  { %vm473_vm0 = vcmask 1045504   ;;  %vm376_vm1 = vcmask 97280   ;;  %vm1022_vm2 = vcmask 27648   ;;  %s3115_s1 = inlined_call_operand.vmem [shape: bf16[12,4], index: 1, kind: input, shape index: {}]   ;;  %s3116_s0 = inlined_call_operand.vmem [shape: bf16[512,12], index: 0, kind: input, shape index: {}]   ;;  %s3117_s2 = inlined_call_operand.vmem [shape: bf16[512,4], index: 2, kind: input, shape index: {}]   ;;  %s3118_s3 = inlined_call_operand.vmem [shape: bf16[512,4], index: 3, kind: output, shape index: {0}]   ;;  %s3119_s4 = inlined_call_operand.vmem [shape: bf16[512,4], index: 4, kind: output, shape index: {1}]  }
   0x1   :  { %v2062_v0 = vld [vmem:[%s3115_s1] sm:$0x3f]   ;;  %v2065_v4 = vld [vmem:[%s3116_s0 + $0x8] sm:$0xff]   ;;  %v2067_v6 = vld [vmem:[%s3116_s0 + $0x10] sm:$0xff]  }
   0x2   :  { %v2063_v1 = vld [vmem:[%s3116_s0] sm:$0xff]   ;;  %2060 = vmatprep.subr.msk.bf16.mxu0 %vm473_vm0, %v2062_v0  ;;  %2061 = vmatprep.subr.msk.bf16.mxu1 %vm473_vm0, %v2062_v0  ;;  %v475_v2 = vsel %vm473_vm0, %v2062_v0, 0  ;;  %v2066_v5 = vld [vmem:[%s3116_s0 + $0x88] sm:$0xff]   ;;  %v2068_v7 = vld [vmem:[%s3116_s0 + $0x90] sm:$0xff]  }
   0x3   :  { %v2064_v3 = vld [vmem:[%s3116_s0 + $0x80] sm:$0xff]   ;;  %1993 = vmatpush3.bf16.msra.mxu0 %v475_v2  ;;  %2059 = vmatpush3.bf16.msra.mxu1 %v475_v2  ;;  %v2069_v8 = vld [vmem:[%s3116_s0 + $0x18] sm:$0xff]   ;;  %v2073_v12 = vld [vmem:[%s3116_s0 + $0x28] sm:$0xff]  }
   0x4   :  { %1994 = vmatprep.mubr.msk.bf16.mxu0 %vm376_vm1, %v2063_v1  ;;  %2026 = vmatprep.mubr.msk.bf16.mxu1 %vm376_vm1, %v2064_v3  ;;  %v2070_v9 = vld [vmem:[%s3116_s0 + $0x98] sm:$0xff]   ;;  %v2071_v10 = vld [vmem:[%s3116_s0 + $0x20] sm:$0xff]   ;;  %v2074_v13 = vld [vmem:[%s3116_s0 + $0xa8] sm:$0xff]  }
   0x5   :  { %v2072_v11 = vld [vmem:[%s3116_s0 + $0xa0] sm:$0xff]   ;;  %v2075_v14 = vld [vmem:[%s3116_s0 + $0x30] sm:$0xff]   ;;  %v2077_v16 = vld [vmem:[%s3116_s0 + $0x38] sm:$0xff]  }
   0x6   :  { %1995 = vmatmul.mubr.msk.bf16.vlgmr.msra.gmra.mxu0 %vm376_vm1, %v2065_v4  ;;  %2027 = vmatmul.mubr.msk.bf16.vlgmr.msra.gmra.mxu1 %vm376_vm1, %v2066_v5  ;;  %v2076_v15 = vld [vmem:[%s3116_s0 + $0xb0] sm:$0xff]   ;;  %v2078_v17 = vld [vmem:[%s3116_s0 + $0xb8] sm:$0xff]   ;;  %v2079_v18 = vld [vmem:[%s3116_s0 + $0x40] sm:$0xff]  }
   0x7   :  { %1998 = vmatprep.mubr.msk.bf16.mxu0 %vm376_vm1, %v2067_v6  ;;  %2030 = vmatprep.mubr.msk.bf16.mxu1 %vm376_vm1, %v2068_v7  ;;  %v2080_v19 = vld [vmem:[%s3116_s0 + $0xc0] sm:$0xff]   ;;  %v2081_v20 = vld [vmem:[%s3116_s0 + $0x48] sm:$0xff]   ;;  %v2083_v22 = vld [vmem:[%s3116_s0 + $0x50] sm:$0xff]  }
   0x8   :  { %v2082_v21 = vld [vmem:[%s3116_s0 + $0xc8] sm:$0xff]   ;;  %v2084_v23 = vld [vmem:[%s3116_s0 + $0xd0] sm:$0xff]   ;;  %v2085_v24 = vld [vmem:[%s3116_s0 + $0x58] sm:$0xff]  }
   0x9   :  { %v2086_v25 = vld [vmem:[%s3116_s0 + $0xd8] sm:$0xff]   ;;  %v2087_v26 = vld [vmem:[%s3116_s0 + $0x60] sm:$0xff]   ;;  %v2089_v28 = vld [vmem:[%s3116_s0 + $0x68] sm:$0xff]  }
   0xa   :  { %v2088_v27 = vld [vmem:[%s3116_s0 + $0xe0] sm:$0xff]   ;;  %v2090_v29 = vld [vmem:[%s3116_s0 + $0xe8] sm:$0xff]   ;;  %v2091_v30 = vld [vmem:[%s3116_s0 + $0x70] sm:$0xff]  }
   0xb   :  { %v2092_v31 = vld [vmem:[%s3116_s0 + $0xf0] sm:$0xff]   ;;  %v2093_v32 = vld [vmem:[%s3116_s0 + $0x78] sm:$0xff]   ;;  %v2254_v34 = vld [vmem:[%s3117_s2 + $0x8] sm:$0xff]  }
   0xc   :  { %v2094_v33 = vld [vmem:[%s3116_s0 + $0xf8] sm:$0xff]   ;;  %v2259_v35 = vld [vmem:[%s3117_s2 + $0x88] sm:$0xff]   ;;  %v2264_v36 = vld [vmem:[%s3117_s2] sm:$0xff]   ;;  %v1806_v42 = vunpack.c.l.bf16 %v2254_v34  ;;  %v1807_v47 = vunpack.c.h.bf16 %v2254_v34 }
   0xd   :  { %v2269_v37 = vld [vmem:[%s3117_s2 + $0x80] sm:$0xff]   ;;  %v2274_v38 = vld [vmem:[%s3117_s2 + $0x18] sm:$0xff]   ;;  %v2284_v40 = vld [vmem:[%s3117_s2 + $0x10] sm:$0xff]   ;;  %v1870_v43 = vunpack.c.l.bf16 %v2259_v35  ;;  %v1802_v44 = vunpack.c.l.bf16 %v2264_v36  ;;  %v1871_v48 = vunpack.c.h.bf16 %v2259_v35  ;;  %v1803_v49 = vunpack.c.h.bf16 %v2264_v36 }
   0xe   :  { %1999 = vmatmul.mubr.msk.bf16.gmra.mxu0 %vm376_vm1, %v2069_v8  ;;  %2031 = vmatmul.mubr.msk.bf16.gmra.mxu1 %vm376_vm1, %v2070_v9  ;;  %v2279_v39 = vld [vmem:[%s3117_s2 + $0x98] sm:$0xff]   ;;  %v2289_v41 = vld [vmem:[%s3117_s2 + $0x90] sm:$0xff]   ;;  %v1866_v45 = vunpack.c.l.bf16 %v2269_v37  ;;  %v2298_v46 = vld [vmem:[%s3117_s2 + $0x28] sm:$0xff]   ;;  %v1867_v50 = vunpack.c.h.bf16 %v2269_v37  ;;  %v1814_v54 = vunpack.c.l.bf16 %v2274_v38  ;;  %v1810_v56 = vunpack.c.l.bf16 %v2284_v40 }
   0xf   :  { %2002 = vmatprep.mubr.msk.bf16.mxu0 %vm376_vm1, %v2071_v10  ;;  %2034 = vmatprep.mubr.msk.bf16.mxu1 %vm376_vm1, %v2072_v11  ;;  %v2307_v51 = vld [vmem:[%s3117_s2 + $0xa8] sm:$0xff]   ;;  %v2312_v52 = vld [vmem:[%s3117_s2 + $0x20] sm:$0xff]   ;;  %v1878_v55 = vunpack.c.l.bf16 %v2279_v39  ;;  %v1874_v57 = vunpack.c.l.bf16 %v2289_v41  ;;  %v2326_v58 = vld [vmem:[%s3117_s2 + $0x38] sm:$0xff]   ;;  %v1815_v59 = vunpack.c.h.bf16 %v2274_v38  ;;  %v1879_v60 = vunpack.c.h.bf16 %v2279_v39 }
  0x10   :  { %v2317_v53 = vld [vmem:[%s3117_s2 + $0xa0] sm:$0xff]   ;;  %v1811_v61 = vunpack.c.h.bf16 %v2284_v40  ;;  %v1875_v62 = vunpack.c.h.bf16 %v2289_v41  ;;  %v2335_v63 = vld [vmem:[%s3117_s2 + $0xb8] sm:$0xff]   ;;  %v2340_v0 = vld [vmem:[%s3117_s2 + $0x30] sm:$0xff]   ;;  %v1822_v2 = vunpack.c.l.bf16 %v2298_v46  ;;  %v1886_v3 = vunpack.c.l.bf16 %v2307_v51 }
  0x11   :  { %v2345_v1 = vld [vmem:[%s3117_s2 + $0xb0] sm:$0xff]   ;;  %v2354_v6 = vld [vmem:[%s3117_s2 + $0x48] sm:$0xff]  }
  0x12   :  { %v2363_v11 = vld [vmem:[%s3117_s2 + $0xc8] sm:$0xff]  }
  0x16   :  { %2003 = vmatmul.mubr.msk.bf16.gmra.mxu0 %vm376_vm1, %v2073_v12  ;;  %2035 = vmatmul.mubr.msk.bf16.gmra.mxu1 %vm376_vm1, %v2074_v13  ;;  %v2368_v12 = vld [vmem:[%s3117_s2 + $0x40] sm:$0xff]  }
  0x17   :  { %2006 = vmatprep.mubr.msk.bf16.mxu0 %vm376_vm1, %v2075_v14  ;;  %2038 = vmatprep.mubr.msk.bf16.mxu1 %vm376_vm1, %v2076_v15  ;;  %v2373_v13 = vld [vmem:[%s3117_s2 + $0xc0] sm:$0xff]  }
  0x1e   :  { %2007 = vmatmul.mubr.msk.bf16.gmra.mxu0 %vm376_vm1, %v2077_v16  ;;  %2039 = vmatmul.mubr.msk.bf16.gmra.mxu1 %vm376_vm1, %v2078_v17  ;;  %v2442_v17 = vld [vmem:[%s3117_s2 + $0x78] sm:$0xff]  }
  0x1f   :  { %2010 = vmatprep.mubr.msk.bf16.mxu0 %vm376_vm1, %v2079_v18  ;;  %2042 = vmatprep.mubr.msk.bf16.mxu1 %vm376_vm1, %v2080_v19  ;;  %v2382_v18 = vld [vmem:[%s3117_s2 + $0x58] sm:$0xff]   ;;  %v2456_v19 = vld [vmem:[%s3117_s2 + $0x70] sm:$0xff]  }
  0x26   :  { %2011 = vmatmul.mubr.msk.bf16.gmra.mxu0 %vm376_vm1, %v2081_v20  ;;  %2043 = vmatmul.mubr.msk.bf16.gmra.mxu1 %vm376_vm1, %v2082_v21 }
  0x27   :  { %2014 = vmatprep.mubr.msk.bf16.mxu0 %vm376_vm1, %v2083_v22  ;;  %2046 = vmatprep.mubr.msk.bf16.mxu1 %vm376_vm1, %v2084_v23  ;;  %v2391_v23 = vld [vmem:[%s3117_s2 + $0xd8] sm:$0xff]   ;;  %v2461_v22 = vld [vmem:[%s3117_s2 + $0xf0] sm:$0xff]  }
  0x2e   :  { %2015 = vmatmul.mubr.msk.bf16.gmra.mxu0 %vm376_vm1, %v2085_v24  ;;  %2047 = vmatmul.mubr.msk.bf16.gmra.mxu1 %vm376_vm1, %v2086_v25  ;;  %v2396_v24 = vld [vmem:[%s3117_s2 + $0x50] sm:$0xff]  }
  0x2f   :  { %2018 = vmatprep.mubr.msk.bf16.mxu0 %vm376_vm1, %v2087_v26  ;;  %2050 = vmatprep.mubr.msk.bf16.mxu1 %vm376_vm1, %v2088_v27  ;;  %v2401_v25 = vld [vmem:[%s3117_s2 + $0xd0] sm:$0xff]   ;;  %v2419_v27 = vld [vmem:[%s3117_s2 + $0xe8] sm:$0xff]  }
  0x36   :  { %2019 = vmatmul.mubr.msk.bf16.gmra.mxu0 %vm376_vm1, %v2089_v28  ;;  %2051 = vmatmul.mubr.msk.bf16.gmra.mxu1 %vm376_vm1, %v2090_v29  ;;  %v2424_v29 = vld [vmem:[%s3117_s2 + $0x60] sm:$0xff]  }
  0x37   :  { %2022 = vmatprep.mubr.msk.bf16.mxu0 %vm376_vm1, %v2091_v30  ;;  %2054 = vmatprep.mubr.msk.bf16.mxu1 %vm376_vm1, %v2092_v31  ;;  %v2410_v30 = vld [vmem:[%s3117_s2 + $0x68] sm:$0xff]   ;;  %v2429_v31 = vld [vmem:[%s3117_s2 + $0xe0] sm:$0xff]  }
  0x3e   :  { %2023 = vmatmul.mubr.msk.bf16.gmra.mxu0 %vm376_vm1, %v2093_v32  ;;  %2055 = vmatmul.mubr.msk.bf16.gmra.mxu1 %vm376_vm1, %v2094_v33  ;;  %v2447_v33 = vld [vmem:[%s3117_s2 + $0xf8] sm:$0xff]  }
  0xc6   :  { %v1996_v32 = vpop.f32.mrf.mxu0  ;;  %v2028_v16 = vpop.f32.mrf.mxu1 }
  0xc7   :  { %v520_v15 = vadd.f32 %v1996_v32, %v1806_v42  ;;  %v648_v14 = vadd.f32 %v2028_v16, %v1870_v43 }
  0xc8   :  { %v511_v8 = vpop.f32.mrf.mxu0  ;;  %v639_v7 = vpop.f32.mrf.mxu1 }
  0xc9   :  { %v1674_v5 = vpack.c.bf16 %v520_v15, %v520_v15  ;;  %v1089_v4 = vmax.f32 %v520_v15, 0.0  ;;  %v1706_v42 = vpack.c.bf16 %v648_v14, %v648_v14  ;;  %v1121_v32 = vmax.f32 %v648_v14, 0.0 }
  0xca   :  { %v512_v43 = vadd.f32 %v1802_v44, %v511_v8  ;;  %v640_v16 = vadd.f32 %v1866_v45, %v639_v7  ;;  %v1997_v9 = vpop.f32.mrf.mxu0  ;;  %v2029_v10 = vpop.f32.mrf.mxu1 }
  0xcb   :  { %1025 = vst.msk [vmem:[%s3118_s3 + $0x8] sm:$0xf] %vm1022_vm2, %v1674_v5  ;;  %v1738_v15 = vpack.c.bf16 %v1089_v4, %v1089_v4  ;;  %1057 = vst.msk [vmem:[%s3118_s3 + $0x88] sm:$0xf] %vm1022_vm2, %v1706_v42  ;;  %v1770_v44 = vpack.c.bf16 %v1121_v32, %v1121_v32  ;;  %v523_v45 = vadd.f32 %v1997_v9, %v1807_v47 }
  0xcc   :  { %v651_v7 = vadd.f32 %v2029_v10, %v1871_v48  ;;  %v1672_v8 = vpack.c.bf16 %v512_v43, %v512_v43  ;;  %v1087_v14 = vmax.f32 %v512_v43, 0.0  ;;  %v1704_v26 = vpack.c.bf16 %v640_v16, %v640_v16  ;;  %v514_v20 = vpop.f32.mrf.mxu0  ;;  %v642_v21 = vpop.f32.mrf.mxu1 }
  0xcd   :  { %v1119_v28 = vmax.f32 %v640_v16, 0.0  ;;  %1409 = vst.msk [vmem:[%s3119_s4 + $0x8] sm:$0xf] %vm1022_vm2, %v1738_v15  ;;  %1441 = vst.msk [vmem:[%s3119_s4 + $0x88] sm:$0xf] %vm1022_vm2, %v1770_v44  ;;  %v1675_v34 = vpack.c.bf16 %v523_v45, %v523_v45  ;;  %v1090_v47 = vmax.f32 %v523_v45, 0.0  ;;  %v515_v9 = vadd.f32 %v1803_v49, %v514_v20 }
  0xce   :  { %v1707_v35 = vpack.c.bf16 %v651_v7, %v651_v7  ;;  %v1122_v48 = vmax.f32 %v651_v7, 0.0  ;;  %1023 = vst.msk [vmem:[%s3118_s3] sm:$0xf] %vm1022_vm2, %v1672_v8  ;;  %v1736_v4 = vpack.c.bf16 %v1087_v14, %v1087_v14  ;;  %1055 = vst.msk [vmem:[%s3118_s3 + $0x80] sm:$0xf] %vm1022_vm2, %v1704_v26  ;;  %v643_v10 = vadd.f32 %v1867_v50, %v642_v21  ;;  %v2000_v42 = vpop.f32.mrf.mxu0  ;;  %v2032_v32 = vpop.f32.mrf.mxu1 }
  0xcf   :  { %v1768_v5 = vpack.c.bf16 %v1119_v28, %v1119_v28  ;;  %1026 = vst.msk [vmem:[%s3118_s3 + $0xc] sm:$0xf] %vm1022_vm2, %v1675_v34  ;;  %v1739_v43 = vpack.c.bf16 %v1090_v47, %v1090_v47  ;;  %v536_v36 = vadd.f32 %v2000_v42, %v1814_v54  ;;  %v664_v37 = vadd.f32 %v2032_v32, %v1878_v55 }
  0xd0   :  { %1058 = vst.msk [vmem:[%s3118_s3 + $0x8c] sm:$0xf] %vm1022_vm2, %v1707_v35  ;;  %v1771_v26 = vpack.c.bf16 %v1122_v48, %v1122_v48  ;;  %1407 = vst.msk [vmem:[%s3119_s4] sm:$0xf] %vm1022_vm2, %v1736_v4  ;;  %v1673_v49 = vpack.c.bf16 %v515_v9, %v515_v9  ;;  %v1088_v50 = vmax.f32 %v515_v9, 0.0  ;;  %v1705_v20 = vpack.c.bf16 %v643_v10, %v643_v10  ;;  %v527_v28 = vpop.f32.mrf.mxu0  ;;  %v655_v16 = vpop.f32.mrf.mxu1 }
  0xd1   :  { %1439 = vst.msk [vmem:[%s3119_s4 + $0x80] sm:$0xf] %vm1022_vm2, %v1768_v5  ;;  %v1120_v21 = vmax.f32 %v643_v10, 0.0  ;;  %1410 = vst.msk [vmem:[%s3119_s4 + $0xc] sm:$0xf] %vm1022_vm2, %v1739_v43  ;;  %v1678_v54 = vpack.c.bf16 %v536_v36, %v536_v36  ;;  %v1093_v55 = vmax.f32 %v536_v36, 0.0  ;;  %v1710_v15 = vpack.c.bf16 %v664_v37, %v664_v37 }
  0xd2   :  { %1442 = vst.msk [vmem:[%s3119_s4 + $0x8c] sm:$0xf] %vm1022_vm2, %v1771_v26  ;;  %v1125_v44 = vmax.f32 %v664_v37, 0.0  ;;  %1024 = vst.msk [vmem:[%s3118_s3 + $0x4] sm:$0xf] %vm1022_vm2, %v1673_v49  ;;  %v1737_v45 = vpack.c.bf16 %v1088_v50, %v1088_v50  ;;  %v528_v8 = vadd.f32 %v1810_v56, %v527_v28  ;;  %v656_v14 = vadd.f32 %v1874_v57, %v655_v16  ;;  %v2001_v34 = vpop.f32.mrf.mxu0  ;;  %v2033_v47 = vpop.f32.mrf.mxu1 }
  0xd3   :  { %1056 = vst.msk [vmem:[%s3118_s3 + $0x84] sm:$0xf] %vm1022_vm2, %v1705_v20  ;;  %v1769_v7 = vpack.c.bf16 %v1120_v21, %v1120_v21  ;;  %1029 = vst.msk [vmem:[%s3118_s3 + $0x18] sm:$0xf] %vm1022_vm2, %v1678_v54  ;;  %v1742_v35 = vpack.c.bf16 %v1093_v55, %v1093_v55  ;;  %v539_v56 = vadd.f32 %v2001_v34, %v1815_v59  ;;  %v3121_v34 = vunpack.c.l.bf16 %v2317_v53 }
  0xd4   :  { %1061 = vst.msk [vmem:[%s3118_s3 + $0x98] sm:$0xf] %vm1022_vm2, %v1710_v15  ;;  %v1774_v48 = vpack.c.bf16 %v1125_v44, %v1125_v44  ;;  %v667_v57 = vadd.f32 %v2033_v47, %v1879_v60  ;;  %1408 = vst.msk [vmem:[%s3119_s4 + $0x4] sm:$0xf] %vm1022_vm2, %v1737_v45  ;;  %v1676_v4 = vpack.c.bf16 %v528_v8, %v528_v8  ;;  %v1091_v5 = vmax.f32 %v528_v8, 0.0  ;;  %v530_v42 = vpop.f32.mrf.mxu0  ;;  %v658_v38 = vpop.f32.mrf.mxu1 }
  0xd5   :  { %1440 = vst.msk [vmem:[%s3119_s4 + $0x84] sm:$0xf] %vm1022_vm2, %v1769_v7  ;;  %v1708_v9 = vpack.c.bf16 %v656_v14, %v656_v14  ;;  %v1123_v10 = vmax.f32 %v656_v14, 0.0  ;;  %1413 = vst.msk [vmem:[%s3119_s4 + $0x18] sm:$0xf] %vm1022_vm2, %v1742_v35  ;;  %v1679_v39 = vpack.c.bf16 %v539_v56, %v539_v56  ;;  %v1094_v59 = vmax.f32 %v539_v56, 0.0 }
  0xd6   :  { %1445 = vst.msk [vmem:[%s3119_s4 + $0x98] sm:$0xf] %vm1022_vm2, %v1774_v48  ;;  %v1711_v60 = vpack.c.bf16 %v667_v57, %v667_v57  ;;  %v1126_v32 = vmax.f32 %v667_v57, 0.0  ;;  %1027 = vst.msk [vmem:[%s3118_s3 + $0x10] sm:$0xf] %vm1022_vm2, %v1676_v4  ;;  %v1740_v43 = vpack.c.bf16 %v1091_v5, %v1091_v5  ;;  %v531_v36 = vadd.f32 %v1811_v61, %v530_v42  ;;  %v2004_v49 = vpop.f32.mrf.mxu0  ;;  %v2036_v50 = vpop.f32.mrf.mxu1 }
  0xd7   :  { %1059 = vst.msk [vmem:[%s3118_s3 + $0x90] sm:$0xf] %vm1022_vm2, %v1708_v9  ;;  %v1772_v26 = vpack.c.bf16 %v1123_v10, %v1123_v10  ;;  %v659_v37 = vadd.f32 %v1875_v62, %v658_v38  ;;  %1030 = vst.msk [vmem:[%s3118_s3 + $0x1c] sm:$0xf] %vm1022_vm2, %v1679_v39  ;;  %v1743_v20 = vpack.c.bf16 %v1094_v59, %v1094_v59  ;;  %v3120_v8 = vunpack.c.l.bf16 %v2312_v52 }
  0xd8   :  { %1062 = vst.msk [vmem:[%s3118_s3 + $0x9c] sm:$0xf] %vm1022_vm2, %v1711_v60  ;;  %v1775_v21 = vpack.c.bf16 %v1126_v32, %v1126_v32  ;;  %v552_v40 = vadd.f32 %v2004_v49, %v1822_v2  ;;  %v680_v41 = vadd.f32 %v2036_v50, %v1886_v3  ;;  %1411 = vst.msk [vmem:[%s3119_s4 + $0x10] sm:$0xf] %vm1022_vm2, %v1740_v43  ;;  %v1092_v62 = vmax.f32 %v531_v36, 0.0  ;;  %v543_v54 = vpop.f32.mrf.mxu0  ;;  %v671_v55 = vpop.f32.mrf.mxu1 }
  0xd9   :  { %1443 = vst.msk [vmem:[%s3119_s4 + $0x90] sm:$0xf] %vm1022_vm2, %v1772_v26  ;;  %v1677_v61 = vpack.c.bf16 %v531_v36, %v531_v36  ;;  %v1709_v28 = vpack.c.bf16 %v659_v37, %v659_v37  ;;  %v1124_v16 = vmax.f32 %v659_v37, 0.0  ;;  %1414 = vst.msk [vmem:[%s3119_s4 + $0x1c] sm:$0xf] %vm1022_vm2, %v1743_v20  ;;  %v544_v14 = vadd.f32 %v3120_v8, %v543_v54 }
  0xda   :  { %1446 = vst.msk [vmem:[%s3119_s4 + $0x9c] sm:$0xf] %vm1022_vm2, %v1775_v21  ;;  %v1682_v2 = vpack.c.bf16 %v552_v40, %v552_v40  ;;  %v1097_v3 = vmax.f32 %v552_v40, 0.0  ;;  %v1714_v15 = vpack.c.bf16 %v680_v41, %v680_v41  ;;  %v1129_v44 = vmax.f32 %v680_v41, 0.0  ;;  %v2005_v35 = vpop.f32.mrf.mxu0  ;;  %v2037_v48 = vpop.f32.mrf.mxu1 }
  0xdb   :  { %1028 = vst.msk [vmem:[%s3118_s3 + $0x14] sm:$0xf] %vm1022_vm2, %v1677_v61  ;;  %v1741_v45 = vpack.c.bf16 %v1092_v62, %v1092_v62  ;;  %1060 = vst.msk [vmem:[%s3118_s3 + $0x94] sm:$0xf] %vm1022_vm2, %v1709_v28  ;;  %v1773_v7 = vpack.c.bf16 %v1124_v16, %v1124_v16  ;;  %v672_v47 = vadd.f32 %v3121_v34, %v671_v55  ;;  %v3122_v4 = vunpack.c.h.bf16 %v2298_v46 }
  0xdc   :  { %1033 = vst.msk [vmem:[%s3118_s3 + $0x28] sm:$0xf] %vm1022_vm2, %v1682_v2  ;;  %v1746_v56 = vpack.c.bf16 %v1097_v3, %v1097_v3  ;;  %1065 = vst.msk [vmem:[%s3118_s3 + $0xa8] sm:$0xf] %vm1022_vm2, %v1714_v15  ;;  %v1778_v57 = vpack.c.bf16 %v1129_v44, %v1129_v44  ;;  %v3123_v9 = vunpack.c.h.bf16 %v2307_v51  ;;  %v1680_v42 = vpack.c.bf16 %v544_v14, %v544_v14  ;;  %v546_v60 = vpop.f32.mrf.mxu0  ;;  %v674_v46 = vpop.f32.mrf.mxu1 }
  0xdd   :  { %v555_v5 = vadd.f32 %v2005_v35, %v3122_v4  ;;  %1412 = vst.msk [vmem:[%s3119_s4 + $0x14] sm:$0xf] %vm1022_vm2, %v1741_v45  ;;  %1444 = vst.msk [vmem:[%s3119_s4 + $0x94] sm:$0xf] %vm1022_vm2, %v1773_v7  ;;  %v1095_v38 = vmax.f32 %v544_v14, 0.0  ;;  %v1712_v39 = vpack.c.bf16 %v672_v47, %v672_v47  ;;  %v1127_v59 = vmax.f32 %v672_v47, 0.0 }
  0xde   :  { %v683_v10 = vadd.f32 %v2037_v48, %v3123_v9  ;;  %1417 = vst.msk [vmem:[%s3119_s4 + $0x28] sm:$0xf] %vm1022_vm2, %v1746_v56  ;;  %1449 = vst.msk [vmem:[%s3119_s4 + $0xa8] sm:$0xf] %vm1022_vm2, %v1778_v57  ;;  %v3124_v49 = vunpack.c.h.bf16 %v2312_v52  ;;  %v3125_v20 = vunpack.c.h.bf16 %v2317_v53  ;;  %v2008_v40 = vpop.f32.mrf.mxu0  ;;  %v2040_v41 = vpop.f32.mrf.mxu1  ;;  %v3126_v52 = vunpack.c.l.bf16 %v2326_v58 }
  0xdf   :  { %v1683_v51 = vpack.c.bf16 %v555_v5, %v555_v5  ;;  %v1098_v32 = vmax.f32 %v555_v5, 0.0  ;;  %1031 = vst.msk [vmem:[%s3118_s3 + $0x20] sm:$0xf] %vm1022_vm2, %v1680_v42  ;;  %v1744_v36 = vpack.c.bf16 %v1095_v38, %v1095_v38  ;;  %1063 = vst.msk [vmem:[%s3118_s3 + $0xa0] sm:$0xf] %vm1022_vm2, %v1712_v39  ;;  %v1776_v37 = vpack.c.bf16 %v1127_v59, %v1127_v59 }
  0xe0   :  { %v1715_v43 = vpack.c.bf16 %v683_v10, %v683_v10  ;;  %v1130_v26 = vmax.f32 %v683_v10, 0.0  ;;  %v547_v50 = vadd.f32 %v3124_v49, %v546_v60  ;;  %v675_v21 = vadd.f32 %v3125_v20, %v674_v46  ;;  %v559_v15 = vpop.f32.mrf.mxu0  ;;  %v687_v44 = vpop.f32.mrf.mxu1 }
  0xe1   :  { %1034 = vst.msk [vmem:[%s3118_s3 + $0x2c] sm:$0xf] %vm1022_vm2, %v1683_v51  ;;  %v1747_v61 = vpack.c.bf16 %v1098_v32, %v1098_v32  ;;  %v568_v28 = vadd.f32 %v2008_v40, %v3126_v52  ;;  %v3127_v53 = vunpack.c.l.bf16 %v2335_v63  ;;  %1415 = vst.msk [vmem:[%s3119_s4 + $0x20] sm:$0xf] %vm1022_vm2, %v1744_v36  ;;  %v3128_v35 = vunpack.c.l.bf16 %v2340_v0 }
  0xe2   :  { %1066 = vst.msk [vmem:[%s3118_s3 + $0xac] sm:$0xf] %vm1022_vm2, %v1715_v43  ;;  %v1779_v62 = vpack.c.bf16 %v1130_v26, %v1130_v26  ;;  %1447 = vst.msk [vmem:[%s3119_s4 + $0xa0] sm:$0xf] %vm1022_vm2, %v1776_v37  ;;  %v1681_v54 = vpack.c.bf16 %v547_v50, %v547_v50  ;;  %v1096_v55 = vmax.f32 %v547_v50, 0.0  ;;  %v1713_v2 = vpack.c.bf16 %v675_v21, %v675_v21  ;;  %v2009_v4 = vpop.f32.mrf.mxu0  ;;  %v2041_v5 = vpop.f32.mrf.mxu1 }
  0xe3   :  { %v696_v16 = vadd.f32 %v2040_v41, %v3127_v53  ;;  %v1128_v3 = vmax.f32 %v675_v21, 0.0  ;;  %1418 = vst.msk [vmem:[%s3119_s4 + $0x2c] sm:$0xf] %vm1022_vm2, %v1747_v61  ;;  %v1686_v45 = vpack.c.bf16 %v568_v28, %v568_v28  ;;  %v1101_v7 = vmax.f32 %v568_v28, 0.0 }
  0xe4   :  { %1450 = vst.msk [vmem:[%s3119_s4 + $0xac] sm:$0xf] %vm1022_vm2, %v1779_v62  ;;  %1032 = vst.msk [vmem:[%s3118_s3 + $0x24] sm:$0xf] %vm1022_vm2, %v1681_v54  ;;  %v1745_v34 = vpack.c.bf16 %v1096_v55, %v1096_v55  ;;  %v560_v48 = vadd.f32 %v3128_v35, %v559_v15  ;;  %v3129_v56 = vunpack.c.l.bf16 %v2345_v1  ;;  %v3130_v42 = vunpack.c.h.bf16 %v2326_v58  ;;  %v562_v43 = vpop.f32.mrf.mxu0  ;;  %v690_v58 = vpop.f32.mrf.mxu1 }
  0xe5   :  { %v1718_v8 = vpack.c.bf16 %v696_v16, %v696_v16  ;;  %v1133_v14 = vmax.f32 %v696_v16, 0.0  ;;  %1064 = vst.msk [vmem:[%s3118_s3 + $0xa4] sm:$0xf] %vm1022_vm2, %v1713_v2  ;;  %v1777_v47 = vpack.c.bf16 %v1128_v3, %v1128_v3  ;;  %1037 = vst.msk [vmem:[%s3118_s3 + $0x38] sm:$0xf] %vm1022_vm2, %v1686_v45  ;;  %v1750_v9 = vpack.c.bf16 %v1101_v7, %v1101_v7 }
  0xe6   :  { %v688_v57 = vadd.f32 %v3129_v56, %v687_v44  ;;  %v571_v38 = vadd.f32 %v2009_v4, %v3130_v42  ;;  %v3131_v39 = vunpack.c.h.bf16 %v2335_v63  ;;  %1416 = vst.msk [vmem:[%s3119_s4 + $0x24] sm:$0xf] %vm1022_vm2, %v1745_v34  ;;  %v1684_v60 = vpack.c.bf16 %v560_v48, %v560_v48  ;;  %v2012_v61 = vpop.f32.mrf.mxu0  ;;  %v2044_v62 = vpop.f32.mrf.mxu1 }
  0xe7   :  { %1069 = vst.msk [vmem:[%s3118_s3 + $0xb8] sm:$0xf] %vm1022_vm2, %v1718_v8  ;;  %v1782_v10 = vpack.c.bf16 %v1133_v14, %v1133_v14  ;;  %1448 = vst.msk [vmem:[%s3119_s4 + $0xa4] sm:$0xf] %vm1022_vm2, %v1777_v47  ;;  %v1099_v46 = vmax.f32 %v560_v48, 0.0  ;;  %v3132_v20 = vunpack.c.h.bf16 %v2340_v0  ;;  %v3133_v40 = vunpack.c.h.bf16 %v2345_v1 }
  0xe8   :  { %v699_v59 = vadd.f32 %v2041_v5, %v3131_v39  ;;  %v1716_v51 = vpack.c.bf16 %v688_v57, %v688_v57  ;;  %v1131_v32 = vmax.f32 %v688_v57, 0.0  ;;  %1421 = vst.msk [vmem:[%s3119_s4 + $0x38] sm:$0xf] %vm1022_vm2, %v1750_v9  ;;  %v1687_v63 = vpack.c.bf16 %v571_v38, %v571_v38  ;;  %1035 = vst.msk [vmem:[%s3118_s3 + $0x30] sm:$0xf] %vm1022_vm2, %v1684_v60  ;;  %v575_v15 = vpop.f32.mrf.mxu0  ;;  %v703_v44 = vpop.f32.mrf.mxu1 }
  0xe9   :  { %1453 = vst.msk [vmem:[%s3119_s4 + $0xb8] sm:$0xf] %vm1022_vm2, %v1782_v10  ;;  %v1102_v26 = vmax.f32 %v571_v38, 0.0  ;;  %v1748_v49 = vpack.c.bf16 %v1099_v46, %v1099_v46  ;;  %v563_v21 = vadd.f32 %v3132_v20, %v562_v43  ;;  %v691_v41 = vadd.f32 %v3133_v40, %v690_v58 }
  0xea   :  { %v1719_v36 = vpack.c.bf16 %v699_v59, %v699_v59  ;;  %v1134_v37 = vmax.f32 %v699_v59, 0.0  ;;  %1067 = vst.msk [vmem:[%s3118_s3 + $0xb0] sm:$0xf] %vm1022_vm2, %v1716_v51  ;;  %v1780_v50 = vpack.c.bf16 %v1131_v32, %v1131_v32  ;;  %1038 = vst.msk [vmem:[%s3118_s3 + $0x3c] sm:$0xf] %vm1022_vm2, %v1687_v63  ;;  %v3134_v0 = vunpack.c.l.bf16 %v2354_v6  ;;  %v2013_v4 = vpop.f32.mrf.mxu0  ;;  %v2045_v5 = vpop.f32.mrf.mxu1 }
  0xeb   :  { %v1751_v52 = vpack.c.bf16 %v1102_v26, %v1102_v26  ;;  %v3135_v1 = vunpack.c.l.bf16 %v2363_v11  ;;  %1419 = vst.msk [vmem:[%s3119_s4 + $0x30] sm:$0xf] %vm1022_vm2, %v1748_v49  ;;  %v1685_v54 = vpack.c.bf16 %v563_v21, %v563_v21  ;;  %v1100_v55 = vmax.f32 %v563_v21, 0.0 }
  0xec   :  { %1070 = vst.msk [vmem:[%s3118_s3 + $0xbc] sm:$0xf] %vm1022_vm2, %v1719_v36  ;;  %v1783_v28 = vpack.c.bf16 %v1134_v37, %v1134_v37  ;;  %v584_v53 = vadd.f32 %v2012_v61, %v3134_v0  ;;  %1451 = vst.msk [vmem:[%s3119_s4 + $0xb0] sm:$0xf] %vm1022_vm2, %v1780_v50  ;;  %v1717_v2 = vpack.c.bf16 %v691_v41, %v691_v41  ;;  %v1132_v3 = vmax.f32 %v691_v41, 0.0  ;;  %v578_v43 = vpop.f32.mrf.mxu0 }
  0xed   :  { %v712_v16 = vadd.f32 %v2044_v62, %v3135_v1  ;;  %1422 = vst.msk [vmem:[%s3119_s4 + $0x3c] sm:$0xf] %vm1022_vm2, %v1751_v52  ;;  %1036 = vst.msk [vmem:[%s3118_s3 + $0x34] sm:$0xf] %vm1022_vm2, %v1685_v54  ;;  %v1749_v34 = vpack.c.bf16 %v1100_v55, %v1100_v55  ;;  %v3136_v35 = vunpack.c.l.bf16 %v2368_v12  ;;  %v3137_v56 = vunpack.c.l.bf16 %v2373_v13 }
  0xee   :  { %1454 = vst.msk [vmem:[%s3119_s4 + $0xbc] sm:$0xf] %vm1022_vm2, %v1783_v28  ;;  %v1690_v45 = vpack.c.bf16 %v584_v53, %v584_v53  ;;  %v1105_v7 = vmax.f32 %v584_v53, 0.0  ;;  %1068 = vst.msk [vmem:[%s3118_s3 + $0xb4] sm:$0xf] %vm1022_vm2, %v1717_v2  ;;  %v1781_v47 = vpack.c.bf16 %v1132_v3, %v1132_v3  ;;  %v3138_v42 = vunpack.c.h.bf16 %v2354_v6  ;;  %v706_v6 = vpop.f32.mrf.mxu1  ;;  %v2016_v40 = vpop.f32.mrf.mxu0 }
  0xef   :  { %v1722_v8 = vpack.c.bf16 %v712_v16, %v712_v16  ;;  %v1137_v14 = vmax.f32 %v712_v16, 0.0  ;;  %v576_v48 = vadd.f32 %v3136_v35, %v575_v15  ;;  %v704_v57 = vadd.f32 %v3137_v56, %v703_v44  ;;  %1420 = vst.msk [vmem:[%s3119_s4 + $0x34] sm:$0xf] %vm1022_vm2, %v1749_v34 }
  0xf0   :  { %1041 = vst.msk [vmem:[%s3118_s3 + $0x48] sm:$0xf] %vm1022_vm2, %v1690_v45  ;;  %v1754_v9 = vpack.c.bf16 %v1105_v7, %v1105_v7  ;;  %v587_v38 = vadd.f32 %v2013_v4, %v3138_v42  ;;  %v3139_v39 = vunpack.c.h.bf16 %v2363_v11  ;;  %1452 = vst.msk [vmem:[%s3119_s4 + $0xb4] sm:$0xf] %vm1022_vm2, %v1781_v47  ;;  %v3140_v49 = vunpack.c.h.bf16 %v2368_v12  ;;  %v2048_v41 = vpop.f32.mrf.mxu1  ;;  %v591_v54 = vpop.f32.mrf.mxu0 }
  0xf1   :  { %1073 = vst.msk [vmem:[%s3118_s3 + $0xc8] sm:$0xf] %vm1022_vm2, %v1722_v8  ;;  %v1786_v10 = vpack.c.bf16 %v1137_v14, %v1137_v14  ;;  %v1688_v60 = vpack.c.bf16 %v576_v48, %v576_v48  ;;  %v1103_v46 = vmax.f32 %v576_v48, 0.0  ;;  %v1720_v51 = vpack.c.bf16 %v704_v57, %v704_v57 }
  0xf2   :  { %v715_v59 = vadd.f32 %v2045_v5, %v3139_v39  ;;  %v1135_v32 = vmax.f32 %v704_v57, 0.0  ;;  %1425 = vst.msk [vmem:[%s3119_s4 + $0x48] sm:$0xf] %vm1022_vm2, %v1754_v9  ;;  %v1691_v11 = vpack.c.bf16 %v587_v38, %v587_v38  ;;  %v1106_v58 = vmax.f32 %v587_v38, 0.0  ;;  %v719_v55 = vpop.f32.mrf.mxu1  ;;  %v2017_v35 = vpop.f32.mrf.mxu0 }
  0xf3   :  { %1457 = vst.msk [vmem:[%s3119_s4 + $0xc8] sm:$0xf] %vm1022_vm2, %v1786_v10  ;;  %1039 = vst.msk [vmem:[%s3118_s3 + $0x40] sm:$0xf] %vm1022_vm2, %v1688_v60  ;;  %v1752_v36 = vpack.c.bf16 %v1103_v46, %v1103_v46  ;;  %v579_v50 = vadd.f32 %v3140_v49, %v578_v43  ;;  %v3141_v20 = vunpack.c.h.bf16 %v2373_v13  ;;  %v3142_v12 = vunpack.c.l.bf16 %v2382_v18 }
  0xf4   :  { %v1723_v63 = vpack.c.bf16 %v715_v59, %v715_v59  ;;  %v1138_v26 = vmax.f32 %v715_v59, 0.0  ;;  %1071 = vst.msk [vmem:[%s3118_s3 + $0xc0] sm:$0xf] %vm1022_vm2, %v1720_v51  ;;  %v1784_v37 = vpack.c.bf16 %v1135_v32, %v1135_v32  ;;  %1042 = vst.msk [vmem:[%s3118_s3 + $0x4c] sm:$0xf] %vm1022_vm2, %v1691_v11  ;;  %v1755_v61 = vpack.c.bf16 %v1106_v58, %v1106_v58  ;;  %v2049_v48 = vpop.f32.mrf.mxu1  ;;  %v594_v60 = vpop.f32.mrf.mxu0 }
  0xf5   :  { %v707_v21 = vadd.f32 %v3141_v20, %v706_v6  ;;  %v600_v52 = vadd.f32 %v2016_v40, %v3142_v12  ;;  %v3143_v13 = vunpack.c.l.bf16 %v2391_v23  ;;  %1423 = vst.msk [vmem:[%s3119_s4 + $0x40] sm:$0xf] %vm1022_vm2, %v1752_v36  ;;  %v1689_v0 = vpack.c.bf16 %v579_v50, %v579_v50 }
  0xf6   :  { %1074 = vst.msk [vmem:[%s3118_s3 + $0xcc] sm:$0xf] %vm1022_vm2, %v1723_v63  ;;  %v1787_v62 = vpack.c.bf16 %v1138_v26, %v1138_v26  ;;  %1455 = vst.msk [vmem:[%s3119_s4 + $0xc0] sm:$0xf] %vm1022_vm2, %v1784_v37  ;;  %v1104_v53 = vmax.f32 %v579_v50, 0.0  ;;  %v3144_v8 = vunpack.c.l.bf16 %v2396_v24  ;;  %v3145_v34 = vunpack.c.l.bf16 %v2401_v25  ;;  %v2020_v36 = vpop.f32.mrf.mxu0 }
  0xf7   :  { %v728_v28 = vadd.f32 %v2048_v41, %v3143_v13  ;;  %v1721_v1 = vpack.c.bf16 %v707_v21, %v707_v21  ;;  %v1136_v16 = vmax.f32 %v707_v21, 0.0  ;;  %1426 = vst.msk [vmem:[%s3119_s4 + $0x4c] sm:$0xf] %vm1022_vm2, %v1755_v61  ;;  %v1694_v2 = vpack.c.bf16 %v600_v52, %v600_v52  ;;  %1040 = vst.msk [vmem:[%s3118_s3 + $0x44] sm:$0xf] %vm1022_vm2, %v1689_v0 }
  0xf8   :  { %1458 = vst.msk [vmem:[%s3119_s4 + $0xcc] sm:$0xf] %vm1022_vm2, %v1787_v62  ;;  %v1109_v3 = vmax.f32 %v600_v52, 0.0  ;;  %v1753_v45 = vpack.c.bf16 %v1104_v53, %v1104_v53  ;;  %v592_v14 = vadd.f32 %v3144_v8, %v591_v54  ;;  %v720_v47 = vadd.f32 %v3145_v34, %v719_v55  ;;  %v607_v12 = vpop.f32.mrf.mxu0 }
  0xf9   :  { %v1726_v15 = vpack.c.bf16 %v728_v28, %v728_v28  ;;  %v1141_v44 = vmax.f32 %v728_v28, 0.0  ;;  %1072 = vst.msk [vmem:[%s3118_s3 + $0xc4] sm:$0xf] %vm1022_vm2, %v1721_v1  ;;  %v1785_v7 = vpack.c.bf16 %v1136_v16, %v1136_v16  ;;  %1045 = vst.msk [vmem:[%s3118_s3 + $0x58] sm:$0xf] %vm1022_vm2, %v1694_v2  ;;  %v3146_v4 = vunpack.c.h.bf16 %v2382_v18  ;;  %v722_v18 = vpop.f32.mrf.mxu1 }
  0xfa   :  { %v1758_v56 = vpack.c.bf16 %v1109_v3, %v1109_v3  ;;  %v3147_v9 = vunpack.c.h.bf16 %v2391_v23  ;;  %1424 = vst.msk [vmem:[%s3119_s4 + $0x44] sm:$0xf] %vm1022_vm2, %v1753_v45  ;;  %v1692_v42 = vpack.c.bf16 %v592_v14, %v592_v14  ;;  %v1107_v38 = vmax.f32 %v592_v14, 0.0 }
  0xfb   :  { %1077 = vst.msk [vmem:[%s3118_s3 + $0xd8] sm:$0xf] %vm1022_vm2, %v1726_v15  ;;  %v1790_v57 = vpack.c.bf16 %v1141_v44, %v1141_v44  ;;  %v603_v5 = vadd.f32 %v2017_v35, %v3146_v4  ;;  %1456 = vst.msk [vmem:[%s3119_s4 + $0xc4] sm:$0xf] %vm1022_vm2, %v1785_v7  ;;  %v1724_v39 = vpack.c.bf16 %v720_v47, %v720_v47  ;;  %v1139_v59 = vmax.f32 %v720_v47, 0.0  ;;  %v2052_v37 = vpop.f32.mrf.mxu1  ;;  %v2021_v15 = vpop.f32.mrf.mxu0 }
  0xfc   :  { %v731_v10 = vadd.f32 %v2049_v48, %v3147_v9  ;;  %1429 = vst.msk [vmem:[%s3119_s4 + $0x58] sm:$0xf] %vm1022_vm2, %v1758_v56  ;;  %1043 = vst.msk [vmem:[%s3118_s3 + $0x50] sm:$0xf] %vm1022_vm2, %v1692_v42  ;;  %v1756_v43 = vpack.c.bf16 %v1107_v38, %v1107_v38  ;;  %v3148_v11 = vunpack.c.h.bf16 %v2396_v24  ;;  %v3149_v63 = vunpack.c.h.bf16 %v2401_v25 }
  0xfd   :  { %1461 = vst.msk [vmem:[%s3119_s4 + $0xd8] sm:$0xf] %vm1022_vm2, %v1790_v57  ;;  %v1695_v23 = vpack.c.bf16 %v603_v5, %v603_v5  ;;  %v1110_v46 = vmax.f32 %v603_v5, 0.0  ;;  %1075 = vst.msk [vmem:[%s3118_s3 + $0xd0] sm:$0xf] %vm1022_vm2, %v1724_v39  ;;  %v1788_v6 = vpack.c.bf16 %v1139_v59, %v1139_v59  ;;  %v3150_v24 = vunpack.c.l.bf16 %v2410_v30  ;;  %v735_v52 = vpop.f32.mrf.mxu1  ;;  %v610_v4 = vpop.f32.mrf.mxu0 }
  0xfe   :  { %v1727_v51 = vpack.c.bf16 %v731_v10, %v731_v10  ;;  %v1142_v32 = vmax.f32 %v731_v10, 0.0  ;;  %v595_v58 = vadd.f32 %v3148_v11, %v594_v60  ;;  %v723_v26 = vadd.f32 %v3149_v63, %v722_v18  ;;  %1427 = vst.msk [vmem:[%s3119_s4 + $0x50] sm:$0xf] %vm1022_vm2, %v1756_v43 }
  0xff   :  { %1046 = vst.msk [vmem:[%s3118_s3 + $0x5c] sm:$0xf] %vm1022_vm2, %v1695_v23  ;;  %v1759_v49 = vpack.c.bf16 %v1110_v46, %v1110_v46  ;;  %v616_v20 = vadd.f32 %v2020_v36, %v3150_v24  ;;  %v3151_v25 = vunpack.c.l.bf16 %v2419_v27  ;;  %1459 = vst.msk [vmem:[%s3119_s4 + $0xd0] sm:$0xf] %vm1022_vm2, %v1788_v6  ;;  %v3152_v54 = vunpack.c.l.bf16 %v2424_v29  ;;  %v2053_v44 = vpop.f32.mrf.mxu1  ;;  %v2024_v23 = vpop.f32.mrf.mxu0 }
 0x100   :  { %1078 = vst.msk [vmem:[%s3118_s3 + $0xdc] sm:$0xf] %vm1022_vm2, %v1727_v51  ;;  %v1791_v50 = vpack.c.bf16 %v1142_v32, %v1142_v32  ;;  %v1693_v40 = vpack.c.bf16 %v595_v58, %v595_v58  ;;  %v1108_v41 = vmax.f32 %v595_v58, 0.0  ;;  %v1725_v61 = vpack.c.bf16 %v723_v26, %v723_v26 }
 0x101   :  { %v744_v21 = vadd.f32 %v2052_v37, %v3151_v25  ;;  %v1140_v62 = vmax.f32 %v723_v26, 0.0  ;;  %1430 = vst.msk [vmem:[%s3119_s4 + $0x5c] sm:$0xf] %vm1022_vm2, %v1759_v49  ;;  %v1698_v13 = vpack.c.bf16 %v616_v20, %v616_v20  ;;  %v1113_v28 = vmax.f32 %v616_v20, 0.0  ;;  %v623_v36 = vpop.f32.mrf.mxu0 }
 0x102   :  { %1462 = vst.msk [vmem:[%s3119_s4 + $0xdc] sm:$0xf] %vm1022_vm2, %v1791_v50  ;;  %1044 = vst.msk [vmem:[%s3118_s3 + $0x54] sm:$0xf] %vm1022_vm2, %v1693_v40  ;;  %v1757_v1 = vpack.c.bf16 %v1108_v41, %v1108_v41  ;;  %v608_v55 = vadd.f32 %v3152_v54, %v607_v12  ;;  %v3153_v2 = vunpack.c.l.bf16 %v2429_v31  ;;  %v3154_v8 = vunpack.c.h.bf16 %v2410_v30  ;;  %v738_v30 = vpop.f32.mrf.mxu1 }
 0x103   :  { %v1730_v0 = vpack.c.bf16 %v744_v21, %v744_v21  ;;  %v1145_v53 = vmax.f32 %v744_v21, 0.0  ;;  %1076 = vst.msk [vmem:[%s3118_s3 + $0xd4] sm:$0xf] %vm1022_vm2, %v1725_v61  ;;  %v1789_v16 = vpack.c.bf16 %v1140_v62, %v1140_v62  ;;  %1049 = vst.msk [vmem:[%s3118_s3 + $0x68] sm:$0xf] %vm1022_vm2, %v1698_v13  ;;  %v1762_v45 = vpack.c.bf16 %v1113_v28, %v1113_v28  ;;  %v2025_v12 = vpop.f32.mrf.mxu0 }
 0x104   :  { %v736_v3 = vadd.f32 %v3153_v2, %v735_v52  ;;  %v619_v14 = vadd.f32 %v2021_v15, %v3154_v8  ;;  %v3155_v34 = vunpack.c.h.bf16 %v2419_v27  ;;  %1428 = vst.msk [vmem:[%s3119_s4 + $0x54] sm:$0xf] %vm1022_vm2, %v1757_v1  ;;  %v1696_v35 = vpack.c.bf16 %v608_v55, %v608_v55  ;;  %v2056_v46 = vpop.f32.mrf.mxu1 }
 0x105   :  { %1081 = vst.msk [vmem:[%s3118_s3 + $0xe8] sm:$0xf] %vm1022_vm2, %v1730_v0  ;;  %v1794_v7 = vpack.c.bf16 %v1145_v53, %v1145_v53  ;;  %1460 = vst.msk [vmem:[%s3119_s4 + $0xd4] sm:$0xf] %vm1022_vm2, %v1789_v16  ;;  %v1111_v48 = vmax.f32 %v608_v55, 0.0  ;;  %v3156_v39 = vunpack.c.h.bf16 %v2424_v29  ;;  %v3157_v60 = vunpack.c.h.bf16 %v2429_v31  ;;  %v626_v15 = vpop.f32.mrf.mxu0 }
 0x106   :  { %v747_v47 = vadd.f32 %v2053_v44, %v3155_v34  ;;  %v1728_v56 = vpack.c.bf16 %v736_v3, %v736_v3  ;;  %v1143_v57 = vmax.f32 %v736_v3, 0.0  ;;  %1433 = vst.msk [vmem:[%s3119_s4 + $0x68] sm:$0xf] %vm1022_vm2, %v1762_v45  ;;  %v1699_v27 = vpack.c.bf16 %v619_v14, %v619_v14  ;;  %1047 = vst.msk [vmem:[%s3118_s3 + $0x60] sm:$0xf] %vm1022_vm2, %v1696_v35  ;;  %v751_v37 = vpop.f32.mrf.mxu1 }
 0x107   :  { %1465 = vst.msk [vmem:[%s3119_s4 + $0xe8] sm:$0xf] %vm1022_vm2, %v1794_v7  ;;  %v1114_v5 = vmax.f32 %v619_v14, 0.0  ;;  %v1760_v42 = vpack.c.bf16 %v1111_v48, %v1111_v48  ;;  %v611_v59 = vadd.f32 %v3156_v39, %v610_v4  ;;  %v739_v18 = vadd.f32 %v3157_v60, %v738_v30 }
 0x108   :  { %v1731_v9 = vpack.c.bf16 %v747_v47, %v747_v47  ;;  %v1146_v10 = vmax.f32 %v747_v47, 0.0  ;;  %1079 = vst.msk [vmem:[%s3118_s3 + $0xe0] sm:$0xf] %vm1022_vm2, %v1728_v56  ;;  %v1792_v38 = vpack.c.bf16 %v1143_v57, %v1143_v57  ;;  %1050 = vst.msk [vmem:[%s3118_s3 + $0x6c] sm:$0xf] %vm1022_vm2, %v1699_v27  ;;  %v3158_v29 = vunpack.c.l.bf16 %v2442_v17  ;;  %v2057_v52 = vpop.f32.mrf.mxu1 }
 0x109   :  { %v1763_v51 = vpack.c.bf16 %v1114_v5, %v1114_v5  ;;  %v3159_v31 = vunpack.c.l.bf16 %v2447_v33  ;;  %1431 = vst.msk [vmem:[%s3119_s4 + $0x60] sm:$0xf] %vm1022_vm2, %v1760_v42  ;;  %v1697_v11 = vpack.c.bf16 %v611_v59, %v611_v59  ;;  %v1112_v58 = vmax.f32 %v611_v59, 0.0 }
 0x10a   :  { %1082 = vst.msk [vmem:[%s3118_s3 + $0xec] sm:$0xf] %vm1022_vm2, %v1731_v9  ;;  %v1795_v32 = vpack.c.bf16 %v1146_v10, %v1146_v10  ;;  %v632_v43 = vadd.f32 %v2024_v23, %v3158_v29  ;;  %1463 = vst.msk [vmem:[%s3119_s4 + $0xe0] sm:$0xf] %vm1022_vm2, %v1792_v38  ;;  %v1729_v63 = vpack.c.bf16 %v739_v18, %v739_v18  ;;  %v1144_v26 = vmax.f32 %v739_v18, 0.0 }
 0x10b   :  { %v760_v6 = vadd.f32 %v2056_v46, %v3159_v31  ;;  %1434 = vst.msk [vmem:[%s3119_s4 + $0x6c] sm:$0xf] %vm1022_vm2, %v1763_v51  ;;  %1048 = vst.msk [vmem:[%s3118_s3 + $0x64] sm:$0xf] %vm1022_vm2, %v1697_v11  ;;  %v1761_v25 = vpack.c.bf16 %v1112_v58, %v1112_v58  ;;  %v3160_v40 = vunpack.c.l.bf16 %v2456_v19  ;;  %v3161_v61 = vunpack.c.l.bf16 %v2461_v22 }
 0x10c   :  { %1466 = vst.msk [vmem:[%s3119_s4 + $0xec] sm:$0xf] %vm1022_vm2, %v1795_v32  ;;  %v1702_v49 = vpack.c.bf16 %v632_v43, %v632_v43  ;;  %v1117_v50 = vmax.f32 %v632_v43, 0.0  ;;  %1080 = vst.msk [vmem:[%s3118_s3 + $0xe4] sm:$0xf] %vm1022_vm2, %v1729_v63  ;;  %v1793_v21 = vpack.c.bf16 %v1144_v26, %v1144_v26  ;;  %v3162_v0 = vunpack.c.h.bf16 %v2442_v17  ;;  %v754_v17 = vpop.f32.mrf.mxu1 }
 0x10d   :  { %v1734_v24 = vpack.c.bf16 %v760_v6, %v760_v6  ;;  %v1149_v20 = vmax.f32 %v760_v6, 0.0  ;;  %v624_v41 = vadd.f32 %v3160_v40, %v623_v36  ;;  %v752_v62 = vadd.f32 %v3161_v61, %v751_v37  ;;  %1432 = vst.msk [vmem:[%s3119_s4 + $0x64] sm:$0xf] %vm1022_vm2, %v1761_v25 }
 0x10e   :  { %1053 = vst.msk [vmem:[%s3118_s3 + $0x78] sm:$0xf] %vm1022_vm2, %v1702_v49  ;;  %v1766_v13 = vpack.c.bf16 %v1117_v50, %v1117_v50  ;;  %v635_v53 = vadd.f32 %v2025_v12, %v3162_v0  ;;  %v3163_v1 = vunpack.c.h.bf16 %v2447_v33  ;;  %1464 = vst.msk [vmem:[%s3119_s4 + $0xe4] sm:$0xf] %vm1022_vm2, %v1793_v21  ;;  %v3164_v34 = vunpack.c.h.bf16 %v2456_v19 }
 0x10f   :  { %1085 = vst.msk [vmem:[%s3118_s3 + $0xf8] sm:$0xf] %vm1022_vm2, %v1734_v24  ;;  %v1798_v28 = vpack.c.bf16 %v1149_v20, %v1149_v20  ;;  %v1700_v54 = vpack.c.bf16 %v624_v41, %v624_v41  ;;  %v1115_v55 = vmax.f32 %v624_v41, 0.0  ;;  %v1732_v2 = vpack.c.bf16 %v752_v62, %v752_v62 }
 0x110   :  { %v763_v16 = vadd.f32 %v2057_v52, %v3163_v1  ;;  %v1147_v3 = vmax.f32 %v752_v62, 0.0  ;;  %1437 = vst.msk [vmem:[%s3119_s4 + $0x78] sm:$0xf] %vm1022_vm2, %v1766_v13  ;;  %v1703_v33 = vpack.c.bf16 %v635_v53, %v635_v53  ;;  %v1118_v44 = vmax.f32 %v635_v53, 0.0 }
 0x111   :  { %1469 = vst.msk [vmem:[%s3119_s4 + $0xf8] sm:$0xf] %vm1022_vm2, %v1798_v28  ;;  %1051 = vst.msk [vmem:[%s3118_s3 + $0x70] sm:$0xf] %vm1022_vm2, %v1700_v54  ;;  %v1764_v8 = vpack.c.bf16 %v1115_v55, %v1115_v55  ;;  %v627_v47 = vadd.f32 %v3164_v34, %v626_v15  ;;  %v3165_v35 = vunpack.c.h.bf16 %v2461_v22 }
 0x112   :  { %v1735_v45 = vpack.c.bf16 %v763_v16, %v763_v16  ;;  %v1150_v7 = vmax.f32 %v763_v16, 0.0  ;;  %1083 = vst.msk [vmem:[%s3118_s3 + $0xf0] sm:$0xf] %vm1022_vm2, %v1732_v2  ;;  %v1796_v14 = vpack.c.bf16 %v1147_v3, %v1147_v3  ;;  %1054 = vst.msk [vmem:[%s3118_s3 + $0x7c] sm:$0xf] %vm1022_vm2, %v1703_v33  ;;  %v1767_v56 = vpack.c.bf16 %v1118_v44, %v1118_v44 }
 0x113   :  { %v755_v48 = vadd.f32 %v3165_v35, %v754_v17  ;;  %1435 = vst.msk [vmem:[%s3119_s4 + $0x70] sm:$0xf] %vm1022_vm2, %v1764_v8  ;;  %v1701_v19 = vpack.c.bf16 %v627_v47, %v627_v47  ;;  %v1116_v22 = vmax.f32 %v627_v47, 0.0 }
 0x114   :  { %1086 = vst.msk [vmem:[%s3118_s3 + $0xfc] sm:$0xf] %vm1022_vm2, %v1735_v45  ;;  %v1799_v57 = vpack.c.bf16 %v1150_v7, %v1150_v7  ;;  %1467 = vst.msk [vmem:[%s3119_s4 + $0xf0] sm:$0xf] %vm1022_vm2, %v1796_v14 }
 0x115   :  { %v1733_v4 = vpack.c.bf16 %v755_v48, %v755_v48  ;;  %v1148_v30 = vmax.f32 %v755_v48, 0.0  ;;  %1438 = vst.msk [vmem:[%s3119_s4 + $0x7c] sm:$0xf] %vm1022_vm2, %v1767_v56  ;;  %1052 = vst.msk [vmem:[%s3118_s3 + $0x74] sm:$0xf] %vm1022_vm2, %v1701_v19  ;;  %v1765_v27 = vpack.c.bf16 %v1116_v22, %v1116_v22 }
 0x116   :  { %1470 = vst.msk [vmem:[%s3119_s4 + $0xfc] sm:$0xf] %vm1022_vm2, %v1799_v57 }
 0x117   :  { %1084 = vst.msk [vmem:[%s3118_s3 + $0xf4] sm:$0xf] %vm1022_vm2, %v1733_v4  ;;  %v1797_v5 = vpack.c.bf16 %v1148_v30, %v1148_v30  ;;  %1436 = vst.msk [vmem:[%s3119_s4 + $0x74] sm:$0xf] %vm1022_vm2, %v1765_v27 }
 0x119   :  { %1468 = vst.msk [vmem:[%s3119_s4 + $0xf4] sm:$0xf] %vm1022_vm2, %v1797_v5 }

// kernel: unet3d_forward.31
= control target key start
LH: loop header
LB: loop body
LE: loop exit
PB: predicated region body
PF: predicated region fallthrough
CT: control target
= control target key end

     0   :  { %vm205_vm0 = vcmask 257024   ;;  %s393_s1 = inlined_call_operand.vmem [shape: bf16[128,32], index: 1, kind: input, shape index: {}]   ;;  %s394_s0 = inlined_call_operand.vmem [shape: bf16[64,128], index: 0, kind: input, shape index: {}]   ;;  %s395_s2 = inlined_call_operand.vmem [shape: bf16[64,32], index: 2, kind: output, shape index: {}]  }
   0x1   :  { %v298_v0 = vld [vmem:[%s393_s1 + $0x38] sm:$0xff]   ;;  %v299_v1 = vld [vmem:[%s393_s1 + $0x30] sm:$0xff]   ;;  %v300_v2 = vld [vmem:[%s393_s1 + $0x28] sm:$0xff]  }
   0x2   :  { %258 = vmatprep.subr.bf16.mxu0 %v298_v0  ;;  %282 = vmatprep.subr.bf16.mxu1 %v298_v0  ;;  %v301_v3 = vld [vmem:[%s393_s1 + $0x20] sm:$0xff]   ;;  %v307_v5 = vld [vmem:[%s394_s0 + $0x10] sm:$0xff]   ;;  %v302_v6 = vld [vmem:[%s393_s1 + $0x18] sm:$0xff]  }
   0x3   :  { %259 = vmatpush3.bf16.msra.mxu0 %v298_v0  ;;  %290 = vmatpush3.bf16.msra.mxu1 %v298_v0  ;;  %v306_v4 = vld [vmem:[%s394_s0] sm:$0xff]   ;;  %v303_v7 = vld [vmem:[%s393_s1 + $0x10] sm:$0xff]   ;;  %v304_v8 = vld [vmem:[%s393_s1 + $0x8] sm:$0xff]  }
   0x4   :  { %260 = vmatprep.subr.bf16.mxu0 %v299_v1  ;;  %283 = vmatprep.subr.bf16.mxu1 %v299_v1  ;;  %v305_v9 = vld [vmem:[%s393_s1] sm:$0xff]   ;;  %v308_v10 = vld [vmem:[%s394_s0 + $0x8] sm:$0xff]   ;;  %v309_v11 = vld [vmem:[%s394_s0 + $0x18] sm:$0xff]  }
   0x5   :  { %274 = vmatprep.mubr.bf16.mxu0 %v306_v4  ;;  %278 = vmatprep.mubr.bf16.mxu1 %v307_v5 }
   0x7   :  { %261 = vmatpush3.bf16.msra.mxu0 %v299_v1  ;;  %291 = vmatpush3.bf16.msra.mxu1 %v299_v1 }
   0x8   :  { %262 = vmatprep.subr.bf16.mxu0 %v300_v2  ;;  %284 = vmatprep.subr.bf16.mxu1 %v300_v2 }
   0xb   :  { %263 = vmatpush3.bf16.msra.mxu0 %v300_v2  ;;  %292 = vmatpush3.bf16.msra.mxu1 %v300_v2 }
   0xc   :  { %264 = vmatprep.subr.bf16.mxu0 %v301_v3  ;;  %285 = vmatprep.subr.bf16.mxu1 %v301_v3 }
   0xf   :  { %265 = vmatpush3.bf16.msra.mxu0 %v301_v3  ;;  %293 = vmatpush3.bf16.msra.mxu1 %v301_v3 }
  0x10   :  { %266 = vmatprep.subr.bf16.mxu0 %v302_v6  ;;  %286 = vmatprep.subr.bf16.mxu1 %v302_v6 }
  0x13   :  { %267 = vmatpush3.bf16.msra.mxu0 %v302_v6  ;;  %294 = vmatpush3.bf16.msra.mxu1 %v302_v6 }
  0x14   :  { %268 = vmatprep.subr.bf16.mxu0 %v303_v7  ;;  %287 = vmatprep.subr.bf16.mxu1 %v303_v7 }
  0x17   :  { %269 = vmatpush3.bf16.msra.mxu0 %v303_v7  ;;  %295 = vmatpush3.bf16.msra.mxu1 %v303_v7 }
  0x18   :  { %270 = vmatprep.subr.bf16.mxu0 %v304_v8  ;;  %288 = vmatprep.subr.bf16.mxu1 %v304_v8 }
  0x1b   :  { %271 = vmatpush3.bf16.msra.mxu0 %v304_v8  ;;  %296 = vmatpush3.bf16.msra.mxu1 %v304_v8 }
  0x1c   :  { %272 = vmatprep.subr.bf16.mxu0 %v305_v9  ;;  %289 = vmatprep.subr.bf16.mxu1 %v305_v9 }
  0x1f   :  { %273 = vmatpush3.bf16.msra.mxu0 %v305_v9  ;;  %297 = vmatpush3.bf16.msra.mxu1 %v305_v9 }
  0x22   :  { %275 = vmatmul.mubr.bf16.vlgmr.msra.gmra.mxu0 %v308_v10  ;;  %279 = vmatmul.mubr.bf16.vlgmr.msra.gmra.mxu1 %v309_v11 }
  0xe2   :  { %v276_v12 = vpop.f32.mrf.mxu0  ;;  %v280_v13 = vpop.f32.mrf.mxu1 }
  0xe3   :  { %v240_v14 = vpack.c.bf16 %v276_v12, %v276_v12  ;;  %v244_v15 = vpack.c.bf16 %v280_v13, %v280_v13 }
  0xe4   :  { %v142_v16 = vpop.f32.mrf.mxu0  ;;  %v158_v17 = vpop.f32.mrf.mxu1 }
  0xe5   :  { %208 = vst.msk [vmem:[%s395_s2 + $0x8] sm:$0xf] %vm205_vm0, %v240_v14  ;;  %212 = vst.msk [vmem:[%s395_s2 + $0x18] sm:$0xf] %vm205_vm0, %v244_v15  ;;  %v238_v18 = vpack.c.bf16 %v142_v16, %v142_v16  ;;  %v242_v19 = vpack.c.bf16 %v158_v17, %v158_v17 }
  0xe6   :  { %v277_v20 = vpop.f32.mrf.mxu0  ;;  %v281_v21 = vpop.f32.mrf.mxu1 }
  0xe7   :  { %206 = vst.msk [vmem:[%s395_s2] sm:$0xf] %vm205_vm0, %v238_v18  ;;  %210 = vst.msk [vmem:[%s395_s2 + $0x10] sm:$0xf] %vm205_vm0, %v242_v19  ;;  %v241_v22 = vpack.c.bf16 %v277_v20, %v277_v20  ;;  %v245_v23 = vpack.c.bf16 %v281_v21, %v281_v21 }
  0xe8   :  { %v145_v24 = vpop.f32.mrf.mxu0  ;;  %v161_v25 = vpop.f32.mrf.mxu1 }
  0xe9   :  { %209 = vst.msk [vmem:[%s395_s2 + $0xc] sm:$0xf] %vm205_vm0, %v241_v22  ;;  %213 = vst.msk [vmem:[%s395_s2 + $0x1c] sm:$0xf] %vm205_vm0, %v245_v23  ;;  %v239_v26 = vpack.c.bf16 %v145_v24, %v145_v24  ;;  %v243_v27 = vpack.c.bf16 %v161_v25, %v161_v25 }
  0xeb   :  { %207 = vst.msk [vmem:[%s395_s2 + $0x4] sm:$0xf] %vm205_vm0, %v239_v26  ;;  %211 = vst.msk [vmem:[%s395_s2 + $0x14] sm:$0xf] %vm205_vm0, %v243_v27 }

// kernel: unet3d_forward.30
= control target key start
LH: loop header
LB: loop body
LE: loop exit
PB: predicated region body
PF: predicated region fallthrough
CT: control target
= control target key end

     0   :  { %vm480_vm0 = vcmask 1045504   ;;  %vm383_vm1 = vcmask 97280   ;;  %vm1287_vm2 = vcmask 1041408   ;;  %vm1190_vm3 = vcmask 31744   ;;  %s3649_s1 = inlined_call_operand.vmem [shape: bf16[12,4], index: 1, kind: input, shape index: {}]   ;;  %s3650_s0 = inlined_call_operand.vmem [shape: bf16[512,12], index: 0, kind: input, shape index: {}]   ;;  %s3651_s4 = inlined_call_operand.vmem [shape: bf16[4,16], index: 4, kind: input, shape index: {}]   ;;  %s3652_s2 = inlined_call_operand.vmem [shape: bf16[512,4], index: 2, kind: input, shape index: {}]   ;;  %s3653_s3 = inlined_call_operand.vmem [shape: bf16[512,4], index: 3, kind: input, shape index: {}]   ;;  %s3654_s5 = inlined_call_operand.vmem [shape: bf16[512,16], index: 5, kind: input, shape index: {}]   ;;  %s3655_s6 = inlined_call_operand.vmem [shape: bf16[512,16], index: 6, kind: output, shape index: {}]  }
   0x1   :  { %v2871_v0 = vld [vmem:[%s3649_s1] sm:$0x3f]   ;;  %v2873_v3 = vld [vmem:[%s3650_s0 + $0x8] sm:$0xff]   ;;  %v2874_v4 = vld [vmem:[%s3650_s0 + $0x10] sm:$0xff]   ;;  %vm1900_vm4 = vcmask 125952  }
   0x2   :  { %v2872_v1 = vld [vmem:[%s3650_s0] sm:$0xff]   ;;  %2869 = vmatprep.subr.msk.bf16.mxu0 %vm480_vm0, %v2871_v0  ;;  %v482_v2 = vsel %vm480_vm0, %v2871_v0, 0  ;;  %v2875_v5 = vld [vmem:[%s3650_s0 + $0x18] sm:$0xff]   ;;  %v2877_v7 = vld [vmem:[%s3650_s0 + $0x28] sm:$0xff]  }
   0x3   :  { %2738 = vmatpush3.bf16.msra.mxu0 %v482_v2  ;;  %2739 = vmatprep.mubr.msk.bf16.mxu0 %vm383_vm1, %v2872_v1  ;;  %v2876_v6 = vld [vmem:[%s3650_s0 + $0x20] sm:$0xff]   ;;  %v2878_v8 = vld [vmem:[%s3650_s0 + $0x30] sm:$0xff]   ;;  %v2879_v9 = vld [vmem:[%s3650_s0 + $0x38] sm:$0xff]  }
   0x4   :  { %v2880_v10 = vld [vmem:[%s3650_s0 + $0x40] sm:$0xff]   ;;  %v2881_v11 = vld [vmem:[%s3650_s0 + $0x48] sm:$0xff]   ;;  %v2882_v12 = vld [vmem:[%s3650_s0 + $0x50] sm:$0xff]  }
   0x5   :  { %v2883_v13 = vld [vmem:[%s3650_s0 + $0x58] sm:$0xff]   ;;  %v2884_v14 = vld [vmem:[%s3650_s0 + $0x60] sm:$0xff]   ;;  %v2885_v15 = vld [vmem:[%s3650_s0 + $0x68] sm:$0xff]  }
   0x6   :  { %2740 = vmatmul.mubr.msk.bf16.vlgmr.msra.gmra.mxu0 %vm383_vm1, %v2873_v3  ;;  %v2886_v16 = vld [vmem:[%s3650_s0 + $0x70] sm:$0xff]   ;;  %v2887_v17 = vld [vmem:[%s3650_s0 + $0x78] sm:$0xff]   ;;  %v2888_v18 = vld [vmem:[%s3650_s0 + $0x80] sm:$0xff]  }
   0x7   :  { %2743 = vmatprep.mubr.msk.bf16.mxu0 %vm383_vm1, %v2874_v4  ;;  %v2889_v19 = vld [vmem:[%s3650_s0 + $0x88] sm:$0xff]   ;;  %v2890_v20 = vld [vmem:[%s3650_s0 + $0x90] sm:$0xff]   ;;  %v2891_v21 = vld [vmem:[%s3650_s0 + $0x98] sm:$0xff]  }
   0x8   :  { %v2892_v22 = vld [vmem:[%s3650_s0 + $0xa0] sm:$0xff]   ;;  %v2893_v24 = vld [vmem:[%s3650_s0 + $0xa8] sm:$0xff]   ;;  %v2894_v26 = vld [vmem:[%s3650_s0 + $0xb0] sm:$0xff]  }
   0x9   :  { %v1061_v23 = vld [vmem:[%s3651_s4] sm:$0x3]  ;;  %v2895_v27 = vld [vmem:[%s3650_s0 + $0xb8] sm:$0xff]   ;;  %v2897_v29 = vld [vmem:[%s3650_s0 + $0xc8] sm:$0xff]  }
   0xa   :  { %2870 = vmatprep.subr.msk.bf16.mxu1 %vm1287_vm2, %v1061_v23  ;;  %v1289_v25 = vsel %vm1287_vm2, %v1061_v23, 0  ;;  %v2896_v28 = vld [vmem:[%s3650_s0 + $0xc0] sm:$0xff]   ;;  %v2898_v30 = vld [vmem:[%s3650_s0 + $0xd0] sm:$0xff]   ;;  %v2899_v31 = vld [vmem:[%s3650_s0 + $0xd8] sm:$0xff]  }
   0xb   :  { %2804 = vmatpush3.bf16.msra.mxu1 %v1289_v25  ;;  %v2900_v32 = vld [vmem:[%s3650_s0 + $0xe0] sm:$0xff]   ;;  %v2901_v33 = vld [vmem:[%s3650_s0 + $0xe8] sm:$0xff]   ;;  %v2902_v34 = vld [vmem:[%s3650_s0 + $0xf0] sm:$0xff]  }
   0xc   :  { %v2903_v35 = vld [vmem:[%s3650_s0 + $0xf8] sm:$0xff]   ;;  %v2195_v36 = vld [vmem:[%s3652_s2] sm:$0xff]   ;;  %v2578_v37 = vld [vmem:[%s3652_s2 + $0x8] sm:$0xff]  }
   0xd   :  { %v2196_v38 = vunpack.c.l.bf16 %v2195_v36  ;;  %v2200_v39 = vunpack.c.l.bf16 %v2578_v37  ;;  %v2323_v41 = vld [vmem:[%s3653_s3] sm:$0xff]   ;;  %v2609_v42 = vld [vmem:[%s3653_s3 + $0x8] sm:$0xff]   ;;  %v2201_v43 = vunpack.c.h.bf16 %v2578_v37  ;;  %v2197_v48 = vunpack.c.h.bf16 %v2195_v36  ;;  %v2579_v52 = vld [vmem:[%s3652_s2 + $0x10] sm:$0xff]  }
   0xe   :  { %2744 = vmatmul.mubr.msk.bf16.gmra.mxu0 %vm383_vm1, %v2875_v5  ;;  %v2324_v46 = vunpack.c.l.bf16 %v2323_v41  ;;  %v2329_v47 = vunpack.c.h.bf16 %v2609_v42  ;;  %v2328_v50 = vunpack.c.l.bf16 %v2609_v42  ;;  %v2325_v54 = vunpack.c.h.bf16 %v2323_v41  ;;  %v2580_v55 = vld [vmem:[%s3652_s2 + $0x18] sm:$0xff]   ;;  %v2610_v61 = vld [vmem:[%s3653_s3 + $0x10] sm:$0xff]  }
   0xf   :  { %2747 = vmatprep.mubr.msk.bf16.mxu0 %vm383_vm1, %v2876_v6  ;;  %v2204_v60 = vunpack.c.l.bf16 %v2579_v52  ;;  %v2208_v63 = vunpack.c.l.bf16 %v2580_v55  ;;  %v2611_v2 = vld [vmem:[%s3653_s3 + $0x18] sm:$0xff]   ;;  %v2209_v3 = vunpack.c.h.bf16 %v2580_v55  ;;  %v2332_v6 = vunpack.c.l.bf16 %v2610_v61 }
  0x16   :  { %2748 = vmatmul.mubr.msk.bf16.gmra.mxu0 %vm383_vm1, %v2877_v7  ;;  %v2337_v7 = vunpack.c.h.bf16 %v2611_v2 }
  0x17   :  { %2751 = vmatprep.mubr.msk.bf16.mxu0 %vm383_vm1, %v2878_v8 }
  0x1e   :  { %2752 = vmatmul.mubr.msk.bf16.gmra.mxu0 %vm383_vm1, %v2879_v9 }
  0x1f   :  { %2755 = vmatprep.mubr.msk.bf16.mxu0 %vm383_vm1, %v2880_v10 }
  0x26   :  { %2756 = vmatmul.mubr.msk.bf16.gmra.mxu0 %vm383_vm1, %v2881_v11  ;;  %v2205_v11 = vunpack.c.h.bf16 %v2579_v52 }
  0x27   :  { %2759 = vmatprep.mubr.msk.bf16.mxu0 %vm383_vm1, %v2882_v12 }
  0x2e   :  { %2760 = vmatmul.mubr.msk.bf16.gmra.mxu0 %vm383_vm1, %v2883_v13 }
  0x2f   :  { %2763 = vmatprep.mubr.msk.bf16.mxu0 %vm383_vm1, %v2884_v14  ;;  %v2336_v14 = vunpack.c.l.bf16 %v2611_v2 }
  0x36   :  { %2764 = vmatmul.mubr.msk.bf16.gmra.mxu0 %vm383_vm1, %v2885_v15 }
  0x37   :  { %2767 = vmatprep.mubr.msk.bf16.mxu0 %vm383_vm1, %v2886_v16  ;;  %v2581_v16 = vld [vmem:[%s3652_s2 + $0x20] sm:$0xff]  }
  0x38   :  { %v2213_v41 = vunpack.c.h.bf16 %v2581_v16 }
  0x3e   :  { %2768 = vmatmul.mubr.msk.bf16.gmra.mxu0 %vm383_vm1, %v2887_v17 }
  0x3f   :  { %2771 = vmatprep.mubr.msk.bf16.mxu0 %vm383_vm1, %v2888_v18  ;;  %v2333_v18 = vunpack.c.h.bf16 %v2610_v61 }
  0x46   :  { %2772 = vmatmul.mubr.msk.bf16.gmra.mxu0 %vm383_vm1, %v2889_v19 }
  0x47   :  { %2775 = vmatprep.mubr.msk.bf16.mxu0 %vm383_vm1, %v2890_v20  ;;  %v2582_v20 = vld [vmem:[%s3652_s2 + $0x28] sm:$0xff]  }
  0x4e   :  { %2776 = vmatmul.mubr.msk.bf16.gmra.mxu0 %vm383_vm1, %v2891_v21 }
  0x4f   :  { %2779 = vmatprep.mubr.msk.bf16.mxu0 %vm383_vm1, %v2892_v22 }
  0x56   :  { %2780 = vmatmul.mubr.msk.bf16.gmra.mxu0 %vm383_vm1, %v2893_v24 }
  0x57   :  { %2783 = vmatprep.mubr.msk.bf16.mxu0 %vm383_vm1, %v2894_v26  ;;  %v2212_v26 = vunpack.c.l.bf16 %v2581_v16  ;;  %v2586_v16 = vld [vmem:[%s3652_s2 + $0x48] sm:$0xff]  }
  0x5e   :  { %2784 = vmatmul.mubr.msk.bf16.gmra.mxu0 %vm383_vm1, %v2895_v27  ;;  %v2612_v27 = vld [vmem:[%s3653_s3 + $0x20] sm:$0xff]  }
  0x5f   :  { %2787 = vmatprep.mubr.msk.bf16.mxu0 %vm383_vm1, %v2896_v28  ;;  %v2340_v36 = vunpack.c.l.bf16 %v2612_v27 }
  0x66   :  { %2788 = vmatmul.mubr.msk.bf16.gmra.mxu0 %vm383_vm1, %v2897_v29  ;;  %v2216_v29 = vunpack.c.l.bf16 %v2582_v20 }
  0x67   :  { %2791 = vmatprep.mubr.msk.bf16.mxu0 %vm383_vm1, %v2898_v30 }
  0x6e   :  { %2792 = vmatmul.mubr.msk.bf16.gmra.mxu0 %vm383_vm1, %v2899_v31 }
  0x6f   :  { %2795 = vmatprep.mubr.msk.bf16.mxu0 %vm383_vm1, %v2900_v32  ;;  %v2613_v32 = vld [vmem:[%s3653_s3 + $0x28] sm:$0xff]  }
  0x70   :  { %v2345_v37 = vunpack.c.h.bf16 %v2613_v32 }
  0x76   :  { %2796 = vmatmul.mubr.msk.bf16.gmra.mxu0 %vm383_vm1, %v2901_v33  ;;  %v2217_v33 = vunpack.c.h.bf16 %v2582_v20 }
  0x77   :  { %2799 = vmatprep.mubr.msk.bf16.mxu0 %vm383_vm1, %v2902_v34 }
  0x7e   :  { %2800 = vmatmul.mubr.msk.bf16.gmra.mxu0 %vm383_vm1, %v2903_v35 }
  0xc6   :  { %v2741_v40 = vpop.f32.mrf.mxu0 }
  0xc7   :  { %v527_v49 = vadd.f32 %v2741_v40, %v2200_v39 }
  0xc8   :  { %v518_v44 = vpop.f32.mrf.mxu0 }
  0xc9   :  { %v519_v45 = vadd.f32 %v2196_v38, %v518_v44  ;;  %v903_v62 = vadd.f32 %v2328_v50, %v527_v49  ;;  %v2344_v44 = vunpack.c.l.bf16 %v2613_v32  ;;  %v2341_v49 = vunpack.c.h.bf16 %v2612_v27  ;;  %v2584_v50 = vld [vmem:[%s3652_s2 + $0x38] sm:$0xff]  }
  0xca   :  { %v2742_v51 = vpop.f32.mrf.mxu0 }
  0xcb   :  { %v530_v53 = vadd.f32 %v2742_v51, %v2201_v43  ;;  %v901_v57 = vadd.f32 %v2324_v46, %v519_v45  ;;  %v967_v12 = vmax.f32 %v903_v62, 0.0  ;;  %v2583_v46 = vld [vmem:[%s3652_s2 + $0x30] sm:$0xff]   ;;  %v2615_v62 = vld [vmem:[%s3653_s3 + $0x38] sm:$0xff]  }
  0xcc   :  { %v521_v56 = vpop.f32.mrf.mxu0 }
  0xcd   :  { %v904_v58 = vadd.f32 %v2329_v47, %v530_v53  ;;  %v522_v59 = vadd.f32 %v2197_v48, %v521_v56  ;;  %v965_v8 = vmax.f32 %v901_v57, 0.0  ;;  %v2220_v56 = vunpack.c.l.bf16 %v2583_v46  ;;  %v2614_v57 = vld [vmem:[%s3653_s3 + $0x30] sm:$0xff]  }
  0xce   :  { %v2745_v0 = vpop.f32.mrf.mxu0  ;;  %v2348_v2 = vunpack.c.l.bf16 %v2614_v57 }
  0xcf   :  { %v902_v1 = vadd.f32 %v2325_v54, %v522_v59  ;;  %v968_v4 = vmax.f32 %v904_v58, 0.0  ;;  %v543_v13 = vadd.f32 %v2745_v0, %v2208_v63  ;;  %v2224_v59 = vunpack.c.l.bf16 %v2584_v50 }
  0xd0   :  { %v534_v5 = vpop.f32.mrf.mxu0  ;;  %v2225_v63 = vunpack.c.h.bf16 %v2584_v50 }
  0xd1   :  { %v966_v9 = vmax.f32 %v902_v1, 0.0  ;;  %v535_v10 = vadd.f32 %v2204_v60, %v534_v5  ;;  %v1030_v21 = vpack.c.bf16 %v968_v4, %v967_v12  ;;  %v907_v28 = vadd.f32 %v2336_v14, %v543_v13  ;;  %v2585_v12 = vld [vmem:[%s3652_s2 + $0x40] sm:$0xff]  }
  0xd2   :  { %v2746_v15 = vpop.f32.mrf.mxu0 }
  0xd3   :  { %v546_v17 = vadd.f32 %v2746_v15, %v2209_v3  ;;  %v1029_v19 = vpack.c.bf16 %v966_v9, %v965_v8  ;;  %v905_v23 = vadd.f32 %v2332_v6, %v535_v10  ;;  %v971_v42 = vmax.f32 %v907_v28, 0.0  ;;  %v2617_v28 = vld [vmem:[%s3653_s3 + $0x48] sm:$0xff]  }
  0xd4   :  { %v537_v22 = vpop.f32.mrf.mxu0  ;;  %v2353_v3 = vunpack.c.h.bf16 %v2615_v62  ;;  %v2352_v10 = vunpack.c.l.bf16 %v2615_v62  ;;  %v2349_v15 = vunpack.c.h.bf16 %v2614_v57 }
  0xd5   :  { %v908_v24 = vadd.f32 %v2337_v7, %v546_v17  ;;  %v538_v25 = vadd.f32 %v2205_v11, %v537_v22  ;;  %2805 = vmatprep.mubr.msk.bf16.mxu1 %vm1190_vm3, %v1029_v19  ;;  %v969_v38 = vmax.f32 %v905_v23, 0.0  ;;  %v2221_v7 = vunpack.c.h.bf16 %v2583_v46  ;;  %v2616_v23 = vld [vmem:[%s3653_s3 + $0x40] sm:$0xff]   ;;  %v2588_v46 = vld [vmem:[%s3652_s2 + $0x58] sm:$0xff]  }
  0xd6   :  { %v2749_v30 = vpop.f32.mrf.mxu0  ;;  %2806 = vmatmul.mubr.msk.bf16.vlgmr.msra.gmra.mxu1 %vm1190_vm3, %v1030_v21  ;;  %v2228_v22 = vunpack.c.l.bf16 %v2585_v12  ;;  %v2356_v32 = vunpack.c.l.bf16 %v2616_v23 }
  0xd7   :  { %v906_v31 = vadd.f32 %v2333_v18, %v538_v25  ;;  %v972_v34 = vmax.f32 %v908_v24, 0.0  ;;  %v559_v43 = vadd.f32 %v2749_v30, %v2216_v29  ;;  %v2232_v25 = vunpack.c.l.bf16 %v2586_v16 }
  0xd8   :  { %v550_v35 = vpop.f32.mrf.mxu0  ;;  %v2233_v29 = vunpack.c.h.bf16 %v2586_v16 }
  0xd9   :  { %v970_v39 = vmax.f32 %v906_v31, 0.0  ;;  %v551_v40 = vadd.f32 %v2212_v26, %v550_v35  ;;  %v1032_v51 = vpack.c.bf16 %v972_v34, %v971_v42  ;;  %v911_v58 = vadd.f32 %v2344_v44, %v559_v43  ;;  %v2587_v42 = vld [vmem:[%s3652_s2 + $0x50] sm:$0xff]  }
  0xda   :  { %v2750_v45 = vpop.f32.mrf.mxu0 }
  0xdb   :  { %v1031_v47 = vpack.c.bf16 %v970_v39, %v969_v38  ;;  %v562_v48 = vadd.f32 %v2750_v45, %v2217_v33  ;;  %v909_v53 = vadd.f32 %v2340_v36, %v551_v40  ;;  %v975_v8 = vmax.f32 %v911_v58, 0.0  ;;  %v2619_v58 = vld [vmem:[%s3653_s3 + $0x58] sm:$0xff]  }
  0xdc   :  { %v553_v52 = vpop.f32.mrf.mxu0  ;;  %v2361_v33 = vunpack.c.h.bf16 %v2617_v28  ;;  %v2360_v40 = vunpack.c.l.bf16 %v2617_v28  ;;  %v2357_v45 = vunpack.c.h.bf16 %v2616_v23 }
  0xdd   :  { %v912_v54 = vadd.f32 %v2345_v37, %v562_v48  ;;  %v554_v55 = vadd.f32 %v2213_v41, %v553_v52  ;;  %2809 = vmatprep.mubr.msk.bf16.mxu1 %vm1190_vm3, %v1031_v47  ;;  %v973_v4 = vmax.f32 %v909_v53, 0.0  ;;  %v2229_v37 = vunpack.c.h.bf16 %v2585_v12  ;;  %v2618_v53 = vld [vmem:[%s3653_s3 + $0x50] sm:$0xff]   ;;  %v2590_v12 = vld [vmem:[%s3652_s2 + $0x68] sm:$0xff]  }
  0xde   :  { %v2753_v60 = vpop.f32.mrf.mxu0  ;;  %2810 = vmatmul.mubr.msk.bf16.gmra.mxu1 %vm1190_vm3, %v1032_v51  ;;  %v2236_v52 = vunpack.c.l.bf16 %v2587_v42  ;;  %v2364_v62 = vunpack.c.l.bf16 %v2618_v53 }
  0xdf   :  { %v910_v61 = vadd.f32 %v2341_v49, %v554_v55  ;;  %v976_v0 = vmax.f32 %v912_v54, 0.0  ;;  %v575_v9 = vadd.f32 %v2753_v60, %v2224_v59  ;;  %v2240_v55 = vunpack.c.l.bf16 %v2588_v46 }
  0xe0   :  { %v566_v1 = vpop.f32.mrf.mxu0  ;;  %v2241_v59 = vunpack.c.h.bf16 %v2588_v46 }
  0xe1   :  { %v974_v5 = vmax.f32 %v910_v61, 0.0  ;;  %v567_v6 = vadd.f32 %v2220_v56, %v566_v1  ;;  %v1034_v17 = vpack.c.bf16 %v976_v0, %v975_v8  ;;  %v915_v24 = vadd.f32 %v2352_v10, %v575_v9  ;;  %v2589_v8 = vld [vmem:[%s3652_s2 + $0x60] sm:$0xff]  }
  0xe2   :  { %v2754_v11 = vpop.f32.mrf.mxu0 }
  0xe3   :  { %v1033_v13 = vpack.c.bf16 %v974_v5, %v973_v4  ;;  %v578_v14 = vadd.f32 %v2754_v11, %v2225_v63  ;;  %v913_v19 = vadd.f32 %v2348_v2, %v567_v6  ;;  %v979_v38 = vmax.f32 %v915_v24, 0.0  ;;  %v2621_v24 = vld [vmem:[%s3653_s3 + $0x68] sm:$0xff]  }
  0xe4   :  { %v569_v18 = vpop.f32.mrf.mxu0  ;;  %v2369_v63 = vunpack.c.h.bf16 %v2619_v58  ;;  %v2368_v6 = vunpack.c.l.bf16 %v2619_v58  ;;  %v2365_v11 = vunpack.c.h.bf16 %v2618_v53 }
  0xe5   :  { %v916_v20 = vadd.f32 %v2353_v3, %v578_v14  ;;  %v570_v21 = vadd.f32 %v2221_v7, %v569_v18  ;;  %2813 = vmatprep.mubr.msk.bf16.mxu1 %vm1190_vm3, %v1033_v13  ;;  %v977_v34 = vmax.f32 %v913_v19, 0.0  ;;  %v2237_v3 = vunpack.c.h.bf16 %v2587_v42  ;;  %v2620_v19 = vld [vmem:[%s3653_s3 + $0x60] sm:$0xff]   ;;  %v2592_v42 = vld [vmem:[%s3652_s2 + $0x78] sm:$0xff]  }
  0xe6   :  { %v2757_v26 = vpop.f32.mrf.mxu0  ;;  %2814 = vmatmul.mubr.msk.bf16.gmra.mxu1 %vm1190_vm3, %v1034_v17  ;;  %v2244_v18 = vunpack.c.l.bf16 %v2589_v8  ;;  %v2372_v28 = vunpack.c.l.bf16 %v2620_v19 }
  0xe7   :  { %v914_v27 = vadd.f32 %v2349_v15, %v570_v21  ;;  %v980_v30 = vmax.f32 %v916_v20, 0.0  ;;  %v591_v39 = vadd.f32 %v2757_v26, %v2232_v25  ;;  %v2248_v21 = vunpack.c.l.bf16 %v2590_v12 }
  0xe8   :  { %v582_v31 = vpop.f32.mrf.mxu0  ;;  %v2249_v25 = vunpack.c.h.bf16 %v2590_v12 }
  0xe9   :  { %v978_v35 = vmax.f32 %v914_v27, 0.0  ;;  %v583_v36 = vadd.f32 %v2228_v22, %v582_v31  ;;  %v1036_v47 = vpack.c.bf16 %v980_v30, %v979_v38  ;;  %v919_v54 = vadd.f32 %v2360_v40, %v591_v39  ;;  %v2591_v38 = vld [vmem:[%s3652_s2 + $0x70] sm:$0xff]  }
  0xea   :  { %v2758_v41 = vpop.f32.mrf.mxu0 }
  0xeb   :  { %v1035_v43 = vpack.c.bf16 %v978_v35, %v977_v34  ;;  %v594_v44 = vadd.f32 %v2758_v41, %v2233_v29  ;;  %v917_v49 = vadd.f32 %v2356_v32, %v583_v36  ;;  %v983_v4 = vmax.f32 %v919_v54, 0.0  ;;  %v2623_v54 = vld [vmem:[%s3653_s3 + $0x78] sm:$0xff]  }
  0xec   :  { %v585_v48 = vpop.f32.mrf.mxu0  ;;  %v2377_v29 = vunpack.c.h.bf16 %v2621_v24  ;;  %v2376_v36 = vunpack.c.l.bf16 %v2621_v24  ;;  %v2373_v41 = vunpack.c.h.bf16 %v2620_v19 }
  0xed   :  { %v920_v50 = vadd.f32 %v2361_v33, %v594_v44  ;;  %v586_v51 = vadd.f32 %v2229_v37, %v585_v48  ;;  %2817 = vmatprep.mubr.msk.bf16.mxu1 %vm1190_vm3, %v1035_v43  ;;  %v981_v0 = vmax.f32 %v917_v49, 0.0  ;;  %v2245_v33 = vunpack.c.h.bf16 %v2589_v8  ;;  %v2622_v49 = vld [vmem:[%s3653_s3 + $0x70] sm:$0xff]   ;;  %v2594_v8 = vld [vmem:[%s3652_s2 + $0x88] sm:$0xff]  }
  0xee   :  { %v2761_v56 = vpop.f32.mrf.mxu0  ;;  %2818 = vmatmul.mubr.msk.bf16.gmra.mxu1 %vm1190_vm3, %v1036_v47  ;;  %v2252_v48 = vunpack.c.l.bf16 %v2591_v38  ;;  %v2380_v58 = vunpack.c.l.bf16 %v2622_v49 }
  0xef   :  { %v918_v57 = vadd.f32 %v2357_v45, %v586_v51  ;;  %v984_v60 = vmax.f32 %v920_v50, 0.0  ;;  %v607_v5 = vadd.f32 %v2761_v56, %v2240_v55  ;;  %v2256_v51 = vunpack.c.l.bf16 %v2592_v42 }
  0xf0   :  { %v598_v61 = vpop.f32.mrf.mxu0  ;;  %v2257_v55 = vunpack.c.h.bf16 %v2592_v42 }
  0xf1   :  { %v982_v1 = vmax.f32 %v918_v57, 0.0  ;;  %v599_v2 = vadd.f32 %v2236_v52, %v598_v61  ;;  %v1038_v13 = vpack.c.bf16 %v984_v60, %v983_v4  ;;  %v923_v20 = vadd.f32 %v2368_v6, %v607_v5  ;;  %v2593_v4 = vld [vmem:[%s3652_s2 + $0x80] sm:$0xff]  }
  0xf2   :  { %v2762_v7 = vpop.f32.mrf.mxu0 }
  0xf3   :  { %v1037_v9 = vpack.c.bf16 %v982_v1, %v981_v0  ;;  %v610_v10 = vadd.f32 %v2762_v7, %v2241_v59  ;;  %v921_v15 = vadd.f32 %v2364_v62, %v599_v2  ;;  %v987_v34 = vmax.f32 %v923_v20, 0.0  ;;  %v2625_v20 = vld [vmem:[%s3653_s3 + $0x88] sm:$0xff]  }
  0xf4   :  { %v601_v14 = vpop.f32.mrf.mxu0  ;;  %v2385_v59 = vunpack.c.h.bf16 %v2623_v54  ;;  %v2384_v2 = vunpack.c.l.bf16 %v2623_v54  ;;  %v2381_v7 = vunpack.c.h.bf16 %v2622_v49 }
  0xf5   :  { %v924_v16 = vadd.f32 %v2369_v63, %v610_v10  ;;  %v602_v17 = vadd.f32 %v2237_v3, %v601_v14  ;;  %2821 = vmatprep.mubr.msk.bf16.mxu1 %vm1190_vm3, %v1037_v9  ;;  %v985_v30 = vmax.f32 %v921_v15, 0.0  ;;  %v2253_v63 = vunpack.c.h.bf16 %v2591_v38  ;;  %v2624_v15 = vld [vmem:[%s3653_s3 + $0x80] sm:$0xff]   ;;  %v2596_v38 = vld [vmem:[%s3652_s2 + $0x98] sm:$0xff]  }
  0xf6   :  { %v2765_v22 = vpop.f32.mrf.mxu0  ;;  %2822 = vmatmul.mubr.msk.bf16.gmra.mxu1 %vm1190_vm3, %v1038_v13  ;;  %v2260_v14 = vunpack.c.l.bf16 %v2593_v4  ;;  %v2388_v24 = vunpack.c.l.bf16 %v2624_v15 }
  0xf7   :  { %v922_v23 = vadd.f32 %v2365_v11, %v602_v17  ;;  %v988_v26 = vmax.f32 %v924_v16, 0.0  ;;  %v623_v35 = vadd.f32 %v2765_v22, %v2248_v21  ;;  %v2264_v17 = vunpack.c.l.bf16 %v2594_v8 }
  0xf8   :  { %v614_v27 = vpop.f32.mrf.mxu0  ;;  %v2265_v21 = vunpack.c.h.bf16 %v2594_v8 }
  0xf9   :  { %v986_v31 = vmax.f32 %v922_v23, 0.0  ;;  %v615_v32 = vadd.f32 %v2244_v18, %v614_v27  ;;  %v1040_v43 = vpack.c.bf16 %v988_v26, %v987_v34  ;;  %v927_v50 = vadd.f32 %v2376_v36, %v623_v35  ;;  %v2595_v34 = vld [vmem:[%s3652_s2 + $0x90] sm:$0xff]  }
  0xfa   :  { %v2766_v37 = vpop.f32.mrf.mxu0 }
  0xfb   :  { %v1039_v39 = vpack.c.bf16 %v986_v31, %v985_v30  ;;  %v626_v40 = vadd.f32 %v2766_v37, %v2249_v25  ;;  %v925_v45 = vadd.f32 %v2372_v28, %v615_v32  ;;  %v991_v0 = vmax.f32 %v927_v50, 0.0  ;;  %v2627_v50 = vld [vmem:[%s3653_s3 + $0x98] sm:$0xff]  }
  0xfc   :  { %v617_v44 = vpop.f32.mrf.mxu0  ;;  %v2393_v25 = vunpack.c.h.bf16 %v2625_v20  ;;  %v2392_v32 = vunpack.c.l.bf16 %v2625_v20  ;;  %v2389_v37 = vunpack.c.h.bf16 %v2624_v15 }
  0xfd   :  { %v928_v46 = vadd.f32 %v2377_v29, %v626_v40  ;;  %v618_v47 = vadd.f32 %v2245_v33, %v617_v44  ;;  %2825 = vmatprep.mubr.msk.bf16.mxu1 %vm1190_vm3, %v1039_v39  ;;  %v989_v60 = vmax.f32 %v925_v45, 0.0  ;;  %v2261_v29 = vunpack.c.h.bf16 %v2593_v4  ;;  %v2626_v45 = vld [vmem:[%s3653_s3 + $0x90] sm:$0xff]   ;;  %v2598_v4 = vld [vmem:[%s3652_s2 + $0xa8] sm:$0xff]  }
  0xfe   :  { %v2769_v52 = vpop.f32.mrf.mxu0  ;;  %2826 = vmatmul.mubr.msk.bf16.gmra.mxu1 %vm1190_vm3, %v1040_v43  ;;  %v2268_v44 = vunpack.c.l.bf16 %v2595_v34  ;;  %v2396_v54 = vunpack.c.l.bf16 %v2626_v45 }
  0xff   :  { %v926_v53 = vadd.f32 %v2373_v41, %v618_v47  ;;  %v992_v56 = vmax.f32 %v928_v46, 0.0  ;;  %v639_v1 = vadd.f32 %v2769_v52, %v2256_v51  ;;  %v2272_v47 = vunpack.c.l.bf16 %v2596_v38 }
 0x100   :  { %v630_v57 = vpop.f32.mrf.mxu0  ;;  %v2273_v51 = vunpack.c.h.bf16 %v2596_v38 }
 0x101   :  { %v990_v61 = vmax.f32 %v926_v53, 0.0  ;;  %v631_v62 = vadd.f32 %v2252_v48, %v630_v57  ;;  %v1042_v9 = vpack.c.bf16 %v992_v56, %v991_v0  ;;  %v931_v16 = vadd.f32 %v2384_v2, %v639_v1  ;;  %v2597_v0 = vld [vmem:[%s3652_s2 + $0xa0] sm:$0xff]  }
 0x102   :  { %v2770_v3 = vpop.f32.mrf.mxu0 }
 0x103   :  { %v1041_v5 = vpack.c.bf16 %v990_v61, %v989_v60  ;;  %v642_v6 = vadd.f32 %v2770_v3, %v2257_v55  ;;  %v929_v11 = vadd.f32 %v2380_v58, %v631_v62  ;;  %v995_v30 = vmax.f32 %v931_v16, 0.0  ;;  %v2629_v16 = vld [vmem:[%s3653_s3 + $0xa8] sm:$0xff]  }
 0x104   :  { %v633_v10 = vpop.f32.mrf.mxu0  ;;  %v2401_v55 = vunpack.c.h.bf16 %v2627_v50  ;;  %v2400_v62 = vunpack.c.l.bf16 %v2627_v50  ;;  %v2397_v3 = vunpack.c.h.bf16 %v2626_v45 }
 0x105   :  { %v932_v12 = vadd.f32 %v2385_v59, %v642_v6  ;;  %v634_v13 = vadd.f32 %v2253_v63, %v633_v10  ;;  %2829 = vmatprep.mubr.msk.bf16.mxu1 %vm1190_vm3, %v1041_v5  ;;  %v993_v26 = vmax.f32 %v929_v11, 0.0  ;;  %v2269_v59 = vunpack.c.h.bf16 %v2595_v34  ;;  %v2628_v11 = vld [vmem:[%s3653_s3 + $0xa0] sm:$0xff]   ;;  %v2600_v34 = vld [vmem:[%s3652_s2 + $0xb8] sm:$0xff]  }
 0x106   :  { %v2773_v18 = vpop.f32.mrf.mxu0  ;;  %2830 = vmatmul.mubr.msk.bf16.gmra.mxu1 %vm1190_vm3, %v1042_v9  ;;  %v2276_v10 = vunpack.c.l.bf16 %v2597_v0  ;;  %v2404_v20 = vunpack.c.l.bf16 %v2628_v11 }
 0x107   :  { %v930_v19 = vadd.f32 %v2381_v7, %v634_v13  ;;  %v996_v22 = vmax.f32 %v932_v12, 0.0  ;;  %v655_v31 = vadd.f32 %v2773_v18, %v2264_v17  ;;  %v2280_v13 = vunpack.c.l.bf16 %v2598_v4 }
 0x108   :  { %v646_v23 = vpop.f32.mrf.mxu0  ;;  %v2281_v17 = vunpack.c.h.bf16 %v2598_v4 }
 0x109   :  { %v994_v27 = vmax.f32 %v930_v19, 0.0  ;;  %v647_v28 = vadd.f32 %v2260_v14, %v646_v23  ;;  %v1044_v39 = vpack.c.bf16 %v996_v22, %v995_v30  ;;  %v935_v46 = vadd.f32 %v2392_v32, %v655_v31  ;;  %v2599_v30 = vld [vmem:[%s3652_s2 + $0xb0] sm:$0xff]  }
 0x10a   :  { %v2774_v33 = vpop.f32.mrf.mxu0 }
 0x10b   :  { %v1043_v35 = vpack.c.bf16 %v994_v27, %v993_v26  ;;  %v658_v36 = vadd.f32 %v2774_v33, %v2265_v21  ;;  %v933_v41 = vadd.f32 %v2388_v24, %v647_v28  ;;  %v999_v60 = vmax.f32 %v935_v46, 0.0  ;;  %v2631_v46 = vld [vmem:[%s3653_s3 + $0xb8] sm:$0xff]  }
 0x10c   :  { %v649_v40 = vpop.f32.mrf.mxu0  ;;  %v2409_v21 = vunpack.c.h.bf16 %v2629_v16  ;;  %v2408_v28 = vunpack.c.l.bf16 %v2629_v16  ;;  %v2405_v33 = vunpack.c.h.bf16 %v2628_v11 }
 0x10d   :  { %v936_v42 = vadd.f32 %v2393_v25, %v658_v36  ;;  %v650_v43 = vadd.f32 %v2261_v29, %v649_v40  ;;  %2833 = vmatprep.mubr.msk.bf16.mxu1 %vm1190_vm3, %v1043_v35  ;;  %v997_v56 = vmax.f32 %v933_v41, 0.0  ;;  %v2277_v25 = vunpack.c.h.bf16 %v2597_v0  ;;  %v2630_v41 = vld [vmem:[%s3653_s3 + $0xb0] sm:$0xff]   ;;  %v2602_v0 = vld [vmem:[%s3652_s2 + $0xc8] sm:$0xff]  }
 0x10e   :  { %v2777_v48 = vpop.f32.mrf.mxu0  ;;  %2834 = vmatmul.mubr.msk.bf16.gmra.mxu1 %vm1190_vm3, %v1044_v39  ;;  %v2284_v40 = vunpack.c.l.bf16 %v2599_v30  ;;  %v2412_v50 = vunpack.c.l.bf16 %v2630_v41 }
 0x10f   :  { %v934_v49 = vadd.f32 %v2389_v37, %v650_v43  ;;  %v1000_v52 = vmax.f32 %v936_v42, 0.0  ;;  %v671_v61 = vadd.f32 %v2777_v48, %v2272_v47  ;;  %v2288_v43 = vunpack.c.l.bf16 %v2600_v34 }
 0x110   :  { %v662_v53 = vpop.f32.mrf.mxu0  ;;  %v2289_v47 = vunpack.c.h.bf16 %v2600_v34 }
 0x111   :  { %v998_v57 = vmax.f32 %v934_v49, 0.0  ;;  %v663_v58 = vadd.f32 %v2268_v44, %v662_v53  ;;  %v1046_v5 = vpack.c.bf16 %v1000_v52, %v999_v60  ;;  %v939_v12 = vadd.f32 %v2400_v62, %v671_v61  ;;  %v2601_v60 = vld [vmem:[%s3652_s2 + $0xc0] sm:$0xff]  }
 0x112   :  { %v2778_v63 = vpop.f32.mrf.mxu0 }
 0x113   :  { %v1045_v1 = vpack.c.bf16 %v998_v57, %v997_v56  ;;  %v674_v2 = vadd.f32 %v2778_v63, %v2273_v51  ;;  %v937_v7 = vadd.f32 %v2396_v54, %v663_v58  ;;  %v1003_v26 = vmax.f32 %v939_v12, 0.0  ;;  %v2633_v12 = vld [vmem:[%s3653_s3 + $0xc8] sm:$0xff]  }
 0x114   :  { %v665_v6 = vpop.f32.mrf.mxu0  ;;  %v2417_v51 = vunpack.c.h.bf16 %v2631_v46  ;;  %v2416_v58 = vunpack.c.l.bf16 %v2631_v46  ;;  %v2413_v63 = vunpack.c.h.bf16 %v2630_v41 }
 0x115   :  { %v940_v8 = vadd.f32 %v2401_v55, %v674_v2  ;;  %v666_v9 = vadd.f32 %v2269_v59, %v665_v6  ;;  %2837 = vmatprep.mubr.msk.bf16.mxu1 %vm1190_vm3, %v1045_v1  ;;  %v1001_v22 = vmax.f32 %v937_v7, 0.0  ;;  %v2285_v55 = vunpack.c.h.bf16 %v2599_v30  ;;  %v2632_v7 = vld [vmem:[%s3653_s3 + $0xc0] sm:$0xff]   ;;  %v2604_v30 = vld [vmem:[%s3652_s2 + $0xd8] sm:$0xff]  }
 0x116   :  { %v2781_v14 = vpop.f32.mrf.mxu0  ;;  %2838 = vmatmul.mubr.msk.bf16.gmra.mxu1 %vm1190_vm3, %v1046_v5  ;;  %v2292_v6 = vunpack.c.l.bf16 %v2601_v60  ;;  %v2420_v16 = vunpack.c.l.bf16 %v2632_v7 }
 0x117   :  { %v938_v15 = vadd.f32 %v2397_v3, %v666_v9  ;;  %v1004_v18 = vmax.f32 %v940_v8, 0.0  ;;  %v687_v27 = vadd.f32 %v2781_v14, %v2280_v13  ;;  %v2296_v9 = vunpack.c.l.bf16 %v2602_v0 }
 0x118   :  { %v678_v19 = vpop.f32.mrf.mxu0  ;;  %v2297_v13 = vunpack.c.h.bf16 %v2602_v0 }
 0x119   :  { %v1002_v23 = vmax.f32 %v938_v15, 0.0  ;;  %v679_v24 = vadd.f32 %v2276_v10, %v678_v19  ;;  %v1048_v35 = vpack.c.bf16 %v1004_v18, %v1003_v26  ;;  %v943_v42 = vadd.f32 %v2408_v28, %v687_v27  ;;  %v2603_v26 = vld [vmem:[%s3652_s2 + $0xd0] sm:$0xff]  }
 0x11a   :  { %v2782_v29 = vpop.f32.mrf.mxu0 }
 0x11b   :  { %v1047_v31 = vpack.c.bf16 %v1002_v23, %v1001_v22  ;;  %v690_v32 = vadd.f32 %v2782_v29, %v2281_v17  ;;  %v941_v37 = vadd.f32 %v2404_v20, %v679_v24  ;;  %v1007_v56 = vmax.f32 %v943_v42, 0.0  ;;  %v2635_v42 = vld [vmem:[%s3653_s3 + $0xd8] sm:$0xff]  }
 0x11c   :  { %v681_v36 = vpop.f32.mrf.mxu0  ;;  %v2425_v17 = vunpack.c.h.bf16 %v2633_v12  ;;  %v2424_v24 = vunpack.c.l.bf16 %v2633_v12  ;;  %v2421_v29 = vunpack.c.h.bf16 %v2632_v7 }
 0x11d   :  { %v944_v38 = vadd.f32 %v2409_v21, %v690_v32  ;;  %v682_v39 = vadd.f32 %v2277_v25, %v681_v36  ;;  %2841 = vmatprep.mubr.msk.bf16.mxu1 %vm1190_vm3, %v1047_v31  ;;  %v1005_v52 = vmax.f32 %v941_v37, 0.0  ;;  %v2293_v21 = vunpack.c.h.bf16 %v2601_v60  ;;  %v2634_v37 = vld [vmem:[%s3653_s3 + $0xd0] sm:$0xff]   ;;  %v2606_v60 = vld [vmem:[%s3652_s2 + $0xe8] sm:$0xff]  }
 0x11e   :  { %v2785_v44 = vpop.f32.mrf.mxu0  ;;  %2842 = vmatmul.mubr.msk.bf16.gmra.mxu1 %vm1190_vm3, %v1048_v35  ;;  %v2300_v36 = vunpack.c.l.bf16 %v2603_v26  ;;  %v2428_v46 = vunpack.c.l.bf16 %v2634_v37 }
 0x11f   :  { %v942_v45 = vadd.f32 %v2405_v33, %v682_v39  ;;  %v1008_v48 = vmax.f32 %v944_v38, 0.0  ;;  %v703_v57 = vadd.f32 %v2785_v44, %v2288_v43  ;;  %v2304_v39 = vunpack.c.l.bf16 %v2604_v30 }
 0x120   :  { %v694_v49 = vpop.f32.mrf.mxu0  ;;  %v2305_v43 = vunpack.c.h.bf16 %v2604_v30 }
 0x121   :  { %v1006_v53 = vmax.f32 %v942_v45, 0.0  ;;  %v695_v54 = vadd.f32 %v2284_v40, %v694_v49  ;;  %v1050_v1 = vpack.c.bf16 %v1008_v48, %v1007_v56  ;;  %v947_v8 = vadd.f32 %v2416_v58, %v703_v57  ;;  %v2605_v56 = vld [vmem:[%s3652_s2 + $0xe0] sm:$0xff]  }
 0x122   :  { %v2786_v59 = vpop.f32.mrf.mxu0 }
 0x123   :  { %v1049_v61 = vpack.c.bf16 %v1006_v53, %v1005_v52  ;;  %v706_v62 = vadd.f32 %v2786_v59, %v2289_v47  ;;  %v945_v3 = vadd.f32 %v2412_v50, %v695_v54  ;;  %v1011_v22 = vmax.f32 %v947_v8, 0.0  ;;  %v2637_v8 = vld [vmem:[%s3653_s3 + $0xe8] sm:$0xff]  }
 0x124   :  { %v697_v2 = vpop.f32.mrf.mxu0  ;;  %v2433_v47 = vunpack.c.h.bf16 %v2635_v42  ;;  %v2432_v54 = vunpack.c.l.bf16 %v2635_v42  ;;  %v2429_v59 = vunpack.c.h.bf16 %v2634_v37 }
 0x125   :  { %v948_v4 = vadd.f32 %v2417_v51, %v706_v62  ;;  %v698_v5 = vadd.f32 %v2285_v55, %v697_v2  ;;  %2845 = vmatprep.mubr.msk.bf16.mxu1 %vm1190_vm3, %v1049_v61  ;;  %v1009_v18 = vmax.f32 %v945_v3, 0.0  ;;  %v2301_v51 = vunpack.c.h.bf16 %v2603_v26  ;;  %v2636_v3 = vld [vmem:[%s3653_s3 + $0xe0] sm:$0xff]   ;;  %v2608_v26 = vld [vmem:[%s3652_s2 + $0xf8] sm:$0xff]  }
 0x126   :  { %v2789_v10 = vpop.f32.mrf.mxu0  ;;  %2846 = vmatmul.mubr.msk.bf16.gmra.mxu1 %vm1190_vm3, %v1050_v1  ;;  %v2308_v2 = vunpack.c.l.bf16 %v2605_v56  ;;  %v2436_v12 = vunpack.c.l.bf16 %v2636_v3 }
 0x127   :  { %v946_v11 = vadd.f32 %v2413_v63, %v698_v5  ;;  %v1012_v14 = vmax.f32 %v948_v4, 0.0  ;;  %v719_v23 = vadd.f32 %v2789_v10, %v2296_v9  ;;  %v2312_v5 = vunpack.c.l.bf16 %v2606_v60 }
 0x128   :  { %v710_v15 = vpop.f32.mrf.mxu0  ;;  %v2313_v9 = vunpack.c.h.bf16 %v2606_v60 }
 0x129   :  { %v1010_v19 = vmax.f32 %v946_v11, 0.0  ;;  %v711_v20 = vadd.f32 %v2292_v6, %v710_v15  ;;  %v1052_v31 = vpack.c.bf16 %v1012_v14, %v1011_v22  ;;  %v951_v38 = vadd.f32 %v2424_v24, %v719_v23  ;;  %v2607_v22 = vld [vmem:[%s3652_s2 + $0xf0] sm:$0xff]  }
 0x12a   :  { %v2790_v25 = vpop.f32.mrf.mxu0 }
 0x12b   :  { %v1051_v27 = vpack.c.bf16 %v1010_v19, %v1009_v18  ;;  %v722_v28 = vadd.f32 %v2790_v25, %v2297_v13  ;;  %v949_v33 = vadd.f32 %v2420_v16, %v711_v20  ;;  %v1015_v52 = vmax.f32 %v951_v38, 0.0  ;;  %v2639_v38 = vld [vmem:[%s3653_s3 + $0xf8] sm:$0xff]  }
 0x12c   :  { %v713_v32 = vpop.f32.mrf.mxu0  ;;  %v2441_v13 = vunpack.c.h.bf16 %v2637_v8  ;;  %v2440_v20 = vunpack.c.l.bf16 %v2637_v8  ;;  %v2437_v25 = vunpack.c.h.bf16 %v2636_v3 }
 0x12d   :  { %v952_v34 = vadd.f32 %v2425_v17, %v722_v28  ;;  %v714_v35 = vadd.f32 %v2293_v21, %v713_v32  ;;  %2849 = vmatprep.mubr.msk.bf16.mxu1 %vm1190_vm3, %v1051_v27  ;;  %v1013_v48 = vmax.f32 %v949_v33, 0.0  ;;  %v2309_v17 = vunpack.c.h.bf16 %v2605_v56  ;;  %v2638_v33 = vld [vmem:[%s3653_s3 + $0xf0] sm:$0xff]  }
 0x12e   :  { %v2793_v40 = vpop.f32.mrf.mxu0  ;;  %2850 = vmatmul.mubr.msk.bf16.gmra.mxu1 %vm1190_vm3, %v1052_v31  ;;  %v2316_v32 = vunpack.c.l.bf16 %v2607_v22  ;;  %v2444_v42 = vunpack.c.l.bf16 %v2638_v33 }
 0x12f   :  { %v950_v41 = vadd.f32 %v2421_v29, %v714_v35  ;;  %v1016_v44 = vmax.f32 %v952_v34, 0.0  ;;  %v735_v53 = vadd.f32 %v2793_v40, %v2304_v39  ;;  %v2320_v35 = vunpack.c.l.bf16 %v2608_v26 }
 0x130   :  { %v726_v45 = vpop.f32.mrf.mxu0  ;;  %v2321_v39 = vunpack.c.h.bf16 %v2608_v26 }
 0x131   :  { %v1014_v49 = vmax.f32 %v950_v41, 0.0  ;;  %v727_v50 = vadd.f32 %v2300_v36, %v726_v45  ;;  %v1054_v61 = vpack.c.bf16 %v1016_v44, %v1015_v52  ;;  %v955_v4 = vadd.f32 %v2432_v54, %v735_v53 }
 0x132   :  { %v2794_v55 = vpop.f32.mrf.mxu0  ;;  %v2445_v54 = vunpack.c.h.bf16 %v2638_v33  ;;  %v2644_v33 = vld [vmem:[%s3654_s5 + $0x28] sm:$0xff]  }
 0x133   :  { %v1053_v57 = vpack.c.bf16 %v1014_v49, %v1013_v48  ;;  %v738_v58 = vadd.f32 %v2794_v55, %v2305_v43  ;;  %v953_v63 = vadd.f32 %v2428_v46, %v727_v50  ;;  %v1019_v18 = vmax.f32 %v955_v4, 0.0  ;;  %v2640_v4 = vld [vmem:[%s3654_s5 + $0x8] sm:$0xff]  }
 0x134   :  { %v729_v62 = vpop.f32.mrf.mxu0  ;;  %v2449_v43 = vunpack.c.h.bf16 %v2639_v38  ;;  %v2448_v50 = vunpack.c.l.bf16 %v2639_v38 }
 0x135   :  { %v956_v0 = vadd.f32 %v2433_v47, %v738_v58  ;;  %v730_v1 = vadd.f32 %v2301_v51, %v729_v62  ;;  %2853 = vmatprep.mubr.msk.bf16.mxu1 %vm1190_vm3, %v1053_v57  ;;  %v1017_v14 = vmax.f32 %v953_v63, 0.0  ;;  %v2317_v47 = vunpack.c.h.bf16 %v2607_v22 }
 0x136   :  { %v2797_v6 = vpop.f32.mrf.mxu0  ;;  %2854 = vmatmul.mubr.msk.bf16.gmra.mxu1 %vm1190_vm3, %v1054_v61 }
 0x137   :  { %v954_v7 = vadd.f32 %v2429_v59, %v730_v1  ;;  %v1020_v10 = vmax.f32 %v956_v0, 0.0  ;;  %v751_v19 = vadd.f32 %v2797_v6, %v2312_v5  ;;  %v2451_v5 = vld [vmem:[%s3654_s5] sm:$0xff]   ;;  %v2456_v6 = vunpack.c.l.bf16 %v2640_v4 }
 0x138   :  { %v742_v11 = vpop.f32.mrf.mxu0 }
 0x139   :  { %v1018_v15 = vmax.f32 %v954_v7, 0.0  ;;  %v743_v16 = vadd.f32 %v2308_v2, %v742_v11  ;;  %v1056_v27 = vpack.c.bf16 %v1020_v10, %v1019_v18  ;;  %v959_v34 = vadd.f32 %v2440_v20, %v751_v19 }
 0x13a   :  { %v2798_v21 = vpop.f32.mrf.mxu0  ;;  %v2452_v7 = vunpack.c.l.bf16 %v2451_v5  ;;  %v2457_v10 = vunpack.c.h.bf16 %v2640_v4 }
 0x13b   :  { %v1055_v23 = vpack.c.bf16 %v1018_v15, %v1017_v14  ;;  %v754_v24 = vadd.f32 %v2798_v21, %v2313_v9  ;;  %v957_v29 = vadd.f32 %v2436_v12, %v743_v16  ;;  %v1023_v48 = vmax.f32 %v959_v34, 0.0  ;;  %v2642_v12 = vld [vmem:[%s3654_s5 + $0x18] sm:$0xff]  }
 0x13c   :  { %v745_v28 = vpop.f32.mrf.mxu0  ;;  %v2453_v15 = vunpack.c.h.bf16 %v2451_v5  ;;  %v2464_v21 = vunpack.c.l.bf16 %v2642_v12 }
 0x13d   :  { %v960_v30 = vadd.f32 %v2441_v13, %v754_v24  ;;  %v746_v31 = vadd.f32 %v2309_v17, %v745_v28  ;;  %2857 = vmatprep.mubr.msk.bf16.mxu1 %vm1190_vm3, %v1055_v23  ;;  %v1021_v44 = vmax.f32 %v957_v29, 0.0  ;;  %v2641_v17 = vld [vmem:[%s3654_s5 + $0x10] sm:$0xff]  }
 0x13e   :  { %v2801_v36 = vpop.f32.mrf.mxu0  ;;  %2858 = vmatmul.mubr.msk.bf16.gmra.mxu1 %vm1190_vm3, %v1056_v27  ;;  %v2460_v26 = vunpack.c.l.bf16 %v2641_v17 }
 0x13f   :  { %v958_v37 = vadd.f32 %v2437_v25, %v746_v31  ;;  %v1024_v40 = vmax.f32 %v960_v30, 0.0  ;;  %v767_v49 = vadd.f32 %v2801_v36, %v2320_v35  ;;  %v2465_v31 = vunpack.c.h.bf16 %v2642_v12 }
 0x140   :  { %v758_v41 = vpop.f32.mrf.mxu0 }
 0x141   :  { %v1022_v45 = vmax.f32 %v958_v37, 0.0  ;;  %v759_v46 = vadd.f32 %v2316_v32, %v758_v41  ;;  %v1058_v55 = vpack.c.bf16 %v1024_v40, %v1023_v48  ;;  %v963_v60 = vadd.f32 %v2448_v50, %v767_v49 }
 0x142   :  { %v2802_v51 = vpop.f32.mrf.mxu0  ;;  %v2461_v37 = vunpack.c.h.bf16 %v2641_v17 }
 0x143   :  { %v1057_v52 = vpack.c.bf16 %v1022_v45, %v1021_v44  ;;  %v770_v53 = vadd.f32 %v2802_v51, %v2321_v39  ;;  %v961_v57 = vadd.f32 %v2444_v42, %v759_v46  ;;  %v1027_v1 = vmax.f32 %v963_v60, 0.0  ;;  %v2643_v39 = vld [vmem:[%s3654_s5 + $0x20] sm:$0xff]  }
 0x144   :  { %v761_v56 = vpop.f32.mrf.mxu0  ;;  %v2468_v48 = vunpack.c.l.bf16 %v2643_v39 }
 0x145   :  { %v964_v58 = vadd.f32 %v2449_v43, %v770_v53  ;;  %v762_v59 = vadd.f32 %v2317_v47, %v761_v56  ;;  %2861 = vmatprep.mubr.msk.bf16.mxu1 %vm1190_vm3, %v1057_v52  ;;  %v1025_v63 = vmax.f32 %v961_v57, 0.0  ;;  %v2472_v43 = vunpack.c.l.bf16 %v2644_v33 }
 0x146   :  { %2862 = vmatmul.mubr.msk.bf16.gmra.mxu1 %vm1190_vm3, %v1058_v55  ;;  %v2473_v53 = vunpack.c.h.bf16 %v2644_v33  ;;  %v2646_v55 = vld [vmem:[%s3654_s5 + $0x38] sm:$0xff]  }
 0x147   :  { %v962_v61 = vadd.f32 %v2445_v54, %v762_v59  ;;  %v1028_v62 = vmax.f32 %v964_v58, 0.0  ;;  %v2469_v59 = vunpack.c.h.bf16 %v2643_v39 }
 0x149   :  { %v1026_v0 = vmax.f32 %v962_v61, 0.0  ;;  %v1060_v3 = vpack.c.bf16 %v1028_v62, %v1027_v1  ;;  %v2645_v61 = vld [vmem:[%s3654_s5 + $0x30] sm:$0xff]   ;;  %v2480_v1 = vunpack.c.l.bf16 %v2646_v55 }
 0x14a   :  { %v2477_v17 = vunpack.c.h.bf16 %v2645_v61 }
 0x14b   :  { %v1059_v2 = vpack.c.bf16 %v1026_v0, %v1025_v63 }
 0x14d   :  { %2865 = vmatprep.mubr.msk.bf16.mxu1 %vm1190_vm3, %v1059_v2 }
 0x14e   :  { %2866 = vmatmul.mubr.msk.bf16.gmra.mxu1 %vm1190_vm3, %v1060_v3 }
 0x196   :  { %v2807_v8 = vpop.f32.mrf.mxu1 }
 0x197   :  { %v1334_v9 = vadd.f32 %v2807_v8, %v2456_v6  ;;  %v2476_v6 = vunpack.c.l.bf16 %v2645_v61 }
 0x198   :  { %v1325_v11 = vpop.f32.mrf.mxu1 }
 0x199   :  { %v1582_v13 = vmax.f32 %v1334_v9, 0.0  ;;  %v1326_v14 = vadd.f32 %v2452_v7, %v1325_v11  ;;  %v2481_v11 = vunpack.c.h.bf16 %v2646_v55 }
 0x19a   :  { %v2808_v16 = vpop.f32.mrf.mxu1 }
 0x19b   :  { %v2132_v18 = vpack.c.bf16 %v1582_v13, %v1582_v13  ;;  %v1580_v19 = vmax.f32 %v1326_v14, 0.0  ;;  %v1337_v20 = vadd.f32 %v2808_v16, %v2457_v10  ;;  %v2648_v13 = vld [vmem:[%s3654_s5 + $0x48] sm:$0xff]  }
 0x19c   :  { %v1328_v22 = vpop.f32.mrf.mxu1  ;;  %v2489_v33 = vunpack.c.h.bf16 %v2648_v13 }
 0x19d   :  { %1903 = vst.msk [vmem:[%s3655_s6 + $0x8] sm:$0xf] %vm1900_vm4, %v2132_v18  ;;  %v2130_v23 = vpack.c.bf16 %v1580_v19, %v1580_v19  ;;  %v1583_v24 = vmax.f32 %v1337_v20, 0.0  ;;  %v1329_v25 = vadd.f32 %v2453_v15, %v1328_v22  ;;  %v2647_v19 = vld [vmem:[%s3654_s5 + $0x40] sm:$0xff]  }
 0x19e   :  { %v2811_v27 = vpop.f32.mrf.mxu1  ;;  %v2485_v39 = vunpack.c.h.bf16 %v2647_v19 }
 0x19f   :  { %1901 = vst.msk [vmem:[%s3655_s6] sm:$0xf] %vm1900_vm4, %v2130_v23  ;;  %v2133_v28 = vpack.c.bf16 %v1583_v24, %v1583_v24  ;;  %v1581_v29 = vmax.f32 %v1329_v25, 0.0  ;;  %v1350_v30 = vadd.f32 %v2811_v27, %v2464_v21  ;;  %v2488_v23 = vunpack.c.l.bf16 %v2648_v13 }
 0x1a0   :  { %v1341_v32 = vpop.f32.mrf.mxu1 }
 0x1a1   :  { %1904 = vst.msk [vmem:[%s3655_s6 + $0xc] sm:$0xf] %vm1900_vm4, %v2133_v28  ;;  %v2131_v34 = vpack.c.bf16 %v1581_v29, %v1581_v29  ;;  %v1586_v35 = vmax.f32 %v1350_v30, 0.0  ;;  %v1342_v36 = vadd.f32 %v2460_v26, %v1341_v32  ;;  %v2484_v28 = vunpack.c.l.bf16 %v2647_v19 }
 0x1a2   :  { %v2812_v38 = vpop.f32.mrf.mxu1 }
 0x1a3   :  { %1902 = vst.msk [vmem:[%s3655_s6 + $0x4] sm:$0xf] %vm1900_vm4, %v2131_v34  ;;  %v2136_v40 = vpack.c.bf16 %v1586_v35, %v1586_v35  ;;  %v1584_v41 = vmax.f32 %v1342_v36, 0.0  ;;  %v1353_v42 = vadd.f32 %v2812_v38, %v2465_v31  ;;  %v2650_v35 = vld [vmem:[%s3654_s5 + $0x58] sm:$0xff]  }
 0x1a4   :  { %v1344_v44 = vpop.f32.mrf.mxu1  ;;  %v2497_v55 = vunpack.c.h.bf16 %v2650_v35 }
 0x1a5   :  { %1907 = vst.msk [vmem:[%s3655_s6 + $0x18] sm:$0xf] %vm1900_vm4, %v2136_v40  ;;  %v2134_v45 = vpack.c.bf16 %v1584_v41, %v1584_v41  ;;  %v1587_v46 = vmax.f32 %v1353_v42, 0.0  ;;  %v1345_v47 = vadd.f32 %v2461_v37, %v1344_v44  ;;  %v2649_v41 = vld [vmem:[%s3654_s5 + $0x50] sm:$0xff]  }
 0x1a6   :  { %v2815_v49 = vpop.f32.mrf.mxu1  ;;  %v2493_v61 = vunpack.c.h.bf16 %v2649_v41 }
 0x1a7   :  { %1905 = vst.msk [vmem:[%s3655_s6 + $0x10] sm:$0xf] %vm1900_vm4, %v2134_v45  ;;  %v2137_v50 = vpack.c.bf16 %v1587_v46, %v1587_v46  ;;  %v1585_v51 = vmax.f32 %v1345_v47, 0.0  ;;  %v1366_v52 = vadd.f32 %v2815_v49, %v2472_v43  ;;  %v2496_v45 = vunpack.c.l.bf16 %v2650_v35 }
 0x1a8   :  { %v1357_v54 = vpop.f32.mrf.mxu1 }
 0x1a9   :  { %1908 = vst.msk [vmem:[%s3655_s6 + $0x1c] sm:$0xf] %vm1900_vm4, %v2137_v50  ;;  %v2135_v56 = vpack.c.bf16 %v1585_v51, %v1585_v51  ;;  %v1590_v57 = vmax.f32 %v1366_v52, 0.0  ;;  %v1358_v58 = vadd.f32 %v2468_v48, %v1357_v54  ;;  %v2492_v50 = vunpack.c.l.bf16 %v2649_v41 }
 0x1aa   :  { %v2816_v60 = vpop.f32.mrf.mxu1 }
 0x1ab   :  { %1906 = vst.msk [vmem:[%s3655_s6 + $0x14] sm:$0xf] %vm1900_vm4, %v2135_v56  ;;  %v2140_v62 = vpack.c.bf16 %v1590_v57, %v1590_v57  ;;  %v1588_v63 = vmax.f32 %v1358_v58, 0.0  ;;  %v1369_v0 = vadd.f32 %v2816_v60, %v2473_v53  ;;  %v2652_v57 = vld [vmem:[%s3654_s5 + $0x68] sm:$0xff]  }
 0x1ac   :  { %v1360_v2 = vpop.f32.mrf.mxu1  ;;  %v2505_v13 = vunpack.c.h.bf16 %v2652_v57 }
 0x1ad   :  { %1911 = vst.msk [vmem:[%s3655_s6 + $0x28] sm:$0xf] %vm1900_vm4, %v2140_v62  ;;  %v2138_v3 = vpack.c.bf16 %v1588_v63, %v1588_v63  ;;  %v1591_v4 = vmax.f32 %v1369_v0, 0.0  ;;  %v1361_v5 = vadd.f32 %v2469_v59, %v1360_v2  ;;  %v2651_v63 = vld [vmem:[%s3654_s5 + $0x60] sm:$0xff]  }
 0x1ae   :  { %v2819_v7 = vpop.f32.mrf.mxu1  ;;  %v2501_v19 = vunpack.c.h.bf16 %v2651_v63 }
 0x1af   :  { %1909 = vst.msk [vmem:[%s3655_s6 + $0x20] sm:$0xf] %vm1900_vm4, %v2138_v3  ;;  %v2141_v8 = vpack.c.bf16 %v1591_v4, %v1591_v4  ;;  %v1589_v9 = vmax.f32 %v1361_v5, 0.0  ;;  %v1382_v10 = vadd.f32 %v2819_v7, %v2480_v1  ;;  %v2504_v3 = vunpack.c.l.bf16 %v2652_v57 }
 0x1b0   :  { %v1373_v12 = vpop.f32.mrf.mxu1 }
 0x1b1   :  { %1912 = vst.msk [vmem:[%s3655_s6 + $0x2c] sm:$0xf] %vm1900_vm4, %v2141_v8  ;;  %v2139_v14 = vpack.c.bf16 %v1589_v9, %v1589_v9  ;;  %v1594_v15 = vmax.f32 %v1382_v10, 0.0  ;;  %v1374_v16 = vadd.f32 %v2476_v6, %v1373_v12  ;;  %v2500_v8 = vunpack.c.l.bf16 %v2651_v63 }
 0x1b2   :  { %v2820_v18 = vpop.f32.mrf.mxu1 }
 0x1b3   :  { %1910 = vst.msk [vmem:[%s3655_s6 + $0x24] sm:$0xf] %vm1900_vm4, %v2139_v14  ;;  %v2144_v20 = vpack.c.bf16 %v1594_v15, %v1594_v15  ;;  %v1592_v21 = vmax.f32 %v1374_v16, 0.0  ;;  %v1385_v22 = vadd.f32 %v2820_v18, %v2481_v11  ;;  %v2654_v15 = vld [vmem:[%s3654_s5 + $0x78] sm:$0xff]  }
 0x1b4   :  { %v1376_v24 = vpop.f32.mrf.mxu1  ;;  %v2513_v35 = vunpack.c.h.bf16 %v2654_v15 }
 0x1b5   :  { %1915 = vst.msk [vmem:[%s3655_s6 + $0x38] sm:$0xf] %vm1900_vm4, %v2144_v20  ;;  %v2142_v25 = vpack.c.bf16 %v1592_v21, %v1592_v21  ;;  %v1595_v26 = vmax.f32 %v1385_v22, 0.0  ;;  %v1377_v27 = vadd.f32 %v2477_v17, %v1376_v24  ;;  %v2653_v21 = vld [vmem:[%s3654_s5 + $0x70] sm:$0xff]  }
 0x1b6   :  { %v2823_v29 = vpop.f32.mrf.mxu1  ;;  %v2509_v41 = vunpack.c.h.bf16 %v2653_v21 }
 0x1b7   :  { %1913 = vst.msk [vmem:[%s3655_s6 + $0x30] sm:$0xf] %vm1900_vm4, %v2142_v25  ;;  %v2145_v30 = vpack.c.bf16 %v1595_v26, %v1595_v26  ;;  %v1593_v31 = vmax.f32 %v1377_v27, 0.0  ;;  %v1398_v32 = vadd.f32 %v2823_v29, %v2488_v23  ;;  %v2512_v25 = vunpack.c.l.bf16 %v2654_v15 }
 0x1b8   :  { %v1389_v34 = vpop.f32.mrf.mxu1 }
 0x1b9   :  { %1916 = vst.msk [vmem:[%s3655_s6 + $0x3c] sm:$0xf] %vm1900_vm4, %v2145_v30  ;;  %v2143_v36 = vpack.c.bf16 %v1593_v31, %v1593_v31  ;;  %v1598_v37 = vmax.f32 %v1398_v32, 0.0  ;;  %v1390_v38 = vadd.f32 %v2484_v28, %v1389_v34  ;;  %v2508_v30 = vunpack.c.l.bf16 %v2653_v21 }
 0x1ba   :  { %v2824_v40 = vpop.f32.mrf.mxu1 }
 0x1bb   :  { %1914 = vst.msk [vmem:[%s3655_s6 + $0x34] sm:$0xf] %vm1900_vm4, %v2143_v36  ;;  %v2148_v42 = vpack.c.bf16 %v1598_v37, %v1598_v37  ;;  %v1596_v43 = vmax.f32 %v1390_v38, 0.0  ;;  %v1401_v44 = vadd.f32 %v2824_v40, %v2489_v33  ;;  %v2656_v37 = vld [vmem:[%s3654_s5 + $0x88] sm:$0xff]  }
 0x1bc   :  { %v1392_v46 = vpop.f32.mrf.mxu1  ;;  %v2521_v57 = vunpack.c.h.bf16 %v2656_v37 }
 0x1bd   :  { %1919 = vst.msk [vmem:[%s3655_s6 + $0x48] sm:$0xf] %vm1900_vm4, %v2148_v42  ;;  %v2146_v47 = vpack.c.bf16 %v1596_v43, %v1596_v43  ;;  %v1599_v48 = vmax.f32 %v1401_v44, 0.0  ;;  %v1393_v49 = vadd.f32 %v2485_v39, %v1392_v46  ;;  %v2655_v43 = vld [vmem:[%s3654_s5 + $0x80] sm:$0xff]  }
 0x1be   :  { %v2827_v51 = vpop.f32.mrf.mxu1  ;;  %v2517_v63 = vunpack.c.h.bf16 %v2655_v43 }
 0x1bf   :  { %1917 = vst.msk [vmem:[%s3655_s6 + $0x40] sm:$0xf] %vm1900_vm4, %v2146_v47  ;;  %v2149_v52 = vpack.c.bf16 %v1599_v48, %v1599_v48  ;;  %v1597_v53 = vmax.f32 %v1393_v49, 0.0  ;;  %v1414_v54 = vadd.f32 %v2827_v51, %v2496_v45  ;;  %v2520_v47 = vunpack.c.l.bf16 %v2656_v37 }
 0x1c0   :  { %v1405_v56 = vpop.f32.mrf.mxu1 }
 0x1c1   :  { %1920 = vst.msk [vmem:[%s3655_s6 + $0x4c] sm:$0xf] %vm1900_vm4, %v2149_v52  ;;  %v2147_v58 = vpack.c.bf16 %v1597_v53, %v1597_v53  ;;  %v1602_v59 = vmax.f32 %v1414_v54, 0.0  ;;  %v1406_v60 = vadd.f32 %v2492_v50, %v1405_v56  ;;  %v2516_v52 = vunpack.c.l.bf16 %v2655_v43 }
 0x1c2   :  { %v2828_v62 = vpop.f32.mrf.mxu1 }
 0x1c3   :  { %1918 = vst.msk [vmem:[%s3655_s6 + $0x44] sm:$0xf] %vm1900_vm4, %v2147_v58  ;;  %v2152_v0 = vpack.c.bf16 %v1602_v59, %v1602_v59  ;;  %v1600_v1 = vmax.f32 %v1406_v60, 0.0  ;;  %v1417_v2 = vadd.f32 %v2828_v62, %v2497_v55  ;;  %v2658_v59 = vld [vmem:[%s3654_s5 + $0x98] sm:$0xff]  }
 0x1c4   :  { %v1408_v4 = vpop.f32.mrf.mxu1  ;;  %v2529_v15 = vunpack.c.h.bf16 %v2658_v59 }
 0x1c5   :  { %1923 = vst.msk [vmem:[%s3655_s6 + $0x58] sm:$0xf] %vm1900_vm4, %v2152_v0  ;;  %v2150_v5 = vpack.c.bf16 %v1600_v1, %v1600_v1  ;;  %v1603_v6 = vmax.f32 %v1417_v2, 0.0  ;;  %v1409_v7 = vadd.f32 %v2493_v61, %v1408_v4  ;;  %v2657_v1 = vld [vmem:[%s3654_s5 + $0x90] sm:$0xff]  }
 0x1c6   :  { %v2831_v9 = vpop.f32.mrf.mxu1  ;;  %v2525_v21 = vunpack.c.h.bf16 %v2657_v1 }
 0x1c7   :  { %1921 = vst.msk [vmem:[%s3655_s6 + $0x50] sm:$0xf] %vm1900_vm4, %v2150_v5  ;;  %v2153_v10 = vpack.c.bf16 %v1603_v6, %v1603_v6  ;;  %v1601_v11 = vmax.f32 %v1409_v7, 0.0  ;;  %v1430_v12 = vadd.f32 %v2831_v9, %v2504_v3  ;;  %v2528_v5 = vunpack.c.l.bf16 %v2658_v59 }
 0x1c8   :  { %v1421_v14 = vpop.f32.mrf.mxu1 }
 0x1c9   :  { %1924 = vst.msk [vmem:[%s3655_s6 + $0x5c] sm:$0xf] %vm1900_vm4, %v2153_v10  ;;  %v2151_v16 = vpack.c.bf16 %v1601_v11, %v1601_v11  ;;  %v1606_v17 = vmax.f32 %v1430_v12, 0.0  ;;  %v1422_v18 = vadd.f32 %v2500_v8, %v1421_v14  ;;  %v2524_v10 = vunpack.c.l.bf16 %v2657_v1 }
 0x1ca   :  { %v2832_v20 = vpop.f32.mrf.mxu1 }
 0x1cb   :  { %1922 = vst.msk [vmem:[%s3655_s6 + $0x54] sm:$0xf] %vm1900_vm4, %v2151_v16  ;;  %v2156_v22 = vpack.c.bf16 %v1606_v17, %v1606_v17  ;;  %v1604_v23 = vmax.f32 %v1422_v18, 0.0  ;;  %v1433_v24 = vadd.f32 %v2832_v20, %v2505_v13  ;;  %v2660_v17 = vld [vmem:[%s3654_s5 + $0xa8] sm:$0xff]  }
 0x1cc   :  { %v1424_v26 = vpop.f32.mrf.mxu1  ;;  %v2537_v37 = vunpack.c.h.bf16 %v2660_v17 }
 0x1cd   :  { %1927 = vst.msk [vmem:[%s3655_s6 + $0x68] sm:$0xf] %vm1900_vm4, %v2156_v22  ;;  %v2154_v27 = vpack.c.bf16 %v1604_v23, %v1604_v23  ;;  %v1607_v28 = vmax.f32 %v1433_v24, 0.0  ;;  %v1425_v29 = vadd.f32 %v2501_v19, %v1424_v26  ;;  %v2659_v23 = vld [vmem:[%s3654_s5 + $0xa0] sm:$0xff]  }
 0x1ce   :  { %v2835_v31 = vpop.f32.mrf.mxu1  ;;  %v2533_v43 = vunpack.c.h.bf16 %v2659_v23 }
 0x1cf   :  { %1925 = vst.msk [vmem:[%s3655_s6 + $0x60] sm:$0xf] %vm1900_vm4, %v2154_v27  ;;  %v2157_v32 = vpack.c.bf16 %v1607_v28, %v1607_v28  ;;  %v1605_v33 = vmax.f32 %v1425_v29, 0.0  ;;  %v1446_v34 = vadd.f32 %v2835_v31, %v2512_v25  ;;  %v2536_v27 = vunpack.c.l.bf16 %v2660_v17 }
 0x1d0   :  { %v1437_v36 = vpop.f32.mrf.mxu1 }
 0x1d1   :  { %1928 = vst.msk [vmem:[%s3655_s6 + $0x6c] sm:$0xf] %vm1900_vm4, %v2157_v32  ;;  %v2155_v38 = vpack.c.bf16 %v1605_v33, %v1605_v33  ;;  %v1610_v39 = vmax.f32 %v1446_v34, 0.0  ;;  %v1438_v40 = vadd.f32 %v2508_v30, %v1437_v36  ;;  %v2532_v32 = vunpack.c.l.bf16 %v2659_v23 }
 0x1d2   :  { %v2836_v42 = vpop.f32.mrf.mxu1 }
 0x1d3   :  { %1926 = vst.msk [vmem:[%s3655_s6 + $0x64] sm:$0xf] %vm1900_vm4, %v2155_v38  ;;  %v2160_v44 = vpack.c.bf16 %v1610_v39, %v1610_v39  ;;  %v1608_v45 = vmax.f32 %v1438_v40, 0.0  ;;  %v1449_v46 = vadd.f32 %v2836_v42, %v2513_v35  ;;  %v2662_v39 = vld [vmem:[%s3654_s5 + $0xb8] sm:$0xff]  }
 0x1d4   :  { %v1440_v48 = vpop.f32.mrf.mxu1  ;;  %v2545_v59 = vunpack.c.h.bf16 %v2662_v39 }
 0x1d5   :  { %1931 = vst.msk [vmem:[%s3655_s6 + $0x78] sm:$0xf] %vm1900_vm4, %v2160_v44  ;;  %v2158_v49 = vpack.c.bf16 %v1608_v45, %v1608_v45  ;;  %v1611_v50 = vmax.f32 %v1449_v46, 0.0  ;;  %v1441_v51 = vadd.f32 %v2509_v41, %v1440_v48  ;;  %v2661_v45 = vld [vmem:[%s3654_s5 + $0xb0] sm:$0xff]  }
 0x1d6   :  { %v2839_v53 = vpop.f32.mrf.mxu1  ;;  %v2541_v1 = vunpack.c.h.bf16 %v2661_v45 }
 0x1d7   :  { %1929 = vst.msk [vmem:[%s3655_s6 + $0x70] sm:$0xf] %vm1900_vm4, %v2158_v49  ;;  %v2161_v54 = vpack.c.bf16 %v1611_v50, %v1611_v50  ;;  %v1609_v55 = vmax.f32 %v1441_v51, 0.0  ;;  %v1462_v56 = vadd.f32 %v2839_v53, %v2520_v47  ;;  %v2544_v49 = vunpack.c.l.bf16 %v2662_v39 }
 0x1d8   :  { %v1453_v58 = vpop.f32.mrf.mxu1 }
 0x1d9   :  { %1932 = vst.msk [vmem:[%s3655_s6 + $0x7c] sm:$0xf] %vm1900_vm4, %v2161_v54  ;;  %v2159_v60 = vpack.c.bf16 %v1609_v55, %v1609_v55  ;;  %v1614_v61 = vmax.f32 %v1462_v56, 0.0  ;;  %v1454_v62 = vadd.f32 %v2516_v52, %v1453_v58  ;;  %v2540_v54 = vunpack.c.l.bf16 %v2661_v45 }
 0x1da   :  { %v2840_v0 = vpop.f32.mrf.mxu1 }
 0x1db   :  { %1930 = vst.msk [vmem:[%s3655_s6 + $0x74] sm:$0xf] %vm1900_vm4, %v2159_v60  ;;  %v2164_v2 = vpack.c.bf16 %v1614_v61, %v1614_v61  ;;  %v1612_v3 = vmax.f32 %v1454_v62, 0.0  ;;  %v1465_v4 = vadd.f32 %v2840_v0, %v2521_v57  ;;  %v2664_v61 = vld [vmem:[%s3654_s5 + $0xc8] sm:$0xff]  }
 0x1dc   :  { %v1456_v6 = vpop.f32.mrf.mxu1  ;;  %v2553_v17 = vunpack.c.h.bf16 %v2664_v61 }
 0x1dd   :  { %1935 = vst.msk [vmem:[%s3655_s6 + $0x88] sm:$0xf] %vm1900_vm4, %v2164_v2  ;;  %v2162_v7 = vpack.c.bf16 %v1612_v3, %v1612_v3  ;;  %v1615_v8 = vmax.f32 %v1465_v4, 0.0  ;;  %v1457_v9 = vadd.f32 %v2517_v63, %v1456_v6  ;;  %v2663_v3 = vld [vmem:[%s3654_s5 + $0xc0] sm:$0xff]  }
 0x1de   :  { %v2843_v11 = vpop.f32.mrf.mxu1  ;;  %v2549_v23 = vunpack.c.h.bf16 %v2663_v3 }
 0x1df   :  { %1933 = vst.msk [vmem:[%s3655_s6 + $0x80] sm:$0xf] %vm1900_vm4, %v2162_v7  ;;  %v2165_v12 = vpack.c.bf16 %v1615_v8, %v1615_v8  ;;  %v1613_v13 = vmax.f32 %v1457_v9, 0.0  ;;  %v1478_v14 = vadd.f32 %v2843_v11, %v2528_v5  ;;  %v2552_v7 = vunpack.c.l.bf16 %v2664_v61 }
 0x1e0   :  { %v1469_v16 = vpop.f32.mrf.mxu1 }
 0x1e1   :  { %1936 = vst.msk [vmem:[%s3655_s6 + $0x8c] sm:$0xf] %vm1900_vm4, %v2165_v12  ;;  %v2163_v18 = vpack.c.bf16 %v1613_v13, %v1613_v13  ;;  %v1618_v19 = vmax.f32 %v1478_v14, 0.0  ;;  %v1470_v20 = vadd.f32 %v2524_v10, %v1469_v16  ;;  %v2548_v12 = vunpack.c.l.bf16 %v2663_v3 }
 0x1e2   :  { %v2844_v22 = vpop.f32.mrf.mxu1 }
 0x1e3   :  { %1934 = vst.msk [vmem:[%s3655_s6 + $0x84] sm:$0xf] %vm1900_vm4, %v2163_v18  ;;  %v2168_v24 = vpack.c.bf16 %v1618_v19, %v1618_v19  ;;  %v1616_v25 = vmax.f32 %v1470_v20, 0.0  ;;  %v1481_v26 = vadd.f32 %v2844_v22, %v2529_v15  ;;  %v2666_v19 = vld [vmem:[%s3654_s5 + $0xd8] sm:$0xff]  }
 0x1e4   :  { %v1472_v28 = vpop.f32.mrf.mxu1  ;;  %v2561_v39 = vunpack.c.h.bf16 %v2666_v19 }
 0x1e5   :  { %1939 = vst.msk [vmem:[%s3655_s6 + $0x98] sm:$0xf] %vm1900_vm4, %v2168_v24  ;;  %v2166_v29 = vpack.c.bf16 %v1616_v25, %v1616_v25  ;;  %v1619_v30 = vmax.f32 %v1481_v26, 0.0  ;;  %v1473_v31 = vadd.f32 %v2525_v21, %v1472_v28  ;;  %v2665_v25 = vld [vmem:[%s3654_s5 + $0xd0] sm:$0xff]  }
 0x1e6   :  { %v2847_v33 = vpop.f32.mrf.mxu1  ;;  %v2557_v45 = vunpack.c.h.bf16 %v2665_v25 }
 0x1e7   :  { %1937 = vst.msk [vmem:[%s3655_s6 + $0x90] sm:$0xf] %vm1900_vm4, %v2166_v29  ;;  %v2169_v34 = vpack.c.bf16 %v1619_v30, %v1619_v30  ;;  %v1617_v35 = vmax.f32 %v1473_v31, 0.0  ;;  %v1494_v36 = vadd.f32 %v2847_v33, %v2536_v27  ;;  %v2560_v29 = vunpack.c.l.bf16 %v2666_v19 }
 0x1e8   :  { %v1485_v38 = vpop.f32.mrf.mxu1 }
 0x1e9   :  { %1940 = vst.msk [vmem:[%s3655_s6 + $0x9c] sm:$0xf] %vm1900_vm4, %v2169_v34  ;;  %v2167_v40 = vpack.c.bf16 %v1617_v35, %v1617_v35  ;;  %v1622_v41 = vmax.f32 %v1494_v36, 0.0  ;;  %v1486_v42 = vadd.f32 %v2532_v32, %v1485_v38  ;;  %v2556_v34 = vunpack.c.l.bf16 %v2665_v25 }
 0x1ea   :  { %v2848_v44 = vpop.f32.mrf.mxu1 }
 0x1eb   :  { %1938 = vst.msk [vmem:[%s3655_s6 + $0x94] sm:$0xf] %vm1900_vm4, %v2167_v40  ;;  %v2172_v46 = vpack.c.bf16 %v1622_v41, %v1622_v41  ;;  %v1620_v47 = vmax.f32 %v1486_v42, 0.0  ;;  %v1497_v48 = vadd.f32 %v2848_v44, %v2537_v37  ;;  %v2668_v41 = vld [vmem:[%s3654_s5 + $0xe8] sm:$0xff]  }
 0x1ec   :  { %v1488_v50 = vpop.f32.mrf.mxu1  ;;  %v2569_v61 = vunpack.c.h.bf16 %v2668_v41 }
 0x1ed   :  { %1943 = vst.msk [vmem:[%s3655_s6 + $0xa8] sm:$0xf] %vm1900_vm4, %v2172_v46  ;;  %v2170_v51 = vpack.c.bf16 %v1620_v47, %v1620_v47  ;;  %v1623_v52 = vmax.f32 %v1497_v48, 0.0  ;;  %v1489_v53 = vadd.f32 %v2533_v43, %v1488_v50  ;;  %v2667_v47 = vld [vmem:[%s3654_s5 + $0xe0] sm:$0xff]  }
 0x1ee   :  { %v2851_v55 = vpop.f32.mrf.mxu1  ;;  %v2565_v3 = vunpack.c.h.bf16 %v2667_v47 }
 0x1ef   :  { %1941 = vst.msk [vmem:[%s3655_s6 + $0xa0] sm:$0xf] %vm1900_vm4, %v2170_v51  ;;  %v2173_v56 = vpack.c.bf16 %v1623_v52, %v1623_v52  ;;  %v1621_v57 = vmax.f32 %v1489_v53, 0.0  ;;  %v1510_v58 = vadd.f32 %v2851_v55, %v2544_v49  ;;  %v2568_v51 = vunpack.c.l.bf16 %v2668_v41 }
 0x1f0   :  { %v1501_v60 = vpop.f32.mrf.mxu1 }
 0x1f1   :  { %1944 = vst.msk [vmem:[%s3655_s6 + $0xac] sm:$0xf] %vm1900_vm4, %v2173_v56  ;;  %v2171_v62 = vpack.c.bf16 %v1621_v57, %v1621_v57  ;;  %v1626_v63 = vmax.f32 %v1510_v58, 0.0  ;;  %v1502_v0 = vadd.f32 %v2540_v54, %v1501_v60  ;;  %v2564_v56 = vunpack.c.l.bf16 %v2667_v47 }
 0x1f2   :  { %v2852_v2 = vpop.f32.mrf.mxu1 }
 0x1f3   :  { %1942 = vst.msk [vmem:[%s3655_s6 + $0xa4] sm:$0xf] %vm1900_vm4, %v2171_v62  ;;  %v2176_v4 = vpack.c.bf16 %v1626_v63, %v1626_v63  ;;  %v1624_v5 = vmax.f32 %v1502_v0, 0.0  ;;  %v1513_v6 = vadd.f32 %v2852_v2, %v2545_v59  ;;  %v2670_v63 = vld [vmem:[%s3654_s5 + $0xf8] sm:$0xff]  }
 0x1f4   :  { %v1504_v8 = vpop.f32.mrf.mxu1  ;;  %v2577_v19 = vunpack.c.h.bf16 %v2670_v63 }
 0x1f5   :  { %1947 = vst.msk [vmem:[%s3655_s6 + $0xb8] sm:$0xf] %vm1900_vm4, %v2176_v4  ;;  %v2174_v9 = vpack.c.bf16 %v1624_v5, %v1624_v5  ;;  %v1627_v10 = vmax.f32 %v1513_v6, 0.0  ;;  %v1505_v11 = vadd.f32 %v2541_v1, %v1504_v8  ;;  %v2669_v5 = vld [vmem:[%s3654_s5 + $0xf0] sm:$0xff]  }
 0x1f6   :  { %v2855_v13 = vpop.f32.mrf.mxu1 }
 0x1f7   :  { %1945 = vst.msk [vmem:[%s3655_s6 + $0xb0] sm:$0xf] %vm1900_vm4, %v2174_v9  ;;  %v2177_v14 = vpack.c.bf16 %v1627_v10, %v1627_v10  ;;  %v1625_v15 = vmax.f32 %v1505_v11, 0.0  ;;  %v1526_v16 = vadd.f32 %v2855_v13, %v2552_v7  ;;  %v2576_v9 = vunpack.c.l.bf16 %v2670_v63 }
 0x1f8   :  { %v1517_v18 = vpop.f32.mrf.mxu1 }
 0x1f9   :  { %1948 = vst.msk [vmem:[%s3655_s6 + $0xbc] sm:$0xf] %vm1900_vm4, %v2177_v14  ;;  %v2175_v20 = vpack.c.bf16 %v1625_v15, %v1625_v15  ;;  %v1630_v21 = vmax.f32 %v1526_v16, 0.0  ;;  %v1518_v22 = vadd.f32 %v2548_v12, %v1517_v18  ;;  %v2572_v14 = vunpack.c.l.bf16 %v2669_v5 }
 0x1fa   :  { %v2856_v24 = vpop.f32.mrf.mxu1 }
 0x1fb   :  { %1946 = vst.msk [vmem:[%s3655_s6 + $0xb4] sm:$0xf] %vm1900_vm4, %v2175_v20  ;;  %v2180_v26 = vpack.c.bf16 %v1630_v21, %v1630_v21  ;;  %v1628_v27 = vmax.f32 %v1518_v22, 0.0  ;;  %v1529_v28 = vadd.f32 %v2856_v24, %v2553_v17  ;;  %v2573_v24 = vunpack.c.h.bf16 %v2669_v5 }
 0x1fc   :  { %v1520_v30 = vpop.f32.mrf.mxu1 }
 0x1fd   :  { %1951 = vst.msk [vmem:[%s3655_s6 + $0xc8] sm:$0xf] %vm1900_vm4, %v2180_v26  ;;  %v2178_v31 = vpack.c.bf16 %v1628_v27, %v1628_v27  ;;  %v1631_v32 = vmax.f32 %v1529_v28, 0.0  ;;  %v1521_v33 = vadd.f32 %v2549_v23, %v1520_v30 }
 0x1fe   :  { %v2859_v35 = vpop.f32.mrf.mxu1 }
 0x1ff   :  { %1949 = vst.msk [vmem:[%s3655_s6 + $0xc0] sm:$0xf] %vm1900_vm4, %v2178_v31  ;;  %v2181_v36 = vpack.c.bf16 %v1631_v32, %v1631_v32  ;;  %v1629_v37 = vmax.f32 %v1521_v33, 0.0  ;;  %v1542_v38 = vadd.f32 %v2859_v35, %v2560_v29 }
 0x200   :  { %v1533_v40 = vpop.f32.mrf.mxu1 }
 0x201   :  { %1952 = vst.msk [vmem:[%s3655_s6 + $0xcc] sm:$0xf] %vm1900_vm4, %v2181_v36  ;;  %v2179_v42 = vpack.c.bf16 %v1629_v37, %v1629_v37  ;;  %v1634_v43 = vmax.f32 %v1542_v38, 0.0  ;;  %v1534_v44 = vadd.f32 %v2556_v34, %v1533_v40 }
 0x202   :  { %v2860_v46 = vpop.f32.mrf.mxu1 }
 0x203   :  { %1950 = vst.msk [vmem:[%s3655_s6 + $0xc4] sm:$0xf] %vm1900_vm4, %v2179_v42  ;;  %v2184_v48 = vpack.c.bf16 %v1634_v43, %v1634_v43  ;;  %v1632_v49 = vmax.f32 %v1534_v44, 0.0  ;;  %v1545_v50 = vadd.f32 %v2860_v46, %v2561_v39 }
 0x204   :  { %v1536_v52 = vpop.f32.mrf.mxu1 }
 0x205   :  { %1955 = vst.msk [vmem:[%s3655_s6 + $0xd8] sm:$0xf] %vm1900_vm4, %v2184_v48  ;;  %v2182_v53 = vpack.c.bf16 %v1632_v49, %v1632_v49  ;;  %v1635_v54 = vmax.f32 %v1545_v50, 0.0  ;;  %v1537_v55 = vadd.f32 %v2557_v45, %v1536_v52 }
 0x206   :  { %v2863_v57 = vpop.f32.mrf.mxu1 }
 0x207   :  { %1953 = vst.msk [vmem:[%s3655_s6 + $0xd0] sm:$0xf] %vm1900_vm4, %v2182_v53  ;;  %v2185_v58 = vpack.c.bf16 %v1635_v54, %v1635_v54  ;;  %v1633_v59 = vmax.f32 %v1537_v55, 0.0  ;;  %v1558_v60 = vadd.f32 %v2863_v57, %v2568_v51 }
 0x208   :  { %v1549_v62 = vpop.f32.mrf.mxu1 }
 0x209   :  { %1956 = vst.msk [vmem:[%s3655_s6 + $0xdc] sm:$0xf] %vm1900_vm4, %v2185_v58  ;;  %v2183_v0 = vpack.c.bf16 %v1633_v59, %v1633_v59  ;;  %v1638_v1 = vmax.f32 %v1558_v60, 0.0  ;;  %v1550_v2 = vadd.f32 %v2564_v56, %v1549_v62 }
 0x20a   :  { %v2864_v4 = vpop.f32.mrf.mxu1 }
 0x20b   :  { %1954 = vst.msk [vmem:[%s3655_s6 + $0xd4] sm:$0xf] %vm1900_vm4, %v2183_v0  ;;  %v2188_v6 = vpack.c.bf16 %v1638_v1, %v1638_v1  ;;  %v1636_v7 = vmax.f32 %v1550_v2, 0.0  ;;  %v1561_v8 = vadd.f32 %v2864_v4, %v2569_v61 }
 0x20c   :  { %v1552_v10 = vpop.f32.mrf.mxu1 }
 0x20d   :  { %1959 = vst.msk [vmem:[%s3655_s6 + $0xe8] sm:$0xf] %vm1900_vm4, %v2188_v6  ;;  %v2186_v11 = vpack.c.bf16 %v1636_v7, %v1636_v7  ;;  %v1639_v12 = vmax.f32 %v1561_v8, 0.0  ;;  %v1553_v13 = vadd.f32 %v2565_v3, %v1552_v10 }
 0x20e   :  { %v2867_v15 = vpop.f32.mrf.mxu1 }
 0x20f   :  { %1957 = vst.msk [vmem:[%s3655_s6 + $0xe0] sm:$0xf] %vm1900_vm4, %v2186_v11  ;;  %v2189_v16 = vpack.c.bf16 %v1639_v12, %v1639_v12  ;;  %v1637_v17 = vmax.f32 %v1553_v13, 0.0  ;;  %v1574_v18 = vadd.f32 %v2867_v15, %v2576_v9 }
 0x210   :  { %v1565_v20 = vpop.f32.mrf.mxu1 }
 0x211   :  { %1960 = vst.msk [vmem:[%s3655_s6 + $0xec] sm:$0xf] %vm1900_vm4, %v2189_v16  ;;  %v2187_v21 = vpack.c.bf16 %v1637_v17, %v1637_v17  ;;  %v1642_v22 = vmax.f32 %v1574_v18, 0.0  ;;  %v1566_v23 = vadd.f32 %v2572_v14, %v1565_v20 }
 0x212   :  { %v2868_v25 = vpop.f32.mrf.mxu1 }
 0x213   :  { %1958 = vst.msk [vmem:[%s3655_s6 + $0xe4] sm:$0xf] %vm1900_vm4, %v2187_v21  ;;  %v2192_v26 = vpack.c.bf16 %v1642_v22, %v1642_v22  ;;  %v1640_v27 = vmax.f32 %v1566_v23, 0.0  ;;  %v1577_v28 = vadd.f32 %v2868_v25, %v2577_v19 }
 0x214   :  { %v1568_v29 = vpop.f32.mrf.mxu1 }
 0x215   :  { %1963 = vst.msk [vmem:[%s3655_s6 + $0xf8] sm:$0xf] %vm1900_vm4, %v2192_v26  ;;  %v2190_v30 = vpack.c.bf16 %v1640_v27, %v1640_v27  ;;  %v1643_v31 = vmax.f32 %v1577_v28, 0.0  ;;  %v1569_v32 = vadd.f32 %v2573_v24, %v1568_v29 }
 0x217   :  { %1961 = vst.msk [vmem:[%s3655_s6 + $0xf0] sm:$0xf] %vm1900_vm4, %v2190_v30  ;;  %v2193_v33 = vpack.c.bf16 %v1643_v31, %v1643_v31  ;;  %v1641_v34 = vmax.f32 %v1569_v32, 0.0 }
 0x219   :  { %1964 = vst.msk [vmem:[%s3655_s6 + $0xfc] sm:$0xf] %vm1900_vm4, %v2193_v33  ;;  %v2191_v35 = vpack.c.bf16 %v1641_v34, %v1641_v34 }
 0x21b   :  { %1962 = vst.msk [vmem:[%s3655_s6 + $0xf4] sm:$0xf] %vm1900_vm4, %v2191_v35 }

// kernel: unet3d_forward.34
= control target key start
LH: loop header
LB: loop body
LE: loop exit
PB: predicated region body
PF: predicated region fallthrough
CT: control target
= control target key end

     0   :  { %vm94_vm0 = vcmask 1043456   ;;  %vm69_vm1 = vcmask 64512   ;;  %vm259_vm2 = vcmask 27648   ;;  %s481_s1 = inlined_call_operand.vmem [shape: bf16[8,4], index: 1, kind: input, shape index: {}]   ;;  %s482_s0 = inlined_call_operand.vmem [shape: bf16[128,8], index: 0, kind: input, shape index: {}]   ;;  %s483_s2 = inlined_call_operand.vmem [shape: bf16[128,4], index: 2, kind: output, shape index: {}]  }
   0x1   :  { %v28_v0 = vld [vmem:[%s481_s1] sm:$0xf]  ;;  %v361_v4 = vld [vmem:[%s482_s0 + $0x8] sm:$0xff]   ;;  %v363_v6 = vld [vmem:[%s482_s0 + $0x10] sm:$0xff]  }
   0x2   :  { %357 = vmatprep.subr.msk.bf16.mxu0 %vm94_vm0, %v28_v0  ;;  %358 = vmatprep.subr.msk.bf16.mxu1 %vm94_vm0, %v28_v0  ;;  %v96_v1 = vsel %vm94_vm0, %v28_v0, 0  ;;  %v359_v2 = vld [vmem:[%s482_s0] sm:$0xff]   ;;  %v362_v5 = vld [vmem:[%s482_s0 + $0x28] sm:$0xff]   ;;  %v364_v7 = vld [vmem:[%s482_s0 + $0x30] sm:$0xff]  }
   0x3   :  { %338 = vmatpush3.bf16.msra.mxu0 %v96_v1  ;;  %356 = vmatpush3.bf16.msra.mxu1 %v96_v1  ;;  %v360_v3 = vld [vmem:[%s482_s0 + $0x20] sm:$0xff]   ;;  %v365_v8 = vld [vmem:[%s482_s0 + $0x18] sm:$0xff]  }
   0x4   :  { %339 = vmatprep.mubr.msk.bf16.mxu0 %vm69_vm1, %v359_v2  ;;  %347 = vmatprep.mubr.msk.bf16.mxu1 %vm69_vm1, %v360_v3  ;;  %v366_v9 = vld [vmem:[%s482_s0 + $0x38] sm:$0xff]  }
   0x6   :  { %340 = vmatmul.mubr.msk.bf16.vlgmr.msra.gmra.mxu0 %vm69_vm1, %v361_v4  ;;  %348 = vmatmul.mubr.msk.bf16.vlgmr.msra.gmra.mxu1 %vm69_vm1, %v362_v5 }
   0x7   :  { %343 = vmatprep.mubr.msk.bf16.mxu0 %vm69_vm1, %v363_v6  ;;  %351 = vmatprep.mubr.msk.bf16.mxu1 %vm69_vm1, %v364_v7 }
   0xe   :  { %344 = vmatmul.mubr.msk.bf16.gmra.mxu0 %vm69_vm1, %v365_v8  ;;  %352 = vmatmul.mubr.msk.bf16.gmra.mxu1 %vm69_vm1, %v366_v9 }
  0xc6   :  { %v341_v10 = vpop.f32.mrf.mxu0  ;;  %v349_v12 = vpop.f32.mrf.mxu1 }
  0xc7   :  { %v314_v11 = vpack.c.bf16 %v341_v10, %v341_v10  ;;  %v322_v13 = vpack.c.bf16 %v349_v12, %v349_v12 }
  0xc8   :  { %v132_v14 = vpop.f32.mrf.mxu0  ;;  %v164_v16 = vpop.f32.mrf.mxu1 }
  0xc9   :  { %262 = vst.msk [vmem:[%s483_s2 + $0x8] sm:$0xf] %vm259_vm2, %v314_v11  ;;  %v312_v15 = vpack.c.bf16 %v132_v14, %v132_v14  ;;  %270 = vst.msk [vmem:[%s483_s2 + $0x28] sm:$0xf] %vm259_vm2, %v322_v13  ;;  %v320_v17 = vpack.c.bf16 %v164_v16, %v164_v16 }
  0xca   :  { %v342_v18 = vpop.f32.mrf.mxu0  ;;  %v350_v20 = vpop.f32.mrf.mxu1 }
  0xcb   :  { %260 = vst.msk [vmem:[%s483_s2] sm:$0xf] %vm259_vm2, %v312_v15  ;;  %v315_v19 = vpack.c.bf16 %v342_v18, %v342_v18  ;;  %268 = vst.msk [vmem:[%s483_s2 + $0x20] sm:$0xf] %vm259_vm2, %v320_v17  ;;  %v323_v21 = vpack.c.bf16 %v350_v20, %v350_v20 }
  0xcc   :  { %v135_v22 = vpop.f32.mrf.mxu0  ;;  %v167_v24 = vpop.f32.mrf.mxu1 }
  0xcd   :  { %263 = vst.msk [vmem:[%s483_s2 + $0xc] sm:$0xf] %vm259_vm2, %v315_v19  ;;  %v313_v23 = vpack.c.bf16 %v135_v22, %v135_v22  ;;  %271 = vst.msk [vmem:[%s483_s2 + $0x2c] sm:$0xf] %vm259_vm2, %v323_v21  ;;  %v321_v25 = vpack.c.bf16 %v167_v24, %v167_v24 }
  0xce   :  { %v345_v26 = vpop.f32.mrf.mxu0  ;;  %v353_v28 = vpop.f32.mrf.mxu1 }
  0xcf   :  { %261 = vst.msk [vmem:[%s483_s2 + $0x4] sm:$0xf] %vm259_vm2, %v313_v23  ;;  %v318_v27 = vpack.c.bf16 %v345_v26, %v345_v26  ;;  %269 = vst.msk [vmem:[%s483_s2 + $0x24] sm:$0xf] %vm259_vm2, %v321_v25  ;;  %v326_v29 = vpack.c.bf16 %v353_v28, %v353_v28 }
  0xd0   :  { %v148_v30 = vpop.f32.mrf.mxu0  ;;  %v180_v32 = vpop.f32.mrf.mxu1 }
  0xd1   :  { %266 = vst.msk [vmem:[%s483_s2 + $0x18] sm:$0xf] %vm259_vm2, %v318_v27  ;;  %v316_v31 = vpack.c.bf16 %v148_v30, %v148_v30  ;;  %274 = vst.msk [vmem:[%s483_s2 + $0x38] sm:$0xf] %vm259_vm2, %v326_v29  ;;  %v324_v33 = vpack.c.bf16 %v180_v32, %v180_v32 }
  0xd2   :  { %v346_v34 = vpop.f32.mrf.mxu0  ;;  %v354_v36 = vpop.f32.mrf.mxu1 }
  0xd3   :  { %264 = vst.msk [vmem:[%s483_s2 + $0x10] sm:$0xf] %vm259_vm2, %v316_v31  ;;  %v319_v35 = vpack.c.bf16 %v346_v34, %v346_v34  ;;  %272 = vst.msk [vmem:[%s483_s2 + $0x30] sm:$0xf] %vm259_vm2, %v324_v33  ;;  %v327_v37 = vpack.c.bf16 %v354_v36, %v354_v36 }
  0xd4   :  { %v151_v38 = vpop.f32.mrf.mxu0  ;;  %v183_v40 = vpop.f32.mrf.mxu1 }
  0xd5   :  { %267 = vst.msk [vmem:[%s483_s2 + $0x1c] sm:$0xf] %vm259_vm2, %v319_v35  ;;  %v317_v39 = vpack.c.bf16 %v151_v38, %v151_v38  ;;  %275 = vst.msk [vmem:[%s483_s2 + $0x3c] sm:$0xf] %vm259_vm2, %v327_v37  ;;  %v325_v41 = vpack.c.bf16 %v183_v40, %v183_v40 }
  0xd7   :  { %265 = vst.msk [vmem:[%s483_s2 + $0x14] sm:$0xf] %vm259_vm2, %v317_v39  ;;  %273 = vst.msk [vmem:[%s483_s2 + $0x34] sm:$0xf] %vm259_vm2, %v325_v41 }

// kernel: unet3d_forward.33
= control target key start
LH: loop header
LB: loop body
LE: loop exit
PB: predicated region body
PF: predicated region fallthrough
CT: control target
= control target key end

     0   :  { %vm182_vm0 = vcmask 1045504   ;;  %vm133_vm1 = vcmask 97280   ;;  %vm475_vm2 = vcmask 27648   ;;  %s1284_s1 = inlined_call_operand.vmem [shape: bf16[12,4], index: 1, kind: input, shape index: {}]   ;;  %s1285_s0 = inlined_call_operand.vmem [shape: bf16[256,12], index: 0, kind: input, shape index: {}]   ;;  %s1286_s2 = inlined_call_operand.vmem [shape: bf16[256,4], index: 2, kind: output, shape index: {0}]   ;;  %s1287_s3 = inlined_call_operand.vmem [shape: bf16[256,4], index: 3, kind: output, shape index: {1}]  }
   0x1   :  { %v924_v0 = vld [vmem:[%s1284_s1] sm:$0x3f]   ;;  %v927_v4 = vld [vmem:[%s1285_s0 + $0x8] sm:$0xff]   ;;  %v929_v6 = vld [vmem:[%s1285_s0 + $0x10] sm:$0xff]  }
   0x2   :  { %v925_v1 = vld [vmem:[%s1285_s0] sm:$0xff]   ;;  %922 = vmatprep.subr.msk.bf16.mxu0 %vm182_vm0, %v924_v0  ;;  %923 = vmatprep.subr.msk.bf16.mxu1 %vm182_vm0, %v924_v0  ;;  %v184_v2 = vsel %vm182_vm0, %v924_v0, 0  ;;  %v928_v5 = vld [vmem:[%s1285_s0 + $0x48] sm:$0xff]   ;;  %v930_v7 = vld [vmem:[%s1285_s0 + $0x50] sm:$0xff]  }
   0x3   :  { %v926_v3 = vld [vmem:[%s1285_s0 + $0x40] sm:$0xff]   ;;  %887 = vmatpush3.bf16.msra.mxu0 %v184_v2  ;;  %921 = vmatpush3.bf16.msra.mxu1 %v184_v2  ;;  %v931_v8 = vld [vmem:[%s1285_s0 + $0x18] sm:$0xff]   ;;  %v935_v12 = vld [vmem:[%s1285_s0 + $0x28] sm:$0xff]  }
   0x4   :  { %888 = vmatprep.mubr.msk.bf16.mxu0 %vm133_vm1, %v925_v1  ;;  %904 = vmatprep.mubr.msk.bf16.mxu1 %vm133_vm1, %v926_v3  ;;  %v932_v9 = vld [vmem:[%s1285_s0 + $0x58] sm:$0xff]   ;;  %v933_v10 = vld [vmem:[%s1285_s0 + $0x20] sm:$0xff]   ;;  %v936_v13 = vld [vmem:[%s1285_s0 + $0x68] sm:$0xff]  }
   0x5   :  { %v934_v11 = vld [vmem:[%s1285_s0 + $0x60] sm:$0xff]   ;;  %v937_v14 = vld [vmem:[%s1285_s0 + $0x30] sm:$0xff]   ;;  %v939_v16 = vld [vmem:[%s1285_s0 + $0x38] sm:$0xff]  }
   0x6   :  { %889 = vmatmul.mubr.msk.bf16.vlgmr.msra.gmra.mxu0 %vm133_vm1, %v927_v4  ;;  %905 = vmatmul.mubr.msk.bf16.vlgmr.msra.gmra.mxu1 %vm133_vm1, %v928_v5  ;;  %v938_v15 = vld [vmem:[%s1285_s0 + $0x70] sm:$0xff]   ;;  %v940_v17 = vld [vmem:[%s1285_s0 + $0x78] sm:$0xff]  }
   0x7   :  { %892 = vmatprep.mubr.msk.bf16.mxu0 %vm133_vm1, %v929_v6  ;;  %908 = vmatprep.mubr.msk.bf16.mxu1 %vm133_vm1, %v930_v7 }
   0xe   :  { %893 = vmatmul.mubr.msk.bf16.gmra.mxu0 %vm133_vm1, %v931_v8  ;;  %909 = vmatmul.mubr.msk.bf16.gmra.mxu1 %vm133_vm1, %v932_v9 }
   0xf   :  { %896 = vmatprep.mubr.msk.bf16.mxu0 %vm133_vm1, %v933_v10  ;;  %912 = vmatprep.mubr.msk.bf16.mxu1 %vm133_vm1, %v934_v11 }
  0x16   :  { %897 = vmatmul.mubr.msk.bf16.gmra.mxu0 %vm133_vm1, %v935_v12  ;;  %913 = vmatmul.mubr.msk.bf16.gmra.mxu1 %vm133_vm1, %v936_v13 }
  0x17   :  { %900 = vmatprep.mubr.msk.bf16.mxu0 %vm133_vm1, %v937_v14  ;;  %916 = vmatprep.mubr.msk.bf16.mxu1 %vm133_vm1, %v938_v15 }
  0x1e   :  { %901 = vmatmul.mubr.msk.bf16.gmra.mxu0 %vm133_vm1, %v939_v16  ;;  %917 = vmatmul.mubr.msk.bf16.gmra.mxu1 %vm133_vm1, %v940_v17 }
  0xc6   :  { %v890_v18 = vpop.f32.mrf.mxu0  ;;  %v906_v19 = vpop.f32.mrf.mxu1 }
  0xc7   :  { %v807_v20 = vpack.c.bf16 %v890_v18, %v890_v18  ;;  %v510_v21 = vmax.f32 %v890_v18, 0.0  ;;  %v823_v22 = vpack.c.bf16 %v906_v19, %v906_v19  ;;  %v526_v23 = vmax.f32 %v906_v19, 0.0 }
  0xc8   :  { %v220_v24 = vpop.f32.mrf.mxu0  ;;  %v284_v25 = vpop.f32.mrf.mxu1 }
  0xc9   :  { %478 = vst.msk [vmem:[%s1286_s2 + $0x8] sm:$0xf] %vm475_vm2, %v807_v20  ;;  %v839_v26 = vpack.c.bf16 %v510_v21, %v510_v21  ;;  %494 = vst.msk [vmem:[%s1286_s2 + $0x48] sm:$0xf] %vm475_vm2, %v823_v22  ;;  %v855_v27 = vpack.c.bf16 %v526_v23, %v526_v23  ;;  %v805_v28 = vpack.c.bf16 %v220_v24, %v220_v24  ;;  %v508_v29 = vmax.f32 %v220_v24, 0.0 }
  0xca   :  { %v821_v30 = vpack.c.bf16 %v284_v25, %v284_v25  ;;  %v524_v31 = vmax.f32 %v284_v25, 0.0  ;;  %v891_v32 = vpop.f32.mrf.mxu0  ;;  %v907_v33 = vpop.f32.mrf.mxu1 }
  0xcb   :  { %670 = vst.msk [vmem:[%s1287_s3 + $0x8] sm:$0xf] %vm475_vm2, %v839_v26  ;;  %686 = vst.msk [vmem:[%s1287_s3 + $0x48] sm:$0xf] %vm475_vm2, %v855_v27  ;;  %v837_v34 = vpack.c.bf16 %v508_v29, %v508_v29  ;;  %v808_v35 = vpack.c.bf16 %v891_v32, %v891_v32  ;;  %v511_v36 = vmax.f32 %v891_v32, 0.0  ;;  %v824_v37 = vpack.c.bf16 %v907_v33, %v907_v33 }
  0xcc   :  { %476 = vst.msk [vmem:[%s1286_s2] sm:$0xf] %vm475_vm2, %v805_v28  ;;  %492 = vst.msk [vmem:[%s1286_s2 + $0x40] sm:$0xf] %vm475_vm2, %v821_v30  ;;  %v853_v38 = vpack.c.bf16 %v524_v31, %v524_v31  ;;  %v527_v39 = vmax.f32 %v907_v33, 0.0  ;;  %v223_v40 = vpop.f32.mrf.mxu0  ;;  %v287_v41 = vpop.f32.mrf.mxu1 }
  0xcd   :  { %668 = vst.msk [vmem:[%s1287_s3] sm:$0xf] %vm475_vm2, %v837_v34  ;;  %479 = vst.msk [vmem:[%s1286_s2 + $0xc] sm:$0xf] %vm475_vm2, %v808_v35  ;;  %v840_v42 = vpack.c.bf16 %v511_v36, %v511_v36  ;;  %v806_v43 = vpack.c.bf16 %v223_v40, %v223_v40  ;;  %v509_v44 = vmax.f32 %v223_v40, 0.0  ;;  %v822_v45 = vpack.c.bf16 %v287_v41, %v287_v41 }
  0xce   :  { %495 = vst.msk [vmem:[%s1286_s2 + $0x4c] sm:$0xf] %vm475_vm2, %v824_v37  ;;  %684 = vst.msk [vmem:[%s1287_s3 + $0x40] sm:$0xf] %vm475_vm2, %v853_v38  ;;  %v856_v46 = vpack.c.bf16 %v527_v39, %v527_v39  ;;  %v525_v47 = vmax.f32 %v287_v41, 0.0  ;;  %v894_v48 = vpop.f32.mrf.mxu0  ;;  %v910_v49 = vpop.f32.mrf.mxu1 }
  0xcf   :  { %671 = vst.msk [vmem:[%s1287_s3 + $0xc] sm:$0xf] %vm475_vm2, %v840_v42  ;;  %477 = vst.msk [vmem:[%s1286_s2 + $0x4] sm:$0xf] %vm475_vm2, %v806_v43  ;;  %v838_v50 = vpack.c.bf16 %v509_v44, %v509_v44  ;;  %v811_v51 = vpack.c.bf16 %v894_v48, %v894_v48  ;;  %v514_v52 = vmax.f32 %v894_v48, 0.0  ;;  %v827_v53 = vpack.c.bf16 %v910_v49, %v910_v49 }
  0xd0   :  { %493 = vst.msk [vmem:[%s1286_s2 + $0x44] sm:$0xf] %vm475_vm2, %v822_v45  ;;  %687 = vst.msk [vmem:[%s1287_s3 + $0x4c] sm:$0xf] %vm475_vm2, %v856_v46  ;;  %v854_v54 = vpack.c.bf16 %v525_v47, %v525_v47  ;;  %v530_v55 = vmax.f32 %v910_v49, 0.0  ;;  %v236_v56 = vpop.f32.mrf.mxu0  ;;  %v300_v57 = vpop.f32.mrf.mxu1 }
  0xd1   :  { %669 = vst.msk [vmem:[%s1287_s3 + $0x4] sm:$0xf] %vm475_vm2, %v838_v50  ;;  %482 = vst.msk [vmem:[%s1286_s2 + $0x18] sm:$0xf] %vm475_vm2, %v811_v51  ;;  %v843_v58 = vpack.c.bf16 %v514_v52, %v514_v52  ;;  %v809_v59 = vpack.c.bf16 %v236_v56, %v236_v56  ;;  %v512_v60 = vmax.f32 %v236_v56, 0.0  ;;  %v825_v61 = vpack.c.bf16 %v300_v57, %v300_v57 }
  0xd2   :  { %498 = vst.msk [vmem:[%s1286_s2 + $0x58] sm:$0xf] %vm475_vm2, %v827_v53  ;;  %685 = vst.msk [vmem:[%s1287_s3 + $0x44] sm:$0xf] %vm475_vm2, %v854_v54  ;;  %v859_v62 = vpack.c.bf16 %v530_v55, %v530_v55  ;;  %v528_v63 = vmax.f32 %v300_v57, 0.0  ;;  %v895_v0 = vpop.f32.mrf.mxu0  ;;  %v911_v1 = vpop.f32.mrf.mxu1 }
  0xd3   :  { %674 = vst.msk [vmem:[%s1287_s3 + $0x18] sm:$0xf] %vm475_vm2, %v843_v58  ;;  %480 = vst.msk [vmem:[%s1286_s2 + $0x10] sm:$0xf] %vm475_vm2, %v809_v59  ;;  %v841_v2 = vpack.c.bf16 %v512_v60, %v512_v60  ;;  %v812_v3 = vpack.c.bf16 %v895_v0, %v895_v0  ;;  %v515_v4 = vmax.f32 %v895_v0, 0.0  ;;  %v828_v5 = vpack.c.bf16 %v911_v1, %v911_v1 }
  0xd4   :  { %496 = vst.msk [vmem:[%s1286_s2 + $0x50] sm:$0xf] %vm475_vm2, %v825_v61  ;;  %690 = vst.msk [vmem:[%s1287_s3 + $0x58] sm:$0xf] %vm475_vm2, %v859_v62  ;;  %v857_v6 = vpack.c.bf16 %v528_v63, %v528_v63  ;;  %v531_v7 = vmax.f32 %v911_v1, 0.0  ;;  %v239_v8 = vpop.f32.mrf.mxu0  ;;  %v303_v9 = vpop.f32.mrf.mxu1 }
  0xd5   :  { %672 = vst.msk [vmem:[%s1287_s3 + $0x10] sm:$0xf] %vm475_vm2, %v841_v2  ;;  %483 = vst.msk [vmem:[%s1286_s2 + $0x1c] sm:$0xf] %vm475_vm2, %v812_v3  ;;  %v844_v10 = vpack.c.bf16 %v515_v4, %v515_v4  ;;  %v810_v11 = vpack.c.bf16 %v239_v8, %v239_v8  ;;  %v513_v12 = vmax.f32 %v239_v8, 0.0  ;;  %v826_v13 = vpack.c.bf16 %v303_v9, %v303_v9 }
  0xd6   :  { %499 = vst.msk [vmem:[%s1286_s2 + $0x5c] sm:$0xf] %vm475_vm2, %v828_v5  ;;  %688 = vst.msk [vmem:[%s1287_s3 + $0x50] sm:$0xf] %vm475_vm2, %v857_v6  ;;  %v860_v14 = vpack.c.bf16 %v531_v7, %v531_v7  ;;  %v529_v15 = vmax.f32 %v303_v9, 0.0  ;;  %v898_v16 = vpop.f32.mrf.mxu0  ;;  %v914_v17 = vpop.f32.mrf.mxu1 }
  0xd7   :  { %675 = vst.msk [vmem:[%s1287_s3 + $0x1c] sm:$0xf] %vm475_vm2, %v844_v10  ;;  %481 = vst.msk [vmem:[%s1286_s2 + $0x14] sm:$0xf] %vm475_vm2, %v810_v11  ;;  %v842_v18 = vpack.c.bf16 %v513_v12, %v513_v12  ;;  %v815_v19 = vpack.c.bf16 %v898_v16, %v898_v16  ;;  %v518_v20 = vmax.f32 %v898_v16, 0.0  ;;  %v831_v21 = vpack.c.bf16 %v914_v17, %v914_v17 }
  0xd8   :  { %497 = vst.msk [vmem:[%s1286_s2 + $0x54] sm:$0xf] %vm475_vm2, %v826_v13  ;;  %691 = vst.msk [vmem:[%s1287_s3 + $0x5c] sm:$0xf] %vm475_vm2, %v860_v14  ;;  %v858_v22 = vpack.c.bf16 %v529_v15, %v529_v15  ;;  %v534_v23 = vmax.f32 %v914_v17, 0.0  ;;  %v252_v24 = vpop.f32.mrf.mxu0  ;;  %v316_v25 = vpop.f32.mrf.mxu1 }
  0xd9   :  { %673 = vst.msk [vmem:[%s1287_s3 + $0x14] sm:$0xf] %vm475_vm2, %v842_v18  ;;  %486 = vst.msk [vmem:[%s1286_s2 + $0x28] sm:$0xf] %vm475_vm2, %v815_v19  ;;  %v847_v26 = vpack.c.bf16 %v518_v20, %v518_v20  ;;  %v813_v27 = vpack.c.bf16 %v252_v24, %v252_v24  ;;  %v516_v28 = vmax.f32 %v252_v24, 0.0  ;;  %v829_v29 = vpack.c.bf16 %v316_v25, %v316_v25 }
  0xda   :  { %502 = vst.msk [vmem:[%s1286_s2 + $0x68] sm:$0xf] %vm475_vm2, %v831_v21  ;;  %689 = vst.msk [vmem:[%s1287_s3 + $0x54] sm:$0xf] %vm475_vm2, %v858_v22  ;;  %v863_v30 = vpack.c.bf16 %v534_v23, %v534_v23  ;;  %v532_v31 = vmax.f32 %v316_v25, 0.0  ;;  %v899_v32 = vpop.f32.mrf.mxu0  ;;  %v915_v33 = vpop.f32.mrf.mxu1 }
  0xdb   :  { %678 = vst.msk [vmem:[%s1287_s3 + $0x28] sm:$0xf] %vm475_vm2, %v847_v26  ;;  %484 = vst.msk [vmem:[%s1286_s2 + $0x20] sm:$0xf] %vm475_vm2, %v813_v27  ;;  %v845_v34 = vpack.c.bf16 %v516_v28, %v516_v28  ;;  %v816_v35 = vpack.c.bf16 %v899_v32, %v899_v32  ;;  %v519_v36 = vmax.f32 %v899_v32, 0.0  ;;  %v832_v37 = vpack.c.bf16 %v915_v33, %v915_v33 }
  0xdc   :  { %500 = vst.msk [vmem:[%s1286_s2 + $0x60] sm:$0xf] %vm475_vm2, %v829_v29  ;;  %694 = vst.msk [vmem:[%s1287_s3 + $0x68] sm:$0xf] %vm475_vm2, %v863_v30  ;;  %v861_v38 = vpack.c.bf16 %v532_v31, %v532_v31  ;;  %v535_v39 = vmax.f32 %v915_v33, 0.0  ;;  %v255_v40 = vpop.f32.mrf.mxu0  ;;  %v319_v41 = vpop.f32.mrf.mxu1 }
  0xdd   :  { %676 = vst.msk [vmem:[%s1287_s3 + $0x20] sm:$0xf] %vm475_vm2, %v845_v34  ;;  %487 = vst.msk [vmem:[%s1286_s2 + $0x2c] sm:$0xf] %vm475_vm2, %v816_v35  ;;  %v848_v42 = vpack.c.bf16 %v519_v36, %v519_v36  ;;  %v814_v43 = vpack.c.bf16 %v255_v40, %v255_v40  ;;  %v517_v44 = vmax.f32 %v255_v40, 0.0  ;;  %v830_v45 = vpack.c.bf16 %v319_v41, %v319_v41 }
  0xde   :  { %503 = vst.msk [vmem:[%s1286_s2 + $0x6c] sm:$0xf] %vm475_vm2, %v832_v37  ;;  %692 = vst.msk [vmem:[%s1287_s3 + $0x60] sm:$0xf] %vm475_vm2, %v861_v38  ;;  %v864_v46 = vpack.c.bf16 %v535_v39, %v535_v39  ;;  %v533_v47 = vmax.f32 %v319_v41, 0.0  ;;  %v902_v48 = vpop.f32.mrf.mxu0  ;;  %v918_v49 = vpop.f32.mrf.mxu1 }
  0xdf   :  { %679 = vst.msk [vmem:[%s1287_s3 + $0x2c] sm:$0xf] %vm475_vm2, %v848_v42  ;;  %485 = vst.msk [vmem:[%s1286_s2 + $0x24] sm:$0xf] %vm475_vm2, %v814_v43  ;;  %v846_v50 = vpack.c.bf16 %v517_v44, %v517_v44  ;;  %v819_v51 = vpack.c.bf16 %v902_v48, %v902_v48  ;;  %v522_v52 = vmax.f32 %v902_v48, 0.0  ;;  %v835_v53 = vpack.c.bf16 %v918_v49, %v918_v49 }
  0xe0   :  { %501 = vst.msk [vmem:[%s1286_s2 + $0x64] sm:$0xf] %vm475_vm2, %v830_v45  ;;  %695 = vst.msk [vmem:[%s1287_s3 + $0x6c] sm:$0xf] %vm475_vm2, %v864_v46  ;;  %v862_v54 = vpack.c.bf16 %v533_v47, %v533_v47  ;;  %v538_v55 = vmax.f32 %v918_v49, 0.0  ;;  %v268_v56 = vpop.f32.mrf.mxu0  ;;  %v332_v57 = vpop.f32.mrf.mxu1 }
  0xe1   :  { %677 = vst.msk [vmem:[%s1287_s3 + $0x24] sm:$0xf] %vm475_vm2, %v846_v50  ;;  %490 = vst.msk [vmem:[%s1286_s2 + $0x38] sm:$0xf] %vm475_vm2, %v819_v51  ;;  %v851_v58 = vpack.c.bf16 %v522_v52, %v522_v52  ;;  %v817_v59 = vpack.c.bf16 %v268_v56, %v268_v56  ;;  %v520_v60 = vmax.f32 %v268_v56, 0.0  ;;  %v833_v61 = vpack.c.bf16 %v332_v57, %v332_v57 }
  0xe2   :  { %506 = vst.msk [vmem:[%s1286_s2 + $0x78] sm:$0xf] %vm475_vm2, %v835_v53  ;;  %693 = vst.msk [vmem:[%s1287_s3 + $0x64] sm:$0xf] %vm475_vm2, %v862_v54  ;;  %v867_v62 = vpack.c.bf16 %v538_v55, %v538_v55  ;;  %v536_v63 = vmax.f32 %v332_v57, 0.0  ;;  %v903_v0 = vpop.f32.mrf.mxu0  ;;  %v919_v1 = vpop.f32.mrf.mxu1 }
  0xe3   :  { %682 = vst.msk [vmem:[%s1287_s3 + $0x38] sm:$0xf] %vm475_vm2, %v851_v58  ;;  %488 = vst.msk [vmem:[%s1286_s2 + $0x30] sm:$0xf] %vm475_vm2, %v817_v59  ;;  %v849_v2 = vpack.c.bf16 %v520_v60, %v520_v60  ;;  %v820_v3 = vpack.c.bf16 %v903_v0, %v903_v0  ;;  %v523_v4 = vmax.f32 %v903_v0, 0.0  ;;  %v836_v5 = vpack.c.bf16 %v919_v1, %v919_v1 }
  0xe4   :  { %504 = vst.msk [vmem:[%s1286_s2 + $0x70] sm:$0xf] %vm475_vm2, %v833_v61  ;;  %698 = vst.msk [vmem:[%s1287_s3 + $0x78] sm:$0xf] %vm475_vm2, %v867_v62  ;;  %v865_v6 = vpack.c.bf16 %v536_v63, %v536_v63  ;;  %v539_v7 = vmax.f32 %v919_v1, 0.0  ;;  %v271_v8 = vpop.f32.mrf.mxu0  ;;  %v335_v9 = vpop.f32.mrf.mxu1 }
  0xe5   :  { %680 = vst.msk [vmem:[%s1287_s3 + $0x30] sm:$0xf] %vm475_vm2, %v849_v2  ;;  %491 = vst.msk [vmem:[%s1286_s2 + $0x3c] sm:$0xf] %vm475_vm2, %v820_v3  ;;  %v852_v10 = vpack.c.bf16 %v523_v4, %v523_v4  ;;  %v818_v11 = vpack.c.bf16 %v271_v8, %v271_v8  ;;  %v521_v12 = vmax.f32 %v271_v8, 0.0  ;;  %v834_v13 = vpack.c.bf16 %v335_v9, %v335_v9 }
  0xe6   :  { %507 = vst.msk [vmem:[%s1286_s2 + $0x7c] sm:$0xf] %vm475_vm2, %v836_v5  ;;  %696 = vst.msk [vmem:[%s1287_s3 + $0x70] sm:$0xf] %vm475_vm2, %v865_v6  ;;  %v868_v14 = vpack.c.bf16 %v539_v7, %v539_v7  ;;  %v537_v15 = vmax.f32 %v335_v9, 0.0 }
  0xe7   :  { %683 = vst.msk [vmem:[%s1287_s3 + $0x3c] sm:$0xf] %vm475_vm2, %v852_v10  ;;  %489 = vst.msk [vmem:[%s1286_s2 + $0x34] sm:$0xf] %vm475_vm2, %v818_v11  ;;  %v850_v16 = vpack.c.bf16 %v521_v12, %v521_v12 }
  0xe8   :  { %505 = vst.msk [vmem:[%s1286_s2 + $0x74] sm:$0xf] %vm475_vm2, %v834_v13  ;;  %699 = vst.msk [vmem:[%s1287_s3 + $0x7c] sm:$0xf] %vm475_vm2, %v868_v14  ;;  %v866_v17 = vpack.c.bf16 %v537_v15, %v537_v15 }
  0xe9   :  { %681 = vst.msk [vmem:[%s1287_s3 + $0x34] sm:$0xf] %vm475_vm2, %v850_v16 }
  0xea   :  { %697 = vst.msk [vmem:[%s1287_s3 + $0x74] sm:$0xf] %vm475_vm2, %v866_v17 }

// kernel: unet3d_forward.37
= control target key start
LH: loop header
LB: loop body
LE: loop exit
PB: predicated region body
PF: predicated region fallthrough
CT: control target
= control target key end

     0   :  { %vm54_vm0 = vcmask 1043456   ;;  %vm41_vm1 = vcmask 64512   ;;  %vm155_vm2 = vcmask 27648   ;;  %s277_s1 = inlined_call_operand.vmem [shape: bf16[8,4], index: 1, kind: input, shape index: {}]   ;;  %s278_s0 = inlined_call_operand.vmem [shape: bf16[64,8], index: 0, kind: input, shape index: {}]   ;;  %s279_s2 = inlined_call_operand.vmem [shape: bf16[64,4], index: 2, kind: output, shape index: {}]  }
   0x1   :  { %v20_v0 = vld [vmem:[%s277_s1] sm:$0xf]  ;;  %v212_v3 = vld [vmem:[%s278_s0 + $0x10] sm:$0xff]   ;;  %v213_v4 = vld [vmem:[%s278_s0 + $0x8] sm:$0xff]  }
   0x2   :  { %209 = vmatprep.subr.msk.bf16.mxu0 %vm54_vm0, %v20_v0  ;;  %210 = vmatprep.subr.msk.bf16.mxu1 %vm54_vm0, %v20_v0  ;;  %v56_v1 = vsel %vm54_vm0, %v20_v0, 0  ;;  %v211_v2 = vld [vmem:[%s278_s0] sm:$0xff]   ;;  %v214_v5 = vld [vmem:[%s278_s0 + $0x18] sm:$0xff]  }
   0x3   :  { %198 = vmatpush3.bf16.msra.mxu0 %v56_v1  ;;  %208 = vmatpush3.bf16.msra.mxu1 %v56_v1 }
   0x4   :  { %199 = vmatprep.mubr.msk.bf16.mxu0 %vm41_vm1, %v211_v2  ;;  %203 = vmatprep.mubr.msk.bf16.mxu1 %vm41_vm1, %v212_v3 }
   0x6   :  { %200 = vmatmul.mubr.msk.bf16.vlgmr.msra.gmra.mxu0 %vm41_vm1, %v213_v4  ;;  %204 = vmatmul.mubr.msk.bf16.vlgmr.msra.gmra.mxu1 %vm41_vm1, %v214_v5 }
  0xc6   :  { %v201_v6 = vpop.f32.mrf.mxu0  ;;  %v205_v8 = vpop.f32.mrf.mxu1 }
  0xc7   :  { %v186_v7 = vpack.c.bf16 %v201_v6, %v201_v6  ;;  %v190_v9 = vpack.c.bf16 %v205_v8, %v205_v8 }
  0xc8   :  { %v92_v10 = vpop.f32.mrf.mxu0  ;;  %v108_v12 = vpop.f32.mrf.mxu1 }
  0xc9   :  { %158 = vst.msk [vmem:[%s279_s2 + $0x8] sm:$0xf] %vm155_vm2, %v186_v7  ;;  %v184_v11 = vpack.c.bf16 %v92_v10, %v92_v10  ;;  %162 = vst.msk [vmem:[%s279_s2 + $0x18] sm:$0xf] %vm155_vm2, %v190_v9  ;;  %v188_v13 = vpack.c.bf16 %v108_v12, %v108_v12 }
  0xca   :  { %v202_v14 = vpop.f32.mrf.mxu0  ;;  %v206_v16 = vpop.f32.mrf.mxu1 }
  0xcb   :  { %156 = vst.msk [vmem:[%s279_s2] sm:$0xf] %vm155_vm2, %v184_v11  ;;  %v187_v15 = vpack.c.bf16 %v202_v14, %v202_v14  ;;  %160 = vst.msk [vmem:[%s279_s2 + $0x10] sm:$0xf] %vm155_vm2, %v188_v13  ;;  %v191_v17 = vpack.c.bf16 %v206_v16, %v206_v16 }
  0xcc   :  { %v95_v18 = vpop.f32.mrf.mxu0  ;;  %v111_v20 = vpop.f32.mrf.mxu1 }
  0xcd   :  { %159 = vst.msk [vmem:[%s279_s2 + $0xc] sm:$0xf] %vm155_vm2, %v187_v15  ;;  %v185_v19 = vpack.c.bf16 %v95_v18, %v95_v18  ;;  %163 = vst.msk [vmem:[%s279_s2 + $0x1c] sm:$0xf] %vm155_vm2, %v191_v17  ;;  %v189_v21 = vpack.c.bf16 %v111_v20, %v111_v20 }
  0xcf   :  { %157 = vst.msk [vmem:[%s279_s2 + $0x4] sm:$0xf] %vm155_vm2, %v185_v19  ;;  %161 = vst.msk [vmem:[%s279_s2 + $0x14] sm:$0xf] %vm155_vm2, %v189_v21 }

// kernel: unet3d_forward.35
= control target key start
LH: loop header
LB: loop body
LE: loop exit
PB: predicated region body
PF: predicated region fallthrough
CT: control target
= control target key end

     0   :  { %vm137_vm0 = vcmask 1045504   ;;  %vm112_vm1 = vcmask 97280   ;;  %vm302_vm2 = vcmask 27648   ;;  %s823_s1 = inlined_call_operand.vmem [shape: bf16[12,4], index: 1, kind: input, shape index: {}]   ;;  %s824_s0 = inlined_call_operand.vmem [shape: bf16[128,12], index: 0, kind: input, shape index: {}]   ;;  %s825_s2 = inlined_call_operand.vmem [shape: bf16[128,4], index: 2, kind: input, shape index: {}]   ;;  %s826_s3 = inlined_call_operand.vmem [shape: bf16[128,4], index: 3, kind: output, shape index: {0}]   ;;  %s827_s4 = inlined_call_operand.vmem [shape: bf16[128,4], index: 4, kind: output, shape index: {1}]  }
   0x1   :  { %v574_v0 = vld [vmem:[%s823_s1] sm:$0x3f]   ;;  %v577_v4 = vld [vmem:[%s824_s0 + $0x8] sm:$0xff]   ;;  %v579_v6 = vld [vmem:[%s824_s0 + $0x10] sm:$0xff]  }
   0x2   :  { %v575_v1 = vld [vmem:[%s824_s0] sm:$0xff]   ;;  %572 = vmatprep.subr.msk.bf16.mxu0 %vm137_vm0, %v574_v0  ;;  %573 = vmatprep.subr.msk.bf16.mxu1 %vm137_vm0, %v574_v0  ;;  %v139_v2 = vsel %vm137_vm0, %v574_v0, 0  ;;  %v578_v5 = vld [vmem:[%s824_s0 + $0x28] sm:$0xff]   ;;  %v580_v7 = vld [vmem:[%s824_s0 + $0x30] sm:$0xff]  }
   0x3   :  { %v576_v3 = vld [vmem:[%s824_s0 + $0x20] sm:$0xff]   ;;  %553 = vmatpush3.bf16.msra.mxu0 %v139_v2  ;;  %571 = vmatpush3.bf16.msra.mxu1 %v139_v2  ;;  %v581_v8 = vld [vmem:[%s824_s0 + $0x18] sm:$0xff]   ;;  %v536_v10 = vld [vmem:[%s825_s2 + $0x8] sm:$0xff]  }
   0x4   :  { %554 = vmatprep.mubr.msk.bf16.mxu0 %vm112_vm1, %v575_v1  ;;  %562 = vmatprep.mubr.msk.bf16.mxu1 %vm112_vm1, %v576_v3  ;;  %v582_v9 = vld [vmem:[%s824_s0 + $0x38] sm:$0xff]   ;;  %v540_v11 = vld [vmem:[%s825_s2 + $0x28] sm:$0xff]   ;;  %v505_v12 = vld [vmem:[%s825_s2] sm:$0xff]   ;;  %v510_v14 = vunpack.c.l.bf16 %v536_v10  ;;  %v511_v24 = vunpack.c.h.bf16 %v536_v10 }
   0x5   :  { %v539_v13 = vld [vmem:[%s825_s2 + $0x20] sm:$0xff]   ;;  %v526_v15 = vunpack.c.l.bf16 %v540_v11  ;;  %v658_v16 = vld [vmem:[%s825_s2 + $0x18] sm:$0xff]   ;;  %v506_v18 = vunpack.c.l.bf16 %v505_v12  ;;  %v668_v20 = vld [vmem:[%s825_s2 + $0x10] sm:$0xff]   ;;  %v527_v25 = vunpack.c.h.bf16 %v540_v11  ;;  %v507_v26 = vunpack.c.h.bf16 %v505_v12 }
   0x6   :  { %555 = vmatmul.mubr.msk.bf16.vlgmr.msra.gmra.mxu0 %vm112_vm1, %v577_v4  ;;  %563 = vmatmul.mubr.msk.bf16.vlgmr.msra.gmra.mxu1 %vm112_vm1, %v578_v5  ;;  %v663_v17 = vld [vmem:[%s825_s2 + $0x38] sm:$0xff]   ;;  %v522_v19 = vunpack.c.l.bf16 %v539_v13  ;;  %v673_v21 = vld [vmem:[%s825_s2 + $0x30] sm:$0xff]   ;;  %v523_v27 = vunpack.c.h.bf16 %v539_v13  ;;  %v518_v30 = vunpack.c.l.bf16 %v658_v16  ;;  %v514_v34 = vunpack.c.l.bf16 %v668_v20 }
   0x7   :  { %558 = vmatprep.mubr.msk.bf16.mxu0 %vm112_vm1, %v579_v6  ;;  %566 = vmatprep.mubr.msk.bf16.mxu1 %vm112_vm1, %v580_v7  ;;  %v534_v31 = vunpack.c.l.bf16 %v663_v17  ;;  %v530_v35 = vunpack.c.l.bf16 %v673_v21  ;;  %v519_v36 = vunpack.c.h.bf16 %v658_v16  ;;  %v535_v37 = vunpack.c.h.bf16 %v663_v17 }
   0x8   :  { %v515_v46 = vunpack.c.h.bf16 %v668_v20  ;;  %v531_v47 = vunpack.c.h.bf16 %v673_v21 }
   0xe   :  { %559 = vmatmul.mubr.msk.bf16.gmra.mxu0 %vm112_vm1, %v581_v8  ;;  %567 = vmatmul.mubr.msk.bf16.gmra.mxu1 %vm112_vm1, %v582_v9 }
  0xc6   :  { %v556_v22 = vpop.f32.mrf.mxu0  ;;  %v564_v23 = vpop.f32.mrf.mxu1 }
  0xc7   :  { %v184_v28 = vadd.f32 %v556_v22, %v510_v14  ;;  %v216_v29 = vadd.f32 %v564_v23, %v526_v15 }
  0xc8   :  { %v175_v32 = vpop.f32.mrf.mxu0  ;;  %v207_v33 = vpop.f32.mrf.mxu1 }
  0xc9   :  { %v474_v38 = vpack.c.bf16 %v184_v28, %v184_v28  ;;  %v321_v39 = vmax.f32 %v184_v28, 0.0  ;;  %v482_v40 = vpack.c.bf16 %v216_v29, %v216_v29  ;;  %v329_v41 = vmax.f32 %v216_v29, 0.0 }
  0xca   :  { %v176_v42 = vadd.f32 %v506_v18, %v175_v32  ;;  %v208_v43 = vadd.f32 %v522_v19, %v207_v33  ;;  %v557_v44 = vpop.f32.mrf.mxu0  ;;  %v565_v45 = vpop.f32.mrf.mxu1 }
  0xcb   :  { %305 = vst.msk [vmem:[%s826_s3 + $0x8] sm:$0xf] %vm302_vm2, %v474_v38  ;;  %v490_v48 = vpack.c.bf16 %v321_v39, %v321_v39  ;;  %313 = vst.msk [vmem:[%s826_s3 + $0x28] sm:$0xf] %vm302_vm2, %v482_v40  ;;  %v498_v49 = vpack.c.bf16 %v329_v41, %v329_v41  ;;  %v187_v50 = vadd.f32 %v557_v44, %v511_v24 }
  0xcc   :  { %v219_v51 = vadd.f32 %v565_v45, %v527_v25  ;;  %v472_v52 = vpack.c.bf16 %v176_v42, %v176_v42  ;;  %v319_v53 = vmax.f32 %v176_v42, 0.0  ;;  %v480_v54 = vpack.c.bf16 %v208_v43, %v208_v43  ;;  %v178_v56 = vpop.f32.mrf.mxu0  ;;  %v210_v57 = vpop.f32.mrf.mxu1 }
  0xcd   :  { %v327_v55 = vmax.f32 %v208_v43, 0.0  ;;  %401 = vst.msk [vmem:[%s827_s4 + $0x8] sm:$0xf] %vm302_vm2, %v490_v48  ;;  %409 = vst.msk [vmem:[%s827_s4 + $0x28] sm:$0xf] %vm302_vm2, %v498_v49  ;;  %v475_v58 = vpack.c.bf16 %v187_v50, %v187_v50  ;;  %v322_v59 = vmax.f32 %v187_v50, 0.0  ;;  %v179_v0 = vadd.f32 %v507_v26, %v178_v56 }
  0xce   :  { %v483_v60 = vpack.c.bf16 %v219_v51, %v219_v51  ;;  %v330_v61 = vmax.f32 %v219_v51, 0.0  ;;  %303 = vst.msk [vmem:[%s826_s3] sm:$0xf] %vm302_vm2, %v472_v52  ;;  %v488_v62 = vpack.c.bf16 %v319_v53, %v319_v53  ;;  %311 = vst.msk [vmem:[%s826_s3 + $0x20] sm:$0xf] %vm302_vm2, %v480_v54  ;;  %v211_v1 = vadd.f32 %v523_v27, %v210_v57  ;;  %v560_v2 = vpop.f32.mrf.mxu0  ;;  %v568_v3 = vpop.f32.mrf.mxu1 }
  0xcf   :  { %v496_v63 = vpack.c.bf16 %v327_v55, %v327_v55  ;;  %306 = vst.msk [vmem:[%s826_s3 + $0xc] sm:$0xf] %vm302_vm2, %v475_v58  ;;  %v491_v4 = vpack.c.bf16 %v322_v59, %v322_v59  ;;  %v200_v6 = vadd.f32 %v560_v2, %v518_v30  ;;  %v232_v7 = vadd.f32 %v568_v3, %v534_v31 }
  0xd0   :  { %314 = vst.msk [vmem:[%s826_s3 + $0x2c] sm:$0xf] %vm302_vm2, %v483_v60  ;;  %v499_v5 = vpack.c.bf16 %v330_v61, %v330_v61  ;;  %399 = vst.msk [vmem:[%s827_s4] sm:$0xf] %vm302_vm2, %v488_v62  ;;  %v473_v8 = vpack.c.bf16 %v179_v0, %v179_v0  ;;  %v320_v9 = vmax.f32 %v179_v0, 0.0  ;;  %v481_v10 = vpack.c.bf16 %v211_v1, %v211_v1  ;;  %v191_v12 = vpop.f32.mrf.mxu0  ;;  %v223_v13 = vpop.f32.mrf.mxu1 }
  0xd1   :  { %407 = vst.msk [vmem:[%s827_s4 + $0x20] sm:$0xf] %vm302_vm2, %v496_v63  ;;  %v328_v11 = vmax.f32 %v211_v1, 0.0  ;;  %402 = vst.msk [vmem:[%s827_s4 + $0xc] sm:$0xf] %vm302_vm2, %v491_v4  ;;  %v478_v14 = vpack.c.bf16 %v200_v6, %v200_v6  ;;  %v325_v15 = vmax.f32 %v200_v6, 0.0  ;;  %v486_v18 = vpack.c.bf16 %v232_v7, %v232_v7 }
  0xd2   :  { %410 = vst.msk [vmem:[%s827_s4 + $0x2c] sm:$0xf] %vm302_vm2, %v499_v5  ;;  %v333_v19 = vmax.f32 %v232_v7, 0.0  ;;  %304 = vst.msk [vmem:[%s826_s3 + $0x4] sm:$0xf] %vm302_vm2, %v473_v8  ;;  %v489_v22 = vpack.c.bf16 %v320_v9, %v320_v9  ;;  %v192_v24 = vadd.f32 %v514_v34, %v191_v12  ;;  %v224_v25 = vadd.f32 %v530_v35, %v223_v13  ;;  %v561_v26 = vpop.f32.mrf.mxu0  ;;  %v569_v27 = vpop.f32.mrf.mxu1 }
  0xd3   :  { %312 = vst.msk [vmem:[%s826_s3 + $0x24] sm:$0xf] %vm302_vm2, %v481_v10  ;;  %v497_v23 = vpack.c.bf16 %v328_v11, %v328_v11  ;;  %309 = vst.msk [vmem:[%s826_s3 + $0x18] sm:$0xf] %vm302_vm2, %v478_v14  ;;  %v494_v28 = vpack.c.bf16 %v325_v15, %v325_v15  ;;  %v203_v30 = vadd.f32 %v561_v26, %v519_v36 }
  0xd4   :  { %317 = vst.msk [vmem:[%s826_s3 + $0x38] sm:$0xf] %vm302_vm2, %v486_v18  ;;  %v502_v29 = vpack.c.bf16 %v333_v19, %v333_v19  ;;  %v235_v31 = vadd.f32 %v569_v27, %v535_v37  ;;  %400 = vst.msk [vmem:[%s827_s4 + $0x4] sm:$0xf] %vm302_vm2, %v489_v22  ;;  %v476_v32 = vpack.c.bf16 %v192_v24, %v192_v24  ;;  %v323_v33 = vmax.f32 %v192_v24, 0.0  ;;  %v194_v38 = vpop.f32.mrf.mxu0  ;;  %v226_v16 = vpop.f32.mrf.mxu1 }
  0xd5   :  { %408 = vst.msk [vmem:[%s827_s4 + $0x24] sm:$0xf] %vm302_vm2, %v497_v23  ;;  %v484_v34 = vpack.c.bf16 %v224_v25, %v224_v25  ;;  %v331_v35 = vmax.f32 %v224_v25, 0.0  ;;  %405 = vst.msk [vmem:[%s827_s4 + $0x18] sm:$0xf] %vm302_vm2, %v494_v28  ;;  %v479_v17 = vpack.c.bf16 %v203_v30, %v203_v30  ;;  %v326_v36 = vmax.f32 %v203_v30, 0.0 }
  0xd6   :  { %413 = vst.msk [vmem:[%s827_s4 + $0x38] sm:$0xf] %vm302_vm2, %v502_v29  ;;  %v487_v37 = vpack.c.bf16 %v235_v31, %v235_v31  ;;  %v334_v39 = vmax.f32 %v235_v31, 0.0  ;;  %307 = vst.msk [vmem:[%s826_s3 + $0x10] sm:$0xf] %vm302_vm2, %v476_v32  ;;  %v492_v40 = vpack.c.bf16 %v323_v33, %v323_v33  ;;  %v195_v42 = vadd.f32 %v515_v46, %v194_v38 }
  0xd7   :  { %315 = vst.msk [vmem:[%s826_s3 + $0x30] sm:$0xf] %vm302_vm2, %v484_v34  ;;  %v500_v41 = vpack.c.bf16 %v331_v35, %v331_v35  ;;  %v227_v43 = vadd.f32 %v531_v47, %v226_v16  ;;  %310 = vst.msk [vmem:[%s826_s3 + $0x1c] sm:$0xf] %vm302_vm2, %v479_v17  ;;  %v495_v44 = vpack.c.bf16 %v326_v36, %v326_v36 }
  0xd8   :  { %318 = vst.msk [vmem:[%s826_s3 + $0x3c] sm:$0xf] %vm302_vm2, %v487_v37  ;;  %v503_v45 = vpack.c.bf16 %v334_v39, %v334_v39  ;;  %403 = vst.msk [vmem:[%s827_s4 + $0x10] sm:$0xf] %vm302_vm2, %v492_v40  ;;  %v477_v20 = vpack.c.bf16 %v195_v42, %v195_v42  ;;  %v324_v21 = vmax.f32 %v195_v42, 0.0 }
  0xd9   :  { %411 = vst.msk [vmem:[%s827_s4 + $0x30] sm:$0xf] %vm302_vm2, %v500_v41  ;;  %v485_v46 = vpack.c.bf16 %v227_v43, %v227_v43  ;;  %v332_v47 = vmax.f32 %v227_v43, 0.0  ;;  %406 = vst.msk [vmem:[%s827_s4 + $0x1c] sm:$0xf] %vm302_vm2, %v495_v44 }
  0xda   :  { %414 = vst.msk [vmem:[%s827_s4 + $0x3c] sm:$0xf] %vm302_vm2, %v503_v45  ;;  %308 = vst.msk [vmem:[%s826_s3 + $0x14] sm:$0xf] %vm302_vm2, %v477_v20  ;;  %v493_v48 = vpack.c.bf16 %v324_v21, %v324_v21 }
  0xdb   :  { %316 = vst.msk [vmem:[%s826_s3 + $0x34] sm:$0xf] %vm302_vm2, %v485_v46  ;;  %v501_v49 = vpack.c.bf16 %v332_v47, %v332_v47 }
  0xdc   :  { %404 = vst.msk [vmem:[%s827_s4 + $0x14] sm:$0xf] %vm302_vm2, %v493_v48 }
  0xdd   :  { %412 = vst.msk [vmem:[%s827_s4 + $0x34] sm:$0xf] %vm302_vm2, %v501_v49 }

// kernel: unet3d_forward.38
= control target key start
LH: loop header
LB: loop body
LE: loop exit
PB: predicated region body
PF: predicated region fallthrough
CT: control target
= control target key end

     0   :  { %vm88_vm0 = vcmask 1045504   ;;  %vm75_vm1 = vcmask 97280   ;;  %vm223_vm2 = vcmask 1041408   ;;  %vm210_vm3 = vcmask 31744   ;;  %s593_s1 = inlined_call_operand.vmem [shape: bf16[12,4], index: 1, kind: input, shape index: {}]   ;;  %s594_s0 = inlined_call_operand.vmem [shape: bf16[64,12], index: 0, kind: input, shape index: {}]   ;;  %s595_s4 = inlined_call_operand.vmem [shape: bf16[4,32], index: 4, kind: input, shape index: {}]   ;;  %s596_s2 = inlined_call_operand.vmem [shape: bf16[64,4], index: 2, kind: input, shape index: {}]   ;;  %s597_s3 = inlined_call_operand.vmem [shape: bf16[64,4], index: 3, kind: input, shape index: {}]   ;;  %s598_s5 = inlined_call_operand.vmem [shape: bf16[64,32], index: 5, kind: input, shape index: {}]   ;;  %s599_s6 = inlined_call_operand.vmem [shape: bf16[64,32], index: 6, kind: output, shape index: {}]  }
   0x1   :  { %v463_v0 = vld [vmem:[%s593_s1] sm:$0x3f]   ;;  %v465_v3 = vld [vmem:[%s594_s0 + $0x8] sm:$0xff]   ;;  %v466_v4 = vld [vmem:[%s594_s0 + $0x10] sm:$0xff]   ;;  %vm332_vm4 = vcmask 257024  }
   0x2   :  { %v464_v1 = vld [vmem:[%s594_s0] sm:$0xff]   ;;  %461 = vmatprep.subr.msk.bf16.mxu0 %vm88_vm0, %v463_v0  ;;  %v90_v2 = vsel %vm88_vm0, %v463_v0, 0  ;;  %v467_v5 = vld [vmem:[%s594_s0 + $0x18] sm:$0xff]   ;;  %v422_v9 = vld [vmem:[%s596_s2 + $0x8] sm:$0xff]  }
   0x3   :  { %442 = vmatpush3.bf16.msra.mxu0 %v90_v2  ;;  %443 = vmatprep.mubr.msk.bf16.mxu0 %vm75_vm1, %v464_v1  ;;  %v193_v6 = vld [vmem:[%s595_s4] sm:$0x3]  ;;  %v380_v11 = vunpack.c.l.bf16 %v422_v9  ;;  %v425_v14 = vld [vmem:[%s597_s3 + $0x8] sm:$0xff]   ;;  %v381_v15 = vunpack.c.h.bf16 %v422_v9  ;;  %v423_v24 = vld [vmem:[%s596_s2 + $0x10] sm:$0xff]  }
   0x4   :  { %462 = vmatprep.subr.msk.bf16.mxu1 %vm223_vm2, %v193_v6  ;;  %v225_v7 = vsel %vm223_vm2, %v193_v6, 0  ;;  %v375_v8 = vld [vmem:[%s596_s2] sm:$0xff]   ;;  %v397_v19 = vunpack.c.h.bf16 %v425_v14  ;;  %v396_v22 = vunpack.c.l.bf16 %v425_v14  ;;  %v424_v27 = vld [vmem:[%s596_s2 + $0x18] sm:$0xff]   ;;  %v384_v32 = vunpack.c.l.bf16 %v423_v24  ;;  %v426_v33 = vld [vmem:[%s597_s3 + $0x10] sm:$0xff]  }
   0x5   :  { %452 = vmatpush3.bf16.msra.mxu1 %v225_v7  ;;  %v376_v10 = vunpack.c.l.bf16 %v375_v8  ;;  %v391_v13 = vld [vmem:[%s597_s3] sm:$0xff]   ;;  %v377_v20 = vunpack.c.h.bf16 %v375_v8  ;;  %v388_v35 = vunpack.c.l.bf16 %v424_v27  ;;  %v427_v38 = vld [vmem:[%s597_s3 + $0x18] sm:$0xff]   ;;  %v389_v39 = vunpack.c.h.bf16 %v424_v27 }
   0x6   :  { %444 = vmatmul.mubr.msk.bf16.vlgmr.msra.gmra.mxu0 %vm75_vm1, %v465_v3  ;;  %v392_v18 = vunpack.c.l.bf16 %v391_v13  ;;  %v393_v26 = vunpack.c.h.bf16 %v391_v13  ;;  %v400_v42 = vunpack.c.l.bf16 %v426_v33  ;;  %v405_v43 = vunpack.c.h.bf16 %v427_v38 }
   0x7   :  { %447 = vmatprep.mubr.msk.bf16.mxu0 %vm75_vm1, %v466_v4  ;;  %v385_v47 = vunpack.c.h.bf16 %v423_v24  ;;  %v404_v50 = vunpack.c.l.bf16 %v427_v38  ;;  %v401_v53 = vunpack.c.h.bf16 %v426_v33  ;;  %v428_v4 = vld [vmem:[%s598_s5 + $0x8] sm:$0xff]  }
   0x8   :  { %v412_v6 = vunpack.c.l.bf16 %v428_v4 }
   0xe   :  { %448 = vmatmul.mubr.msk.bf16.gmra.mxu0 %vm75_vm1, %v467_v5  ;;  %v407_v5 = vld [vmem:[%s598_s5] sm:$0xff]  }
   0xf   :  { %v408_v7 = vunpack.c.l.bf16 %v407_v5 }
  0xc6   :  { %v445_v12 = vpop.f32.mrf.mxu0 }
  0xc7   :  { %v135_v21 = vadd.f32 %v445_v12, %v380_v11  ;;  %v430_v12 = vld [vmem:[%s598_s5 + $0x18] sm:$0xff]  }
  0xc8   :  { %v126_v16 = vpop.f32.mrf.mxu0 }
  0xc9   :  { %v127_v17 = vadd.f32 %v376_v10, %v126_v16  ;;  %v175_v34 = vadd.f32 %v396_v22, %v135_v21  ;;  %v413_v10 = vunpack.c.h.bf16 %v428_v4  ;;  %v420_v21 = vunpack.c.l.bf16 %v430_v12 }
  0xca   :  { %v446_v23 = vpop.f32.mrf.mxu0 }
  0xcb   :  { %v138_v25 = vadd.f32 %v446_v23, %v381_v15  ;;  %v173_v29 = vadd.f32 %v392_v18, %v127_v17  ;;  %v183_v48 = vmax.f32 %v175_v34, 0.0  ;;  %v409_v15 = vunpack.c.h.bf16 %v407_v5  ;;  %v429_v17 = vld [vmem:[%s598_s5 + $0x10] sm:$0xff]  }
  0xcc   :  { %v129_v28 = vpop.f32.mrf.mxu0 }
  0xcd   :  { %v176_v30 = vadd.f32 %v397_v19, %v138_v25  ;;  %v130_v31 = vadd.f32 %v377_v20, %v129_v28  ;;  %v181_v44 = vmax.f32 %v173_v29, 0.0 }
  0xce   :  { %v449_v36 = vpop.f32.mrf.mxu0 }
  0xcf   :  { %v174_v37 = vadd.f32 %v393_v26, %v130_v31  ;;  %v184_v40 = vmax.f32 %v176_v30, 0.0  ;;  %v151_v49 = vadd.f32 %v449_v36, %v388_v35  ;;  %v416_v26 = vunpack.c.l.bf16 %v429_v17 }
  0xd0   :  { %v142_v41 = vpop.f32.mrf.mxu0  ;;  %v421_v31 = vunpack.c.h.bf16 %v430_v12  ;;  %v417_v36 = vunpack.c.h.bf16 %v429_v17 }
  0xd1   :  { %v182_v45 = vmax.f32 %v174_v37, 0.0  ;;  %v143_v46 = vadd.f32 %v384_v32, %v142_v41  ;;  %v190_v55 = vpack.c.bf16 %v184_v40, %v183_v48  ;;  %v179_v60 = vadd.f32 %v404_v50, %v151_v49 }
  0xd2   :  { %v450_v51 = vpop.f32.mrf.mxu0 }
  0xd3   :  { %v154_v52 = vadd.f32 %v450_v51, %v389_v39  ;;  %v189_v54 = vpack.c.bf16 %v182_v45, %v181_v44  ;;  %v177_v57 = vadd.f32 %v400_v42, %v143_v46  ;;  %v187_v1 = vmax.f32 %v179_v60, 0.0 }
  0xd4   :  { %v145_v56 = vpop.f32.mrf.mxu0 }
  0xd5   :  { %v180_v58 = vadd.f32 %v405_v43, %v154_v52  ;;  %v146_v59 = vadd.f32 %v385_v47, %v145_v56  ;;  %453 = vmatprep.mubr.msk.bf16.mxu1 %vm210_vm3, %v189_v54  ;;  %v185_v63 = vmax.f32 %v177_v57, 0.0 }
  0xd6   :  { %454 = vmatmul.mubr.msk.bf16.vlgmr.msra.gmra.mxu1 %vm210_vm3, %v190_v55 }
  0xd7   :  { %v178_v61 = vadd.f32 %v401_v53, %v146_v59  ;;  %v188_v62 = vmax.f32 %v180_v58, 0.0 }
  0xd9   :  { %v186_v0 = vmax.f32 %v178_v61, 0.0  ;;  %v192_v3 = vpack.c.bf16 %v188_v62, %v187_v1 }
  0xdb   :  { %v191_v2 = vpack.c.bf16 %v186_v0, %v185_v63 }
  0xdd   :  { %457 = vmatprep.mubr.msk.bf16.mxu1 %vm210_vm3, %v191_v2 }
  0xde   :  { %458 = vmatmul.mubr.msk.bf16.gmra.mxu1 %vm210_vm3, %v192_v3 }
 0x196   :  { %v455_v8 = vpop.f32.mrf.mxu1 }
 0x197   :  { %v270_v9 = vadd.f32 %v455_v8, %v412_v6 }
 0x198   :  { %v261_v11 = vpop.f32.mrf.mxu1 }
 0x199   :  { %v294_v13 = vmax.f32 %v270_v9, 0.0  ;;  %v262_v14 = vadd.f32 %v408_v7, %v261_v11 }
 0x19a   :  { %v456_v16 = vpop.f32.mrf.mxu1 }
 0x19b   :  { %v368_v18 = vpack.c.bf16 %v294_v13, %v294_v13  ;;  %v292_v19 = vmax.f32 %v262_v14, 0.0  ;;  %v273_v20 = vadd.f32 %v456_v16, %v413_v10 }
 0x19c   :  { %v264_v22 = vpop.f32.mrf.mxu1 }
 0x19d   :  { %335 = vst.msk [vmem:[%s599_s6 + $0x8] sm:$0xf] %vm332_vm4, %v368_v18  ;;  %v366_v23 = vpack.c.bf16 %v292_v19, %v292_v19  ;;  %v295_v24 = vmax.f32 %v273_v20, 0.0  ;;  %v265_v25 = vadd.f32 %v409_v15, %v264_v22 }
 0x19e   :  { %v459_v27 = vpop.f32.mrf.mxu1 }
 0x19f   :  { %333 = vst.msk [vmem:[%s599_s6] sm:$0xf] %vm332_vm4, %v366_v23  ;;  %v369_v28 = vpack.c.bf16 %v295_v24, %v295_v24  ;;  %v293_v29 = vmax.f32 %v265_v25, 0.0  ;;  %v286_v30 = vadd.f32 %v459_v27, %v420_v21 }
 0x1a0   :  { %v277_v32 = vpop.f32.mrf.mxu1 }
 0x1a1   :  { %336 = vst.msk [vmem:[%s599_s6 + $0xc] sm:$0xf] %vm332_vm4, %v369_v28  ;;  %v367_v33 = vpack.c.bf16 %v293_v29, %v293_v29  ;;  %v298_v34 = vmax.f32 %v286_v30, 0.0  ;;  %v278_v35 = vadd.f32 %v416_v26, %v277_v32 }
 0x1a2   :  { %v460_v37 = vpop.f32.mrf.mxu1 }
 0x1a3   :  { %334 = vst.msk [vmem:[%s599_s6 + $0x4] sm:$0xf] %vm332_vm4, %v367_v33  ;;  %v372_v38 = vpack.c.bf16 %v298_v34, %v298_v34  ;;  %v296_v39 = vmax.f32 %v278_v35, 0.0  ;;  %v289_v40 = vadd.f32 %v460_v37, %v421_v31 }
 0x1a4   :  { %v280_v41 = vpop.f32.mrf.mxu1 }
 0x1a5   :  { %339 = vst.msk [vmem:[%s599_s6 + $0x18] sm:$0xf] %vm332_vm4, %v372_v38  ;;  %v370_v42 = vpack.c.bf16 %v296_v39, %v296_v39  ;;  %v299_v43 = vmax.f32 %v289_v40, 0.0  ;;  %v281_v44 = vadd.f32 %v417_v36, %v280_v41 }
 0x1a7   :  { %337 = vst.msk [vmem:[%s599_s6 + $0x10] sm:$0xf] %vm332_vm4, %v370_v42  ;;  %v373_v45 = vpack.c.bf16 %v299_v43, %v299_v43  ;;  %v297_v46 = vmax.f32 %v281_v44, 0.0 }
 0x1a9   :  { %340 = vst.msk [vmem:[%s599_s6 + $0x1c] sm:$0xf] %vm332_vm4, %v373_v45  ;;  %v371_v47 = vpack.c.bf16 %v297_v46, %v297_v46 }
 0x1ab   :  { %338 = vst.msk [vmem:[%s599_s6 + $0x14] sm:$0xf] %vm332_vm4, %v371_v47 }

// kernel: unet3d_forward.39
= control target key start
LH: loop header
LB: loop body
LE: loop exit
PB: predicated region body
PF: predicated region fallthrough
CT: control target
= control target key end

     0   :  { %vm56_vm0 = vcmask 261120   ;;  %vm174_vm1 = vcmask 60416   ;;  %s306_s1 = inlined_call_operand.vmem [shape: bf16[32,8], index: 1, kind: input, shape index: {}]   ;;  %s307_s0 = inlined_call_operand.vmem [shape: bf16[64,32], index: 0, kind: input, shape index: {}]   ;;  %s308_s2 = inlined_call_operand.vmem [shape: bf16[64,8], index: 2, kind: output, shape index: {}]  }
   0x1   :  { %v235_v0 = vld [vmem:[%s306_s1 + $0x8] sm:$0xff]   ;;  %v236_v1 = vld [vmem:[%s306_s1] sm:$0xff]   ;;  %v238_v3 = vld [vmem:[%s307_s0 + $0x10] sm:$0xff]  }
   0x2   :  { %219 = vmatprep.subr.bf16.mxu0 %v235_v0  ;;  %231 = vmatprep.subr.bf16.mxu1 %v235_v0  ;;  %v237_v2 = vld [vmem:[%s307_s0] sm:$0xff]   ;;  %v239_v4 = vld [vmem:[%s307_s0 + $0x8] sm:$0xff]   ;;  %v240_v5 = vld [vmem:[%s307_s0 + $0x18] sm:$0xff]  }
   0x3   :  { %220 = vmatpush3.bf16.msra.mxu0 %v235_v0  ;;  %233 = vmatpush3.bf16.msra.mxu1 %v235_v0 }
   0x4   :  { %221 = vmatprep.subr.bf16.mxu0 %v236_v1  ;;  %232 = vmatprep.subr.bf16.mxu1 %v236_v1 }
   0x5   :  { %223 = vmatprep.mubr.msk.bf16.mxu0 %vm56_vm0, %v237_v2  ;;  %227 = vmatprep.mubr.msk.bf16.mxu1 %vm56_vm0, %v238_v3 }
   0x7   :  { %222 = vmatpush3.bf16.msra.mxu0 %v236_v1  ;;  %234 = vmatpush3.bf16.msra.mxu1 %v236_v1 }
   0xa   :  { %224 = vmatmul.mubr.msk.bf16.vlgmr.msra.gmra.mxu0 %vm56_vm0, %v239_v4  ;;  %228 = vmatmul.mubr.msk.bf16.vlgmr.msra.gmra.mxu1 %vm56_vm0, %v240_v5 }
  0xca   :  { %v225_v6 = vpop.f32.mrf.mxu0  ;;  %v229_v7 = vpop.f32.mrf.mxu1 }
  0xcb   :  { %v136_v8 = vmax.f32 %v225_v6, 0.0  ;;  %v140_v9 = vmax.f32 %v229_v7, 0.0 }
  0xcc   :  { %v103_v10 = vpop.f32.mrf.mxu0  ;;  %v119_v11 = vpop.f32.mrf.mxu1 }
  0xcd   :  { %v207_v12 = vpack.c.bf16 %v136_v8, %v136_v8  ;;  %v211_v13 = vpack.c.bf16 %v140_v9, %v140_v9  ;;  %v134_v14 = vmax.f32 %v103_v10, 0.0  ;;  %v138_v15 = vmax.f32 %v119_v11, 0.0 }
  0xce   :  { %v226_v16 = vpop.f32.mrf.mxu0  ;;  %v230_v17 = vpop.f32.mrf.mxu1 }
  0xcf   :  { %177 = vst.msk [vmem:[%s308_s2 + $0x8] sm:$0xf] %vm174_vm1, %v207_v12  ;;  %181 = vst.msk [vmem:[%s308_s2 + $0x18] sm:$0xf] %vm174_vm1, %v211_v13  ;;  %v205_v18 = vpack.c.bf16 %v134_v14, %v134_v14  ;;  %v209_v19 = vpack.c.bf16 %v138_v15, %v138_v15  ;;  %v137_v20 = vmax.f32 %v226_v16, 0.0  ;;  %v141_v21 = vmax.f32 %v230_v17, 0.0 }
  0xd0   :  { %v106_v22 = vpop.f32.mrf.mxu0  ;;  %v122_v23 = vpop.f32.mrf.mxu1 }
  0xd1   :  { %175 = vst.msk [vmem:[%s308_s2] sm:$0xf] %vm174_vm1, %v205_v18  ;;  %179 = vst.msk [vmem:[%s308_s2 + $0x10] sm:$0xf] %vm174_vm1, %v209_v19  ;;  %v208_v24 = vpack.c.bf16 %v137_v20, %v137_v20  ;;  %v212_v25 = vpack.c.bf16 %v141_v21, %v141_v21  ;;  %v135_v26 = vmax.f32 %v106_v22, 0.0  ;;  %v139_v27 = vmax.f32 %v122_v23, 0.0 }
  0xd3   :  { %178 = vst.msk [vmem:[%s308_s2 + $0xc] sm:$0xf] %vm174_vm1, %v208_v24  ;;  %182 = vst.msk [vmem:[%s308_s2 + $0x1c] sm:$0xf] %vm174_vm1, %v212_v25  ;;  %v206_v28 = vpack.c.bf16 %v135_v26, %v135_v26  ;;  %v210_v29 = vpack.c.bf16 %v139_v27, %v139_v27 }
  0xd5   :  { %176 = vst.msk [vmem:[%s308_s2 + $0x4] sm:$0xf] %vm174_vm1, %v206_v28  ;;  %180 = vst.msk [vmem:[%s308_s2 + $0x14] sm:$0xf] %vm174_vm1, %v210_v29 }

// kernel: unet3d_forward.40
= control target key start
LH: loop header
LB: loop body
LE: loop exit
PB: predicated region body
PF: predicated region fallthrough
CT: control target
= control target key end

     0   :  { %vm67_vm0 = vcmask 1043456   ;;  %vm54_vm1 = vcmask 195584   ;;  %vm168_vm2 = vcmask 60416   ;;  %s411_s1 = inlined_call_operand.vmem [shape: bf16[24,8], index: 1, kind: input, shape index: {}]   ;;  %s412_s0 = inlined_call_operand.vmem [shape: bf16[64,24], index: 0, kind: input, shape index: {}]   ;;  %s413_s2 = inlined_call_operand.vmem [shape: bf16[64,8], index: 2, kind: output, shape index: {0}]   ;;  %s414_s3 = inlined_call_operand.vmem [shape: bf16[64,8], index: 3, kind: output, shape index: {1}]  }
   0x1   :  { %v299_v0 = vld [vmem:[%s411_s1 + $0x8] ss:$0 sps:$4 sm:$0xff]   ;;  %v300_v1 = vld [vmem:[%s411_s1] sm:$0xff]   ;;  %v302_v4 = vld [vmem:[%s412_s0 + $0x10] sm:$0xff]  }
   0x2   :  { %297 = vmatprep.subr.msk.bf16.mxu0 %vm67_vm0, %v299_v0  ;;  %298 = vmatprep.subr.msk.bf16.mxu1 %vm67_vm0, %v299_v0  ;;  %v69_v2 = vsel %vm67_vm0, %v299_v0, 0  ;;  %v301_v3 = vld [vmem:[%s412_s0] sm:$0xff]   ;;  %v303_v5 = vld [vmem:[%s412_s0 + $0x8] sm:$0xff]   ;;  %v304_v6 = vld [vmem:[%s412_s0 + $0x18] sm:$0xff]  }
   0x3   :  { %282 = vmatpush3.bf16.msra.mxu0 %v69_v2  ;;  %295 = vmatpush3.bf16.msra.mxu1 %v69_v2 }
   0x4   :  { %283 = vmatprep.subr.bf16.mxu0 %v300_v1  ;;  %294 = vmatprep.subr.bf16.mxu1 %v300_v1 }
   0x5   :  { %285 = vmatprep.mubr.msk.bf16.mxu0 %vm54_vm1, %v301_v3  ;;  %289 = vmatprep.mubr.msk.bf16.mxu1 %vm54_vm1, %v302_v4 }
   0x7   :  { %284 = vmatpush3.bf16.msra.mxu0 %v300_v1  ;;  %296 = vmatpush3.bf16.msra.mxu1 %v300_v1 }
   0xa   :  { %286 = vmatmul.mubr.msk.bf16.vlgmr.msra.gmra.mxu0 %vm54_vm1, %v303_v5  ;;  %290 = vmatmul.mubr.msk.bf16.vlgmr.msra.gmra.mxu1 %vm54_vm1, %v304_v6 }
  0xca   :  { %v287_v7 = vpop.f32.mrf.mxu0  ;;  %v291_v8 = vpop.f32.mrf.mxu1 }
  0xcb   :  { %v261_v9 = vpack.c.bf16 %v287_v7, %v287_v7  ;;  %v179_v10 = vmax.f32 %v287_v7, 0.0  ;;  %v265_v11 = vpack.c.bf16 %v291_v8, %v291_v8  ;;  %v183_v12 = vmax.f32 %v291_v8, 0.0 }
  0xcc   :  { %v105_v13 = vpop.f32.mrf.mxu0  ;;  %v121_v14 = vpop.f32.mrf.mxu1 }
  0xcd   :  { %171 = vst.msk [vmem:[%s413_s2 + $0x8] sm:$0xf] %vm168_vm2, %v261_v9  ;;  %v269_v15 = vpack.c.bf16 %v179_v10, %v179_v10  ;;  %175 = vst.msk [vmem:[%s413_s2 + $0x18] sm:$0xf] %vm168_vm2, %v265_v11  ;;  %v273_v16 = vpack.c.bf16 %v183_v12, %v183_v12  ;;  %v259_v17 = vpack.c.bf16 %v105_v13, %v105_v13  ;;  %v177_v18 = vmax.f32 %v105_v13, 0.0 }
  0xce   :  { %v263_v19 = vpack.c.bf16 %v121_v14, %v121_v14  ;;  %v181_v20 = vmax.f32 %v121_v14, 0.0  ;;  %v288_v21 = vpop.f32.mrf.mxu0  ;;  %v292_v22 = vpop.f32.mrf.mxu1 }
  0xcf   :  { %219 = vst.msk [vmem:[%s414_s3 + $0x8] sm:$0xf] %vm168_vm2, %v269_v15  ;;  %223 = vst.msk [vmem:[%s414_s3 + $0x18] sm:$0xf] %vm168_vm2, %v273_v16  ;;  %v267_v23 = vpack.c.bf16 %v177_v18, %v177_v18  ;;  %v262_v24 = vpack.c.bf16 %v288_v21, %v288_v21  ;;  %v180_v25 = vmax.f32 %v288_v21, 0.0  ;;  %v266_v26 = vpack.c.bf16 %v292_v22, %v292_v22 }
  0xd0   :  { %169 = vst.msk [vmem:[%s413_s2] sm:$0xf] %vm168_vm2, %v259_v17  ;;  %173 = vst.msk [vmem:[%s413_s2 + $0x10] sm:$0xf] %vm168_vm2, %v263_v19  ;;  %v271_v27 = vpack.c.bf16 %v181_v20, %v181_v20  ;;  %v184_v28 = vmax.f32 %v292_v22, 0.0  ;;  %v108_v29 = vpop.f32.mrf.mxu0  ;;  %v124_v30 = vpop.f32.mrf.mxu1 }
  0xd1   :  { %217 = vst.msk [vmem:[%s414_s3] sm:$0xf] %vm168_vm2, %v267_v23  ;;  %172 = vst.msk [vmem:[%s413_s2 + $0xc] sm:$0xf] %vm168_vm2, %v262_v24  ;;  %v270_v31 = vpack.c.bf16 %v180_v25, %v180_v25  ;;  %v260_v32 = vpack.c.bf16 %v108_v29, %v108_v29  ;;  %v178_v33 = vmax.f32 %v108_v29, 0.0  ;;  %v264_v34 = vpack.c.bf16 %v124_v30, %v124_v30 }
  0xd2   :  { %176 = vst.msk [vmem:[%s413_s2 + $0x1c] sm:$0xf] %vm168_vm2, %v266_v26  ;;  %221 = vst.msk [vmem:[%s414_s3 + $0x10] sm:$0xf] %vm168_vm2, %v271_v27  ;;  %v274_v35 = vpack.c.bf16 %v184_v28, %v184_v28  ;;  %v182_v36 = vmax.f32 %v124_v30, 0.0 }
  0xd3   :  { %220 = vst.msk [vmem:[%s414_s3 + $0xc] sm:$0xf] %vm168_vm2, %v270_v31  ;;  %170 = vst.msk [vmem:[%s413_s2 + $0x4] sm:$0xf] %vm168_vm2, %v260_v32  ;;  %v268_v37 = vpack.c.bf16 %v178_v33, %v178_v33 }
  0xd4   :  { %174 = vst.msk [vmem:[%s413_s2 + $0x14] sm:$0xf] %vm168_vm2, %v264_v34  ;;  %224 = vst.msk [vmem:[%s414_s3 + $0x1c] sm:$0xf] %vm168_vm2, %v274_v35  ;;  %v272_v38 = vpack.c.bf16 %v182_v36, %v182_v36 }
  0xd5   :  { %218 = vst.msk [vmem:[%s414_s3 + $0x4] sm:$0xf] %vm168_vm2, %v268_v37 }
  0xd6   :  { %222 = vst.msk [vmem:[%s414_s3 + $0x14] sm:$0xf] %vm168_vm2, %v272_v38 }

// kernel: unet3d_forward.41
= control target key start
LH: loop header
LB: loop body
LE: loop exit
PB: predicated region body
PF: predicated region fallthrough
CT: control target
= control target key end

     0   :  { %vm86_vm0 = vcmask 1043456   ;;  %vm73_vm1 = vcmask 195584   ;;  %vm187_vm2 = vcmask 60416   ;;  %s466_s1 = inlined_call_operand.vmem [shape: bf16[24,8], index: 1, kind: input, shape index: {}]   ;;  %s467_s0 = inlined_call_operand.vmem [shape: bf16[64,24], index: 0, kind: input, shape index: {}]   ;;  %s468_s2 = inlined_call_operand.vmem [shape: bf16[64,8], index: 2, kind: input, shape index: {}]   ;;  %s469_s3 = inlined_call_operand.vmem [shape: bf16[64,8], index: 3, kind: output, shape index: {0}]   ;;  %s470_s4 = inlined_call_operand.vmem [shape: bf16[64,8], index: 4, kind: output, shape index: {1}]  }
   0x1   :  { %v337_v0 = vld [vmem:[%s466_s1 + $0x8] ss:$0 sps:$4 sm:$0xff]   ;;  %v338_v1 = vld [vmem:[%s466_s1] sm:$0xff]   ;;  %v340_v4 = vld [vmem:[%s467_s0 + $0x10] sm:$0xff]  }
   0x2   :  { %335 = vmatprep.subr.msk.bf16.mxu0 %vm86_vm0, %v337_v0  ;;  %336 = vmatprep.subr.msk.bf16.mxu1 %vm86_vm0, %v337_v0  ;;  %v88_v2 = vsel %vm86_vm0, %v337_v0, 0  ;;  %v339_v3 = vld [vmem:[%s467_s0] sm:$0xff]   ;;  %v341_v5 = vld [vmem:[%s467_s0 + $0x8] sm:$0xff]   ;;  %v342_v6 = vld [vmem:[%s467_s0 + $0x18] sm:$0xff]  }
   0x3   :  { %320 = vmatpush3.bf16.msra.mxu0 %v88_v2  ;;  %333 = vmatpush3.bf16.msra.mxu1 %v88_v2  ;;  %v310_v7 = vld [vmem:[%s468_s2 + $0x8] sm:$0xff]   ;;  %v312_v8 = vld [vmem:[%s468_s2 + $0x18] sm:$0xff]   ;;  %v295_v11 = vld [vmem:[%s468_s2] sm:$0xff]  }
   0x4   :  { %321 = vmatprep.subr.bf16.mxu0 %v338_v1  ;;  %332 = vmatprep.subr.bf16.mxu1 %v338_v1  ;;  %v300_v9 = vunpack.c.l.bf16 %v310_v7  ;;  %v308_v10 = vunpack.c.l.bf16 %v312_v8  ;;  %v311_v12 = vld [vmem:[%s468_s2 + $0x10] sm:$0xff]   ;;  %v296_v15 = vunpack.c.l.bf16 %v295_v11  ;;  %v301_v19 = vunpack.c.h.bf16 %v310_v7 }
   0x5   :  { %323 = vmatprep.mubr.msk.bf16.mxu0 %vm73_vm1, %v339_v3  ;;  %327 = vmatprep.mubr.msk.bf16.mxu1 %vm73_vm1, %v340_v4  ;;  %v304_v16 = vunpack.c.l.bf16 %v311_v12  ;;  %v309_v20 = vunpack.c.h.bf16 %v312_v8  ;;  %v297_v31 = vunpack.c.h.bf16 %v295_v11  ;;  %v305_v32 = vunpack.c.h.bf16 %v311_v12 }
   0x7   :  { %322 = vmatpush3.bf16.msra.mxu0 %v338_v1  ;;  %334 = vmatpush3.bf16.msra.mxu1 %v338_v1 }
   0xa   :  { %324 = vmatmul.mubr.msk.bf16.vlgmr.msra.gmra.mxu0 %vm73_vm1, %v341_v5  ;;  %328 = vmatmul.mubr.msk.bf16.vlgmr.msra.gmra.mxu1 %vm73_vm1, %v342_v6 }
  0xca   :  { %v325_v13 = vpop.f32.mrf.mxu0  ;;  %v329_v14 = vpop.f32.mrf.mxu1 }
  0xcb   :  { %v133_v17 = vadd.f32 %v325_v13, %v300_v9  ;;  %v149_v18 = vadd.f32 %v329_v14, %v308_v10 }
  0xcc   :  { %v124_v21 = vpop.f32.mrf.mxu0  ;;  %v140_v22 = vpop.f32.mrf.mxu1 }
  0xcd   :  { %v280_v23 = vpack.c.bf16 %v133_v17, %v133_v17  ;;  %v198_v24 = vmax.f32 %v133_v17, 0.0  ;;  %v284_v25 = vpack.c.bf16 %v149_v18, %v149_v18  ;;  %v202_v26 = vmax.f32 %v149_v18, 0.0 }
  0xce   :  { %v125_v27 = vadd.f32 %v296_v15, %v124_v21  ;;  %v141_v28 = vadd.f32 %v304_v16, %v140_v22  ;;  %v326_v29 = vpop.f32.mrf.mxu0  ;;  %v330_v30 = vpop.f32.mrf.mxu1 }
  0xcf   :  { %190 = vst.msk [vmem:[%s469_s3 + $0x8] sm:$0xf] %vm187_vm2, %v280_v23  ;;  %v288_v33 = vpack.c.bf16 %v198_v24, %v198_v24  ;;  %194 = vst.msk [vmem:[%s469_s3 + $0x18] sm:$0xf] %vm187_vm2, %v284_v25  ;;  %v292_v34 = vpack.c.bf16 %v202_v26, %v202_v26  ;;  %v136_v35 = vadd.f32 %v326_v29, %v301_v19 }
  0xd0   :  { %v152_v36 = vadd.f32 %v330_v30, %v309_v20  ;;  %v278_v37 = vpack.c.bf16 %v125_v27, %v125_v27  ;;  %v196_v38 = vmax.f32 %v125_v27, 0.0  ;;  %v282_v39 = vpack.c.bf16 %v141_v28, %v141_v28  ;;  %v127_v41 = vpop.f32.mrf.mxu0  ;;  %v143_v42 = vpop.f32.mrf.mxu1 }
  0xd1   :  { %v200_v40 = vmax.f32 %v141_v28, 0.0  ;;  %238 = vst.msk [vmem:[%s470_s4 + $0x8] sm:$0xf] %vm187_vm2, %v288_v33  ;;  %242 = vst.msk [vmem:[%s470_s4 + $0x18] sm:$0xf] %vm187_vm2, %v292_v34  ;;  %v281_v43 = vpack.c.bf16 %v136_v35, %v136_v35  ;;  %v199_v44 = vmax.f32 %v136_v35, 0.0  ;;  %v128_v49 = vadd.f32 %v297_v31, %v127_v41 }
  0xd2   :  { %v285_v45 = vpack.c.bf16 %v152_v36, %v152_v36  ;;  %v203_v46 = vmax.f32 %v152_v36, 0.0  ;;  %188 = vst.msk [vmem:[%s469_s3] sm:$0xf] %vm187_vm2, %v278_v37  ;;  %v286_v47 = vpack.c.bf16 %v196_v38, %v196_v38  ;;  %192 = vst.msk [vmem:[%s469_s3 + $0x10] sm:$0xf] %vm187_vm2, %v282_v39  ;;  %v144_v50 = vadd.f32 %v305_v32, %v143_v42 }
  0xd3   :  { %v290_v48 = vpack.c.bf16 %v200_v40, %v200_v40  ;;  %191 = vst.msk [vmem:[%s469_s3 + $0xc] sm:$0xf] %vm187_vm2, %v281_v43  ;;  %v289_v51 = vpack.c.bf16 %v199_v44, %v199_v44  ;;  %v279_v53 = vpack.c.bf16 %v128_v49, %v128_v49  ;;  %v197_v54 = vmax.f32 %v128_v49, 0.0 }
  0xd4   :  { %195 = vst.msk [vmem:[%s469_s3 + $0x1c] sm:$0xf] %vm187_vm2, %v285_v45  ;;  %v293_v52 = vpack.c.bf16 %v203_v46, %v203_v46  ;;  %236 = vst.msk [vmem:[%s470_s4] sm:$0xf] %vm187_vm2, %v286_v47  ;;  %v283_v55 = vpack.c.bf16 %v144_v50, %v144_v50  ;;  %v201_v56 = vmax.f32 %v144_v50, 0.0 }
  0xd5   :  { %240 = vst.msk [vmem:[%s470_s4 + $0x10] sm:$0xf] %vm187_vm2, %v290_v48  ;;  %239 = vst.msk [vmem:[%s470_s4 + $0xc] sm:$0xf] %vm187_vm2, %v289_v51  ;;  %v287_v57 = vpack.c.bf16 %v197_v54, %v197_v54 }
  0xd6   :  { %243 = vst.msk [vmem:[%s470_s4 + $0x1c] sm:$0xf] %vm187_vm2, %v293_v52  ;;  %189 = vst.msk [vmem:[%s469_s3 + $0x4] sm:$0xf] %vm187_vm2, %v279_v53  ;;  %v291_v58 = vpack.c.bf16 %v201_v56, %v201_v56 }
  0xd7   :  { %193 = vst.msk [vmem:[%s469_s3 + $0x14] sm:$0xf] %vm187_vm2, %v283_v55  ;;  %237 = vst.msk [vmem:[%s470_s4 + $0x4] sm:$0xf] %vm187_vm2, %v287_v57 }
  0xd8   :  { %241 = vst.msk [vmem:[%s470_s4 + $0x14] sm:$0xf] %vm187_vm2, %v291_v58 }

// kernel: unet3d_forward.42
= control target key start
LH: loop header
LB: loop body
LE: loop exit
PB: predicated region body
PF: predicated region fallthrough
CT: control target
= control target key end

     0   :  { %vm93_vm0 = vcmask 1043456   ;;  %vm80_vm1 = vcmask 195584   ;;  %vm215_vm2 = vcmask 64512   ;;  %vm336_vm3 = vcmask 257024   ;;  %s609_s1 = inlined_call_operand.vmem [shape: bf16[24,8], index: 1, kind: input, shape index: {}]   ;;  %s610_s0 = inlined_call_operand.vmem [shape: bf16[64,24], index: 0, kind: input, shape index: {}]   ;;  %s611_s4 = inlined_call_operand.vmem [shape: bf16[8,32], index: 4, kind: input, shape index: {}]   ;;  %s612_s2 = inlined_call_operand.vmem [shape: bf16[64,8], index: 2, kind: input, shape index: {}]   ;;  %s613_s3 = inlined_call_operand.vmem [shape: bf16[64,8], index: 3, kind: input, shape index: {}]   ;;  %s614_s5 = inlined_call_operand.vmem [shape: bf16[64,32], index: 5, kind: input, shape index: {}]   ;;  %s615_s6 = inlined_call_operand.vmem [shape: bf16[64,32], index: 6, kind: output, shape index: {}]  }
   0x1   :  { %v471_v0 = vld [vmem:[%s609_s1 + $0x8] ss:$0 sps:$4 sm:$0xff]   ;;  %v472_v1 = vld [vmem:[%s609_s1] sm:$0xff]   ;;  %v475_v5 = vld [vmem:[%s610_s0 + $0x10] sm:$0xff]  }
   0x2   :  { %469 = vmatprep.subr.msk.bf16.mxu0 %vm93_vm0, %v471_v0  ;;  %v95_v2 = vsel %vm93_vm0, %v471_v0, 0  ;;  %v473_v3 = vld [vmem:[%s610_s0] sm:$0xff]   ;;  %v474_v4 = vld [vmem:[%s610_s0 + $0x8] sm:$0xff]   ;;  %v476_v6 = vld [vmem:[%s610_s0 + $0x18] sm:$0xff]  }
   0x3   :  { %448 = vmatpush3.bf16.msra.mxu0 %v95_v2  ;;  %451 = vmatprep.mubr.msk.bf16.mxu0 %vm80_vm1, %v473_v3  ;;  %v198_v7 = vld [vmem:[%s611_s4] sm:$0xf]  ;;  %v427_v10 = vld [vmem:[%s612_s2 + $0x8] sm:$0xff]   ;;  %v428_v25 = vld [vmem:[%s612_s2 + $0x10] sm:$0xff]  }
   0x4   :  { %449 = vmatprep.subr.bf16.mxu0 %v472_v1  ;;  %470 = vmatprep.subr.msk.bf16.mxu1 %vm93_vm0, %v198_v7  ;;  %v229_v8 = vsel %vm93_vm0, %v198_v7, 0  ;;  %v380_v9 = vld [vmem:[%s612_s2] sm:$0xff]   ;;  %v385_v12 = vunpack.c.l.bf16 %v427_v10  ;;  %v430_v15 = vld [vmem:[%s613_s3 + $0x8] sm:$0xff]   ;;  %v386_v16 = vunpack.c.h.bf16 %v427_v10  ;;  %v429_v28 = vld [vmem:[%s612_s2 + $0x18] sm:$0xff]   ;;  %v389_v33 = vunpack.c.l.bf16 %v428_v25 }
   0x5   :  { %460 = vmatpush3.bf16.msra.mxu1 %v229_v8  ;;  %v381_v11 = vunpack.c.l.bf16 %v380_v9  ;;  %v396_v14 = vld [vmem:[%s613_s3] sm:$0xff]   ;;  %v402_v20 = vunpack.c.h.bf16 %v430_v15  ;;  %v382_v21 = vunpack.c.h.bf16 %v380_v9  ;;  %v401_v23 = vunpack.c.l.bf16 %v430_v15  ;;  %v431_v34 = vld [vmem:[%s613_s3 + $0x10] sm:$0xff]   ;;  %v432_v39 = vld [vmem:[%s613_s3 + $0x18] sm:$0xff]  }
   0x6   :  { %v397_v19 = vunpack.c.l.bf16 %v396_v14  ;;  %v398_v27 = vunpack.c.h.bf16 %v396_v14  ;;  %v393_v36 = vunpack.c.l.bf16 %v429_v28  ;;  %v394_v40 = vunpack.c.h.bf16 %v429_v28 }
   0x7   :  { %450 = vmatpush3.bf16.msra.mxu0 %v472_v1  ;;  %v405_v43 = vunpack.c.l.bf16 %v431_v34  ;;  %v410_v44 = vunpack.c.h.bf16 %v432_v39  ;;  %v390_v48 = vunpack.c.h.bf16 %v428_v25  ;;  %v409_v51 = vunpack.c.l.bf16 %v432_v39 }
   0x8   :  { %v406_v54 = vunpack.c.h.bf16 %v431_v34 }
   0xa   :  { %452 = vmatmul.mubr.msk.bf16.vlgmr.msra.gmra.mxu0 %vm80_vm1, %v474_v4 }
   0xb   :  { %455 = vmatprep.mubr.msk.bf16.mxu0 %vm80_vm1, %v475_v5  ;;  %v433_v5 = vld [vmem:[%s614_s5 + $0x8] sm:$0xff]  }
   0xc   :  { %v417_v7 = vunpack.c.l.bf16 %v433_v5 }
  0x12   :  { %456 = vmatmul.mubr.msk.bf16.gmra.mxu0 %vm80_vm1, %v476_v6  ;;  %v412_v6 = vld [vmem:[%s614_s5] sm:$0xff]  }
  0x13   :  { %v413_v8 = vunpack.c.l.bf16 %v412_v6 }
  0xca   :  { %v453_v13 = vpop.f32.mrf.mxu0 }
  0xcb   :  { %v140_v22 = vadd.f32 %v453_v13, %v385_v12  ;;  %v435_v13 = vld [vmem:[%s614_s5 + $0x18] sm:$0xff]  }
  0xcc   :  { %v131_v17 = vpop.f32.mrf.mxu0 }
  0xcd   :  { %v132_v18 = vadd.f32 %v381_v11, %v131_v17  ;;  %v180_v35 = vadd.f32 %v401_v23, %v140_v22  ;;  %v418_v11 = vunpack.c.h.bf16 %v433_v5  ;;  %v425_v22 = vunpack.c.l.bf16 %v435_v13 }
  0xce   :  { %v454_v24 = vpop.f32.mrf.mxu0 }
  0xcf   :  { %v143_v26 = vadd.f32 %v454_v24, %v386_v16  ;;  %v178_v30 = vadd.f32 %v397_v19, %v132_v18  ;;  %v188_v49 = vmax.f32 %v180_v35, 0.0  ;;  %v414_v16 = vunpack.c.h.bf16 %v412_v6  ;;  %v434_v18 = vld [vmem:[%s614_s5 + $0x10] sm:$0xff]  }
  0xd0   :  { %v134_v29 = vpop.f32.mrf.mxu0 }
  0xd1   :  { %v181_v31 = vadd.f32 %v402_v20, %v143_v26  ;;  %v135_v32 = vadd.f32 %v382_v21, %v134_v29  ;;  %v186_v45 = vmax.f32 %v178_v30, 0.0 }
  0xd2   :  { %v457_v37 = vpop.f32.mrf.mxu0 }
  0xd3   :  { %v179_v38 = vadd.f32 %v398_v27, %v135_v32  ;;  %v189_v41 = vmax.f32 %v181_v31, 0.0  ;;  %v156_v50 = vadd.f32 %v457_v37, %v393_v36  ;;  %v421_v27 = vunpack.c.l.bf16 %v434_v18 }
  0xd4   :  { %v147_v42 = vpop.f32.mrf.mxu0  ;;  %v426_v32 = vunpack.c.h.bf16 %v435_v13  ;;  %v422_v37 = vunpack.c.h.bf16 %v434_v18 }
  0xd5   :  { %v187_v46 = vmax.f32 %v179_v38, 0.0  ;;  %v148_v47 = vadd.f32 %v389_v33, %v147_v42  ;;  %v195_v56 = vpack.c.bf16 %v189_v41, %v188_v49  ;;  %v184_v61 = vadd.f32 %v409_v51, %v156_v50 }
  0xd6   :  { %v458_v52 = vpop.f32.mrf.mxu0 }
  0xd7   :  { %v159_v53 = vadd.f32 %v458_v52, %v394_v40  ;;  %v194_v55 = vpack.c.bf16 %v187_v46, %v186_v45  ;;  %v182_v58 = vadd.f32 %v405_v43, %v148_v47  ;;  %v192_v2 = vmax.f32 %v184_v61, 0.0 }
  0xd8   :  { %v150_v57 = vpop.f32.mrf.mxu0 }
  0xd9   :  { %v185_v59 = vadd.f32 %v410_v44, %v159_v53  ;;  %v151_v60 = vadd.f32 %v390_v48, %v150_v57  ;;  %461 = vmatprep.mubr.msk.bf16.mxu1 %vm215_vm2, %v194_v55  ;;  %v190_v0 = vmax.f32 %v182_v58, 0.0 }
  0xda   :  { %462 = vmatmul.mubr.msk.bf16.vlgmr.msra.gmra.mxu1 %vm215_vm2, %v195_v56 }
  0xdb   :  { %v183_v62 = vadd.f32 %v406_v54, %v151_v60  ;;  %v193_v63 = vmax.f32 %v185_v59, 0.0 }
  0xdd   :  { %v191_v1 = vmax.f32 %v183_v62, 0.0  ;;  %v197_v4 = vpack.c.bf16 %v193_v63, %v192_v2 }
  0xdf   :  { %v196_v3 = vpack.c.bf16 %v191_v1, %v190_v0 }
  0xe1   :  { %465 = vmatprep.mubr.msk.bf16.mxu1 %vm215_vm2, %v196_v3 }
  0xe2   :  { %466 = vmatmul.mubr.msk.bf16.gmra.mxu1 %vm215_vm2, %v197_v4 }
 0x19a   :  { %v463_v9 = vpop.f32.mrf.mxu1 }
 0x19b   :  { %v274_v10 = vadd.f32 %v463_v9, %v417_v7 }
 0x19c   :  { %v265_v12 = vpop.f32.mrf.mxu1 }
 0x19d   :  { %v298_v14 = vmax.f32 %v274_v10, 0.0  ;;  %v266_v15 = vadd.f32 %v413_v8, %v265_v12 }
 0x19e   :  { %v464_v17 = vpop.f32.mrf.mxu1 }
 0x19f   :  { %v373_v19 = vpack.c.bf16 %v298_v14, %v298_v14  ;;  %v296_v20 = vmax.f32 %v266_v15, 0.0  ;;  %v277_v21 = vadd.f32 %v464_v17, %v418_v11 }
 0x1a0   :  { %v268_v23 = vpop.f32.mrf.mxu1 }
 0x1a1   :  { %339 = vst.msk [vmem:[%s615_s6 + $0x8] sm:$0xf] %vm336_vm3, %v373_v19  ;;  %v371_v24 = vpack.c.bf16 %v296_v20, %v296_v20  ;;  %v299_v25 = vmax.f32 %v277_v21, 0.0  ;;  %v269_v26 = vadd.f32 %v414_v16, %v268_v23 }
 0x1a2   :  { %v467_v28 = vpop.f32.mrf.mxu1 }
 0x1a3   :  { %337 = vst.msk [vmem:[%s615_s6] sm:$0xf] %vm336_vm3, %v371_v24  ;;  %v374_v29 = vpack.c.bf16 %v299_v25, %v299_v25  ;;  %v297_v30 = vmax.f32 %v269_v26, 0.0  ;;  %v290_v31 = vadd.f32 %v467_v28, %v425_v22 }
 0x1a4   :  { %v281_v33 = vpop.f32.mrf.mxu1 }
 0x1a5   :  { %340 = vst.msk [vmem:[%s615_s6 + $0xc] sm:$0xf] %vm336_vm3, %v374_v29  ;;  %v372_v34 = vpack.c.bf16 %v297_v30, %v297_v30  ;;  %v302_v35 = vmax.f32 %v290_v31, 0.0  ;;  %v282_v36 = vadd.f32 %v421_v27, %v281_v33 }
 0x1a6   :  { %v468_v38 = vpop.f32.mrf.mxu1 }
 0x1a7   :  { %338 = vst.msk [vmem:[%s615_s6 + $0x4] sm:$0xf] %vm336_vm3, %v372_v34  ;;  %v377_v39 = vpack.c.bf16 %v302_v35, %v302_v35  ;;  %v300_v40 = vmax.f32 %v282_v36, 0.0  ;;  %v293_v41 = vadd.f32 %v468_v38, %v426_v32 }
 0x1a8   :  { %v284_v42 = vpop.f32.mrf.mxu1 }
 0x1a9   :  { %343 = vst.msk [vmem:[%s615_s6 + $0x18] sm:$0xf] %vm336_vm3, %v377_v39  ;;  %v375_v43 = vpack.c.bf16 %v300_v40, %v300_v40  ;;  %v303_v44 = vmax.f32 %v293_v41, 0.0  ;;  %v285_v45 = vadd.f32 %v422_v37, %v284_v42 }
 0x1ab   :  { %341 = vst.msk [vmem:[%s615_s6 + $0x10] sm:$0xf] %vm336_vm3, %v375_v43  ;;  %v378_v46 = vpack.c.bf16 %v303_v44, %v303_v44  ;;  %v301_v47 = vmax.f32 %v285_v45, 0.0 }
 0x1ad   :  { %344 = vst.msk [vmem:[%s615_s6 + $0x1c] sm:$0xf] %vm336_vm3, %v378_v46  ;;  %v376_v48 = vpack.c.bf16 %v301_v47, %v301_v47 }
 0x1af   :  { %342 = vst.msk [vmem:[%s615_s6 + $0x14] sm:$0xf] %vm336_vm3, %v376_v48 }

// kernel: unet3d_forward.43
= control target key start
LH: loop header
LB: loop body
LE: loop exit
PB: predicated region body
PF: predicated region fallthrough
CT: control target
= control target key end

     0   :  { %vm201_vm0 = vcmask 519168   ;;  %s346_s1 = inlined_call_operand.vmem [shape: bf16[256,64], index: 1, kind: input, shape index: {}]   ;;  %s347_s0 = inlined_call_operand.vmem [shape: bf16[16,256], index: 0, kind: input, shape index: {}]   ;;  %s348_s2 = inlined_call_operand.vmem [shape: bf16[16,64], index: 2, kind: output, shape index: {}]  }
   0x1   :  { %v252_v0 = vld [vmem:[%s346_s1 + $0x78] sm:$0xff]   ;;  %v254_v2 = vld [vmem:[%s346_s1 + $0x70] sm:$0xff]   ;;  %v256_v4 = vld [vmem:[%s346_s1 + $0x68] sm:$0xff]  }
   0x2   :  { %v253_v1 = vld [vmem:[%s346_s1 + $0x38] sm:$0xff]   ;;  %230 = vmatprep.subr.bf16.mxu0 %v252_v0  ;;  %v255_v3 = vld [vmem:[%s346_s1 + $0x30] sm:$0xff]   ;;  %v257_v5 = vld [vmem:[%s346_s1 + $0x28] sm:$0xff]  }
   0x3   :  { %231 = vmatpush3.bf16.msra.mxu0 %v253_v1  ;;  %v258_v6 = vld [vmem:[%s346_s1 + $0x60] sm:$0xff]   ;;  %v260_v8 = vld [vmem:[%s346_s1 + $0x58] sm:$0xff]   ;;  %v262_v10 = vld [vmem:[%s346_s1 + $0x50] sm:$0xff]  }
   0x4   :  { %232 = vmatprep.subr.bf16.mxu0 %v254_v2  ;;  %v259_v7 = vld [vmem:[%s346_s1 + $0x20] sm:$0xff]   ;;  %v261_v9 = vld [vmem:[%s346_s1 + $0x18] sm:$0xff]   ;;  %v263_v12 = vld [vmem:[%s346_s1 + $0x10] sm:$0xff]  }
   0x5   :  { %v270_v11 = vld [vmem:[%s347_s0 + $0x4] ss:$8 sps:$4 sm:$0xff]   ;;  %v268_v17 = vld [vmem:[%s347_s0] ss:$8 sps:$4 sm:$0xff]  }
   0x6   :  { %184 = vmatprep.mubr.bf16.mxu0 %v270_v11  ;;  %v264_v13 = vld [vmem:[%s346_s1 + $0x48] sm:$0xff]   ;;  %v266_v15 = vld [vmem:[%s346_s1 + $0x40] sm:$0xff]  }
   0x7   :  { %233 = vmatpush3.bf16.msra.mxu0 %v255_v3  ;;  %v265_v14 = vld [vmem:[%s346_s1 + $0x8] sm:$0xff]   ;;  %v267_v16 = vld [vmem:[%s346_s1] sm:$0xff]  }
   0x8   :  { %234 = vmatprep.subr.bf16.mxu0 %v256_v4 }
   0xb   :  { %235 = vmatpush3.bf16.msra.mxu0 %v257_v5 }
   0xc   :  { %236 = vmatprep.subr.bf16.mxu0 %v258_v6 }
   0xf   :  { %237 = vmatpush3.bf16.msra.mxu0 %v259_v7 }
  0x10   :  { %238 = vmatprep.subr.bf16.mxu0 %v260_v8 }
  0x13   :  { %239 = vmatpush3.bf16.msra.mxu0 %v261_v9 }
  0x14   :  { %240 = vmatprep.subr.bf16.mxu0 %v262_v10 }
  0x17   :  { %241 = vmatpush3.bf16.msra.mxu0 %v263_v12 }
  0x18   :  { %242 = vmatprep.subr.bf16.mxu0 %v264_v13 }
  0x1b   :  { %243 = vmatpush3.bf16.msra.mxu0 %v265_v14 }
  0x1c   :  { %244 = vmatprep.subr.bf16.mxu0 %v266_v15 }
  0x1f   :  { %245 = vmatpush3.bf16.msra.mxu0 %v267_v16 }
  0x22   :  { %185 = vmatmul.mubr.bf16.vlgmr.msra.gmra.mxu0 %v268_v17 }
  0xe2   :  { %v246_v18 = vpop.f32.mrf.mxu0 }
  0xe4   :  { %v247_v19 = vpop.f32.mrf.mxu0 }
  0xe5   :  { %v248_v20 = vadd.f32 %v247_v19, %v246_v18 }
  0xe6   :  { %v249_v21 = vpop.f32.mrf.mxu0 }
  0xe7   :  { %v228_v22 = vpack.c.bf16 %v248_v20, %v248_v20 }
  0xe8   :  { %v250_v23 = vpop.f32.mrf.mxu0 }
  0xe9   :  { %202 = vst.msk [vmem:[%s348_s2] sm:$0xf] %vm201_vm0, %v228_v22  ;;  %v251_v24 = vadd.f32 %v250_v23, %v249_v21 }
  0xeb   :  { %v229_v25 = vpack.c.bf16 %v251_v24, %v251_v24 }
  0xed   :  { %203 = vst.msk [vmem:[%s348_s2 + $0x4] sm:$0xf] %vm201_vm0, %v229_v25 }

// kernel: unet3d_forward.45
= control target key start
LH: loop header
LB: loop body
LE: loop exit
PB: predicated region body
PF: predicated region fallthrough
CT: control target
= control target key end

     0   :  { %vm47_vm0 = vcmask 1043456   ;;  %vm40_vm1 = vcmask 195584   ;;  %vm116_vm2 = vcmask 60416   ;;  %s256_s1 = inlined_call_operand.vmem [shape: bf16[24,8], index: 1, kind: input, shape index: {}]   ;;  %s257_s0 = inlined_call_operand.vmem [shape: bf16[32,24], index: 0, kind: input, shape index: {}]   ;;  %s258_s2 = inlined_call_operand.vmem [shape: bf16[32,8], index: 2, kind: output, shape index: {0}]   ;;  %s259_s3 = inlined_call_operand.vmem [shape: bf16[32,8], index: 3, kind: output, shape index: {1}]  }
   0x1   :  { %v188_v0 = vld [vmem:[%s256_s1 + $0x8] ss:$0 sps:$4 sm:$0xff]   ;;  %v189_v1 = vld [vmem:[%s256_s1] sm:$0xff]  }
   0x2   :  { %187 = vmatprep.subr.msk.bf16.mxu0 %vm47_vm0, %v188_v0  ;;  %v49_v2 = vsel %vm47_vm0, %v188_v0, 0  ;;  %v190_v3 = vld [vmem:[%s257_s0] sm:$0xff]   ;;  %v191_v4 = vld [vmem:[%s257_s0 + $0x8] sm:$0xff]  }
   0x3   :  { %180 = vmatpush3.bf16.msra.mxu0 %v49_v2  ;;  %183 = vmatprep.mubr.msk.bf16.mxu0 %vm40_vm1, %v190_v3 }
   0x4   :  { %181 = vmatprep.subr.bf16.mxu0 %v189_v1 }
   0x7   :  { %182 = vmatpush3.bf16.msra.mxu0 %v189_v1 }
   0xa   :  { %184 = vmatmul.mubr.msk.bf16.vlgmr.msra.gmra.mxu0 %vm40_vm1, %v191_v4 }
  0xca   :  { %v185_v5 = vpop.f32.mrf.mxu0 }
  0xcb   :  { %v169_v6 = vpack.c.bf16 %v185_v5, %v185_v5  ;;  %v123_v7 = vmax.f32 %v185_v5, 0.0 }
  0xcc   :  { %v85_v8 = vpop.f32.mrf.mxu0 }
  0xcd   :  { %119 = vst.msk [vmem:[%s258_s2 + $0x8] sm:$0xf] %vm116_vm2, %v169_v6  ;;  %v173_v9 = vpack.c.bf16 %v123_v7, %v123_v7  ;;  %v167_v10 = vpack.c.bf16 %v85_v8, %v85_v8  ;;  %v121_v11 = vmax.f32 %v85_v8, 0.0 }
  0xce   :  { %v186_v12 = vpop.f32.mrf.mxu0 }
  0xcf   :  { %143 = vst.msk [vmem:[%s259_s3 + $0x8] sm:$0xf] %vm116_vm2, %v173_v9  ;;  %117 = vst.msk [vmem:[%s258_s2] sm:$0xf] %vm116_vm2, %v167_v10  ;;  %v171_v13 = vpack.c.bf16 %v121_v11, %v121_v11  ;;  %v170_v14 = vpack.c.bf16 %v186_v12, %v186_v12  ;;  %v124_v15 = vmax.f32 %v186_v12, 0.0 }
  0xd0   :  { %v88_v16 = vpop.f32.mrf.mxu0 }
  0xd1   :  { %141 = vst.msk [vmem:[%s259_s3] sm:$0xf] %vm116_vm2, %v171_v13  ;;  %120 = vst.msk [vmem:[%s258_s2 + $0xc] sm:$0xf] %vm116_vm2, %v170_v14  ;;  %v174_v17 = vpack.c.bf16 %v124_v15, %v124_v15  ;;  %v168_v18 = vpack.c.bf16 %v88_v16, %v88_v16  ;;  %v122_v19 = vmax.f32 %v88_v16, 0.0 }
  0xd3   :  { %144 = vst.msk [vmem:[%s259_s3 + $0xc] sm:$0xf] %vm116_vm2, %v174_v17  ;;  %118 = vst.msk [vmem:[%s258_s2 + $0x4] sm:$0xf] %vm116_vm2, %v168_v18  ;;  %v172_v20 = vpack.c.bf16 %v122_v19, %v122_v19 }
  0xd5   :  { %142 = vst.msk [vmem:[%s259_s3 + $0x4] sm:$0xf] %vm116_vm2, %v172_v20 }

// kernel: unet3d_forward.46
= control target key start
LH: loop header
LB: loop body
LE: loop exit
PB: predicated region body
PF: predicated region fallthrough
CT: control target
= control target key end

     0   :  { %v106_v0 = vmov 0.0   ;;  %vm107_vm0 = vmmov 0   ;;  %vm27_vm1 = vcmask 130048   ;;  %vm80_vm2 = vcmask 60416   ;;  %s135_s1 = inlined_call_operand.vmem [shape: bf16[16,8], index: 1, kind: input, shape index: {}]   ;;  %s136_s0 = inlined_call_operand.vmem [shape: bf16[16,16], index: 0, kind: input, shape index: {}]   ;;  %s137_s2 = inlined_call_operand.vmem [shape: bf16[16,8], index: 2, kind: output, shape index: {}]  }
   0x1   :  { %96 = vmatprep.subr.bf16.mxu0 %v106_v0  ;;  %v104_v1 = vld [vmem:[%s135_s1] sm:$0xff]   ;;  %98 = vmatprep.mubr.msk.bf16.mxu0 %vm107_vm0, %v106_v0 }
   0x2   :  { %v105_v2 = vld [vmem:[%s136_s0] sm:$0xff]   ;;  %97 = vmatpush3.bf16.msra.mxu0 %v104_v1 }
   0x5   :  { %99 = vmatmul.mubr.msk.bf16.vlgmr.msra.gmra.mxu0 %vm27_vm1, %v105_v2 }
  0xc5   :  { %v65_v3 = vpop.f32.mrf.mxu0 }
  0xc6   :  { %v92_v4 = vpack.c.bf16 %v65_v3, %v65_v3 }
  0xc7   :  { %v100_v5 = vpop.f32.mrf.mxu0 }
  0xc8   :  { %81 = vst.msk [vmem:[%s137_s2] sm:$0xf] %vm80_vm2, %v92_v4 }
  0xc9   :  { %v68_v6 = vpop.f32.mrf.mxu0 }
  0xca   :  { %v93_v7 = vpack.c.bf16 %v68_v6, %v68_v6 }
  0xcb   :  { %v101_v8 = vpop.f32.mrf.mxu0 }
  0xcc   :  { %82 = vst.msk [vmem:[%s137_s2 + $0x4] sm:$0xf] %vm80_vm2, %v93_v7 }

// kernel: unet3d_forward.47
= control target key start
LH: loop header
LB: loop body
LE: loop exit
PB: predicated region body
PF: predicated region fallthrough
CT: control target
= control target key end

     0   :  { %vm44_vm0 = vcmask 1043456   ;;  %v152_v0 = vmov 0.0   ;;  %vm153_vm1 = vmmov 0   ;;  %vm40_vm2 = vcmask 195584   ;;  %s203_s1 = inlined_call_operand.vmem [shape: bf16[24,8], index: 1, kind: input, shape index: {}]   ;;  %s204_s0 = inlined_call_operand.vmem [shape: bf16[16,24], index: 0, kind: input, shape index: {}]   ;;  %s205_s2 = inlined_call_operand.vmem [shape: bf16[16,8], index: 2, kind: input, shape index: {}]   ;;  %s206_s3 = inlined_call_operand.vmem [shape: bf16[16,8], index: 3, kind: output, shape index: {0}]   ;;  %s207_s4 = inlined_call_operand.vmem [shape: bf16[16,8], index: 4, kind: output, shape index: {1}]  }
   0x1   :  { %139 = vmatprep.subr.bf16.mxu0 %v152_v0  ;;  %v149_v1 = vld [vmem:[%s203_s1 + $0x8] ss:$0 sps:$4 sm:$0xff]   ;;  %143 = vmatprep.mubr.msk.bf16.mxu0 %vm153_vm1, %v152_v0  ;;  %v150_v3 = vld [vmem:[%s203_s1] sm:$0xff]   ;;  %vm97_vm3 = vcmask 60416  }
   0x2   :  { %v46_v2 = vsel %vm44_vm0, %v149_v1, 0  ;;  %v151_v4 = vld [vmem:[%s204_s0] sm:$0xff]  }
   0x3   :  { %140 = vmatpush3.bf16.msra.mxu0 %v46_v2  ;;  %v133_v5 = vld [vmem:[%s205_s2] sm:$0xff]  }
   0x4   :  { %141 = vmatprep.subr.bf16.mxu0 %v152_v0  ;;  %v134_v6 = vunpack.c.l.bf16 %v133_v5  ;;  %v135_v9 = vunpack.c.h.bf16 %v133_v5 }
   0x7   :  { %142 = vmatpush3.bf16.msra.mxu0 %v150_v3 }
   0xa   :  { %144 = vmatmul.mubr.msk.bf16.vlgmr.msra.gmra.mxu0 %vm40_vm2, %v151_v4 }
  0xca   :  { %v82_v7 = vpop.f32.mrf.mxu0 }
  0xcb   :  { %v83_v8 = vadd.f32 %v134_v6, %v82_v7 }
  0xcc   :  { %v145_v10 = vpop.f32.mrf.mxu0 }
  0xcd   :  { %v128_v11 = vpack.c.bf16 %v83_v8, %v83_v8  ;;  %v100_v12 = vmax.f32 %v83_v8, 0.0 }
  0xce   :  { %v85_v13 = vpop.f32.mrf.mxu0 }
  0xcf   :  { %98 = vst.msk [vmem:[%s206_s3] sm:$0xf] %vm97_vm3, %v128_v11  ;;  %v130_v14 = vpack.c.bf16 %v100_v12, %v100_v12  ;;  %v86_v15 = vadd.f32 %v135_v9, %v85_v13 }
  0xd0   :  { %v146_v16 = vpop.f32.mrf.mxu0 }
  0xd1   :  { %110 = vst.msk [vmem:[%s207_s4] sm:$0xf] %vm97_vm3, %v130_v14  ;;  %v129_v17 = vpack.c.bf16 %v86_v15, %v86_v15  ;;  %v101_v18 = vmax.f32 %v86_v15, 0.0 }
  0xd3   :  { %99 = vst.msk [vmem:[%s206_s3 + $0x4] sm:$0xf] %vm97_vm3, %v129_v17  ;;  %v131_v19 = vpack.c.bf16 %v101_v18, %v101_v18 }
  0xd5   :  { %111 = vst.msk [vmem:[%s207_s4 + $0x4] sm:$0xf] %vm97_vm3, %v131_v19 }

// kernel: unet3d_forward.50
= control target key start
LH: loop header
LB: loop body
LE: loop exit
PB: predicated region body
PF: predicated region fallthrough
CT: control target
= control target key end

     0   :  { %vm51_vm0 = vcmask 1043456   ;;  %v220_v0 = vmov 0.0   ;;  %vm221_vm1 = vmmov 0   ;;  %vm47_vm2 = vcmask 195584   ;;  %s286_s1 = inlined_call_operand.vmem [shape: bf16[24,8], index: 1, kind: input, shape index: {}]   ;;  %s287_s0 = inlined_call_operand.vmem [shape: bf16[16,24], index: 0, kind: input, shape index: {}]   ;;  %s288_s4 = inlined_call_operand.vmem [shape: bf16[8,64], index: 4, kind: input, shape index: {}]   ;;  %s289_s2 = inlined_call_operand.vmem [shape: bf16[16,8], index: 2, kind: input, shape index: {}]   ;;  %s290_s3 = inlined_call_operand.vmem [shape: bf16[16,8], index: 3, kind: input, shape index: {}]   ;;  %s291_s5 = inlined_call_operand.vmem [shape: bf16[16,64], index: 5, kind: input, shape index: {}]   ;;  %s292_s6 = inlined_call_operand.vmem [shape: bf16[16,64], index: 6, kind: output, shape index: {}]  }
   0x1   :  { %201 = vmatprep.subr.bf16.mxu0 %v220_v0  ;;  %v217_v1 = vld [vmem:[%s286_s1 + $0x8] ss:$0 sps:$4 sm:$0xff]   ;;  %205 = vmatprep.mubr.msk.bf16.mxu0 %vm221_vm1, %v220_v0  ;;  %v218_v3 = vld [vmem:[%s286_s1] sm:$0xff]   ;;  %vm110_vm3 = vcmask 64512   ;;  %vm168_vm4 = vcmask 519168  }
   0x2   :  { %209 = vmatprep.subr.bf16.mxu1 %v220_v0  ;;  %211 = vmatprep.mubr.msk.bf16.mxu1 %vm221_vm1, %v220_v0  ;;  %v53_v2 = vsel %vm51_vm0, %v217_v1, 0  ;;  %v219_v4 = vld [vmem:[%s287_s0] sm:$0xff]  }
   0x3   :  { %202 = vmatpush3.bf16.msra.mxu0 %v53_v2  ;;  %v105_v5 = vld [vmem:[%s288_s4] sm:$0xf] }
   0x4   :  { %203 = vmatprep.subr.bf16.mxu0 %v220_v0  ;;  %v115_v6 = vsel %vm51_vm0, %v105_v5, 0  ;;  %v185_v7 = vld [vmem:[%s289_s2] sm:$0xff]  }
   0x5   :  { %210 = vmatpush3.bf16.msra.mxu1 %v115_v6  ;;  %v186_v8 = vunpack.c.l.bf16 %v185_v7  ;;  %v189_v9 = vld [vmem:[%s290_s3] sm:$0xff]   ;;  %v187_v13 = vunpack.c.h.bf16 %v185_v7 }
   0x6   :  { %v190_v12 = vunpack.c.l.bf16 %v189_v9  ;;  %v191_v15 = vunpack.c.h.bf16 %v189_v9  ;;  %v193_v24 = vld [vmem:[%s291_s5] sm:$0xff]  }
   0x7   :  { %204 = vmatpush3.bf16.msra.mxu0 %v218_v3  ;;  %v194_v25 = vunpack.c.l.bf16 %v193_v24  ;;  %v195_v28 = vunpack.c.h.bf16 %v193_v24 }
   0xa   :  { %206 = vmatmul.mubr.msk.bf16.vlgmr.msra.gmra.mxu0 %vm47_vm2, %v219_v4 }
  0xca   :  { %v89_v10 = vpop.f32.mrf.mxu0 }
  0xcb   :  { %v90_v11 = vadd.f32 %v186_v8, %v89_v10 }
  0xcc   :  { %v207_v14 = vpop.f32.mrf.mxu0 }
  0xcd   :  { %v100_v17 = vadd.f32 %v190_v12, %v90_v11 }
  0xce   :  { %v92_v16 = vpop.f32.mrf.mxu0 }
  0xcf   :  { %v93_v18 = vadd.f32 %v187_v13, %v92_v16  ;;  %v102_v21 = vmax.f32 %v100_v17, 0.0 }
  0xd0   :  { %v208_v19 = vpop.f32.mrf.mxu0 }
  0xd1   :  { %v101_v20 = vadd.f32 %v191_v15, %v93_v18 }
  0xd3   :  { %v103_v22 = vmax.f32 %v101_v20, 0.0 }
  0xd5   :  { %v104_v23 = vpack.c.bf16 %v103_v22, %v102_v21 }
  0xd7   :  { %212 = vmatmul.mubr.msk.bf16.vlgmr.msra.gmra.mxu1 %vm110_vm3, %v104_v23 }
 0x197   :  { %v151_v26 = vpop.f32.mrf.mxu1 }
 0x198   :  { %v152_v27 = vadd.f32 %v194_v25, %v151_v26 }
 0x199   :  { %v213_v29 = vpop.f32.mrf.mxu1 }
 0x19a   :  { %v158_v30 = vmax.f32 %v152_v27, 0.0 }
 0x19b   :  { %v154_v31 = vpop.f32.mrf.mxu1 }
 0x19c   :  { %v182_v32 = vpack.c.bf16 %v158_v30, %v158_v30  ;;  %v155_v33 = vadd.f32 %v195_v28, %v154_v31 }
 0x19d   :  { %v214_v34 = vpop.f32.mrf.mxu1 }
 0x19e   :  { %169 = vst.msk [vmem:[%s292_s6] sm:$0xf] %vm168_vm4, %v182_v32  ;;  %v159_v35 = vmax.f32 %v155_v33, 0.0 }
 0x1a0   :  { %v183_v36 = vpack.c.bf16 %v159_v35, %v159_v35 }
 0x1a2   :  { %170 = vst.msk [vmem:[%s292_s6 + $0x4] sm:$0xf] %vm168_vm4, %v183_v36 }

// kernel: unet3d_forward.51
= control target key start
LH: loop header
LB: loop body
LE: loop exit
PB: predicated region body
PF: predicated region fallthrough
CT: control target
= control target key end

     0   :  { %s973_s1 = inlined_call_operand.vmem [shape: bf16[512,256], index: 1, kind: input, shape index: {}]   ;;  %s974_s0 = inlined_call_operand.vmem [shape: bf16[16,512], index: 0, kind: input, shape index: {}]   ;;  %s975_s2 = inlined_call_operand.vmem [shape: f32[1,256], index: 2, kind: input, shape index: {}]   ;;  %s976_s3 = inlined_call_operand.vmem [shape: bf16[16,256], index: 3, kind: input, shape index: {}]   ;;  %s977_s4 = inlined_call_operand.vmem [shape: bf16[16,256], index: 4, kind: output, shape index: {}]  }
   0x1   :  { %v627_v0 = vld [vmem:[%s973_s1 + $0x74] ss:$8 sps:$4 sm:$0xff]   ;;  %v631_v2 = vld [vmem:[%s973_s1 + $0x70] ss:$8 sps:$4 sm:$0xff]   ;;  %v633_v4 = vld [vmem:[%s973_s1 + $0x64] ss:$8 sps:$4 sm:$0xff]  }
   0x2   :  { %v629_v1 = vld [vmem:[%s973_s1 + $0x174] ss:$8 sps:$4 sm:$0xff]   ;;  %437 = vmatprep.subr.bf16.mxu0 %v627_v0  ;;  %v632_v3 = vld [vmem:[%s973_s1 + $0x170] ss:$8 sps:$4 sm:$0xff]   ;;  %v635_v5 = vld [vmem:[%s973_s1 + $0x164] ss:$8 sps:$4 sm:$0xff]  }
   0x3   :  { %480 = vmatprep.subr.bf16.mxu1 %v629_v1  ;;  %438 = vmatpush1.bf16.msra.mxu0 %v631_v2  ;;  %v637_v6 = vld [vmem:[%s973_s1 + $0x60] ss:$8 sps:$4 sm:$0xff]   ;;  %v639_v8 = vld [vmem:[%s973_s1 + $0x54] ss:$8 sps:$4 sm:$0xff]   ;;  %v643_v10 = vld [vmem:[%s973_s1 + $0x50] ss:$8 sps:$4 sm:$0xff]  }
   0x4   :  { %481 = vmatpush1.bf16.msra.mxu1 %v632_v3  ;;  %439 = vmatprep.subr.bf16.mxu0 %v633_v4  ;;  %v638_v7 = vld [vmem:[%s973_s1 + $0x160] ss:$8 sps:$4 sm:$0xff]   ;;  %v641_v9 = vld [vmem:[%s973_s1 + $0x154] ss:$8 sps:$4 sm:$0xff]   ;;  %v644_v11 = vld [vmem:[%s973_s1 + $0x150] ss:$8 sps:$4 sm:$0xff]   ;;  %v87_v4 = vlaneseq }
   0x5   :  { %482 = vmatprep.subr.bf16.mxu1 %v635_v5  ;;  %v645_v12 = vld [vmem:[%s973_s1 + $0x44] ss:$8 sps:$4 sm:$0xff]   ;;  %v649_v14 = vld [vmem:[%s973_s1 + $0x40] ss:$8 sps:$4 sm:$0xff]   ;;  %v651_v16 = vld [vmem:[%s973_s1 + $0x34] ss:$8 sps:$4 sm:$0xff]  }
   0x6   :  { %v647_v13 = vld [vmem:[%s973_s1 + $0x144] ss:$8 sps:$4 sm:$0xff]   ;;  %v650_v15 = vld [vmem:[%s973_s1 + $0x140] ss:$8 sps:$4 sm:$0xff]   ;;  %v653_v17 = vld [vmem:[%s973_s1 + $0x134] ss:$8 sps:$4 sm:$0xff]  }
   0x7   :  { %440 = vmatpush1.bf16.msra.mxu0 %v637_v6  ;;  %v655_v18 = vld [vmem:[%s973_s1 + $0x30] ss:$8 sps:$4 sm:$0xff]   ;;  %v657_v20 = vld [vmem:[%s973_s1 + $0x24] ss:$8 sps:$4 sm:$0xff]   ;;  %v661_v22 = vld [vmem:[%s973_s1 + $0x20] ss:$8 sps:$4 sm:$0xff]  }
   0x8   :  { %483 = vmatpush1.bf16.msra.mxu1 %v638_v7  ;;  %441 = vmatprep.subr.bf16.mxu0 %v639_v8  ;;  %v656_v19 = vld [vmem:[%s973_s1 + $0x130] ss:$8 sps:$4 sm:$0xff]   ;;  %v659_v21 = vld [vmem:[%s973_s1 + $0x124] ss:$8 sps:$4 sm:$0xff]   ;;  %v662_v23 = vld [vmem:[%s973_s1 + $0x120] ss:$8 sps:$4 sm:$0xff]  }
   0x9   :  { %484 = vmatprep.subr.bf16.mxu1 %v641_v9  ;;  %v663_v24 = vld [vmem:[%s973_s1 + $0x14] ss:$8 sps:$4 sm:$0xff]   ;;  %v667_v26 = vld [vmem:[%s973_s1 + $0x10] ss:$8 sps:$4 sm:$0xff]   ;;  %v669_v28 = vld [vmem:[%s973_s1 + $0x4] ss:$8 sps:$4 sm:$0xff]  }
   0xa   :  { %v665_v25 = vld [vmem:[%s973_s1 + $0x114] ss:$8 sps:$4 sm:$0xff]   ;;  %v668_v27 = vld [vmem:[%s973_s1 + $0x110] ss:$8 sps:$4 sm:$0xff]   ;;  %v671_v29 = vld [vmem:[%s973_s1 + $0x104] ss:$8 sps:$4 sm:$0xff]  }
   0xb   :  { %442 = vmatpush1.bf16.msra.mxu0 %v643_v10  ;;  %v673_v30 = vld [vmem:[%s973_s1] ss:$8 sps:$4 sm:$0xff]   ;;  %v675_v32 = vld [vmem:[%s973_s1 + $0xf4] ss:$8 sps:$4 sm:$0xff]   ;;  %v679_v34 = vld [vmem:[%s973_s1 + $0xf0] ss:$8 sps:$4 sm:$0xff]  }
   0xc   :  { %485 = vmatpush1.bf16.msra.mxu1 %v644_v11  ;;  %443 = vmatprep.subr.bf16.mxu0 %v645_v12  ;;  %v674_v31 = vld [vmem:[%s973_s1 + $0x100] ss:$8 sps:$4 sm:$0xff]   ;;  %v677_v33 = vld [vmem:[%s973_s1 + $0x1f4] ss:$8 sps:$4 sm:$0xff]   ;;  %v680_v35 = vld [vmem:[%s973_s1 + $0x1f0] ss:$8 sps:$4 sm:$0xff]  }
   0xd   :  { %486 = vmatprep.subr.bf16.mxu1 %v647_v13  ;;  %v681_v36 = vld [vmem:[%s973_s1 + $0xe4] ss:$8 sps:$4 sm:$0xff]   ;;  %v685_v38 = vld [vmem:[%s973_s1 + $0xe0] ss:$8 sps:$4 sm:$0xff]   ;;  %v687_v40 = vld [vmem:[%s973_s1 + $0xd4] ss:$8 sps:$4 sm:$0xff]  }
   0xe   :  { %v683_v37 = vld [vmem:[%s973_s1 + $0x1e4] ss:$8 sps:$4 sm:$0xff]   ;;  %v686_v39 = vld [vmem:[%s973_s1 + $0x1e0] ss:$8 sps:$4 sm:$0xff]   ;;  %v689_v41 = vld [vmem:[%s973_s1 + $0x1d4] ss:$8 sps:$4 sm:$0xff]  }
   0xf   :  { %444 = vmatpush1.bf16.msra.mxu0 %v649_v14  ;;  %v691_v42 = vld [vmem:[%s973_s1 + $0xd0] ss:$8 sps:$4 sm:$0xff]   ;;  %v693_v44 = vld [vmem:[%s973_s1 + $0xc4] ss:$8 sps:$4 sm:$0xff]   ;;  %v697_v46 = vld [vmem:[%s973_s1 + $0xc0] ss:$8 sps:$4 sm:$0xff]  }
  0x10   :  { %487 = vmatpush1.bf16.msra.mxu1 %v650_v15  ;;  %445 = vmatprep.subr.bf16.mxu0 %v651_v16  ;;  %v692_v43 = vld [vmem:[%s973_s1 + $0x1d0] ss:$8 sps:$4 sm:$0xff]   ;;  %v695_v45 = vld [vmem:[%s973_s1 + $0x1c4] ss:$8 sps:$4 sm:$0xff]   ;;  %v698_v48 = vld [vmem:[%s973_s1 + $0x1c0] ss:$8 sps:$4 sm:$0xff]  }
  0x11   :  { %488 = vmatprep.subr.bf16.mxu1 %v653_v17  ;;  %v725_v47 = vld [vmem:[%s974_s0 + $0x4] ss:$16 sps:$4 sm:$0xff]   ;;  %v728_v51 = vld [vmem:[%s974_s0 + $0xc] ss:$16 sps:$4 sm:$0xff]   ;;  %v703_v52 = vld [vmem:[%s973_s1 + $0xb0] ss:$8 sps:$4 sm:$0xff]  }
  0x12   :  { %v699_v49 = vld [vmem:[%s973_s1 + $0xb4] ss:$8 sps:$4 sm:$0xff]   ;;  %469 = vmatprep.mubr.bf16.mxu0 %v725_v47  ;;  %512 = vmatprep.mubr.bf16.mxu1 %v728_v51  ;;  %v704_v53 = vld [vmem:[%s973_s1 + $0x1b0] ss:$8 sps:$4 sm:$0xff]   ;;  %v705_v54 = vld [vmem:[%s973_s1 + $0xa4] ss:$8 sps:$4 sm:$0xff]  }
  0x13   :  { %446 = vmatpush1.bf16.msra.mxu0 %v655_v18  ;;  %v701_v50 = vld [vmem:[%s973_s1 + $0x1b4] ss:$8 sps:$4 sm:$0xff]   ;;  %v707_v55 = vld [vmem:[%s973_s1 + $0x1a4] ss:$8 sps:$4 sm:$0xff]   ;;  %v709_v56 = vld [vmem:[%s973_s1 + $0xa0] ss:$8 sps:$4 sm:$0xff]  }
  0x14   :  { %489 = vmatpush1.bf16.msra.mxu1 %v656_v19  ;;  %447 = vmatprep.subr.bf16.mxu0 %v657_v20  ;;  %v710_v57 = vld [vmem:[%s973_s1 + $0x1a0] ss:$8 sps:$4 sm:$0xff]   ;;  %v711_v58 = vld [vmem:[%s973_s1 + $0x94] ss:$8 sps:$4 sm:$0xff]   ;;  %v715_v60 = vld [vmem:[%s973_s1 + $0x90] ss:$8 sps:$4 sm:$0xff]  }
  0x15   :  { %490 = vmatprep.subr.bf16.mxu1 %v659_v21  ;;  %v713_v59 = vld [vmem:[%s973_s1 + $0x194] ss:$8 sps:$4 sm:$0xff]   ;;  %v716_v61 = vld [vmem:[%s973_s1 + $0x190] ss:$8 sps:$4 sm:$0xff]   ;;  %v717_v62 = vld [vmem:[%s973_s1 + $0x84] ss:$8 sps:$4 sm:$0xff]  }
  0x16   :  { %v719_v63 = vld [vmem:[%s973_s1 + $0x184] ss:$8 sps:$4 sm:$0xff]   ;;  %v721_v0 = vld [vmem:[%s973_s1 + $0x80] ss:$8 sps:$4 sm:$0xff]   ;;  %v88_v5 = vshrl.u32 %v87_v4, 7 }
  0x17   :  { %448 = vmatpush1.bf16.msra.mxu0 %v661_v22  ;;  %v722_v1 = vld [vmem:[%s973_s1 + $0x180] ss:$8 sps:$4 sm:$0xff]  }
  0x18   :  { %491 = vmatpush1.bf16.msra.mxu1 %v662_v23  ;;  %449 = vmatprep.subr.bf16.mxu0 %v663_v24  ;;  %v723_v2 = vld [vmem:[%s974_s0] ss:$16 sps:$4 sm:$0xff]   ;;  %v726_v3 = vld [vmem:[%s974_s0 + $0x8] ss:$16 sps:$4 sm:$0xff]   ;;  %v89_v6 = vsub.s32 0, %v88_v5  ;;  %v93_v8 = vsub.s32 1, %v88_v5 }
  0x19   :  { %492 = vmatprep.subr.bf16.mxu1 %v665_v25  ;;  %v85_v7 = vld [vmem:[%s975_s2] sm:$0x3] }
  0x1a   :  { %v90_v9 = vrot.slane %v85_v7, %v89_v6  ;;  %v94_v10 = vrot.slane %v85_v7, %v93_v8  ;;  %v527_v14 = vld [vmem:[%s976_s3] sm:$0xff] }
  0x1b   :  { %450 = vmatpush1.bf16.msra.mxu0 %v667_v26  ;;  %v529_v19 = vunpack.c.l.bf16 %v527_v14  ;;  %v530_v24 = vunpack.c.h.bf16 %v527_v14  ;;  %v528_v26 = vld [vmem:[%s976_s3 + $0x8] sm:$0xff] }
  0x1c   :  { %493 = vmatpush1.bf16.msra.mxu1 %v668_v27  ;;  %451 = vmatprep.subr.bf16.mxu0 %v669_v28 }
  0x1d   :  { %494 = vmatprep.subr.bf16.mxu1 %v671_v29 }
  0x1f   :  { %452 = vmatpush1.bf16.msra.mxu0 %v673_v30 }
  0x20   :  { %495 = vmatpush1.bf16.msra.mxu1 %v674_v31  ;;  %453 = vmatprep.subr.bf16.mxu0 %v675_v32  ;;  %v531_v31 = vunpack.c.l.bf16 %v528_v26 }
  0x21   :  { %496 = vmatprep.subr.bf16.mxu1 %v677_v33  ;;  %v532_v33 = vunpack.c.h.bf16 %v528_v26 }
  0x23   :  { %454 = vmatpush2.bf16.msra.mxu0 %v679_v34 }
  0x24   :  { %497 = vmatpush2.bf16.msra.mxu1 %v680_v35  ;;  %455 = vmatprep.subr.bf16.mxu0 %v681_v36 }
  0x25   :  { %498 = vmatprep.subr.bf16.mxu1 %v683_v37 }
  0x27   :  { %456 = vmatpush2.bf16.msra.mxu0 %v685_v38 }
  0x28   :  { %499 = vmatpush2.bf16.msra.mxu1 %v686_v39  ;;  %457 = vmatprep.subr.bf16.mxu0 %v687_v40 }
  0x29   :  { %500 = vmatprep.subr.bf16.mxu1 %v689_v41 }
  0x2b   :  { %458 = vmatpush2.bf16.msra.mxu0 %v691_v42 }
  0x2c   :  { %501 = vmatpush2.bf16.msra.mxu1 %v692_v43  ;;  %459 = vmatprep.subr.bf16.mxu0 %v693_v44 }
  0x2d   :  { %502 = vmatprep.subr.bf16.mxu1 %v695_v45 }
  0x2f   :  { %460 = vmatpush2.bf16.msra.mxu0 %v697_v46 }
  0x30   :  { %503 = vmatpush2.bf16.msra.mxu1 %v698_v48  ;;  %461 = vmatprep.subr.bf16.mxu0 %v699_v49 }
  0x31   :  { %504 = vmatprep.subr.bf16.mxu1 %v701_v50 }
  0x33   :  { %462 = vmatpush2.bf16.msra.mxu0 %v703_v52 }
  0x34   :  { %505 = vmatpush2.bf16.msra.mxu1 %v704_v53  ;;  %463 = vmatprep.subr.bf16.mxu0 %v705_v54 }
  0x35   :  { %506 = vmatprep.subr.bf16.mxu1 %v707_v55 }
  0x37   :  { %464 = vmatpush2.bf16.msra.mxu0 %v709_v56 }
  0x38   :  { %507 = vmatpush2.bf16.msra.mxu1 %v710_v57  ;;  %465 = vmatprep.subr.bf16.mxu0 %v711_v58 }
  0x39   :  { %508 = vmatprep.subr.bf16.mxu1 %v713_v59 }
  0x3b   :  { %466 = vmatpush2.bf16.msra.mxu0 %v715_v60 }
  0x3c   :  { %509 = vmatpush2.bf16.msra.mxu1 %v716_v61  ;;  %467 = vmatprep.subr.bf16.mxu0 %v717_v62 }
  0x3d   :  { %510 = vmatprep.subr.bf16.mxu1 %v719_v63 }
  0x3f   :  { %468 = vmatpush2.bf16.msra.mxu0 %v721_v0 }
  0x40   :  { %511 = vmatpush2.bf16.msra.mxu1 %v722_v1 }
  0x42   :  { %470 = vmatmul.mubr.bf16.vlgmr.msra.gmra.mxu0 %v723_v2 }
  0x43   :  { %513 = vmatmul.mubr.bf16.vlgmr.msra.gmra.mxu1 %v726_v3 }
 0x102   :  { %v471_v11 = vpop.f32.mrf.mxu0 }
 0x103   :  { %v514_v12 = vpop.f32.mrf.mxu1  ;;  %v472_v13 = vadd.f32 %v471_v11, %v90_v9 }
 0x104   :  { %v473_v15 = vpop.f32.mrf.mxu0 }
 0x105   :  { %v516_v16 = vpop.f32.mrf.mxu1  ;;  %v515_v17 = vadd.f32 %v514_v12, %v472_v13  ;;  %v474_v18 = vadd.f32 %v473_v15, %v94_v10 }
 0x106   :  { %v475_v20 = vpop.f32.mrf.mxu0 }
 0x107   :  { %v518_v21 = vpop.f32.mrf.mxu1  ;;  %v523_v22 = vmax.f32 %v515_v17, 0.0  ;;  %v517_v23 = vadd.f32 %v516_v16, %v474_v18  ;;  %v476_v25 = vadd.f32 %v475_v20, %v90_v9 }
 0x108   :  { %v477_v27 = vpop.f32.mrf.mxu0 }
 0x109   :  { %v524_v28 = vmax.f32 %v517_v23, 0.0  ;;  %v519_v29 = vadd.f32 %v518_v21, %v476_v25  ;;  %v478_v30 = vadd.f32 %v477_v27, %v94_v10  ;;  %v520_v32 = vpop.f32.mrf.mxu1  ;;  %v533_v34 = vadd.f32 %v529_v19, %v523_v22 }
 0x10b   :  { %v534_v35 = vadd.f32 %v530_v24, %v524_v28  ;;  %v525_v36 = vmax.f32 %v519_v29, 0.0  ;;  %v521_v37 = vadd.f32 %v520_v32, %v478_v30 }
 0x10d   :  { %v625_v38 = vpack.c.bf16 %v534_v35, %v533_v34  ;;  %v526_v39 = vmax.f32 %v521_v37, 0.0  ;;  %v535_v40 = vadd.f32 %v531_v31, %v525_v36 }
 0x10f   :  { %549 = vst [vmem:[%s977_s4] sm:$0xff] %v625_v38  ;;  %v536_v41 = vadd.f32 %v532_v33, %v526_v39 }
 0x111   :  { %v626_v42 = vpack.c.bf16 %v536_v41, %v535_v40 }
 0x113   :  { %550 = vst [vmem:[%s977_s4 + $0x8] sm:$0xff] %v626_v42 }

// kernel: unet3d_forward.52
= control target key start
LH: loop header
LB: loop body
LE: loop exit
PB: predicated region body
PF: predicated region fallthrough
CT: control target
= control target key end

     0   :  { %s633_s1 = inlined_call_operand.vmem [shape: bf16[256,128], index: 1, kind: input, shape index: {}]   ;;  %s634_s0 = inlined_call_operand.vmem [shape: bf16[64,256], index: 0, kind: input, shape index: {}]   ;;  %s635_s2 = inlined_call_operand.vmem [shape: f32[1,128], index: 2, kind: input, shape index: {}]   ;;  %s636_s3 = inlined_call_operand.vmem [shape: bf16[64,128], index: 3, kind: input, shape index: {}]   ;;  %s637_s4 = inlined_call_operand.vmem [shape: bf16[64,128], index: 4, kind: output, shape index: {}]  }
   0x1   :  { %v481_v0 = vld [vmem:[%s633_s1 + $0x78] sm:$0xff]   ;;  %v483_v2 = vld [vmem:[%s633_s1 + $0x70] sm:$0xff]   ;;  %v485_v4 = vld [vmem:[%s633_s1 + $0x68] sm:$0xff]  }
   0x2   :  { %v482_v1 = vld [vmem:[%s633_s1 + $0x38] sm:$0xff]   ;;  %425 = vmatprep.subr.bf16.mxu0 %v481_v0  ;;  %465 = vmatprep.subr.bf16.mxu1 %v481_v0  ;;  %v484_v3 = vld [vmem:[%s633_s1 + $0x30] sm:$0xff]   ;;  %v486_v5 = vld [vmem:[%s633_s1 + $0x28] sm:$0xff]  }
   0x3   :  { %426 = vmatpush3.bf16.msra.mxu0 %v482_v1  ;;  %473 = vmatpush3.bf16.msra.mxu1 %v482_v1  ;;  %v487_v6 = vld [vmem:[%s633_s1 + $0x60] sm:$0xff]   ;;  %v489_v8 = vld [vmem:[%s633_s1 + $0x58] sm:$0xff]   ;;  %v491_v10 = vld [vmem:[%s633_s1 + $0x50] sm:$0xff]  }
   0x4   :  { %427 = vmatprep.subr.bf16.mxu0 %v483_v2  ;;  %466 = vmatprep.subr.bf16.mxu1 %v483_v2  ;;  %v488_v7 = vld [vmem:[%s633_s1 + $0x20] sm:$0xff]   ;;  %v490_v9 = vld [vmem:[%s633_s1 + $0x18] sm:$0xff]   ;;  %v492_v13 = vld [vmem:[%s633_s1 + $0x10] sm:$0xff]  }
   0x5   :  { %v499_v11 = vld [vmem:[%s634_s0 + $0x4] ss:$8 sps:$4 sm:$0xff]   ;;  %v497_v18 = vld [vmem:[%s634_s0] ss:$8 sps:$4 sm:$0xff]   ;;  %v503_v20 = vld [vmem:[%s634_s0 + $0x14] ss:$8 sps:$4 sm:$0xff]  }
   0x6   :  { %v502_v12 = vld [vmem:[%s634_s0 + $0x24] ss:$8 sps:$4 sm:$0xff]   ;;  %233 = vmatprep.mubr.bf16.mxu0 %v499_v11  ;;  %v500_v19 = vld [vmem:[%s634_s0 + $0x20] ss:$8 sps:$4 sm:$0xff]   ;;  %v505_v21 = vld [vmem:[%s634_s0 + $0x34] ss:$8 sps:$4 sm:$0xff]  }
   0x7   :  { %428 = vmatpush3.bf16.msra.mxu0 %v484_v3  ;;  %474 = vmatpush3.bf16.msra.mxu1 %v484_v3  ;;  %v493_v14 = vld [vmem:[%s633_s1 + $0x48] sm:$0xff]   ;;  %v495_v16 = vld [vmem:[%s633_s1 + $0x40] sm:$0xff]   ;;  %v507_v22 = vld [vmem:[%s634_s0 + $0x10] ss:$8 sps:$4 sm:$0xff]  }
   0x8   :  { %429 = vmatprep.subr.bf16.mxu0 %v485_v4  ;;  %467 = vmatprep.subr.bf16.mxu1 %v485_v4  ;;  %v494_v15 = vld [vmem:[%s633_s1 + $0x8] sm:$0xff]   ;;  %v496_v17 = vld [vmem:[%s633_s1] sm:$0xff]   ;;  %v508_v23 = vld [vmem:[%s634_s0 + $0x30] ss:$8 sps:$4 sm:$0xff]  }
   0x9   :  { %249 = vmatprep.mubr.bf16.mxu1 %v502_v12  ;;  %v342_v26 = vld [vmem:[%s635_s2] ss:$0 sm:$0xff]  ;;  %v420_v36 = vld [vmem:[%s636_s3 + $0x10] sm:$0xff]   ;;  %v419_v0 = vld [vmem:[%s636_s3 + $0x8] sm:$0xff]  }
   0xa   :  { %v384_v34 = vld [vmem:[%s636_s3] sm:$0xff]   ;;  %v393_v42 = vunpack.c.l.bf16 %v420_v36  ;;  %v394_v44 = vunpack.c.h.bf16 %v420_v36  ;;  %v421_v2 = vld [vmem:[%s636_s3 + $0x18] sm:$0xff]   ;;  %v390_v11 = vunpack.c.h.bf16 %v419_v0 }
   0xb   :  { %430 = vmatpush3.bf16.msra.mxu0 %v486_v5  ;;  %475 = vmatpush3.bf16.msra.mxu1 %v486_v5  ;;  %v385_v41 = vunpack.c.l.bf16 %v384_v34  ;;  %v386_v43 = vunpack.c.h.bf16 %v384_v34  ;;  %v398_v12 = vunpack.c.h.bf16 %v421_v2 }
   0xc   :  { %431 = vmatprep.subr.bf16.mxu0 %v487_v6  ;;  %468 = vmatprep.subr.bf16.mxu1 %v487_v6 }
   0xf   :  { %432 = vmatpush3.bf16.msra.mxu0 %v488_v7  ;;  %476 = vmatpush3.bf16.msra.mxu1 %v488_v7 }
  0x10   :  { %433 = vmatprep.subr.bf16.mxu0 %v489_v8  ;;  %469 = vmatprep.subr.bf16.mxu1 %v489_v8 }
  0x13   :  { %434 = vmatpush3.bf16.msra.mxu0 %v490_v9  ;;  %477 = vmatpush3.bf16.msra.mxu1 %v490_v9  ;;  %v389_v9 = vunpack.c.l.bf16 %v419_v0 }
  0x14   :  { %435 = vmatprep.subr.bf16.mxu0 %v491_v10  ;;  %470 = vmatprep.subr.bf16.mxu1 %v491_v10  ;;  %v397_v10 = vunpack.c.l.bf16 %v421_v2 }
  0x17   :  { %436 = vmatpush3.bf16.msra.mxu0 %v492_v13  ;;  %478 = vmatpush3.bf16.msra.mxu1 %v492_v13 }
  0x18   :  { %437 = vmatprep.subr.bf16.mxu0 %v493_v14  ;;  %471 = vmatprep.subr.bf16.mxu1 %v493_v14 }
  0x1b   :  { %438 = vmatpush3.bf16.msra.mxu0 %v494_v15  ;;  %479 = vmatpush3.bf16.msra.mxu1 %v494_v15 }
  0x1c   :  { %439 = vmatprep.subr.bf16.mxu0 %v495_v16  ;;  %472 = vmatprep.subr.bf16.mxu1 %v495_v16 }
  0x1f   :  { %440 = vmatpush3.bf16.msra.mxu0 %v496_v17  ;;  %480 = vmatpush3.bf16.msra.mxu1 %v496_v17 }
  0x22   :  { %234 = vmatmul.mubr.bf16.vlgmr.msra.gmra.mxu0 %v497_v18  ;;  %250 = vmatmul.mubr.bf16.vlgmr.msra.gmra.mxu1 %v500_v19 }
  0x23   :  { %241 = vmatprep.mubr.bf16.mxu0 %v503_v20  ;;  %257 = vmatprep.mubr.bf16.mxu1 %v505_v21 }
  0x2a   :  { %242 = vmatmul.mubr.bf16.gmra.mxu0 %v507_v22  ;;  %258 = vmatmul.mubr.bf16.gmra.mxu1 %v508_v23 }
  0xe2   :  { %v441_v24 = vpop.f32.mrf.mxu0  ;;  %v453_v25 = vpop.f32.mrf.mxu1 }
  0xe4   :  { %v442_v27 = vpop.f32.mrf.mxu0  ;;  %v454_v28 = vpop.f32.mrf.mxu1 }
  0xe5   :  { %v443_v29 = vadd.f32 %v442_v27, %v441_v24  ;;  %v455_v30 = vadd.f32 %v454_v28, %v453_v25 }
  0xe6   :  { %v444_v31 = vpop.f32.mrf.mxu0  ;;  %v456_v32 = vpop.f32.mrf.mxu1 }
  0xe7   :  { %v236_v33 = vadd.f32 %v443_v29, %v342_v26  ;;  %v252_v35 = vadd.f32 %v455_v30, %v342_v26 }
  0xe8   :  { %v445_v37 = vpop.f32.mrf.mxu0  ;;  %v457_v38 = vpop.f32.mrf.mxu1 }
  0xe9   :  { %v446_v39 = vadd.f32 %v445_v37, %v444_v31  ;;  %v458_v40 = vadd.f32 %v457_v38, %v456_v32  ;;  %v266_v47 = vmax.f32 %v236_v33, 0.0  ;;  %v270_v48 = vmax.f32 %v252_v35, 0.0 }
  0xea   :  { %v447_v45 = vpop.f32.mrf.mxu0  ;;  %v459_v46 = vpop.f32.mrf.mxu1 }
  0xeb   :  { %v239_v49 = vadd.f32 %v446_v39, %v342_v26  ;;  %v255_v50 = vadd.f32 %v458_v40, %v342_v26  ;;  %v290_v59 = vadd.f32 %v385_v41, %v266_v47  ;;  %v294_v60 = vadd.f32 %v393_v42, %v270_v48 }
  0xec   :  { %v448_v51 = vpop.f32.mrf.mxu0  ;;  %v460_v52 = vpop.f32.mrf.mxu1 }
  0xed   :  { %v267_v53 = vmax.f32 %v239_v49, 0.0  ;;  %v271_v54 = vmax.f32 %v255_v50, 0.0  ;;  %v449_v55 = vadd.f32 %v448_v51, %v447_v45  ;;  %v461_v56 = vadd.f32 %v460_v52, %v459_v46 }
  0xee   :  { %v450_v57 = vpop.f32.mrf.mxu0  ;;  %v462_v58 = vpop.f32.mrf.mxu1 }
  0xef   :  { %v291_v61 = vadd.f32 %v386_v43, %v267_v53  ;;  %v295_v62 = vadd.f32 %v394_v44, %v271_v54  ;;  %v244_v63 = vadd.f32 %v449_v55, %v342_v26  ;;  %v260_v1 = vadd.f32 %v461_v56, %v342_v26 }
  0xf0   :  { %v451_v3 = vpop.f32.mrf.mxu0  ;;  %v463_v4 = vpop.f32.mrf.mxu1 }
  0xf1   :  { %v402_v5 = vpack.c.bf16 %v291_v61, %v290_v59  ;;  %v412_v6 = vpack.c.bf16 %v295_v62, %v294_v60  ;;  %v452_v7 = vadd.f32 %v451_v3, %v450_v57  ;;  %v464_v8 = vadd.f32 %v463_v4, %v462_v58 }
  0xf2   :  { %v268_v13 = vmax.f32 %v244_v63, 0.0  ;;  %v272_v14 = vmax.f32 %v260_v1, 0.0 }
  0xf3   :  { %403 = vst [vmem:[%s637_s4] sm:$0xff] %v402_v5   ;;  %423 = vst [vmem:[%s637_s4 + $0x10] sm:$0xff] %v412_v6   ;;  %v247_v15 = vadd.f32 %v452_v7, %v342_v26  ;;  %v263_v16 = vadd.f32 %v464_v8, %v342_v26 }
  0xf4   :  { %v292_v19 = vadd.f32 %v389_v9, %v268_v13  ;;  %v296_v20 = vadd.f32 %v397_v10, %v272_v14 }
  0xf5   :  { %v269_v17 = vmax.f32 %v247_v15, 0.0  ;;  %v273_v18 = vmax.f32 %v263_v16, 0.0 }
  0xf7   :  { %v293_v21 = vadd.f32 %v390_v11, %v269_v17  ;;  %v297_v22 = vadd.f32 %v398_v12, %v273_v18 }
  0xf9   :  { %v407_v23 = vpack.c.bf16 %v293_v21, %v292_v19  ;;  %v417_v24 = vpack.c.bf16 %v297_v22, %v296_v20 }
  0xfb   :  { %422 = vst [vmem:[%s637_s4 + $0x8] sm:$0xff] %v407_v23   ;;  %424 = vst [vmem:[%s637_s4 + $0x18] sm:$0xff] %v417_v24  }

// kernel: unet3d_forward.53
= control target key start
LH: loop header
LB: loop body
LE: loop exit
PB: predicated region body
PF: predicated region fallthrough
CT: control target
= control target key end

     0   :  { %vm951_vm0 = vcmask 519168   ;;  %s1830_s1 = inlined_call_operand.vmem [shape: bf16[128,64], index: 1, kind: input, shape index: {}]   ;;  %s1831_s0 = inlined_call_operand.vmem [shape: bf16[512,128], index: 0, kind: input, shape index: {}]   ;;  %s1832_s2 = inlined_call_operand.vmem [shape: f32[1,64], index: 2, kind: input, shape index: {}]   ;;  %s1833_s3 = inlined_call_operand.vmem [shape: bf16[512,64], index: 3, kind: output, shape index: {}]  }
   0x1   :  { %v1325_v0 = vld [vmem:[%s1830_s1 + $0x38] sm:$0xff]   ;;  %v1326_v1 = vld [vmem:[%s1830_s1 + $0x30] sm:$0xff]   ;;  %v1327_v2 = vld [vmem:[%s1830_s1 + $0x28] sm:$0xff]  }
   0x2   :  { %1229 = vmatprep.subr.bf16.mxu0 %v1325_v0  ;;  %1309 = vmatprep.subr.bf16.mxu1 %v1325_v0  ;;  %v1328_v3 = vld [vmem:[%s1830_s1 + $0x20] sm:$0xff]   ;;  %v1329_v6 = vld [vmem:[%s1830_s1 + $0x18] sm:$0xff]   ;;  %v1330_v7 = vld [vmem:[%s1830_s1 + $0x10] sm:$0xff]  }
   0x3   :  { %1230 = vmatpush3.bf16.msra.mxu0 %v1325_v0  ;;  %1317 = vmatpush3.bf16.msra.mxu1 %v1325_v0  ;;  %v1333_v4 = vld [vmem:[%s1831_s0] sm:$0xff]   ;;  %v1331_v8 = vld [vmem:[%s1830_s1 + $0x8] sm:$0xff]   ;;  %v1337_v12 = vld [vmem:[%s1831_s0 + $0x10] sm:$0xff]  }
   0x4   :  { %1231 = vmatprep.subr.bf16.mxu0 %v1326_v1  ;;  %1310 = vmatprep.subr.bf16.mxu1 %v1326_v1  ;;  %v1334_v5 = vld [vmem:[%s1831_s0 + $0x80] sm:$0xff]   ;;  %v1335_v10 = vld [vmem:[%s1831_s0 + $0x8] sm:$0xff]   ;;  %v1338_v13 = vld [vmem:[%s1831_s0 + $0x90] sm:$0xff]  }
   0x5   :  { %1245 = vmatprep.mubr.bf16.mxu0 %v1333_v4  ;;  %1277 = vmatprep.mubr.bf16.mxu1 %v1334_v5  ;;  %v1332_v9 = vld [vmem:[%s1830_s1] sm:$0xff]   ;;  %v1336_v11 = vld [vmem:[%s1831_s0 + $0x88] sm:$0xff]   ;;  %v1339_v14 = vld [vmem:[%s1831_s0 + $0x18] sm:$0xff]  }
   0x6   :  { %v1340_v15 = vld [vmem:[%s1831_s0 + $0x98] sm:$0xff]   ;;  %v1341_v16 = vld [vmem:[%s1831_s0 + $0x20] sm:$0xff]   ;;  %v1343_v18 = vld [vmem:[%s1831_s0 + $0x28] sm:$0xff]  }
   0x7   :  { %1232 = vmatpush3.bf16.msra.mxu0 %v1326_v1  ;;  %1318 = vmatpush3.bf16.msra.mxu1 %v1326_v1  ;;  %v1342_v17 = vld [vmem:[%s1831_s0 + $0xa0] sm:$0xff]   ;;  %v1344_v19 = vld [vmem:[%s1831_s0 + $0xa8] sm:$0xff]   ;;  %v1345_v20 = vld [vmem:[%s1831_s0 + $0x30] sm:$0xff]  }
   0x8   :  { %1233 = vmatprep.subr.bf16.mxu0 %v1327_v2  ;;  %1311 = vmatprep.subr.bf16.mxu1 %v1327_v2  ;;  %v1346_v21 = vld [vmem:[%s1831_s0 + $0xb0] sm:$0xff]   ;;  %v1347_v22 = vld [vmem:[%s1831_s0 + $0x38] sm:$0xff]   ;;  %v1349_v24 = vld [vmem:[%s1831_s0 + $0x40] sm:$0xff]  }
   0x9   :  { %v1348_v23 = vld [vmem:[%s1831_s0 + $0xb8] sm:$0xff]   ;;  %v1350_v25 = vld [vmem:[%s1831_s0 + $0xc0] sm:$0xff]   ;;  %v1351_v26 = vld [vmem:[%s1831_s0 + $0x48] sm:$0xff]  }
   0xa   :  { %v1352_v27 = vld [vmem:[%s1831_s0 + $0xc8] sm:$0xff]   ;;  %v1353_v28 = vld [vmem:[%s1831_s0 + $0x50] sm:$0xff]   ;;  %v1355_v30 = vld [vmem:[%s1831_s0 + $0x58] sm:$0xff]  }
   0xb   :  { %1234 = vmatpush3.bf16.msra.mxu0 %v1327_v2  ;;  %1319 = vmatpush3.bf16.msra.mxu1 %v1327_v2  ;;  %v1354_v29 = vld [vmem:[%s1831_s0 + $0xd0] sm:$0xff]   ;;  %v1356_v31 = vld [vmem:[%s1831_s0 + $0xd8] sm:$0xff]   ;;  %v1357_v32 = vld [vmem:[%s1831_s0 + $0x60] sm:$0xff]  }
   0xc   :  { %1235 = vmatprep.subr.bf16.mxu0 %v1328_v3  ;;  %1312 = vmatprep.subr.bf16.mxu1 %v1328_v3  ;;  %v1358_v33 = vld [vmem:[%s1831_s0 + $0xe0] sm:$0xff]   ;;  %v1359_v34 = vld [vmem:[%s1831_s0 + $0x68] sm:$0xff]   ;;  %v1361_v36 = vld [vmem:[%s1831_s0 + $0x70] sm:$0xff]  }
   0xd   :  { %v1360_v35 = vld [vmem:[%s1831_s0 + $0xe8] sm:$0xff]   ;;  %v1362_v37 = vld [vmem:[%s1831_s0 + $0xf0] sm:$0xff]   ;;  %v1363_v38 = vld [vmem:[%s1831_s0 + $0x78] sm:$0xff]  }
   0xe   :  { %v1364_v39 = vld [vmem:[%s1831_s0 + $0xf8] sm:$0xff]   ;;  %v1508_v40 = vld [vmem:[%s1832_s2] ss:$0 sm:$0xff] }
   0xf   :  { %1236 = vmatpush3.bf16.msra.mxu0 %v1328_v3  ;;  %1320 = vmatpush3.bf16.msra.mxu1 %v1328_v3 }
  0x10   :  { %1237 = vmatprep.subr.bf16.mxu0 %v1329_v6  ;;  %1313 = vmatprep.subr.bf16.mxu1 %v1329_v6 }
  0x13   :  { %1238 = vmatpush3.bf16.msra.mxu0 %v1329_v6  ;;  %1321 = vmatpush3.bf16.msra.mxu1 %v1329_v6 }
  0x14   :  { %1239 = vmatprep.subr.bf16.mxu0 %v1330_v7  ;;  %1314 = vmatprep.subr.bf16.mxu1 %v1330_v7 }
  0x17   :  { %1240 = vmatpush3.bf16.msra.mxu0 %v1330_v7  ;;  %1322 = vmatpush3.bf16.msra.mxu1 %v1330_v7 }
  0x18   :  { %1241 = vmatprep.subr.bf16.mxu0 %v1331_v8  ;;  %1315 = vmatprep.subr.bf16.mxu1 %v1331_v8 }
  0x1b   :  { %1242 = vmatpush3.bf16.msra.mxu0 %v1331_v8  ;;  %1323 = vmatpush3.bf16.msra.mxu1 %v1331_v8 }
  0x1c   :  { %1243 = vmatprep.subr.bf16.mxu0 %v1332_v9  ;;  %1316 = vmatprep.subr.bf16.mxu1 %v1332_v9 }
  0x1f   :  { %1244 = vmatpush3.bf16.msra.mxu0 %v1332_v9  ;;  %1324 = vmatpush3.bf16.msra.mxu1 %v1332_v9 }
  0x22   :  { %1246 = vmatmul.mubr.bf16.vlgmr.msra.gmra.mxu0 %v1335_v10  ;;  %1278 = vmatmul.mubr.bf16.vlgmr.msra.gmra.mxu1 %v1336_v11 }
  0x23   :  { %1249 = vmatprep.mubr.bf16.mxu0 %v1337_v12  ;;  %1281 = vmatprep.mubr.bf16.mxu1 %v1338_v13 }
  0x2a   :  { %1250 = vmatmul.mubr.bf16.gmra.mxu0 %v1339_v14  ;;  %1282 = vmatmul.mubr.bf16.gmra.mxu1 %v1340_v15 }
  0x2b   :  { %1253 = vmatprep.mubr.bf16.mxu0 %v1341_v16  ;;  %1285 = vmatprep.mubr.bf16.mxu1 %v1342_v17 }
  0x32   :  { %1254 = vmatmul.mubr.bf16.gmra.mxu0 %v1343_v18  ;;  %1286 = vmatmul.mubr.bf16.gmra.mxu1 %v1344_v19 }
  0x33   :  { %1257 = vmatprep.mubr.bf16.mxu0 %v1345_v20  ;;  %1289 = vmatprep.mubr.bf16.mxu1 %v1346_v21 }
  0x3a   :  { %1258 = vmatmul.mubr.bf16.gmra.mxu0 %v1347_v22  ;;  %1290 = vmatmul.mubr.bf16.gmra.mxu1 %v1348_v23 }
  0x3b   :  { %1261 = vmatprep.mubr.bf16.mxu0 %v1349_v24  ;;  %1293 = vmatprep.mubr.bf16.mxu1 %v1350_v25 }
  0x42   :  { %1262 = vmatmul.mubr.bf16.gmra.mxu0 %v1351_v26  ;;  %1294 = vmatmul.mubr.bf16.gmra.mxu1 %v1352_v27 }
  0x43   :  { %1265 = vmatprep.mubr.bf16.mxu0 %v1353_v28  ;;  %1297 = vmatprep.mubr.bf16.mxu1 %v1354_v29 }
  0x4a   :  { %1266 = vmatmul.mubr.bf16.gmra.mxu0 %v1355_v30  ;;  %1298 = vmatmul.mubr.bf16.gmra.mxu1 %v1356_v31 }
  0x4b   :  { %1269 = vmatprep.mubr.bf16.mxu0 %v1357_v32  ;;  %1301 = vmatprep.mubr.bf16.mxu1 %v1358_v33 }
  0x52   :  { %1270 = vmatmul.mubr.bf16.gmra.mxu0 %v1359_v34  ;;  %1302 = vmatmul.mubr.bf16.gmra.mxu1 %v1360_v35 }
  0x53   :  { %1273 = vmatprep.mubr.bf16.mxu0 %v1361_v36  ;;  %1305 = vmatprep.mubr.bf16.mxu1 %v1362_v37 }
  0x5a   :  { %1274 = vmatmul.mubr.bf16.gmra.mxu0 %v1363_v38  ;;  %1306 = vmatmul.mubr.bf16.gmra.mxu1 %v1364_v39 }
  0xe2   :  { %v1247_v41 = vpop.f32.mrf.mxu0  ;;  %v1279_v42 = vpop.f32.mrf.mxu1 }
  0xe3   :  { %v385_v43 = vadd.f32 %v1247_v41, %v1508_v40  ;;  %v513_v44 = vadd.f32 %v1279_v42, %v1508_v40 }
  0xe4   :  { %v376_v45 = vpop.f32.mrf.mxu0  ;;  %v504_v46 = vpop.f32.mrf.mxu1 }
  0xe5   :  { %v633_v47 = vmax.f32 %v385_v43, 0.0  ;;  %v665_v48 = vmax.f32 %v513_v44, 0.0  ;;  %v377_v49 = vadd.f32 %v1508_v40, %v376_v45  ;;  %v505_v50 = vadd.f32 %v1508_v40, %v504_v46 }
  0xe6   :  { %v1248_v51 = vpop.f32.mrf.mxu0  ;;  %v1280_v52 = vpop.f32.mrf.mxu1 }
  0xe7   :  { %v1127_v53 = vpack.c.bf16 %v633_v47, %v633_v47  ;;  %v1159_v54 = vpack.c.bf16 %v665_v48, %v665_v48  ;;  %v631_v55 = vmax.f32 %v377_v49, 0.0  ;;  %v663_v56 = vmax.f32 %v505_v50, 0.0 }
  0xe8   :  { %v388_v57 = vadd.f32 %v1248_v51, %v1508_v40  ;;  %v516_v58 = vadd.f32 %v1280_v52, %v1508_v40  ;;  %v379_v59 = vpop.f32.mrf.mxu0  ;;  %v507_v60 = vpop.f32.mrf.mxu1 }
  0xe9   :  { %954 = vst.msk [vmem:[%s1833_s3 + $0x8] sm:$0xf] %vm951_vm0, %v1127_v53  ;;  %986 = vst.msk [vmem:[%s1833_s3 + $0x88] sm:$0xf] %vm951_vm0, %v1159_v54  ;;  %v1125_v61 = vpack.c.bf16 %v631_v55, %v631_v55  ;;  %v1157_v62 = vpack.c.bf16 %v663_v56, %v663_v56  ;;  %v380_v63 = vadd.f32 %v1508_v40, %v379_v59 }
  0xea   :  { %v508_v0 = vadd.f32 %v1508_v40, %v507_v60  ;;  %v634_v1 = vmax.f32 %v388_v57, 0.0  ;;  %v666_v2 = vmax.f32 %v516_v58, 0.0  ;;  %v1251_v3 = vpop.f32.mrf.mxu0  ;;  %v1283_v4 = vpop.f32.mrf.mxu1 }
  0xeb   :  { %952 = vst.msk [vmem:[%s1833_s3] sm:$0xf] %vm951_vm0, %v1125_v61  ;;  %984 = vst.msk [vmem:[%s1833_s3 + $0x80] sm:$0xf] %vm951_vm0, %v1157_v62  ;;  %v632_v5 = vmax.f32 %v380_v63, 0.0  ;;  %v401_v7 = vadd.f32 %v1251_v3, %v1508_v40  ;;  %v529_v8 = vadd.f32 %v1283_v4, %v1508_v40 }
  0xec   :  { %v664_v6 = vmax.f32 %v508_v0, 0.0  ;;  %v1128_v9 = vpack.c.bf16 %v634_v1, %v634_v1  ;;  %v1160_v10 = vpack.c.bf16 %v666_v2, %v666_v2  ;;  %v392_v11 = vpop.f32.mrf.mxu0  ;;  %v520_v12 = vpop.f32.mrf.mxu1 }
  0xed   :  { %v1126_v13 = vpack.c.bf16 %v632_v5, %v632_v5  ;;  %v637_v15 = vmax.f32 %v401_v7, 0.0  ;;  %v669_v16 = vmax.f32 %v529_v8, 0.0  ;;  %v393_v17 = vadd.f32 %v1508_v40, %v392_v11 }
  0xee   :  { %v1158_v14 = vpack.c.bf16 %v664_v6, %v664_v6  ;;  %955 = vst.msk [vmem:[%s1833_s3 + $0xc] sm:$0xf] %vm951_vm0, %v1128_v9  ;;  %987 = vst.msk [vmem:[%s1833_s3 + $0x8c] sm:$0xf] %vm951_vm0, %v1160_v10  ;;  %v521_v18 = vadd.f32 %v1508_v40, %v520_v12  ;;  %v1252_v19 = vpop.f32.mrf.mxu0  ;;  %v1284_v20 = vpop.f32.mrf.mxu1 }
  0xef   :  { %953 = vst.msk [vmem:[%s1833_s3 + $0x4] sm:$0xf] %vm951_vm0, %v1126_v13  ;;  %v1131_v21 = vpack.c.bf16 %v637_v15, %v637_v15  ;;  %v1163_v22 = vpack.c.bf16 %v669_v16, %v669_v16  ;;  %v404_v23 = vadd.f32 %v1252_v19, %v1508_v40  ;;  %v532_v24 = vadd.f32 %v1284_v20, %v1508_v40 }
  0xf0   :  { %985 = vst.msk [vmem:[%s1833_s3 + $0x84] sm:$0xf] %vm951_vm0, %v1158_v14  ;;  %v635_v25 = vmax.f32 %v393_v17, 0.0  ;;  %v667_v26 = vmax.f32 %v521_v18, 0.0  ;;  %v395_v27 = vpop.f32.mrf.mxu0  ;;  %v523_v28 = vpop.f32.mrf.mxu1 }
  0xf1   :  { %958 = vst.msk [vmem:[%s1833_s3 + $0x18] sm:$0xf] %vm951_vm0, %v1131_v21  ;;  %990 = vst.msk [vmem:[%s1833_s3 + $0x98] sm:$0xf] %vm951_vm0, %v1163_v22  ;;  %v638_v29 = vmax.f32 %v404_v23, 0.0  ;;  %v670_v30 = vmax.f32 %v532_v24, 0.0  ;;  %v396_v31 = vadd.f32 %v1508_v40, %v395_v27  ;;  %v524_v32 = vadd.f32 %v1508_v40, %v523_v28 }
  0xf2   :  { %v1129_v33 = vpack.c.bf16 %v635_v25, %v635_v25  ;;  %v1161_v34 = vpack.c.bf16 %v667_v26, %v667_v26  ;;  %v1255_v35 = vpop.f32.mrf.mxu0  ;;  %v1287_v36 = vpop.f32.mrf.mxu1 }
  0xf3   :  { %v1132_v37 = vpack.c.bf16 %v638_v29, %v638_v29  ;;  %v1164_v38 = vpack.c.bf16 %v670_v30, %v670_v30  ;;  %v636_v39 = vmax.f32 %v396_v31, 0.0  ;;  %v668_v41 = vmax.f32 %v524_v32, 0.0 }
  0xf4   :  { %956 = vst.msk [vmem:[%s1833_s3 + $0x10] sm:$0xf] %vm951_vm0, %v1129_v33  ;;  %988 = vst.msk [vmem:[%s1833_s3 + $0x90] sm:$0xf] %vm951_vm0, %v1161_v34  ;;  %v417_v42 = vadd.f32 %v1255_v35, %v1508_v40  ;;  %v545_v43 = vadd.f32 %v1287_v36, %v1508_v40  ;;  %v408_v44 = vpop.f32.mrf.mxu0  ;;  %v536_v45 = vpop.f32.mrf.mxu1 }
  0xf5   :  { %959 = vst.msk [vmem:[%s1833_s3 + $0x1c] sm:$0xf] %vm951_vm0, %v1132_v37  ;;  %991 = vst.msk [vmem:[%s1833_s3 + $0x9c] sm:$0xf] %vm951_vm0, %v1164_v38  ;;  %v1130_v46 = vpack.c.bf16 %v636_v39, %v636_v39  ;;  %v1162_v47 = vpack.c.bf16 %v668_v41, %v668_v41  ;;  %v409_v48 = vadd.f32 %v1508_v40, %v408_v44 }
  0xf6   :  { %v537_v49 = vadd.f32 %v1508_v40, %v536_v45  ;;  %v641_v50 = vmax.f32 %v417_v42, 0.0  ;;  %v673_v51 = vmax.f32 %v545_v43, 0.0  ;;  %v1256_v52 = vpop.f32.mrf.mxu0  ;;  %v1288_v53 = vpop.f32.mrf.mxu1 }
  0xf7   :  { %957 = vst.msk [vmem:[%s1833_s3 + $0x14] sm:$0xf] %vm951_vm0, %v1130_v46  ;;  %989 = vst.msk [vmem:[%s1833_s3 + $0x94] sm:$0xf] %vm951_vm0, %v1162_v47  ;;  %v639_v54 = vmax.f32 %v409_v48, 0.0  ;;  %v420_v56 = vadd.f32 %v1256_v52, %v1508_v40  ;;  %v548_v57 = vadd.f32 %v1288_v53, %v1508_v40 }
  0xf8   :  { %v671_v55 = vmax.f32 %v537_v49, 0.0  ;;  %v1135_v58 = vpack.c.bf16 %v641_v50, %v641_v50  ;;  %v1167_v59 = vpack.c.bf16 %v673_v51, %v673_v51  ;;  %v411_v60 = vpop.f32.mrf.mxu0  ;;  %v539_v61 = vpop.f32.mrf.mxu1 }
  0xf9   :  { %v1133_v62 = vpack.c.bf16 %v639_v54, %v639_v54  ;;  %v642_v0 = vmax.f32 %v420_v56, 0.0  ;;  %v674_v1 = vmax.f32 %v548_v57, 0.0  ;;  %v412_v2 = vadd.f32 %v1508_v40, %v411_v60 }
  0xfa   :  { %v1165_v63 = vpack.c.bf16 %v671_v55, %v671_v55  ;;  %962 = vst.msk [vmem:[%s1833_s3 + $0x28] sm:$0xf] %vm951_vm0, %v1135_v58  ;;  %994 = vst.msk [vmem:[%s1833_s3 + $0xa8] sm:$0xf] %vm951_vm0, %v1167_v59  ;;  %v540_v3 = vadd.f32 %v1508_v40, %v539_v61  ;;  %v1259_v4 = vpop.f32.mrf.mxu0  ;;  %v1291_v5 = vpop.f32.mrf.mxu1 }
  0xfb   :  { %960 = vst.msk [vmem:[%s1833_s3 + $0x20] sm:$0xf] %vm951_vm0, %v1133_v62  ;;  %v1136_v6 = vpack.c.bf16 %v642_v0, %v642_v0  ;;  %v1168_v7 = vpack.c.bf16 %v674_v1, %v674_v1  ;;  %v433_v8 = vadd.f32 %v1259_v4, %v1508_v40  ;;  %v561_v9 = vadd.f32 %v1291_v5, %v1508_v40 }
  0xfc   :  { %992 = vst.msk [vmem:[%s1833_s3 + $0xa0] sm:$0xf] %vm951_vm0, %v1165_v63  ;;  %v640_v10 = vmax.f32 %v412_v2, 0.0  ;;  %v672_v11 = vmax.f32 %v540_v3, 0.0  ;;  %v424_v12 = vpop.f32.mrf.mxu0  ;;  %v552_v13 = vpop.f32.mrf.mxu1 }
  0xfd   :  { %963 = vst.msk [vmem:[%s1833_s3 + $0x2c] sm:$0xf] %vm951_vm0, %v1136_v6  ;;  %995 = vst.msk [vmem:[%s1833_s3 + $0xac] sm:$0xf] %vm951_vm0, %v1168_v7  ;;  %v645_v14 = vmax.f32 %v433_v8, 0.0  ;;  %v677_v15 = vmax.f32 %v561_v9, 0.0  ;;  %v425_v16 = vadd.f32 %v1508_v40, %v424_v12  ;;  %v553_v17 = vadd.f32 %v1508_v40, %v552_v13 }
  0xfe   :  { %v1134_v18 = vpack.c.bf16 %v640_v10, %v640_v10  ;;  %v1166_v19 = vpack.c.bf16 %v672_v11, %v672_v11  ;;  %v1260_v20 = vpop.f32.mrf.mxu0  ;;  %v1292_v21 = vpop.f32.mrf.mxu1 }
  0xff   :  { %v1139_v22 = vpack.c.bf16 %v645_v14, %v645_v14  ;;  %v1171_v23 = vpack.c.bf16 %v677_v15, %v677_v15  ;;  %v643_v24 = vmax.f32 %v425_v16, 0.0  ;;  %v675_v25 = vmax.f32 %v553_v17, 0.0 }
 0x100   :  { %961 = vst.msk [vmem:[%s1833_s3 + $0x24] sm:$0xf] %vm951_vm0, %v1134_v18  ;;  %993 = vst.msk [vmem:[%s1833_s3 + $0xa4] sm:$0xf] %vm951_vm0, %v1166_v19  ;;  %v436_v26 = vadd.f32 %v1260_v20, %v1508_v40  ;;  %v564_v27 = vadd.f32 %v1292_v21, %v1508_v40  ;;  %v427_v28 = vpop.f32.mrf.mxu0  ;;  %v555_v29 = vpop.f32.mrf.mxu1 }
 0x101   :  { %966 = vst.msk [vmem:[%s1833_s3 + $0x38] sm:$0xf] %vm951_vm0, %v1139_v22  ;;  %998 = vst.msk [vmem:[%s1833_s3 + $0xb8] sm:$0xf] %vm951_vm0, %v1171_v23  ;;  %v1137_v30 = vpack.c.bf16 %v643_v24, %v643_v24  ;;  %v1169_v31 = vpack.c.bf16 %v675_v25, %v675_v25  ;;  %v428_v32 = vadd.f32 %v1508_v40, %v427_v28 }
 0x102   :  { %v556_v33 = vadd.f32 %v1508_v40, %v555_v29  ;;  %v646_v34 = vmax.f32 %v436_v26, 0.0  ;;  %v678_v35 = vmax.f32 %v564_v27, 0.0  ;;  %v1263_v36 = vpop.f32.mrf.mxu0  ;;  %v1295_v37 = vpop.f32.mrf.mxu1 }
 0x103   :  { %964 = vst.msk [vmem:[%s1833_s3 + $0x30] sm:$0xf] %vm951_vm0, %v1137_v30  ;;  %996 = vst.msk [vmem:[%s1833_s3 + $0xb0] sm:$0xf] %vm951_vm0, %v1169_v31  ;;  %v644_v38 = vmax.f32 %v428_v32, 0.0  ;;  %v449_v41 = vadd.f32 %v1263_v36, %v1508_v40  ;;  %v577_v42 = vadd.f32 %v1295_v37, %v1508_v40 }
 0x104   :  { %v676_v39 = vmax.f32 %v556_v33, 0.0  ;;  %v1140_v43 = vpack.c.bf16 %v646_v34, %v646_v34  ;;  %v1172_v44 = vpack.c.bf16 %v678_v35, %v678_v35  ;;  %v440_v45 = vpop.f32.mrf.mxu0  ;;  %v568_v46 = vpop.f32.mrf.mxu1 }
 0x105   :  { %v1138_v47 = vpack.c.bf16 %v644_v38, %v644_v38  ;;  %v649_v49 = vmax.f32 %v449_v41, 0.0  ;;  %v681_v50 = vmax.f32 %v577_v42, 0.0  ;;  %v441_v51 = vadd.f32 %v1508_v40, %v440_v45 }
 0x106   :  { %v1170_v48 = vpack.c.bf16 %v676_v39, %v676_v39  ;;  %967 = vst.msk [vmem:[%s1833_s3 + $0x3c] sm:$0xf] %vm951_vm0, %v1140_v43  ;;  %999 = vst.msk [vmem:[%s1833_s3 + $0xbc] sm:$0xf] %vm951_vm0, %v1172_v44  ;;  %v569_v52 = vadd.f32 %v1508_v40, %v568_v46  ;;  %v1264_v53 = vpop.f32.mrf.mxu0  ;;  %v1296_v54 = vpop.f32.mrf.mxu1 }
 0x107   :  { %965 = vst.msk [vmem:[%s1833_s3 + $0x34] sm:$0xf] %vm951_vm0, %v1138_v47  ;;  %v1143_v55 = vpack.c.bf16 %v649_v49, %v649_v49  ;;  %v1175_v56 = vpack.c.bf16 %v681_v50, %v681_v50  ;;  %v452_v57 = vadd.f32 %v1264_v53, %v1508_v40  ;;  %v580_v58 = vadd.f32 %v1296_v54, %v1508_v40 }
 0x108   :  { %997 = vst.msk [vmem:[%s1833_s3 + $0xb4] sm:$0xf] %vm951_vm0, %v1170_v48  ;;  %v647_v59 = vmax.f32 %v441_v51, 0.0  ;;  %v679_v60 = vmax.f32 %v569_v52, 0.0  ;;  %v443_v61 = vpop.f32.mrf.mxu0  ;;  %v571_v62 = vpop.f32.mrf.mxu1 }
 0x109   :  { %970 = vst.msk [vmem:[%s1833_s3 + $0x48] sm:$0xf] %vm951_vm0, %v1143_v55  ;;  %1002 = vst.msk [vmem:[%s1833_s3 + $0xc8] sm:$0xf] %vm951_vm0, %v1175_v56  ;;  %v650_v63 = vmax.f32 %v452_v57, 0.0  ;;  %v682_v0 = vmax.f32 %v580_v58, 0.0  ;;  %v444_v1 = vadd.f32 %v1508_v40, %v443_v61  ;;  %v572_v2 = vadd.f32 %v1508_v40, %v571_v62 }
 0x10a   :  { %v1141_v3 = vpack.c.bf16 %v647_v59, %v647_v59  ;;  %v1173_v4 = vpack.c.bf16 %v679_v60, %v679_v60  ;;  %v1267_v5 = vpop.f32.mrf.mxu0  ;;  %v1299_v6 = vpop.f32.mrf.mxu1 }
 0x10b   :  { %v1144_v7 = vpack.c.bf16 %v650_v63, %v650_v63  ;;  %v1176_v8 = vpack.c.bf16 %v682_v0, %v682_v0  ;;  %v648_v9 = vmax.f32 %v444_v1, 0.0  ;;  %v680_v10 = vmax.f32 %v572_v2, 0.0 }
 0x10c   :  { %968 = vst.msk [vmem:[%s1833_s3 + $0x40] sm:$0xf] %vm951_vm0, %v1141_v3  ;;  %1000 = vst.msk [vmem:[%s1833_s3 + $0xc0] sm:$0xf] %vm951_vm0, %v1173_v4  ;;  %v465_v11 = vadd.f32 %v1267_v5, %v1508_v40  ;;  %v593_v12 = vadd.f32 %v1299_v6, %v1508_v40  ;;  %v456_v13 = vpop.f32.mrf.mxu0  ;;  %v584_v14 = vpop.f32.mrf.mxu1 }
 0x10d   :  { %971 = vst.msk [vmem:[%s1833_s3 + $0x4c] sm:$0xf] %vm951_vm0, %v1144_v7  ;;  %1003 = vst.msk [vmem:[%s1833_s3 + $0xcc] sm:$0xf] %vm951_vm0, %v1176_v8  ;;  %v1142_v15 = vpack.c.bf16 %v648_v9, %v648_v9  ;;  %v1174_v16 = vpack.c.bf16 %v680_v10, %v680_v10  ;;  %v457_v17 = vadd.f32 %v1508_v40, %v456_v13 }
 0x10e   :  { %v585_v18 = vadd.f32 %v1508_v40, %v584_v14  ;;  %v653_v19 = vmax.f32 %v465_v11, 0.0  ;;  %v685_v20 = vmax.f32 %v593_v12, 0.0  ;;  %v1268_v21 = vpop.f32.mrf.mxu0  ;;  %v1300_v22 = vpop.f32.mrf.mxu1 }
 0x10f   :  { %969 = vst.msk [vmem:[%s1833_s3 + $0x44] sm:$0xf] %vm951_vm0, %v1142_v15  ;;  %1001 = vst.msk [vmem:[%s1833_s3 + $0xc4] sm:$0xf] %vm951_vm0, %v1174_v16  ;;  %v651_v23 = vmax.f32 %v457_v17, 0.0  ;;  %v468_v25 = vadd.f32 %v1268_v21, %v1508_v40  ;;  %v596_v26 = vadd.f32 %v1300_v22, %v1508_v40 }
 0x110   :  { %v683_v24 = vmax.f32 %v585_v18, 0.0  ;;  %v1147_v27 = vpack.c.bf16 %v653_v19, %v653_v19  ;;  %v1179_v28 = vpack.c.bf16 %v685_v20, %v685_v20  ;;  %v459_v29 = vpop.f32.mrf.mxu0  ;;  %v587_v30 = vpop.f32.mrf.mxu1 }
 0x111   :  { %v1145_v31 = vpack.c.bf16 %v651_v23, %v651_v23  ;;  %v654_v33 = vmax.f32 %v468_v25, 0.0  ;;  %v686_v34 = vmax.f32 %v596_v26, 0.0  ;;  %v460_v35 = vadd.f32 %v1508_v40, %v459_v29 }
 0x112   :  { %v1177_v32 = vpack.c.bf16 %v683_v24, %v683_v24  ;;  %974 = vst.msk [vmem:[%s1833_s3 + $0x58] sm:$0xf] %vm951_vm0, %v1147_v27  ;;  %1006 = vst.msk [vmem:[%s1833_s3 + $0xd8] sm:$0xf] %vm951_vm0, %v1179_v28  ;;  %v588_v36 = vadd.f32 %v1508_v40, %v587_v30  ;;  %v1271_v37 = vpop.f32.mrf.mxu0  ;;  %v1303_v38 = vpop.f32.mrf.mxu1 }
 0x113   :  { %972 = vst.msk [vmem:[%s1833_s3 + $0x50] sm:$0xf] %vm951_vm0, %v1145_v31  ;;  %v1148_v39 = vpack.c.bf16 %v654_v33, %v654_v33  ;;  %v1180_v41 = vpack.c.bf16 %v686_v34, %v686_v34  ;;  %v481_v42 = vadd.f32 %v1271_v37, %v1508_v40  ;;  %v609_v43 = vadd.f32 %v1303_v38, %v1508_v40 }
 0x114   :  { %1004 = vst.msk [vmem:[%s1833_s3 + $0xd0] sm:$0xf] %vm951_vm0, %v1177_v32  ;;  %v652_v44 = vmax.f32 %v460_v35, 0.0  ;;  %v684_v45 = vmax.f32 %v588_v36, 0.0  ;;  %v472_v46 = vpop.f32.mrf.mxu0  ;;  %v600_v47 = vpop.f32.mrf.mxu1 }
 0x115   :  { %975 = vst.msk [vmem:[%s1833_s3 + $0x5c] sm:$0xf] %vm951_vm0, %v1148_v39  ;;  %1007 = vst.msk [vmem:[%s1833_s3 + $0xdc] sm:$0xf] %vm951_vm0, %v1180_v41  ;;  %v657_v48 = vmax.f32 %v481_v42, 0.0  ;;  %v689_v49 = vmax.f32 %v609_v43, 0.0  ;;  %v473_v50 = vadd.f32 %v1508_v40, %v472_v46  ;;  %v601_v51 = vadd.f32 %v1508_v40, %v600_v47 }
 0x116   :  { %v1146_v52 = vpack.c.bf16 %v652_v44, %v652_v44  ;;  %v1178_v53 = vpack.c.bf16 %v684_v45, %v684_v45  ;;  %v1272_v54 = vpop.f32.mrf.mxu0  ;;  %v1304_v55 = vpop.f32.mrf.mxu1 }
 0x117   :  { %v1151_v56 = vpack.c.bf16 %v657_v48, %v657_v48  ;;  %v1183_v57 = vpack.c.bf16 %v689_v49, %v689_v49  ;;  %v655_v58 = vmax.f32 %v473_v50, 0.0  ;;  %v687_v59 = vmax.f32 %v601_v51, 0.0 }
 0x118   :  { %973 = vst.msk [vmem:[%s1833_s3 + $0x54] sm:$0xf] %vm951_vm0, %v1146_v52  ;;  %1005 = vst.msk [vmem:[%s1833_s3 + $0xd4] sm:$0xf] %vm951_vm0, %v1178_v53  ;;  %v484_v60 = vadd.f32 %v1272_v54, %v1508_v40  ;;  %v612_v61 = vadd.f32 %v1304_v55, %v1508_v40  ;;  %v475_v62 = vpop.f32.mrf.mxu0  ;;  %v603_v63 = vpop.f32.mrf.mxu1 }
 0x119   :  { %978 = vst.msk [vmem:[%s1833_s3 + $0x68] sm:$0xf] %vm951_vm0, %v1151_v56  ;;  %1010 = vst.msk [vmem:[%s1833_s3 + $0xe8] sm:$0xf] %vm951_vm0, %v1183_v57  ;;  %v1149_v0 = vpack.c.bf16 %v655_v58, %v655_v58  ;;  %v1181_v1 = vpack.c.bf16 %v687_v59, %v687_v59  ;;  %v476_v2 = vadd.f32 %v1508_v40, %v475_v62 }
 0x11a   :  { %v604_v3 = vadd.f32 %v1508_v40, %v603_v63  ;;  %v658_v4 = vmax.f32 %v484_v60, 0.0  ;;  %v690_v5 = vmax.f32 %v612_v61, 0.0  ;;  %v1275_v6 = vpop.f32.mrf.mxu0  ;;  %v1307_v7 = vpop.f32.mrf.mxu1 }
 0x11b   :  { %976 = vst.msk [vmem:[%s1833_s3 + $0x60] sm:$0xf] %vm951_vm0, %v1149_v0  ;;  %1008 = vst.msk [vmem:[%s1833_s3 + $0xe0] sm:$0xf] %vm951_vm0, %v1181_v1  ;;  %v656_v8 = vmax.f32 %v476_v2, 0.0  ;;  %v497_v10 = vadd.f32 %v1275_v6, %v1508_v40  ;;  %v625_v11 = vadd.f32 %v1307_v7, %v1508_v40 }
 0x11c   :  { %v688_v9 = vmax.f32 %v604_v3, 0.0  ;;  %v1152_v12 = vpack.c.bf16 %v658_v4, %v658_v4  ;;  %v1184_v13 = vpack.c.bf16 %v690_v5, %v690_v5  ;;  %v488_v14 = vpop.f32.mrf.mxu0  ;;  %v616_v15 = vpop.f32.mrf.mxu1 }
 0x11d   :  { %v1150_v16 = vpack.c.bf16 %v656_v8, %v656_v8  ;;  %v661_v18 = vmax.f32 %v497_v10, 0.0  ;;  %v693_v19 = vmax.f32 %v625_v11, 0.0  ;;  %v489_v20 = vadd.f32 %v1508_v40, %v488_v14 }
 0x11e   :  { %v1182_v17 = vpack.c.bf16 %v688_v9, %v688_v9  ;;  %979 = vst.msk [vmem:[%s1833_s3 + $0x6c] sm:$0xf] %vm951_vm0, %v1152_v12  ;;  %1011 = vst.msk [vmem:[%s1833_s3 + $0xec] sm:$0xf] %vm951_vm0, %v1184_v13  ;;  %v617_v21 = vadd.f32 %v1508_v40, %v616_v15  ;;  %v1276_v22 = vpop.f32.mrf.mxu0  ;;  %v1308_v23 = vpop.f32.mrf.mxu1 }
 0x11f   :  { %977 = vst.msk [vmem:[%s1833_s3 + $0x64] sm:$0xf] %vm951_vm0, %v1150_v16  ;;  %v1155_v24 = vpack.c.bf16 %v661_v18, %v661_v18  ;;  %v1187_v25 = vpack.c.bf16 %v693_v19, %v693_v19  ;;  %v500_v26 = vadd.f32 %v1276_v22, %v1508_v40  ;;  %v628_v27 = vadd.f32 %v1308_v23, %v1508_v40 }
 0x120   :  { %1009 = vst.msk [vmem:[%s1833_s3 + $0xe4] sm:$0xf] %vm951_vm0, %v1182_v17  ;;  %v659_v28 = vmax.f32 %v489_v20, 0.0  ;;  %v691_v29 = vmax.f32 %v617_v21, 0.0  ;;  %v491_v30 = vpop.f32.mrf.mxu0  ;;  %v619_v31 = vpop.f32.mrf.mxu1 }
 0x121   :  { %982 = vst.msk [vmem:[%s1833_s3 + $0x78] sm:$0xf] %vm951_vm0, %v1155_v24  ;;  %1014 = vst.msk [vmem:[%s1833_s3 + $0xf8] sm:$0xf] %vm951_vm0, %v1187_v25  ;;  %v662_v32 = vmax.f32 %v500_v26, 0.0  ;;  %v694_v33 = vmax.f32 %v628_v27, 0.0  ;;  %v492_v34 = vadd.f32 %v1508_v40, %v491_v30  ;;  %v620_v35 = vadd.f32 %v1508_v40, %v619_v31 }
 0x122   :  { %v1153_v36 = vpack.c.bf16 %v659_v28, %v659_v28  ;;  %v1185_v37 = vpack.c.bf16 %v691_v29, %v691_v29 }
 0x123   :  { %v1156_v38 = vpack.c.bf16 %v662_v32, %v662_v32  ;;  %v1188_v39 = vpack.c.bf16 %v694_v33, %v694_v33  ;;  %v660_v41 = vmax.f32 %v492_v34, 0.0  ;;  %v692_v42 = vmax.f32 %v620_v35, 0.0 }
 0x124   :  { %980 = vst.msk [vmem:[%s1833_s3 + $0x70] sm:$0xf] %vm951_vm0, %v1153_v36  ;;  %1012 = vst.msk [vmem:[%s1833_s3 + $0xf0] sm:$0xf] %vm951_vm0, %v1185_v37 }
 0x125   :  { %983 = vst.msk [vmem:[%s1833_s3 + $0x7c] sm:$0xf] %vm951_vm0, %v1156_v38  ;;  %1015 = vst.msk [vmem:[%s1833_s3 + $0xfc] sm:$0xf] %vm951_vm0, %v1188_v39  ;;  %v1154_v40 = vpack.c.bf16 %v660_v41, %v660_v41  ;;  %v1186_v43 = vpack.c.bf16 %v692_v42, %v692_v42 }
 0x127   :  { %981 = vst.msk [vmem:[%s1833_s3 + $0x74] sm:$0xf] %vm951_vm0, %v1154_v40  ;;  %1013 = vst.msk [vmem:[%s1833_s3 + $0xf4] sm:$0xf] %vm951_vm0, %v1186_v43 }

</bundles_post_ra>
